<compile_context>
chip_gen: v7x
topology: tpu7x:2x2x1
jax: 0.10.0
libtpu: 0.0.40
codegen_flags: <defaults>
</compile_context>

<pallas_src>
import math
import functools

import jax
import jax.numpy as jnp
from jax import lax
from jax.experimental import pallas as pl
from jax.experimental.pallas import tpu as pltpu


def mha_kernel(x_ref, wqkv_ref, bqkv_ref, wph_ref, bp_ref, o_ref, *,
               num_heads: int, d_k: int, channels: int):
    C = channels
    x = x_ref[0]                                   # (C, L), kept in the input dtype
    L = x.shape[1]

    # Fused q/k/v 1x1-conv projection: one MXU matmul, f32 accumulate.
    qkv = jnp.dot(wqkv_ref[...], x, preferred_element_type=jnp.float32)   # (3C, L)
    qkv = qkv + bqkv_ref[...]                                             # (3C, 1) bias

    scale = 1.0 / math.sqrt(d_k)
    y = jnp.zeros((C, L), jnp.float32)

    # Per-head attention. d_k is tiny (sub-tile), so heads stay a short static loop, but
    # all transposes / concats are expressed as dot_general contraction specs or folded
    # into the projection accumulation instead of explicit XLU transpose / concat ops.
    for h in range(num_heads):
        lo = h * d_k
        qh = qkv[lo:lo + d_k, :] * scale                         # (d_k, L)
        kh = qkv[C + lo:C + lo + d_k, :]                         # (d_k, L)
        vh = qkv[2 * C + lo:2 * C + lo + d_k, :].astype(x.dtype)  # (d_k, L)

        # scores[t, s] = sum_d qh[d, t] * kh[d, s]   (no materialized transpose)
        s = lax.dot_general(qh, kh, (((0,), (0,)), ((), ())),
                            preferred_element_type=jnp.float32)            # (L, L)
        s = s - jnp.max(s, axis=-1, keepdims=True)
        p = jnp.exp(s)
        p = p * pl.reciprocal(jnp.sum(p, axis=-1, keepdims=True), approx=True)
        # attn_dropout(p=0.0) == identity
        p = p.astype(x.dtype)

        # o_h[d, t] = sum_s vh[d, s] * p[t, s]
        oh = lax.dot_general(vh, p, (((1,), (1,)), ((), ())),
                             preferred_element_type=jnp.float32)           # (d_k, L)

        # Fold this head's output straight into the output projection
        # (replaces the old 8-way lane concat followed by one proj matmul).
        wp_h = wph_ref[h]                                                  # (C, d_k)
        y = y + jnp.dot(wp_h, oh.astype(wp_h.dtype),
                        preferred_element_type=jnp.float32)                # (C, L)

    y = y + bp_ref[...]                                                    # (C, 1) bias
    # proj_dropout(p=0.0) == identity
    o_ref[0] = y.astype(o_ref.dtype)


def multi_head_attention(x_nchw, params, num_heads: int):
    B, C, H, W = x_nchw.shape
    L = H * W
    d_k = C // num_heads
    wq, bq, wkv, bkv, wp, bp = params   # torch conv1x1 layouts: w (C_out, C_in), b (C_out,)

    # Fuse q and kv weights/biases: rows [0,C)=Q, [C,2C)=K, [2C,3C)=V.
    w_qkv = jnp.concatenate([wq, wkv], axis=0)                      # (3C, C)
    b_qkv = jnp.concatenate([bq, bkv], axis=0).reshape(3 * C, 1)    # (3C, 1)
    # Pre-split the proj weight per head: wph[h] = wp[:, h*d_k:(h+1)*d_k]
    w_ph = jnp.transpose(wp.reshape(C, num_heads, d_k), (1, 0, 2))  # (H, C, d_k)
    b_p = bp.reshape(C, 1)                                          # (C, 1)

    x_seq = x_nchw.reshape(B, C, L)     # free reshape; channels-first stays channels-first

    kernel = functools.partial(mha_kernel, num_heads=num_heads, d_k=d_k, channels=C)

    out_seq = pl.pallas_call(
        kernel,
        out_shape=jax.ShapeDtypeStruct((B, C, L), x_seq.dtype),
        grid=(B,),   # one batch element per grid step; "parallel" feeds both v7x cores
        in_specs=[
            pl.BlockSpec((1, C, L), lambda b: (b, 0, 0)),             # x (lane-dense: L)
            pl.BlockSpec((3 * C, C), lambda b: (0, 0)),               # fused qkv weight
            pl.BlockSpec((3 * C, 1), lambda b: (0, 0)),               # fused qkv bias
            pl.BlockSpec((num_heads, C, d_k), lambda b: (0, 0, 0)),   # per-head proj weight
            pl.BlockSpec((C, 1), lambda b: (0, 0)),                   # proj bias
        ],
        out_specs=pl.BlockSpec((1, C, L), lambda b: (b, 0, 0)),       # lane-dense output
        compiler_params=pltpu.CompilerParams(dimension_semantics=("parallel",)),
    )(x_seq, w_qkv, b_qkv, w_ph, b_p)

    return out_seq.reshape(B, C, H, W)


def mha_reference(x_nchw, params, num_heads: int):
    """Pure-JAX reference mirroring the PyTorch forward exactly."""
    wq, bq, wkv, bkv, wp, bp = params
    B, C, H, W = x_nchw.shape
    L = H * W
    d_k = C // num_heads
    xf = x_nchw.reshape(B, C, L)

    q = jnp.einsum('oc,bcl->bol', wq, xf) + bq[None, :, None]
    kv = jnp.einsum('oc,bcl->bol', wkv, xf) + bkv[None, :, None]
    k, v = kv[:, :C], kv[:, C:]          # torch .chunk(2, dim=1) on the activation

    q = q.reshape(B, num_heads, d_k, L)
    k = k.reshape(B, num_heads, d_k, L)
    v = v.reshape(B, num_heads, d_k, L)

    attn = jnp.einsum('bhct,bhcs->bhts', q, k) * (1.0 / math.sqrt(d_k))
    attn = jax.nn.softmax(attn, axis=-1)
    o = jnp.einsum('bhts,bhcs->bhct', attn, v).reshape(B, C, L)

    y = jnp.einsum('oc,bcl->bol', wp, o) + bp[None, :, None]
    return y.reshape(B, C, H, W)


if __name__ == "__main__":
    key = jax.random.PRNGKey(0)
    B, C, H, W = 2, 32, 16, 16          # in_channels=32, num_heads=8 -> d_k=4, L=256
    num_heads = 8

    ks = jax.random.split(key, 7)
    x = jax.random.normal(ks[0], (B, C, H, W), jnp.float32)

    # Deterministic synthetic parameters (shapes match conv_nd(kernel_size=1) weights).
    wq = 0.1 * jax.random.normal(ks[1], (C, C), jnp.float32)        # q:  (C, C)
    bq = 0.1 * jax.random.normal(ks[2], (C,), jnp.float32)
    wkv = 0.1 * jax.random.normal(ks[3], (2 * C, C), jnp.float32)   # kv: (2C, C)
    bkv = 0.1 * jax.random.normal(ks[4], (2 * C,), jnp.float32)
    wp = 0.1 * jax.random.normal(ks[5], (C, C), jnp.float32)        # proj
    bp = 0.1 * jax.random.normal(ks[6], (C,), jnp.float32)

    params = (wq, bq, wkv, bkv, wp, bp)

    out = multi_head_attention(x, params, num_heads)
    out = jax.block_until_ready(out)

    ref = mha_reference(x, params, num_heads)
    assert out.shape == (B, C, H, W)
    max_err = float(jnp.max(jnp.abs(out - ref)))
    # approx reciprocal in the softmax denominator -> allow ~1e-3-level tolerance
    assert jnp.allclose(out, ref, atol=2e-3, rtol=2e-3), max_err

    print("KERNEL_OK")
</pallas_src>

<mosaic_0001>
module attributes {stable_mosaic.version = 11 : i64} {
  func.func @mha_kernel(%arg0: i32, %arg1: memref<1x32x256xf32, #tpu.memory_space<vmem>>, %arg2: memref<96x32xf32, #tpu.memory_space<vmem>>, %arg3: memref<96x1xf32, #tpu.memory_space<vmem>>, %arg4: memref<8x32x4xf32, #tpu.memory_space<vmem>>, %arg5: memref<32x1xf32, #tpu.memory_space<vmem>>, %arg6: memref<1x32x256xf32, #tpu.memory_space<vmem>>) attributes {dimension_semantics = [#tpu.dimension_semantics<parallel>], iteration_bounds = array<i64: 2>, scalar_prefetch = 0 : i64, scratch_operands = 0 : i64, tpu.core_type = #tpu.core_type<tc>, window_params = [{transform_indices = @transform_0, window_bounds = array<i64: 1, 32, 256>}, {pipeline_mode = #tpu.pipeline_mode<synchronous>, transform_indices = @transform_1, window_bounds = array<i64: 96, 32>}, {pipeline_mode = #tpu.pipeline_mode<synchronous>, transform_indices = @transform_2, window_bounds = array<i64: 96, 1>}, {pipeline_mode = #tpu.pipeline_mode<synchronous>, transform_indices = @transform_3, window_bounds = array<i64: 8, 32, 4>}, {pipeline_mode = #tpu.pipeline_mode<synchronous>, transform_indices = @transform_4, window_bounds = array<i64: 32, 1>}, {transform_indices = @transform_5, window_bounds = array<i64: 1, 32, 256>}]} {
    %c0 = arith.constant 0 : index
    %c0_0 = arith.constant 0 : index
    %c0_1 = arith.constant 0 : index
    %0 = vector.load %arg1[%c0, %c0_0, %c0_1] : memref<1x32x256xf32, #tpu.memory_space<vmem>>, vector<1x32x256xf32>
    %1 = vector.shape_cast %0 : vector<1x32x256xf32> to vector<32x256xf32>
    %c0_2 = arith.constant 0 : index
    %c0_3 = arith.constant 0 : index
    %2 = vector.load %arg2[%c0_2, %c0_3] : memref<96x32xf32, #tpu.memory_space<vmem>>, vector<96x32xf32>
    %cst = arith.constant dense<0.000000e+00> : vector<96x256xf32>
    %3 = tpu.matmul %2, %1, %cst {dimension_numbers = #tpu.dot_dimension_numbers<[1], [0], [0], [1], [0, 0, 1, 1], [], []>} : vector<96x32xf32>, vector<32x256xf32>, vector<96x256xf32> -> vector<96x256xf32>
    %c0_4 = arith.constant 0 : index
    %c0_5 = arith.constant 0 : index
    %4 = vector.load %arg3[%c0_4, %c0_5] : memref<96x1xf32, #tpu.memory_space<vmem>>, vector<96x1xf32>
    %5 = vector.broadcast %4 : vector<96x1xf32> to vector<96x256xf32>
    %6 = arith.addf %3, %5 : vector<96x256xf32>
    %cst_6 = arith.constant 0.000000e+00 : f32
    %7 = vector.broadcast %cst_6 : f32 to vector<32x256xf32>
    %8 = vector.extract_strided_slice %6 {offsets = [0, 0], sizes = [4, 256], strides = [1, 1]} : vector<96x256xf32> to vector<4x256xf32>
    %cst_7 = arith.constant 5.000000e-01 : f32
    %9 = vector.broadcast %cst_7 : f32 to vector<4x256xf32>
    %10 = arith.mulf %8, %9 : vector<4x256xf32>
    %11 = vector.extract_strided_slice %6 {offsets = [32, 0], sizes = [4, 256], strides = [1, 1]} : vector<96x256xf32> to vector<4x256xf32>
    %12 = vector.extract_strided_slice %6 {offsets = [64, 0], sizes = [4, 256], strides = [1, 1]} : vector<96x256xf32> to vector<4x256xf32>
    %cst_8 = arith.constant dense<0.000000e+00> : vector<256x256xf32>
    %13 = tpu.matmul %10, %11, %cst_8 {dimension_numbers = #tpu.dot_dimension_numbers<[0], [0], [1], [1], [0, 1, 1, 1], [], []>} : vector<4x256xf32>, vector<4x256xf32>, vector<256x256xf32> -> vector<256x256xf32>
    %cst_9 = arith.constant dense<0xFF800000> : vector<256xf32>
    %14 = vector.multi_reduction <maximumf>, %13, %cst_9 [1] : vector<256x256xf32> to vector<256xf32>
    %15 = vector.shape_cast %14 : vector<256xf32> to vector<256x1xf32>
    %16 = vector.broadcast %15 : vector<256x1xf32> to vector<256x256xf32>
    %17 = arith.subf %13, %16 : vector<256x256xf32>
    %18 = math.exp %17 : vector<256x256xf32>
    %cst_10 = arith.constant dense<0.000000e+00> : vector<256xf32>
    %19 = vector.multi_reduction <add>, %18, %cst_10 [1] : vector<256x256xf32> to vector<256xf32>
    %20 = vector.shape_cast %19 : vector<256xf32> to vector<256x1xf32>
    %21 = tpu.reciprocal %20 {approx = true} : vector<256x1xf32> -> vector<256x1xf32>
    %22 = vector.broadcast %21 : vector<256x1xf32> to vector<256x256xf32>
    %23 = arith.mulf %18, %22 : vector<256x256xf32>
    %cst_11 = arith.constant dense<0.000000e+00> : vector<4x256xf32>
    %24 = tpu.matmul %12, %23, %cst_11 {dimension_numbers = #tpu.dot_dimension_numbers<[1], [1], [0], [0], [0, 0, 1, 0], [], []>} : vector<4x256xf32>, vector<256x256xf32>, vector<4x256xf32> -> vector<4x256xf32>
    %c0_12 = arith.constant 0 : index
    %c0_13 = arith.constant 0 : index
    %c0_14 = arith.constant 0 : index
    %25 = vector.load %arg4[%c0_12, %c0_13, %c0_14] : memref<8x32x4xf32, #tpu.memory_space<vmem>>, vector<1x32x4xf32>
    %26 = vector.shape_cast %25 : vector<1x32x4xf32> to vector<32x4xf32>
    %cst_15 = arith.constant dense<0.000000e+00> : vector<32x256xf32>
    %27 = tpu.matmul %26, %24, %cst_15 {dimension_numbers = #tpu.dot_dimension_numbers<[1], [0], [0], [1], [0, 0, 1, 1], [], []>} : vector<32x4xf32>, vector<4x256xf32>, vector<32x256xf32> -> vector<32x256xf32>
    %28 = arith.addf %7, %27 : vector<32x256xf32>
    %29 = vector.extract_strided_slice %6 {offsets = [4, 0], sizes = [4, 256], strides = [1, 1]} : vector<96x256xf32> to vector<4x256xf32>
    %cst_16 = arith.constant 5.000000e-01 : f32
    %30 = vector.broadcast %cst_16 : f32 to vector<4x256xf32>
    %31 = arith.mulf %29, %30 : vector<4x256xf32>
    %32 = vector.extract_strided_slice %6 {offsets = [36, 0], sizes = [4, 256], strides = [1, 1]} : vector<96x256xf32> to vector<4x256xf32>
    %33 = vector.extract_strided_slice %6 {offsets = [68, 0], sizes = [4, 256], strides = [1, 1]} : vector<96x256xf32> to vector<4x256xf32>
    %cst_17 = arith.constant dense<0.000000e+00> : vector<256x256xf32>
    %34 = tpu.matmul %31, %32, %cst_17 {dimension_numbers = #tpu.dot_dimension_numbers<[0], [0], [1], [1], [0, 1, 1, 1], [], []>} : vector<4x256xf32>, vector<4x256xf32>, vector<256x256xf32> -> vector<256x256xf32>
    %cst_18 = arith.constant dense<0xFF800000> : vector<256xf32>
    %35 = vector.multi_reduction <maximumf>, %34, %cst_18 [1] : vector<256x256xf32> to vector<256xf32>
    %36 = vector.shape_cast %35 : vector<256xf32> to vector<256x1xf32>
    %37 = vector.broadcast %36 : vector<256x1xf32> to vector<256x256xf32>
    %38 = arith.subf %34, %37 : vector<256x256xf32>
    %39 = math.exp %38 : vector<256x256xf32>
    %cst_19 = arith.constant dense<0.000000e+00> : vector<256xf32>
    %40 = vector.multi_reduction <add>, %39, %cst_19 [1] : vector<256x256xf32> to vector<256xf32>
    %41 = vector.shape_cast %40 : vector<256xf32> to vector<256x1xf32>
    %42 = tpu.reciprocal %41 {approx = true} : vector<256x1xf32> -> vector<256x1xf32>
    %43 = vector.broadcast %42 : vector<256x1xf32> to vector<256x256xf32>
    %44 = arith.mulf %39, %43 : vector<256x256xf32>
    %cst_20 = arith.constant dense<0.000000e+00> : vector<4x256xf32>
    %45 = tpu.matmul %33, %44, %cst_20 {dimension_numbers = #tpu.dot_dimension_numbers<[1], [1], [0], [0], [0, 0, 1, 0], [], []>} : vector<4x256xf32>, vector<256x256xf32>, vector<4x256xf32> -> vector<4x256xf32>
    %c1 = arith.constant 1 : index
    %c0_21 = arith.constant 0 : index
    %c0_22 = arith.constant 0 : index
    %46 = vector.load %arg4[%c1, %c0_21, %c0_22] : memref<8x32x4xf32, #tpu.memory_space<vmem>>, vector<1x32x4xf32>
    %47 = vector.shape_cast %46 : vector<1x32x4xf32> to vector<32x4xf32>
    %cst_23 = arith.constant dense<0.000000e+00> : vector<32x256xf32>
    %48 = tpu.matmul %47, %45, %cst_23 {dimension_numbers = #tpu.dot_dimension_numbers<[1], [0], [0], [1], [0, 0, 1, 1], [], []>} : vector<32x4xf32>, vector<4x256xf32>, vector<32x256xf32> -> vector<32x256xf32>
    %49 = arith.addf %28, %48 : vector<32x256xf32>
    %50 = vector.extract_strided_slice %6 {offsets = [8, 0], sizes = [4, 256], strides = [1, 1]} : vector<96x256xf32> to vector<4x256xf32>
    %cst_24 = arith.constant 5.000000e-01 : f32
    %51 = vector.broadcast %cst_24 : f32 to vector<4x256xf32>
    %52 = arith.mulf %50, %51 : vector<4x256xf32>
    %53 = vector.extract_strided_slice %6 {offsets = [40, 0], sizes = [4, 256], strides = [1, 1]} : vector<96x256xf32> to vector<4x256xf32>
    %54 = vector.extract_strided_slice %6 {offsets = [72, 0], sizes = [4, 256], strides = [1, 1]} : vector<96x256xf32> to vector<4x256xf32>
    %cst_25 = arith.constant dense<0.000000e+00> : vector<256x256xf32>
    %55 = tpu.matmul %52, %53, %cst_25 {dimension_numbers = #tpu.dot_dimension_numbers<[0], [0], [1], [1], [0, 1, 1, 1], [], []>} : vector<4x256xf32>, vector<4x256xf32>, vector<256x256xf32> -> vector<256x256xf32>
    %cst_26 = arith.constant dense<0xFF800000> : vector<256xf32>
    %56 = vector.multi_reduction <maximumf>, %55, %cst_26 [1] : vector<256x256xf32> to vector<256xf32>
    %57 = vector.shape_cast %56 : vector<256xf32> to vector<256x1xf32>
    %58 = vector.broadcast %57 : vector<256x1xf32> to vector<256x256xf32>
    %59 = arith.subf %55, %58 : vector<256x256xf32>
    %60 = math.exp %59 : vector<256x256xf32>
    %cst_27 = arith.constant dense<0.000000e+00> : vector<256xf32>
    %61 = vector.multi_reduction <add>, %60, %cst_27 [1] : vector<256x256xf32> to vector<256xf32>
    %62 = vector.shape_cast %61 : vector<256xf32> to vector<256x1xf32>
    %63 = tpu.reciprocal %62 {approx = true} : vector<256x1xf32> -> vector<256x1xf32>
    %64 = vector.broadcast %63 : vector<256x1xf32> to vector<256x256xf32>
    %65 = arith.mulf %60, %64 : vector<256x256xf32>
    %cst_28 = arith.constant dense<0.000000e+00> : vector<4x256xf32>
    %66 = tpu.matmul %54, %65, %cst_28 {dimension_numbers = #tpu.dot_dimension_numbers<[1], [1], [0], [0], [0, 0, 1, 0], [], []>} : vector<4x256xf32>, vector<256x256xf32>, vector<4x256xf32> -> vector<4x256xf32>
    %c2 = arith.constant 2 : index
    %c0_29 = arith.constant 0 : index
    %c0_30 = arith.constant 0 : index
    %67 = vector.load %arg4[%c2, %c0_29, %c0_30] : memref<8x32x4xf32, #tpu.memory_space<vmem>>, vector<1x32x4xf32>
    %68 = vector.shape_cast %67 : vector<1x32x4xf32> to vector<32x4xf32>
    %cst_31 = arith.constant dense<0.000000e+00> : vector<32x256xf32>
    %69 = tpu.matmul %68, %66, %cst_31 {dimension_numbers = #tpu.dot_dimension_numbers<[1], [0], [0], [1], [0, 0, 1, 1], [], []>} : vector<32x4xf32>, vector<4x256xf32>, vector<32x256xf32> -> vector<32x256xf32>
    %70 = arith.addf %49, %69 : vector<32x256xf32>
    %71 = vector.extract_strided_slice %6 {offsets = [12, 0], sizes = [4, 256], strides = [1, 1]} : vector<96x256xf32> to vector<4x256xf32>
    %cst_32 = arith.constant 5.000000e-01 : f32
    %72 = vector.broadcast %cst_32 : f32 to vector<4x256xf32>
    %73 = arith.mulf %71, %72 : vector<4x256xf32>
    %74 = vector.extract_strided_slice %6 {offsets = [44, 0], sizes = [4, 256], strides = [1, 1]} : vector<96x256xf32> to vector<4x256xf32>
    %75 = vector.extract_strided_slice %6 {offsets = [76, 0], sizes = [4, 256], strides = [1, 1]} : vector<96x256xf32> to vector<4x256xf32>
    %cst_33 = arith.constant dense<0.000000e+00> : vector<256x256xf32>
    %76 = tpu.matmul %73, %74, %cst_33 {dimension_numbers = #tpu.dot_dimension_numbers<[0], [0], [1], [1], [0, 1, 1, 1], [], []>} : vector<4x256xf32>, vector<4x256xf32>, vector<256x256xf32> -> vector<256x256xf32>
    %cst_34 = arith.constant dense<0xFF800000> : vector<256xf32>
    %77 = vector.multi_reduction <maximumf>, %76, %cst_34 [1] : vector<256x256xf32> to vector<256xf32>
    %78 = vector.shape_cast %77 : vector<256xf32> to vector<256x1xf32>
    %79 = vector.broadcast %78 : vector<256x1xf32> to vector<256x256xf32>
    %80 = arith.subf %76, %79 : vector<256x256xf32>
    %81 = math.exp %80 : vector<256x256xf32>
    %cst_35 = arith.constant dense<0.000000e+00> : vector<256xf32>
    %82 = vector.multi_reduction <add>, %81, %cst_35 [1] : vector<256x256xf32> to vector<256xf32>
    %83 = vector.shape_cast %82 : vector<256xf32> to vector<256x1xf32>
    %84 = tpu.reciprocal %83 {approx = true} : vector<256x1xf32> -> vector<256x1xf32>
    %85 = vector.broadcast %84 : vector<256x1xf32> to vector<256x256xf32>
    %86 = arith.mulf %81, %85 : vector<256x256xf32>
    %cst_36 = arith.constant dense<0.000000e+00> : vector<4x256xf32>
    %87 = tpu.matmul %75, %86, %cst_36 {dimension_numbers = #tpu.dot_dimension_numbers<[1], [1], [0], [0], [0, 0, 1, 0], [], []>} : vector<4x256xf32>, vector<256x256xf32>, vector<4x256xf32> -> vector<4x256xf32>
    %c3 = arith.constant 3 : index
    %c0_37 = arith.constant 0 : index
    %c0_38 = arith.constant 0 : index
    %88 = vector.load %arg4[%c3, %c0_37, %c0_38] : memref<8x32x4xf32, #tpu.memory_space<vmem>>, vector<1x32x4xf32>
    %89 = vector.shape_cast %88 : vector<1x32x4xf32> to vector<32x4xf32>
    %cst_39 = arith.constant dense<0.000000e+00> : vector<32x256xf32>
    %90 = tpu.matmul %89, %87, %cst_39 {dimension_numbers = #tpu.dot_dimension_numbers<[1], [0], [0], [1], [0, 0, 1, 1], [], []>} : vector<32x4xf32>, vector<4x256xf32>, vector<32x256xf32> -> vector<32x256xf32>
    %91 = arith.addf %70, %90 : vector<32x256xf32>
    %92 = vector.extract_strided_slice %6 {offsets = [16, 0], sizes = [4, 256], strides = [1, 1]} : vector<96x256xf32> to vector<4x256xf32>
    %cst_40 = arith.constant 5.000000e-01 : f32
    %93 = vector.broadcast %cst_40 : f32 to vector<4x256xf32>
    %94 = arith.mulf %92, %93 : vector<4x256xf32>
    %95 = vector.extract_strided_slice %6 {offsets = [48, 0], sizes = [4, 256], strides = [1, 1]} : vector<96x256xf32> to vector<4x256xf32>
    %96 = vector.extract_strided_slice %6 {offsets = [80, 0], sizes = [4, 256], strides = [1, 1]} : vector<96x256xf32> to vector<4x256xf32>
    %cst_41 = arith.constant dense<0.000000e+00> : vector<256x256xf32>
    %97 = tpu.matmul %94, %95, %cst_41 {dimension_numbers = #tpu.dot_dimension_numbers<[0], [0], [1], [1], [0, 1, 1, 1], [], []>} : vector<4x256xf32>, vector<4x256xf32>, vector<256x256xf32> -> vector<256x256xf32>
    %cst_42 = arith.constant dense<0xFF800000> : vector<256xf32>
    %98 = vector.multi_reduction <maximumf>, %97, %cst_42 [1] : vector<256x256xf32> to vector<256xf32>
    %99 = vector.shape_cast %98 : vector<256xf32> to vector<256x1xf32>
    %100 = vector.broadcast %99 : vector<256x1xf32> to vector<256x256xf32>
    %101 = arith.subf %97, %100 : vector<256x256xf32>
    %102 = math.exp %101 : vector<256x256xf32>
    %cst_43 = arith.constant dense<0.000000e+00> : vector<256xf32>
    %103 = vector.multi_reduction <add>, %102, %cst_43 [1] : vector<256x256xf32> to vector<256xf32>
    %104 = vector.shape_cast %103 : vector<256xf32> to vector<256x1xf32>
    %105 = tpu.reciprocal %104 {approx = true} : vector<256x1xf32> -> vector<256x1xf32>
    %106 = vector.broadcast %105 : vector<256x1xf32> to vector<256x256xf32>
    %107 = arith.mulf %102, %106 : vector<256x256xf32>
    %cst_44 = arith.constant dense<0.000000e+00> : vector<4x256xf32>
    %108 = tpu.matmul %96, %107, %cst_44 {dimension_numbers = #tpu.dot_dimension_numbers<[1], [1], [0], [0], [0, 0, 1, 0], [], []>} : vector<4x256xf32>, vector<256x256xf32>, vector<4x256xf32> -> vector<4x256xf32>
    %c4 = arith.constant 4 : index
    %c0_45 = arith.constant 0 : index
    %c0_46 = arith.constant 0 : index
    %109 = vector.load %arg4[%c4, %c0_45, %c0_46] : memref<8x32x4xf32, #tpu.memory_space<vmem>>, vector<1x32x4xf32>
    %110 = vector.shape_cast %109 : vector<1x32x4xf32> to vector<32x4xf32>
    %cst_47 = arith.constant dense<0.000000e+00> : vector<32x256xf32>
    %111 = tpu.matmul %110, %108, %cst_47 {dimension_numbers = #tpu.dot_dimension_numbers<[1], [0], [0], [1], [0, 0, 1, 1], [], []>} : vector<32x4xf32>, vector<4x256xf32>, vector<32x256xf32> -> vector<32x256xf32>
    %112 = arith.addf %91, %111 : vector<32x256xf32>
    %113 = vector.extract_strided_slice %6 {offsets = [20, 0], sizes = [4, 256], strides = [1, 1]} : vector<96x256xf32> to vector<4x256xf32>
    %cst_48 = arith.constant 5.000000e-01 : f32
    %114 = vector.broadcast %cst_48 : f32 to vector<4x256xf32>
    %115 = arith.mulf %113, %114 : vector<4x256xf32>
    %116 = vector.extract_strided_slice %6 {offsets = [52, 0], sizes = [4, 256], strides = [1, 1]} : vector<96x256xf32> to vector<4x256xf32>
    %117 = vector.extract_strided_slice %6 {offsets = [84, 0], sizes = [4, 256], strides = [1, 1]} : vector<96x256xf32> to vector<4x256xf32>
    %cst_49 = arith.constant dense<0.000000e+00> : vector<256x256xf32>
    %118 = tpu.matmul %115, %116, %cst_49 {dimension_numbers = #tpu.dot_dimension_numbers<[0], [0], [1], [1], [0, 1, 1, 1], [], []>} : vector<4x256xf32>, vector<4x256xf32>, vector<256x256xf32> -> vector<256x256xf32>
    %cst_50 = arith.constant dense<0xFF800000> : vector<256xf32>
    %119 = vector.multi_reduction <maximumf>, %118, %cst_50 [1] : vector<256x256xf32> to vector<256xf32>
    %120 = vector.shape_cast %119 : vector<256xf32> to vector<256x1xf32>
    %121 = vector.broadcast %120 : vector<256x1xf32> to vector<256x256xf32>
    %122 = arith.subf %118, %121 : vector<256x256xf32>
    %123 = math.exp %122 : vector<256x256xf32>
    %cst_51 = arith.constant dense<0.000000e+00> : vector<256xf32>
    %124 = vector.multi_reduction <add>, %123, %cst_51 [1] : vector<256x256xf32> to vector<256xf32>
    %125 = vector.shape_cast %124 : vector<256xf32> to vector<256x1xf32>
    %126 = tpu.reciprocal %125 {approx = true} : vector<256x1xf32> -> vector<256x1xf32>
    %127 = vector.broadcast %126 : vector<256x1xf32> to vector<256x256xf32>
    %128 = arith.mulf %123, %127 : vector<256x256xf32>
    %cst_52 = arith.constant dense<0.000000e+00> : vector<4x256xf32>
    %129 = tpu.matmul %117, %128, %cst_52 {dimension_numbers = #tpu.dot_dimension_numbers<[1], [1], [0], [0], [0, 0, 1, 0], [], []>} : vector<4x256xf32>, vector<256x256xf32>, vector<4x256xf32> -> vector<4x256xf32>
    %c5 = arith.constant 5 : index
    %c0_53 = arith.constant 0 : index
    %c0_54 = arith.constant 0 : index
    %130 = vector.load %arg4[%c5, %c0_53, %c0_54] : memref<8x32x4xf32, #tpu.memory_space<vmem>>, vector<1x32x4xf32>
    %131 = vector.shape_cast %130 : vector<1x32x4xf32> to vector<32x4xf32>
    %cst_55 = arith.constant dense<0.000000e+00> : vector<32x256xf32>
    %132 = tpu.matmul %131, %129, %cst_55 {dimension_numbers = #tpu.dot_dimension_numbers<[1], [0], [0], [1], [0, 0, 1, 1], [], []>} : vector<32x4xf32>, vector<4x256xf32>, vector<32x256xf32> -> vector<32x256xf32>
    %133 = arith.addf %112, %132 : vector<32x256xf32>
    %134 = vector.extract_strided_slice %6 {offsets = [24, 0], sizes = [4, 256], strides = [1, 1]} : vector<96x256xf32> to vector<4x256xf32>
    %cst_56 = arith.constant 5.000000e-01 : f32
    %135 = vector.broadcast %cst_56 : f32 to vector<4x256xf32>
    %136 = arith.mulf %134, %135 : vector<4x256xf32>
    %137 = vector.extract_strided_slice %6 {offsets = [56, 0], sizes = [4, 256], strides = [1, 1]} : vector<96x256xf32> to vector<4x256xf32>
    %138 = vector.extract_strided_slice %6 {offsets = [88, 0], sizes = [4, 256], strides = [1, 1]} : vector<96x256xf32> to vector<4x256xf32>
    %cst_57 = arith.constant dense<0.000000e+00> : vector<256x256xf32>
    %139 = tpu.matmul %136, %137, %cst_57 {dimension_numbers = #tpu.dot_dimension_numbers<[0], [0], [1], [1], [0, 1, 1, 1], [], []>} : vector<4x256xf32>, vector<4x256xf32>, vector<256x256xf32> -> vector<256x256xf32>
    %cst_58 = arith.constant dense<0xFF800000> : vector<256xf32>
    %140 = vector.multi_reduction <maximumf>, %139, %cst_58 [1] : vector<256x256xf32> to vector<256xf32>
    %141 = vector.shape_cast %140 : vector<256xf32> to vector<256x1xf32>
    %142 = vector.broadcast %141 : vector<256x1xf32> to vector<256x256xf32>
    %143 = arith.subf %139, %142 : vector<256x256xf32>
    %144 = math.exp %143 : vector<256x256xf32>
    %cst_59 = arith.constant dense<0.000000e+00> : vector<256xf32>
    %145 = vector.multi_reduction <add>, %144, %cst_59 [1] : vector<256x256xf32> to vector<256xf32>
    %146 = vector.shape_cast %145 : vector<256xf32> to vector<256x1xf32>
    %147 = tpu.reciprocal %146 {approx = true} : vector<256x1xf32> -> vector<256x1xf32>
    %148 = vector.broadcast %147 : vector<256x1xf32> to vector<256x256xf32>
    %149 = arith.mulf %144, %148 : vector<256x256xf32>
    %cst_60 = arith.constant dense<0.000000e+00> : vector<4x256xf32>
    %150 = tpu.matmul %138, %149, %cst_60 {dimension_numbers = #tpu.dot_dimension_numbers<[1], [1], [0], [0], [0, 0, 1, 0], [], []>} : vector<4x256xf32>, vector<256x256xf32>, vector<4x256xf32> -> vector<4x256xf32>
    %c6 = arith.constant 6 : index
    %c0_61 = arith.constant 0 : index
    %c0_62 = arith.constant 0 : index
    %151 = vector.load %arg4[%c6, %c0_61, %c0_62] : memref<8x32x4xf32, #tpu.memory_space<vmem>>, vector<1x32x4xf32>
    %152 = vector.shape_cast %151 : vector<1x32x4xf32> to vector<32x4xf32>
    %cst_63 = arith.constant dense<0.000000e+00> : vector<32x256xf32>
    %153 = tpu.matmul %152, %150, %cst_63 {dimension_numbers = #tpu.dot_dimension_numbers<[1], [0], [0], [1], [0, 0, 1, 1], [], []>} : vector<32x4xf32>, vector<4x256xf32>, vector<32x256xf32> -> vector<32x256xf32>
    %154 = arith.addf %133, %153 : vector<32x256xf32>
    %155 = vector.extract_strided_slice %6 {offsets = [28, 0], sizes = [4, 256], strides = [1, 1]} : vector<96x256xf32> to vector<4x256xf32>
    %cst_64 = arith.constant 5.000000e-01 : f32
    %156 = vector.broadcast %cst_64 : f32 to vector<4x256xf32>
    %157 = arith.mulf %155, %156 : vector<4x256xf32>
    %158 = vector.extract_strided_slice %6 {offsets = [60, 0], sizes = [4, 256], strides = [1, 1]} : vector<96x256xf32> to vector<4x256xf32>
    %159 = vector.extract_strided_slice %6 {offsets = [92, 0], sizes = [4, 256], strides = [1, 1]} : vector<96x256xf32> to vector<4x256xf32>
    %cst_65 = arith.constant dense<0.000000e+00> : vector<256x256xf32>
    %160 = tpu.matmul %157, %158, %cst_65 {dimension_numbers = #tpu.dot_dimension_numbers<[0], [0], [1], [1], [0, 1, 1, 1], [], []>} : vector<4x256xf32>, vector<4x256xf32>, vector<256x256xf32> -> vector<256x256xf32>
    %cst_66 = arith.constant dense<0xFF800000> : vector<256xf32>
    %161 = vector.multi_reduction <maximumf>, %160, %cst_66 [1] : vector<256x256xf32> to vector<256xf32>
    %162 = vector.shape_cast %161 : vector<256xf32> to vector<256x1xf32>
    %163 = vector.broadcast %162 : vector<256x1xf32> to vector<256x256xf32>
    %164 = arith.subf %160, %163 : vector<256x256xf32>
    %165 = math.exp %164 : vector<256x256xf32>
    %cst_67 = arith.constant dense<0.000000e+00> : vector<256xf32>
    %166 = vector.multi_reduction <add>, %165, %cst_67 [1] : vector<256x256xf32> to vector<256xf32>
    %167 = vector.shape_cast %166 : vector<256xf32> to vector<256x1xf32>
    %168 = tpu.reciprocal %167 {approx = true} : vector<256x1xf32> -> vector<256x1xf32>
    %169 = vector.broadcast %168 : vector<256x1xf32> to vector<256x256xf32>
    %170 = arith.mulf %165, %169 : vector<256x256xf32>
    %cst_68 = arith.constant dense<0.000000e+00> : vector<4x256xf32>
    %171 = tpu.matmul %159, %170, %cst_68 {dimension_numbers = #tpu.dot_dimension_numbers<[1], [1], [0], [0], [0, 0, 1, 0], [], []>} : vector<4x256xf32>, vector<256x256xf32>, vector<4x256xf32> -> vector<4x256xf32>
    %c7 = arith.constant 7 : index
    %c0_69 = arith.constant 0 : index
    %c0_70 = arith.constant 0 : index
    %172 = vector.load %arg4[%c7, %c0_69, %c0_70] : memref<8x32x4xf32, #tpu.memory_space<vmem>>, vector<1x32x4xf32>
    %173 = vector.shape_cast %172 : vector<1x32x4xf32> to vector<32x4xf32>
    %cst_71 = arith.constant dense<0.000000e+00> : vector<32x256xf32>
    %174 = tpu.matmul %173, %171, %cst_71 {dimension_numbers = #tpu.dot_dimension_numbers<[1], [0], [0], [1], [0, 0, 1, 1], [], []>} : vector<32x4xf32>, vector<4x256xf32>, vector<32x256xf32> -> vector<32x256xf32>
    %175 = arith.addf %154, %174 : vector<32x256xf32>
    %c0_72 = arith.constant 0 : index
    %c0_73 = arith.constant 0 : index
    %176 = vector.load %arg5[%c0_72, %c0_73] : memref<32x1xf32, #tpu.memory_space<vmem>>, vector<32x1xf32>
    %177 = vector.broadcast %176 : vector<32x1xf32> to vector<32x256xf32>
    %178 = arith.addf %175, %177 : vector<32x256xf32>
    %c0_74 = arith.constant 0 : index
    %c0_75 = arith.constant 0 : index
    %c0_76 = arith.constant 0 : index
    %179 = vector.load %arg6[%c0_74, %c0_75, %c0_76] : memref<1x32x256xf32, #tpu.memory_space<vmem>>, vector<1x32x256xf32>
    %180 = vector.shape_cast %179 : vector<1x32x256xf32> to vector<32x256xf32>
    %181 = vector.shape_cast %178 : vector<32x256xf32> to vector<1x32x256xf32>
    tpu.vector_store %arg6[%c0_74, %c0_75, %c0_76], %181 {strides = array<i32>} : memref<1x32x256xf32, #tpu.memory_space<vmem>>, vector<1x32x256xf32>,
    return
  }
  func.func @transform_0(%arg0: i32) -> (i32, i32, i32) {
    %c0_i32 = arith.constant 0 : i32
    %c0_i32_0 = arith.constant 0 : i32
    %c0_i32_1 = arith.constant 0 : i32
    return %arg0, %c0_i32, %c0_i32_0 : i32, i32, i32
  }
  func.func @transform_1(%arg0: i32) -> (i32, i32) {
    %c0_i32 = arith.constant 0 : i32
    %c0_i32_0 = arith.constant 0 : i32
    %c0_i32_1 = arith.constant 0 : i32
    return %c0_i32, %c0_i32_0 : i32, i32
  }
  func.func @transform_2(%arg0: i32) -> (i32, i32) {
    %c0_i32 = arith.constant 0 : i32
    %c0_i32_0 = arith.constant 0 : i32
    %c0_i32_1 = arith.constant 0 : i32
    return %c0_i32, %c0_i32_0 : i32, i32
  }
  func.func @transform_3(%arg0: i32) -> (i32, i32, i32) {
    %c0_i32 = arith.constant 0 : i32
    %c0_i32_0 = arith.constant 0 : i32
    %c0_i32_1 = arith.constant 0 : i32
    %c0_i32_2 = arith.constant 0 : i32
    return %c0_i32, %c0_i32_0, %c0_i32_1 : i32, i32, i32
  }
  func.func @transform_4(%arg0: i32) -> (i32, i32) {
    %c0_i32 = arith.constant 0 : i32
    %c0_i32_0 = arith.constant 0 : i32
    %c0_i32_1 = arith.constant 0 : i32
    return %c0_i32, %c0_i32_0 : i32, i32
  }
  func.func @transform_5(%arg0: i32) -> (i32, i32, i32) {
    %c0_i32 = arith.constant 0 : i32
    %c0_i32_0 = arith.constant 0 : i32
    %c0_i32_1 = arith.constant 0 : i32
    return %arg0, %c0_i32, %c0_i32_0 : i32, i32, i32
  }
}

</mosaic_0001>

<bundles_post_ra>
// kernel: tpu_custom_call.1
= control target key start
LH: loop header
LB: loop body
LE: loop exit
PB: predicated region body
PF: predicated region fallthrough
CT: control target
= control target key end

     0   :  { %10 = vsyncpa [#allocation3], 0  ;;  %s17615_s0 = inlined_call_operand.vmem [shape: f32[2,32,256], index: 0, kind: input, shape index: {}]   ;;  %s17616_s1 = inlined_call_operand.vmem [shape: f32[96,32], index: 1, kind: input, shape index: {}]   ;;  %s17617_s2 = inlined_call_operand.vmem [shape: f32[96,1], index: 2, kind: input, shape index: {}]   ;;  %s17618_s3 = inlined_call_operand.vmem [shape: f32[8,32,4], index: 3, kind: input, shape index: {}]   ;;  %s17619_s4 = inlined_call_operand.vmem [shape: f32[32,1], index: 4, kind: input, shape index: {}]   ;;  %s17620_s5 = inlined_call_operand.hbm [shape: f32[2,32,256], index: 5, kind: output, shape index: {}]  }
   0x1   :  { %12 = vsyncpa [#allocation3 + $0x1], 0  ;;  %s12030_s18 = smov 0   ;;  %s12032_s19 = smov 0  }
   0x2   :  { %s12034_s20 = smov 0   ;;  %s12036_s21 = smov 0  }
   0x3 LB: > { %s12051_s22 = sadd.s32 4294967295, %s11993_s21   ;;  %s9398_s23 = sadd.s32 4294967294, %s11993_s21   ;;  %s11993_s21 = sphi %s12036_s21, %s19206_s21   ;;  %s11989_s20 = sphi %s12034_s20, %s19205_s20   ;;  %s11985_s19 = sphi %s12032_s19, %s19204_s19   ;;  %s11981_s18 = sphi %s12030_s18, %s19203_s18  }
   0x4   : > { %s12055_s24 = sadd.s32 1, %s11993_s21   ;;  %s135_s25 = sadd.s32 1, %s11989_s20 }
   0x5   : > { %s132_s26 = ssub.s32 %s11993_s21, %s12055_s24  ;;  %p145_p0 = scmp.ne.s32.totalorder %s11989_s20, %s11985_s19 }
   0x6   : > { %p133_p1 = scmp.eq.s32.totalorder %s132_s26, 0  ;;  %p146_p2 = scmp.eq.s32.totalorder %s12051_s22, 1 }
   0x7   : > { %p151_p3 = scmp.ne.s32.totalorder %s11985_s19, %s11981_s18  ;;  %p152_p4 = scmp.eq.s32.totalorder %s9398_s23, 1 }
   0x8   : > { %s12066_s27 = scalar_select %p133_p1, %s11989_s20, %s135_s25  }
   0x9   : > { %p12068_p5 = por %p146_p2, %p145_p0  ;;  %p12072_p6 = por %p152_p4, %p151_p3 }
   0xa   : > { %p9401_p7 = scmp.ge.s32.totalorder %s11993_s21, 1  ;;  %p190_p8 = scmp.lt.s32.totalorder %s11993_s21, 3 }
   0xc   : > { %p191_p9 = pnand %p9401_p7, %p190_p8 }
   0xe   : > { %194 = sbr.rel (%p191_p9) target bundleno = 6189 (0x182d), region = 40 }
  0x15   : > { %p218_p10 = scmp.lt.s32.totalorder %s12051_s22, 1  ;;  %v17621_v0 = vmov 0.0   ;;  %v243_v1 = vld [vmem:[%s17617_s2] sm:$0xff]  ;;  %v11996_v2 = vmov 0   ;;  %vm315_vm0 = vcmask 261120   ;;  %v232_v17 = vld [vmem:[%s17616_s1 + $0x8] sm:$0xff] }
  0x16   : > { %416 = vmatprep.mubr.f32.mxu0 %v17621_v0  ;;  %723 = vmatprep.mubr.f32.mxu1 %v17621_v0  ;;  %v247_v3 = vld [vmem:[%s17617_s2 + $0x20] sm:$0xff]  ;;  %v233_v18 = vld [vmem:[%s17616_s1 + $0x10] sm:$0xff]  ;;  %v234_v19 = vld [vmem:[%s17616_s1 + $0x18] sm:$0xff]  ;;  %vm652_vm1 = vcmask 1043456   ;;  %vm555_vm2 = vcmask 31744   ;;  %s215_s23 = sand.u32 1, %s11985_s19  }
  0x17   : > { %s219_s7 = scalar_select %p218_p10, %s12051_s22, 1  ;;  %10393 = vset.pattern.permute.xlu0 %v11996_v2  ;;  %v231_v16 = vld [vmem:[%s17616_s1] sm:$0xff] }
  0x18   : > { %257 = vperm.xlu0 %10393, %v243_v1   ;;  %v235_v20 = vld [vmem:[%s17616_s1 + $0x20] sm:$0xff]  ;;  %s9402_s25 = sshll.u32 %s215_s23, 6  ;;  %s9771_s30 = sshll.u32 %s12051_s22, 10 }
  0x19   : > { %s9770_s8 = sshll.u32 %s219_s7, 6  ;;  %s17547_s26 = scalar_lea.vmem [#allocation2], %s9402_s25 }
  0x1a   : > { %s222_s13 = scalar_lea.vmem %s17615_s0, %s9770_s8  ;;  %s9336_s6 = sshll.u32 %s17547_s26, 4  ;;  %s17568_s6 = int_to_ptr.vmem [resolvable:$true] %s9336_s6 }
  0x1b   : > { %v224_v4 = vld [vmem:[%s222_s13 + $0x8] sm:$0xff]  ;;  %v226_v5 = vld [vmem:[%s222_s13 + $0x18] sm:$0xff]  ;;  %v223_v6 = vld [vmem:[%s222_s13] sm:$0xff]  ;;  %s17566_s9 = scalar_lea.hbm %s17620_s5, %s9771_s30  ;;  %s17574_s22 = scalar_lea.sflag [#allocation3], %s215_s23 }
  0x1c   : > { %v9772_v7 = vpack.c.bf16 %v226_v5, %v224_v4  ;;  %v225_v8 = vld [vmem:[%s222_s13 + $0x10] sm:$0xff]  ;;  %v228_v9 = vld [vmem:[%s222_s13 + $0x28] sm:$0xff]  ;;  %v230_v10 = vld [vmem:[%s222_s13 + $0x38] sm:$0xff]  ;;  %277 = vperm.xlu0 %10393, %v247_v3   ;;  %s11931_s10 = scalar_lea.vmem %s17568_s6, 1024  ;;  %s11997_s11 = smov [#allocation2]  }
  0x1d   : > { %v9774_v11 = vpack.c.bf16 %v225_v8, %v223_v6  ;;  %v9776_v12 = vpack.c.bf16 %v230_v10, %v228_v9  ;;  %v227_v13 = vld [vmem:[%s222_s13 + $0x20] sm:$0xff]  ;;  %v229_v14 = vld [vmem:[%s222_s13 + $0x30] sm:$0xff]  ;;  %p11932_p11 = scmp.ne.s32.totalorder %s17568_s6, %s11931_s10  ;;  %s11935_s12 = sshll.u32 %s11997_s11, 4  ;;  %s11936_s12 = int_to_ptr.vmem [resolvable:$false] %s11935_s12 }
  0x1e   : > { %9773 = vmatprep.subr.bf16.mxu0 %v9772_v7  ;;  %v9778_v15 = vpack.c.bf16 %v229_v14, %v227_v13  ;;  %s11937_s13 = scalar_lea.vmem %s11936_s12, 2048  ;;  %p11938_p0 = scmp.lt.s32.totalorder %s17568_s6, %s11936_s12 }
  0x1f   : > { %9775 = vmatpush1.bf16.msra.mxu0 %v9774_v11  ;;  %p11933_p12 = pnand %p11932_p11, %p12068_p5  ;;  %p11939_p1 = scmp.lt.s32.totalorder %s11937_s13, %s11931_s10 }
  0x20   : > { %9777 = vmatprep.subr.bf16.mxu0 %v9776_v12 }
  0x21   : > { %p11934_p13 = pneg %p11933_p12  ;;  %p11940_p2 = por %p11939_p1, %p11938_p0 }
  0x23   : > { %9779 = vmatpush1.bf16.msra.mxu0 %v9778_v15  ;;  %p11941_p3 = pnand %p11940_p2, %p11934_p13 }
  0x26   : > { %9405 = vmatmul.mubr.msk.f32.vlgmr.msra.gmra.mrb[0].mxu0 %vm315_vm0, %v231_v16 }
  0x27   : > { %422 = vmatprep.mubr.f32.mxu0 %v17621_v0 }
  0x2a   : > { %9406 = vmatmul.mubr.msk.f32.gmra.mrb[2].mxu0 %vm315_vm0, %v232_v17 }
  0x2b   : > { %428 = vmatprep.mubr.f32.mxu0 %v17621_v0 }
  0x2e   : > { %9407 = vmatmul.mubr.msk.f32.gmra.mrb[4].mxu0 %vm315_vm0, %v233_v18 }
  0x2f   : > { %434 = vmatprep.mubr.f32.mxu0 %v17621_v0 }
  0x32   : > { %9408 = vmatmul.mubr.msk.f32.gmra.mrb[6].mxu0 %vm315_vm0, %v234_v19 }
  0x33   : > { %440 = vmatprep.mubr.f32.mxu0 %v17621_v0 }
  0x36   : > { %9409 = vmatmul.mubr.msk.f32.gmra.mrb[8].mxu0 %vm315_vm0, %v235_v20 }
  0x37   : > { %446 = vmatprep.mubr.f32.mxu0 %v17621_v0 }
  0x97   : > { %v258_v21 = vpop.permute.xlu0 %257 }
  0x9b   : > { %v278_v32 = vpop.permute.xlu0 %277 }
  0xf9   : > { %v418_v22 = vpop.f32.mrb[0].mxu0 }
  0xfa   : > { %v420_v23 = vpop.f32.mrb[1].mxu0  ;;  %v419_v24 = vadd.f32 %v418_v22, %v258_v21 }
  0xfb   : > { %v421_v39 = vadd.f32 %v420_v23, %v258_v21 }
  0xfc   : > { %v12117_v25 = vmul.f32 0.5, %v419_v24 }
  0xfd   : > { %v12119_v26 = vpop.f32.mrb[2].mxu0  ;;  %v12136_v40 = vmul.f32 0.5, %v421_v39 }
  0xfe   : > { %18129 = vst [vmem:[#allocation5_spill] sm:$0xff] %v12117_v25  ;;  %18130 = vst [vmem:[#allocation6_spill] sm:$0xff] %v12119_v26  ;;  %491 = vxpose.xlu1.b32.start.end [1/1] (short) %v12117_v25, 128  ;;  %v12122_v27 = vpop.f32.mrb[3].mxu0 }
  0xff   : > { %18131 = vst [vmem:[#allocation7_spill] sm:$0xff] %v12122_v27  ;;  %18136 = vst [vmem:[#allocation12_spill] sm:$0xff] %v12136_v40 }
 0x101   : > { %v12124_v28 = vpop.f32.mrb[4].mxu0 }
 0x102   : > { %18132 = vst [vmem:[#allocation8_spill] sm:$0xff] %v12124_v28  ;;  %v12126_v29 = vpop.f32.mrb[5].mxu0 }
 0x103   : > { %18133 = vst [vmem:[#allocation9_spill] sm:$0xff] %v12126_v29 }
 0x105   : > { %v12128_v30 = vpop.f32.mrb[6].mxu0 }
 0x106   : > { %18134 = vst [vmem:[#allocation10_spill] sm:$0xff] %v12128_v30  ;;  %v12130_v31 = vpop.f32.mrb[7].mxu0 }
 0x107   : > { %18135 = vst [vmem:[#allocation11_spill] sm:$0xff] %v12130_v31 }
 0x109   : > { %v442_v33 = vpop.f32.mrb[8].mxu0 }
 0x10a   : > { %v443_v34 = vadd.f32 %v442_v33, %v278_v32  ;;  %v444_v35 = vpop.f32.mrb[9].mxu0 }
 0x10b   : > { %v445_v36 = vadd.f32 %v444_v35, %v278_v32 }
 0x10c   : > { %v1541_v38 = vrot.slane %v443_v34, 4 }
 0x10d   : > { %9417 = vmatprep.subr.msk.mxu1 %vm652_vm1, %v445_v36  ;;  %v1542_v37 = vrot.slane %v445_v36, 4 }
 0x10e   : > { %9418 = vmatpush1.msk.msra.mxu1 %vm652_vm1, %v443_v34 }
 0x10f   : > { %9451 = vmatprep.subr.msk.mxu0 %vm652_vm1, %v1542_v37 }
 0x110   : > { %9452 = vmatpush1.msk.msra.mxu0 %vm652_vm1, %v1541_v38 }
 0x13b   : > { %523 = vxpose.xlu1.b32.start.end [1/1] (short) %v12136_v40, 128 }
 0x159   : > { %10394 = vset.pattern.permute.xlu1 %v11996_v2 }
 0x17e   : > { %v507_v41 = vpop.trf.xlu1 }
 0x17f   : > { %9419 = vmatmul.mubr.msk.f32.vlgmr.msra.gmra.mrb[0].mxu1 %vm555_vm2, %v507_v41 }
 0x180   : > { %729 = vmatprep.mubr.f32.mxu1 %v17621_v0 }
 0x182   : > { %v508_v42 = vpop.trf.xlu1 }
 0x183   : > { %9420 = vmatmul.mubr.msk.f32.gmra.mrb[2].mxu1 %vm555_vm2, %v508_v42 }
 0x184   : > { %735 = vmatprep.mubr.f32.mxu1 %v17621_v0 }
 0x186   : > { %v509_v43 = vpop.trf.xlu1 }
 0x187   : > { %9421 = vmatmul.mubr.msk.f32.gmra.mrb[4].mxu1 %vm555_vm2, %v509_v43 }
 0x188   : > { %741 = vmatprep.mubr.f32.mxu1 %v17621_v0 }
 0x18a   : > { %v510_v44 = vpop.trf.xlu1 }
 0x18b   : > { %9422 = vmatmul.mubr.msk.f32.gmra.mrb[6].mxu1 %vm555_vm2, %v510_v44 }
 0x18c   : > { %747 = vmatprep.mubr.f32.mxu1 %v17621_v0 }
 0x18e   : > { %v511_v45 = vpop.trf.xlu1 }
 0x18f   : > { %9423 = vmatmul.mubr.msk.f32.gmra.mrb[8].mxu1 %vm555_vm2, %v511_v45 }
 0x190   : > { %753 = vmatprep.mubr.f32.mxu1 %v17621_v0 }
 0x192   : > { %v512_v46 = vpop.trf.xlu1 }
 0x193   : > { %9424 = vmatmul.mubr.msk.f32.gmra.mrb[10].mxu1 %vm555_vm2, %v512_v46 }
 0x194   : > { %759 = vmatprep.mubr.f32.mxu1 %v17621_v0 }
 0x196   : > { %v513_v47 = vpop.trf.xlu1 }
 0x197   : > { %9425 = vmatmul.mubr.msk.f32.gmra.mrb[12].mxu1 %vm555_vm2, %v513_v47 }
 0x198   : > { %765 = vmatprep.mubr.f32.mxu1 %v17621_v0 }
 0x19a   : > { %v514_v48 = vpop.trf.xlu1 }
 0x19b   : > { %9426 = vmatmul.mubr.msk.f32.gmra.mrb[14].mxu1 %vm555_vm2, %v514_v48 }
 0x19c   : > { %771 = vmatprep.mubr.f32.mxu1 %v17621_v0 }
 0x19e   : > { %v515_v49 = vpop.trf.xlu1 }
 0x19f   : > { %9427 = vmatmul.mubr.msk.f32.gmra.mrb[16].mxu1 %vm555_vm2, %v515_v49 }
 0x1a0   : > { %777 = vmatprep.mubr.f32.mxu1 %v17621_v0 }
 0x1a2   : > { %v516_v50 = vpop.trf.xlu1 }
 0x1a3   : > { %9428 = vmatmul.mubr.msk.f32.gmra.mrb[18].mxu1 %vm555_vm2, %v516_v50 }
 0x1a4   : > { %783 = vmatprep.mubr.f32.mxu1 %v17621_v0 }
 0x1a6   : > { %v517_v51 = vpop.trf.xlu1 }
 0x1a7   : > { %9429 = vmatmul.mubr.msk.f32.gmra.mrb[20].mxu1 %vm555_vm2, %v517_v51 }
 0x1a8   : > { %789 = vmatprep.mubr.f32.mxu1 %v17621_v0 }
 0x1aa   : > { %v518_v52 = vpop.trf.xlu1 }
 0x1ab   : > { %9430 = vmatmul.mubr.msk.f32.gmra.mrb[22].mxu1 %vm555_vm2, %v518_v52 }
 0x1ac   : > { %795 = vmatprep.mubr.f32.mxu1 %v17621_v0 }
 0x1ae   : > { %v519_v53 = vpop.trf.xlu1 }
 0x1af   : > { %9431 = vmatmul.mubr.msk.f32.gmra.mrb[24].mxu1 %vm555_vm2, %v519_v53 }
 0x1b0   : > { %801 = vmatprep.mubr.f32.mxu1 %v17621_v0 }
 0x1b2   : > { %v520_v54 = vpop.trf.xlu1 }
 0x1b3   : > { %9432 = vmatmul.mubr.msk.f32.gmra.mrb[26].mxu1 %vm555_vm2, %v520_v54 }
 0x1b4   : > { %807 = vmatprep.mubr.f32.mxu1 %v17621_v0 }
 0x1b6   : > { %v521_v55 = vpop.trf.xlu1 }
 0x1b7   : > { %9433 = vmatmul.mubr.msk.f32.gmra.mrb[28].mxu1 %vm555_vm2, %v521_v55 }
 0x1b8   : > { %813 = vmatprep.mubr.f32.mxu1 %v17621_v0 }
 0x1ba   : > { %v522_v56 = vpop.trf.xlu1 }
 0x1bb   : > { %9434 = vmatmul.mubr.msk.f32.gmra.mrb[30].mxu1 %vm555_vm2, %v522_v56 }
 0x1bc   : > { %819 = vmatprep.mubr.f32.mxu1 %v17621_v0 }
 0x1be   : > { %v539_v57 = vpop.trf.xlu1 }
 0x1bf   : > { %9435 = vmatmul.mubr.msk.f32.gmra.mrb[32].mxu1 %vm555_vm2, %v539_v57 }
 0x1c0   : > { %825 = vmatprep.mubr.f32.mxu1 %v17621_v0 }
 0x1c2   : > { %v540_v58 = vpop.trf.xlu1 }
 0x1c3   : > { %9436 = vmatmul.mubr.msk.f32.gmra.mrb[34].mxu1 %vm555_vm2, %v540_v58 }
 0x1c4   : > { %831 = vmatprep.mubr.f32.mxu1 %v17621_v0 }
 0x1c6   : > { %v541_v59 = vpop.trf.xlu1 }
 0x1c7   : > { %9437 = vmatmul.mubr.msk.f32.gmra.mrb[36].mxu1 %vm555_vm2, %v541_v59 }
 0x1c8   : > { %837 = vmatprep.mubr.f32.mxu1 %v17621_v0 }
 0x1ca   : > { %v542_v60 = vpop.trf.xlu1 }
 0x1cb   : > { %9438 = vmatmul.mubr.msk.f32.gmra.mrb[38].mxu1 %vm555_vm2, %v542_v60 }
 0x1cc   : > { %843 = vmatprep.mubr.f32.mxu1 %v17621_v0 }
 0x1ce   : > { %v543_v61 = vpop.trf.xlu1 }
 0x1cf   : > { %9439 = vmatmul.mubr.msk.f32.gmra.mrb[40].mxu1 %vm555_vm2, %v543_v61 }
 0x1d0   : > { %849 = vmatprep.mubr.f32.mxu1 %v17621_v0 }
 0x1d2   : > { %v544_v62 = vpop.trf.xlu1 }
 0x1d3   : > { %9440 = vmatmul.mubr.msk.f32.gmra.mrb[42].mxu1 %vm555_vm2, %v544_v62 }
 0x1d4   : > { %855 = vmatprep.mubr.f32.mxu1 %v17621_v0 }
 0x1d6   : > { %v545_v63 = vpop.trf.xlu1 }
 0x1d7   : > { %9441 = vmatmul.mubr.msk.f32.gmra.mrb[44].mxu1 %vm555_vm2, %v545_v63 }
 0x1d8   : > { %861 = vmatprep.mubr.f32.mxu1 %v17621_v0 }
 0x1da   : > { %v546_v1 = vpop.trf.xlu1 }
 0x1db   : > { %9442 = vmatmul.mubr.msk.f32.gmra.mrb[46].mxu1 %vm555_vm2, %v546_v1 }
 0x1dc   : > { %867 = vmatprep.mubr.f32.mxu1 %v17621_v0 }
 0x1de   : > { %v547_v2 = vpop.trf.xlu1 }
 0x1df   : > { %9443 = vmatmul.mubr.msk.f32.gmra.mrb[48].mxu1 %vm555_vm2, %v547_v2 }
 0x1e0   : > { %873 = vmatprep.mubr.f32.mxu1 %v17621_v0 }
 0x1e2   : > { %v548_v3 = vpop.trf.xlu1 }
 0x1e3   : > { %9444 = vmatmul.mubr.msk.f32.gmra.mrb[50].mxu1 %vm555_vm2, %v548_v3 }
 0x1e4   : > { %879 = vmatprep.mubr.f32.mxu1 %v17621_v0 }
 0x1e6   : > { %v549_v4 = vpop.trf.xlu1 }
 0x1e7   : > { %9445 = vmatmul.mubr.msk.f32.gmra.mrb[52].mxu1 %vm555_vm2, %v549_v4 }
 0x1e8   : > { %885 = vmatprep.mubr.f32.mxu1 %v17621_v0 }
 0x1ea   : > { %v550_v5 = vpop.trf.xlu1 }
 0x1eb   : > { %9446 = vmatmul.mubr.msk.f32.gmra.mrb[54].mxu1 %vm555_vm2, %v550_v5 }
 0x1ec   : > { %891 = vmatprep.mubr.f32.mxu1 %v17621_v0 }
 0x1ee   : > { %v551_v6 = vpop.trf.xlu1 }
 0x1ef   : > { %9447 = vmatmul.mubr.msk.f32.gmra.mrb[56].mxu1 %vm555_vm2, %v551_v6 }
 0x1f0   : > { %897 = vmatprep.mubr.f32.mxu1 %v17621_v0 }
 0x1f2   : > { %v552_v7 = vpop.trf.xlu1 }
 0x1f3   : > { %9448 = vmatmul.mubr.msk.f32.gmra.mrb[58].mxu1 %vm555_vm2, %v552_v7 }
 0x1f4   : > { %903 = vmatprep.mubr.f32.mxu1 %v17621_v0 }
 0x1f6   : > { %v553_v8 = vpop.trf.xlu1 }
 0x1f7   : > { %9449 = vmatmul.mubr.msk.f32.gmra.mrb[60].mxu1 %vm555_vm2, %v553_v8 }
 0x1f8   : > { %909 = vmatprep.mubr.f32.mxu1 %v17621_v0 }
 0x1fa   : > { %v554_v9 = vpop.trf.xlu1 }
 0x1fb   : > { %9450 = vmatmul.mubr.msk.f32.gmra.mrb[62].mxu1 %vm555_vm2, %v554_v9 }
 0x252   : > { %v12203_v10 = vpop.f32.mrb[0].mxu1 }
 0x253   : > { %v12205_v11 = vpop.f32.mrb[1].mxu1 }
 0x254   : > { %v916_v12 = vmax.f32 %v12203_v10, %v12205_v11 }
 0x256   : > { %917 = vmax.xlane.f32.xlu0 %v916_v12  ;;  %v12209_v13 = vpop.f32.mrb[2].mxu1 }
 0x257   : > { %v12211_v14 = vpop.f32.mrb[3].mxu1 }
 0x258   : > { %v919_v15 = vmax.f32 %v12209_v13, %v12211_v14 }
 0x25a   : > { %920 = vmax.xlane.f32.xlu0 %v919_v15  ;;  %v12215_v16 = vpop.f32.mrb[4].mxu1 }
 0x25b   : > { %v12217_v17 = vpop.f32.mrb[5].mxu1 }
 0x25c   : > { %v922_v18 = vmax.f32 %v12215_v16, %v12217_v17 }
 0x25e   : > { %923 = vmax.xlane.f32.xlu0 %v922_v18  ;;  %v12221_v19 = vpop.f32.mrb[6].mxu1 }
 0x25f   : > { %v12223_v20 = vpop.f32.mrb[7].mxu1 }
 0x260   : > { %v925_v21 = vmax.f32 %v12221_v19, %v12223_v20 }
 0x262   : > { %926 = vmax.xlane.f32.xlu0 %v925_v21  ;;  %v12227_v22 = vpop.f32.mrb[8].mxu1 }
 0x263   : > { %v12229_v23 = vpop.f32.mrb[9].mxu1 }
 0x264   : > { %v928_v24 = vmax.f32 %v12227_v22, %v12229_v23 }
 0x266   : > { %929 = vmax.xlane.f32.xlu0 %v928_v24  ;;  %v12233_v32 = vpop.f32.mrb[10].mxu1 }
 0x267   : > { %v12235_v33 = vpop.f32.mrb[11].mxu1 }
 0x268   : > { %v931_v34 = vmax.f32 %v12233_v32, %v12235_v33 }
 0x26a   : > { %932 = vmax.xlane.f32.xlu0 %v931_v34  ;;  %v12239_v35 = vpop.f32.mrb[12].mxu1 }
 0x26b   : > { %v12241_v36 = vpop.f32.mrb[13].mxu1 }
 0x26c   : > { %v934_v37 = vmax.f32 %v12239_v35, %v12241_v36 }
 0x26e   : > { %935 = vmax.xlane.f32.xlu0 %v934_v37  ;;  %v12245_v38 = vpop.f32.mrb[14].mxu1 }
 0x26f   : > { %v12247_v39 = vpop.f32.mrb[15].mxu1 }
 0x270   : > { %v937_v41 = vmax.f32 %v12245_v38, %v12247_v39 }
 0x272   : > { %938 = vmax.xlane.f32.xlu0 %v937_v41  ;;  %v12251_v42 = vpop.f32.mrb[16].mxu1 }
 0x273   : > { %v12253_v43 = vpop.f32.mrb[17].mxu1 }
 0x274   : > { %v940_v44 = vmax.f32 %v12251_v42, %v12253_v43 }
 0x276   : > { %941 = vmax.xlane.f32.xlu1 %v940_v44  ;;  %v12257_v45 = vpop.f32.mrb[18].mxu1 }
 0x277   : > { %v12259_v46 = vpop.f32.mrb[19].mxu1 }
 0x278   : > { %v943_v47 = vmax.f32 %v12257_v45, %v12259_v46 }
 0x27a   : > { %944 = vmax.xlane.f32.xlu0 %v943_v47  ;;  %v12263_v48 = vpop.f32.mrb[20].mxu1 }
 0x27b   : > { %v12265_v49 = vpop.f32.mrb[21].mxu1 }
 0x27c   : > { %v946_v50 = vmax.f32 %v12263_v48, %v12265_v49 }
 0x27e   : > { %947 = vmax.xlane.f32.xlu0 %v946_v50  ;;  %v12269_v51 = vpop.f32.mrb[22].mxu1 }
 0x27f   : > { %v12271_v52 = vpop.f32.mrb[23].mxu1 }
 0x280   : > { %v949_v53 = vmax.f32 %v12269_v51, %v12271_v52 }
 0x282   : > { %950 = vmax.xlane.f32.xlu0 %v949_v53  ;;  %v12275_v54 = vpop.f32.mrb[24].mxu1 }
 0x283   : > { %v12277_v55 = vpop.f32.mrb[25].mxu1 }
 0x284   : > { %v952_v56 = vmax.f32 %v12275_v54, %v12277_v55 }
 0x286   : > { %953 = vmax.xlane.f32.xlu0 %v952_v56  ;;  %v12281_v57 = vpop.f32.mrb[26].mxu1 }
 0x287   : > { %v12283_v58 = vpop.f32.mrb[27].mxu1 }
 0x288   : > { %v955_v59 = vmax.f32 %v12281_v57, %v12283_v58 }
 0x28a   : > { %956 = vmax.xlane.f32.xlu0 %v955_v59  ;;  %v12287_v60 = vpop.f32.mrb[28].mxu1 }
 0x28b   : > { %v12289_v61 = vpop.f32.mrb[29].mxu1 }
 0x28c   : > { %v958_v62 = vmax.f32 %v12287_v60, %v12289_v61 }
 0x28e   : > { %959 = vmax.xlane.f32.xlu0 %v958_v62  ;;  %v12293_v63 = vpop.f32.mrb[30].mxu1 }
 0x28f   : > { %v12295_v1 = vpop.f32.mrb[31].mxu1 }
 0x290   : > { %v961_v2 = vmax.f32 %v12293_v63, %v12295_v1 }
 0x292   : > { %962 = vmax.xlane.f32.xlu0 %v961_v2  ;;  %v12299_v3 = vpop.f32.mrb[32].mxu1 }
 0x293   : > { %v12301_v4 = vpop.f32.mrb[33].mxu1 }
 0x294   : > { %v964_v5 = vmax.f32 %v12299_v3, %v12301_v4 }
 0x296   : > { %965 = vmax.xlane.f32.xlu0 %v964_v5  ;;  %v12305_v6 = vpop.f32.mrb[34].mxu1 }
 0x297   : > { %v12307_v7 = vpop.f32.mrb[35].mxu1 }
 0x298   : > { %v967_v8 = vmax.f32 %v12305_v6, %v12307_v7 }
 0x29a   : > { %968 = vmax.xlane.f32.xlu0 %v967_v8  ;;  %v12311_v9 = vpop.f32.mrb[36].mxu1 }
 0x29b   : > { %v12313_v12 = vpop.f32.mrb[37].mxu1 }
 0x29c   : > { %v970_v15 = vmax.f32 %v12311_v9, %v12313_v12 }
 0x29e   : > { %971 = vmax.xlane.f32.xlu0 %v970_v15  ;;  %v12317_v18 = vpop.f32.mrb[38].mxu1 }
 0x29f   : > { %v12319_v21 = vpop.f32.mrb[39].mxu1 }
 0x2a0   : > { %v973_v24 = vmax.f32 %v12317_v18, %v12319_v21 }
 0x2a2   : > { %974 = vmax.xlane.f32.xlu0 %v973_v24  ;;  %v12323_v34 = vpop.f32.mrb[40].mxu1 }
 0x2a3   : > { %v12325_v37 = vpop.f32.mrb[41].mxu1 }
 0x2a4   : > { %v976_v41 = vmax.f32 %v12323_v34, %v12325_v37 }
 0x2a6   : > { %977 = vmax.xlane.f32.xlu0 %v976_v41  ;;  %v12329_v44 = vpop.f32.mrb[42].mxu1 }
 0x2a7   : > { %v12331_v47 = vpop.f32.mrb[43].mxu1 }
 0x2a8   : > { %v979_v50 = vmax.f32 %v12329_v44, %v12331_v47 }
 0x2aa   : > { %980 = vmax.xlane.f32.xlu0 %v979_v50  ;;  %v12335_v53 = vpop.f32.mrb[44].mxu1 }
 0x2ab   : > { %v12337_v56 = vpop.f32.mrb[45].mxu1 }
 0x2ac   : > { %v982_v59 = vmax.f32 %v12335_v53, %v12337_v56 }
 0x2ae   : > { %983 = vmax.xlane.f32.xlu0 %v982_v59  ;;  %v12341_v62 = vpop.f32.mrb[46].mxu1 }
 0x2af   : > { %v12343_v2 = vpop.f32.mrb[47].mxu1 }
 0x2b0   : > { %v985_v5 = vmax.f32 %v12341_v62, %v12343_v2 }
 0x2b2   : > { %986 = vmax.xlane.f32.xlu0 %v985_v5  ;;  %v12347_v8 = vpop.f32.mrb[48].mxu1 }
 0x2b3   : > { %v12349_v15 = vpop.f32.mrb[49].mxu1 }
 0x2b4   : > { %18137 = vst [vmem:[#allocation13_spill] sm:$0xff] %v12349_v15  ;;  %v988_v24 = vmax.f32 %v12347_v8, %v12349_v15 }
 0x2b6   : > { %989 = vmax.xlane.f32.xlu0 %v988_v24  ;;  %v12353_v41 = vpop.f32.mrb[50].mxu1 }
 0x2b7   : > { %18138 = vst [vmem:[#allocation14_spill] sm:$0xff] %v12353_v41  ;;  %v12355_v50 = vpop.f32.mrb[51].mxu1 }
 0x2b8   : > { %18139 = vst [vmem:[#allocation15_spill] sm:$0xff] %v12355_v50  ;;  %v991_v59 = vmax.f32 %v12353_v41, %v12355_v50 }
 0x2ba   : > { %992 = vmax.xlane.f32.xlu0 %v991_v59  ;;  %v12359_v0 = vpop.f32.mrb[52].mxu1 }
 0x2bb   : > { %18140 = vst [vmem:[#allocation16_spill] sm:$0xff] %v12359_v0  ;;  %v12361_v31 = vpop.f32.mrb[53].mxu1 }
 0x2bc   : > { %18141 = vst [vmem:[#allocation17_spill] sm:$0xff] %v12361_v31  ;;  %v994_v5 = vmax.f32 %v12359_v0, %v12361_v31 }
 0x2be   : > { %995 = vmax.xlane.f32.xlu0 %v994_v5  ;;  %v12365_v30 = vpop.f32.mrb[54].mxu1 }
 0x2bf   : > { %18142 = vst [vmem:[#allocation18_spill] sm:$0xff] %v12365_v30  ;;  %v12367_v29 = vpop.f32.mrb[55].mxu1 }
 0x2c0   : > { %18143 = vst [vmem:[#allocation19_spill] sm:$0xff] %v12367_v29  ;;  %v997_v24 = vmax.f32 %v12365_v30, %v12367_v29 }
 0x2c2   : > { %998 = vmax.xlane.f32.xlu0 %v997_v24  ;;  %v12371_v28 = vpop.f32.mrb[56].mxu1  ;;  %v236_v24 = vld [vmem:[%s17616_s1 + $0x28] sm:$0xff] }
 0x2c3   : > { %18144 = vst [vmem:[#allocation20_spill] sm:$0xff] %v12371_v28  ;;  %v12373_v27 = vpop.f32.mrb[57].mxu1  ;;  %9410 = vmatmul.mubr.msk.f32.gmra.mrb[10].mxu0 %vm315_vm0, %v236_v24  ;;  %v237_v24 = vld [vmem:[%s17616_s1 + $0x30] sm:$0xff] }
 0x2c4   : > { %18145 = vst [vmem:[#allocation21_spill] sm:$0xff] %v12373_v27  ;;  %v1000_v59 = vmax.f32 %v12371_v28, %v12373_v27 }
 0x2c6   : > { %1001 = vmax.xlane.f32.xlu1 %v1000_v59  ;;  %v12377_v40 = vpop.f32.mrb[58].mxu1  ;;  %v18148_v59 = vmov 0.0  }
 0x2c7   : > { %v12379_v26 = vpop.f32.mrb[59].mxu1  ;;  %452 = vmatprep.mubr.f32.mxu0 %v18148_v59 }
 0x2c8   : > { %9411 = vmatmul.mubr.msk.f32.gmra.mrb[12].mxu0 %vm315_vm0, %v237_v24 }
 0x2c9   : > { %458 = vmatprep.mubr.f32.mxu0 %v18148_v59 }
 0x2ca   : > { %v12383_v25 = vpop.f32.mrb[60].mxu1 }
 0x2cb   : > { %18146 = vst [vmem:[#allocation22_spill] sm:$0xff] %v12383_v25  ;;  %v12385_v31 = vpop.f32.mrb[61].mxu1 }
 0x2cc   : > { %18147 = vst [vmem:[#allocation23_spill] sm:$0xff] %v12385_v31  ;;  %v1006_v0 = vmax.f32 %v12383_v25, %v12385_v31 }
 0x2ce   : > { %1007 = vmax.xlane.f32.xlu1 %v1006_v0  ;;  %v12394_v27 = vpop.f32.mrb[62].mxu1 }
 0x2cf   : > { %v12396_v28 = vpop.f32.mrb[63].mxu1 }
 0x2d0   : > { %v1009_v5 = vmax.f32 %v12394_v27, %v12396_v28 }
 0x2e3   : > { %v918_v29 = vpop.xlane.xlu0 %917 }
 0x2e4   : > { %v1012_v30 = vsub.f32 %v12203_v10, %v918_v29  ;;  %v1013_v50 = vsub.f32 %v12205_v11, %v918_v29  ;;  %v238_v29 = vld [vmem:[%s17616_s1 + $0x38] sm:$0xff] }
 0x2e5   : > { %9412 = vmatmul.mubr.msk.f32.gmra.mrb[14].mxu0 %vm315_vm0, %v238_v29 }
 0x2e6   : > { %v1076_v41 = vmul.f32 1.442695, %v1012_v30  ;;  %v1078_v15 = vmul.f32 1.442695, %v1013_v50  ;;  %464 = vmatprep.mubr.f32.mxu0 %v18148_v59 }
 0x2e7   : > { %v921_v31 = vpop.xlane.xlu0 %920 }
 0x2e8   : > { %10395 = vpow2.f32 %v1076_v41  ;;  %v1014_v0 = vsub.f32 %v12209_v13, %v921_v31  ;;  %v1015_v25 = vsub.f32 %v12211_v14, %v921_v31  ;;  %v239_v31 = vld [vmem:[%s17616_s1 + $0x40] sm:$0xff] }
 0x2e9   : > { %10397 = vpow2.f32 %v1078_v15  ;;  %9413 = vmatmul.mubr.msk.f32.gmra.mrb[16].mxu0 %vm315_vm0, %v239_v31 }
 0x2ea   : > { %v1080_v30 = vmul.f32 1.442695, %v1014_v0  ;;  %v1082_v10 = vmul.f32 1.442695, %v1015_v25  ;;  %470 = vmatprep.mubr.f32.mxu0 %v18148_v59 }
 0x2eb   : > { %v924_v11 = vpop.xlane.xlu0 %923 }
 0x2ec   : > { %10399 = vpow2.f32 %v1080_v30  ;;  %v1016_v50 = vsub.f32 %v12215_v16, %v924_v11  ;;  %v1017_v41 = vsub.f32 %v12217_v17, %v924_v11 }
 0x2ed   : > { %10401 = vpow2.f32 %v1082_v10 }
 0x2ee   : > { %v1084_v13 = vmul.f32 1.442695, %v1016_v50  ;;  %v1086_v14 = vmul.f32 1.442695, %v1017_v41 }
 0x2ef   : > { %v927_v15 = vpop.xlane.xlu0 %926 }
 0x2f0   : > { %10403 = vpow2.f32 %v1084_v13  ;;  %v1018_v25 = vsub.f32 %v12221_v19, %v927_v15  ;;  %v1019_v24 = vsub.f32 %v12223_v20, %v927_v15 }
 0x2f1   : > { %10405 = vpow2.f32 %v1086_v14 }
 0x2f2   : > { %v12423_v16 = vpop.eup %10395  ;;  %v1088_v17 = vmul.f32 1.442695, %v1018_v25  ;;  %v1090_v0 = vmul.f32 1.442695, %v1019_v24 }
 0x2f3   : > { %v12425_v29 = vpop.eup %10397  ;;  %v930_v30 = vpop.xlane.xlu0 %929 }
 0x2f4   : > { %10407 = vpow2.f32 %v1088_v17  ;;  %v1020_v10 = vsub.f32 %v12227_v22, %v930_v30  ;;  %v1021_v11 = vsub.f32 %v12229_v23, %v930_v30  ;;  %v1204_v19 = vadd.f32 %v12425_v29, %v12423_v16 }
 0x2f5   : > { %10409 = vpow2.f32 %v1090_v0 }
 0x2f6   : > { %v12431_v20 = vpop.eup %10399  ;;  %v1092_v50 = vmul.f32 1.442695, %v1020_v10  ;;  %v1094_v41 = vmul.f32 1.442695, %v1021_v11  ;;  %1205 = vadd.xlane.f32.xlu0 %v1204_v19 }
 0x2f7   : > { %v12433_v31 = vpop.eup %10401  ;;  %v933_v13 = vpop.xlane.xlu0 %932 }
 0x2f8   : > { %10411 = vpow2.f32 %v1092_v50  ;;  %v1022_v14 = vsub.f32 %v12233_v32, %v933_v13  ;;  %v1023_v15 = vsub.f32 %v12235_v33, %v933_v13  ;;  %v1207_v22 = vadd.f32 %v12433_v31, %v12431_v20 }
 0x2f9   : > { %10413 = vpow2.f32 %v1094_v41 }
 0x2fa   : > { %v12439_v23 = vpop.eup %10403  ;;  %v1096_v25 = vmul.f32 1.442695, %v1022_v14  ;;  %v1098_v24 = vmul.f32 1.442695, %v1023_v15  ;;  %1208 = vadd.xlane.f32.xlu0 %v1207_v22 }
 0x2fb   : > { %v12441_v17 = vpop.eup %10405  ;;  %v936_v0 = vpop.xlane.xlu0 %935 }
 0x2fc   : > { %10415 = vpow2.f32 %v1096_v25  ;;  %v1024_v30 = vsub.f32 %v12239_v35, %v936_v0  ;;  %v1025_v10 = vsub.f32 %v12241_v36, %v936_v0  ;;  %v1210_v32 = vadd.f32 %v12441_v17, %v12439_v23 }
 0x2fd   : > { %10417 = vpow2.f32 %v1098_v24 }
 0x2fe   : > { %v12447_v33 = vpop.eup %10407  ;;  %v1100_v11 = vmul.f32 1.442695, %v1024_v30  ;;  %v1102_v19 = vmul.f32 1.442695, %v1025_v10  ;;  %1211 = vadd.xlane.f32.xlu0 %v1210_v32 }
 0x2ff   : > { %v12449_v50 = vpop.eup %10409  ;;  %v939_v41 = vpop.xlane.xlu0 %938 }
 0x300   : > { %10419 = vpow2.f32 %v1100_v11  ;;  %v1026_v13 = vsub.f32 %v12245_v38, %v939_v41  ;;  %v1027_v14 = vsub.f32 %v12247_v39, %v939_v41  ;;  %v1213_v35 = vadd.f32 %v12449_v50, %v12447_v33 }
 0x301   : > { %10421 = vpow2.f32 %v1102_v19 }
 0x302   : > { %v12455_v36 = vpop.eup %10411  ;;  %v1104_v15 = vmul.f32 1.442695, %v1026_v13  ;;  %v1106_v22 = vmul.f32 1.442695, %v1027_v14  ;;  %1214 = vadd.xlane.f32.xlu0 %v1213_v35 }
 0x303   : > { %v12457_v25 = vpop.eup %10413  ;;  %v942_v24 = vpop.xlane.xlu1 %941 }
 0x304   : > { %10423 = vpow2.f32 %v1104_v15  ;;  %v1028_v0 = vsub.f32 %v12251_v42, %v942_v24  ;;  %v1029_v30 = vsub.f32 %v12253_v43, %v942_v24  ;;  %v1216_v38 = vadd.f32 %v12457_v25, %v12455_v36 }
 0x305   : > { %10425 = vpow2.f32 %v1106_v22 }
 0x306   : > { %v12463_v39 = vpop.eup %10415  ;;  %v1108_v10 = vmul.f32 1.442695, %v1028_v0  ;;  %v1110_v32 = vmul.f32 1.442695, %v1029_v30  ;;  %1217 = vadd.xlane.f32.xlu0 %v1216_v38 }
 0x307   : > { %v12465_v11 = vpop.eup %10417  ;;  %v945_v19 = vpop.xlane.xlu0 %944 }
 0x308   : > { %10427 = vpow2.f32 %v1108_v10  ;;  %v1030_v41 = vsub.f32 %v12257_v45, %v945_v19  ;;  %v1031_v13 = vsub.f32 %v12259_v46, %v945_v19  ;;  %v1219_v42 = vadd.f32 %v12465_v11, %v12463_v39 }
 0x309   : > { %10429 = vpow2.f32 %v1110_v32  ;;  %v18149_v10 = vmax.f32 %v12377_v40, %v12379_v26 }
 0x30a   : > { %v12471_v43 = vpop.eup %10419  ;;  %v1112_v14 = vmul.f32 1.442695, %v1030_v41  ;;  %v1114_v35 = vmul.f32 1.442695, %v1031_v13  ;;  %1220 = vadd.xlane.f32.xlu0 %v1219_v42 }
 0x30b   : > { %v12473_v15 = vpop.eup %10421  ;;  %v948_v22 = vpop.xlane.xlu0 %947 }
 0x30c   : > { %10431 = vpow2.f32 %v1112_v14  ;;  %v1032_v24 = vsub.f32 %v12263_v48, %v948_v22  ;;  %v1033_v0 = vsub.f32 %v12265_v49, %v948_v22  ;;  %v1222_v45 = vadd.f32 %v12473_v15, %v12471_v43 }
 0x30d   : > { %10433 = vpow2.f32 %v1114_v35 }
 0x30e   : > { %v12479_v46 = vpop.eup %10423  ;;  %v1116_v30 = vmul.f32 1.442695, %v1032_v24  ;;  %v1118_v38 = vmul.f32 1.442695, %v1033_v0  ;;  %1004 = vmax.xlane.f32.xlu0 %v18149_v10  ;;  %1223 = vadd.xlane.f32.xlu1 %v1222_v45 }
 0x30f   : > { %v12484_v32 = vpop.eup %10425  ;;  %v951_v19 = vpop.xlane.xlu0 %950 }
 0x310   : > { %10435 = vpow2.f32 %v1116_v30  ;;  %v1034_v48 = vsub.f32 %v12269_v51, %v951_v19  ;;  %v1035_v49 = vsub.f32 %v12271_v52, %v951_v19  ;;  %v1225_v41 = vadd.f32 %v12484_v32, %v12479_v46 }
 0x311   : > { %10437 = vpow2.f32 %v1118_v38 }
 0x312   : > { %v12490_v13 = vpop.eup %10427  ;;  %v1120_v42 = vmul.f32 1.442695, %v1034_v48  ;;  %v1122_v14 = vmul.f32 1.442695, %v1035_v49  ;;  %1226 = vadd.xlane.f32.xlu0 %v1225_v41 }
 0x313   : > { %v12492_v35 = vpop.eup %10429  ;;  %v954_v22 = vpop.xlane.xlu0 %953 }
 0x314   : > { %10439 = vpow2.f32 %v1120_v42  ;;  %v1036_v24 = vsub.f32 %v12275_v54, %v954_v22  ;;  %v1037_v0 = vsub.f32 %v12277_v55, %v954_v22  ;;  %v1228_v51 = vadd.f32 %v12492_v35, %v12490_v13 }
 0x315   : > { %10441 = vpow2.f32 %v1122_v14 }
 0x316   : > { %v12498_v52 = vpop.eup %10431  ;;  %v1124_v45 = vmul.f32 1.442695, %v1036_v24  ;;  %v1126_v30 = vmul.f32 1.442695, %v1037_v0  ;;  %1010 = vmax.xlane.f32.xlu0 %v1009_v5  ;;  %1229 = vadd.xlane.f32.xlu1 %v1228_v51 }
 0x317   : > { %v12503_v38 = vpop.eup %10433  ;;  %v957_v10 = vpop.xlane.xlu0 %956 }
 0x318   : > { %10443 = vpow2.f32 %v1124_v45  ;;  %v1038_v54 = vsub.f32 %v12281_v57, %v957_v10  ;;  %v1039_v55 = vsub.f32 %v12283_v58, %v957_v10  ;;  %v1231_v19 = vadd.f32 %v12503_v38, %v12498_v52 }
 0x319   : > { %10445 = vpow2.f32 %v1126_v30 }
 0x31a   : > { %v12509_v48 = vpop.eup %10435  ;;  %v1128_v49 = vmul.f32 1.442695, %v1038_v54  ;;  %v1130_v41 = vmul.f32 1.442695, %v1039_v55  ;;  %1232 = vadd.xlane.f32.xlu0 %v1231_v19 }
 0x31b   : > { %v12511_v42 = vpop.eup %10437  ;;  %v960_v5 = vpop.xlane.xlu0 %959 }
 0x31c   : > { %10447 = vpow2.f32 %v1128_v49  ;;  %v1040_v14 = vsub.f32 %v12287_v60, %v960_v5  ;;  %v1041_v22 = vsub.f32 %v12289_v61, %v960_v5  ;;  %v1234_v57 = vadd.f32 %v12511_v42, %v12509_v48 }
 0x31d   : > { %10449 = vpow2.f32 %v1130_v41 }
 0x31e   : > { %v12517_v58 = vpop.eup %10439  ;;  %v1132_v24 = vmul.f32 1.442695, %v1040_v14  ;;  %v1134_v0 = vmul.f32 1.442695, %v1041_v22  ;;  %1235 = vadd.xlane.f32.xlu1 %v1234_v57 }
 0x31f   : > { %v12519_v51 = vpop.eup %10441  ;;  %v963_v45 = vpop.xlane.xlu0 %962 }
 0x320   : > { %10451 = vpow2.f32 %v1132_v24  ;;  %v1042_v30 = vsub.f32 %v12293_v63, %v963_v45  ;;  %v1043_v10 = vsub.f32 %v12295_v1, %v963_v45  ;;  %v1237_v60 = vadd.f32 %v12519_v51, %v12517_v58 }
 0x321   : > { %10453 = vpow2.f32 %v1134_v0 }
 0x322   : > { %v12525_v61 = vpop.eup %10443  ;;  %v1136_v54 = vmul.f32 1.442695, %v1042_v30  ;;  %v1138_v55 = vmul.f32 1.442695, %v1043_v10  ;;  %1238 = vadd.xlane.f32.xlu0 %v1237_v60 }
 0x323   : > { %v12527_v19 = vpop.eup %10445  ;;  %v966_v49 = vpop.xlane.xlu0 %965 }
 0x324   : > { %10455 = vpow2.f32 %v1136_v54  ;;  %v1044_v41 = vsub.f32 %v12299_v3, %v966_v49  ;;  %v1045_v5 = vsub.f32 %v12301_v4, %v966_v49  ;;  %v1240_v63 = vadd.f32 %v12527_v19, %v12525_v61 }
 0x325   : > { %10457 = vpow2.f32 %v1138_v55 }
 0x326   : > { %v12533_v1 = vpop.eup %10447  ;;  %v1140_v14 = vmul.f32 1.442695, %v1044_v41  ;;  %v1142_v22 = vmul.f32 1.442695, %v1045_v5  ;;  %1241 = vadd.xlane.f32.xlu1 %v1240_v63 }
 0x327   : > { %v12535_v57 = vpop.eup %10449  ;;  %v969_v24 = vpop.xlane.xlu0 %968 }
 0x328   : > { %10459 = vpow2.f32 %v1140_v14  ;;  %v1046_v0 = vsub.f32 %v12305_v6, %v969_v24  ;;  %v1047_v45 = vsub.f32 %v12307_v7, %v969_v24  ;;  %v1243_v3 = vadd.f32 %v12535_v57, %v12533_v1 }
 0x329   : > { %10461 = vpow2.f32 %v1142_v22 }
 0x32a   : > { %v12541_v4 = vpop.eup %10451  ;;  %v1144_v30 = vmul.f32 1.442695, %v1046_v0  ;;  %v1146_v10 = vmul.f32 1.442695, %v1047_v45  ;;  %1244 = vadd.xlane.f32.xlu0 %v1243_v3 }
 0x32b   : > { %v12543_v60 = vpop.eup %10453  ;;  %v972_v54 = vpop.xlane.xlu0 %971 }
 0x32c   : > { %10463 = vpow2.f32 %v1144_v30  ;;  %v1048_v55 = vsub.f32 %v12311_v9, %v972_v54  ;;  %v1049_v49 = vsub.f32 %v12313_v12, %v972_v54  ;;  %v1246_v6 = vadd.f32 %v12543_v60, %v12541_v4 }
 0x32d   : > { %10465 = vpow2.f32 %v1146_v10 }
 0x32e   : > { %v12549_v7 = vpop.eup %10455  ;;  %v1148_v41 = vmul.f32 1.442695, %v1048_v55  ;;  %v1150_v5 = vmul.f32 1.442695, %v1049_v49  ;;  %1247 = vadd.xlane.f32.xlu1 %v1246_v6 }
 0x32f   : > { %v12551_v63 = vpop.eup %10457  ;;  %v975_v14 = vpop.xlane.xlu0 %974 }
 0x330   : > { %10467 = vpow2.f32 %v1148_v41  ;;  %v1050_v22 = vsub.f32 %v12317_v18, %v975_v14  ;;  %v1051_v24 = vsub.f32 %v12319_v21, %v975_v14  ;;  %v1249_v9 = vadd.f32 %v12551_v63, %v12549_v7 }
 0x331   : > { %10469 = vpow2.f32 %v1150_v5 }
 0x332   : > { %v12557_v12 = vpop.eup %10459  ;;  %v1152_v0 = vmul.f32 1.442695, %v1050_v22  ;;  %v1154_v45 = vmul.f32 1.442695, %v1051_v24  ;;  %1250 = vadd.xlane.f32.xlu0 %v1249_v9 }
 0x333   : > { %v12559_v3 = vpop.eup %10461  ;;  %v978_v30 = vpop.xlane.xlu0 %977 }
 0x334   : > { %10471 = vpow2.f32 %v1152_v0  ;;  %v1052_v10 = vsub.f32 %v12323_v34, %v978_v30  ;;  %v1053_v54 = vsub.f32 %v12325_v37, %v978_v30  ;;  %v1252_v18 = vadd.f32 %v12559_v3, %v12557_v12 }
 0x335   : > { %10473 = vpow2.f32 %v1154_v45 }
 0x336   : > { %v12565_v21 = vpop.eup %10463  ;;  %v1156_v55 = vmul.f32 1.442695, %v1052_v10  ;;  %v1158_v49 = vmul.f32 1.442695, %v1053_v54  ;;  %1253 = vadd.xlane.f32.xlu1 %v1252_v18 }
 0x337   : > { %v12567_v6 = vpop.eup %10465  ;;  %v981_v41 = vpop.xlane.xlu0 %980 }
 0x338   : > { %10475 = vpow2.f32 %v1156_v55  ;;  %v1054_v5 = vsub.f32 %v12329_v44, %v981_v41  ;;  %v1055_v14 = vsub.f32 %v12331_v47, %v981_v41  ;;  %v1255_v34 = vadd.f32 %v12567_v6, %v12565_v21 }
 0x339   : > { %10477 = vpow2.f32 %v1158_v49 }
 0x33a   : > { %v12573_v37 = vpop.eup %10467  ;;  %v1160_v22 = vmul.f32 1.442695, %v1054_v5  ;;  %v1162_v24 = vmul.f32 1.442695, %v1055_v14  ;;  %1256 = vadd.xlane.f32.xlu0 %v1255_v34 }
 0x33b   : > { %v12575_v9 = vpop.eup %10469  ;;  %v984_v0 = vpop.xlane.xlu0 %983 }
 0x33c   : > { %10479 = vpow2.f32 %v1160_v22  ;;  %v1056_v45 = vsub.f32 %v12335_v53, %v984_v0  ;;  %v1057_v30 = vsub.f32 %v12337_v56, %v984_v0  ;;  %v1258_v44 = vadd.f32 %v12575_v9, %v12573_v37  ;;  %v18151_v0 = vld [vmem:[#allocation13_spill] sm:$0xff] }
 0x33d   : > { %10481 = vpow2.f32 %v1162_v24 }
 0x33e   : > { %v12581_v47 = vpop.eup %10471  ;;  %v1164_v10 = vmul.f32 1.442695, %v1056_v45  ;;  %v1166_v54 = vmul.f32 1.442695, %v1057_v30  ;;  %1259 = vadd.xlane.f32.xlu1 %v1258_v44 }
 0x33f   : > { %v12583_v18 = vpop.eup %10473  ;;  %v987_v55 = vpop.xlane.xlu0 %986 }
 0x340   : > { %10483 = vpow2.f32 %v1164_v10  ;;  %v1058_v49 = vsub.f32 %v12341_v62, %v987_v55  ;;  %v1059_v41 = vsub.f32 %v12343_v2, %v987_v55  ;;  %v1261_v53 = vadd.f32 %v12583_v18, %v12581_v47  ;;  %v18154_v55 = vld [vmem:[#allocation14_spill] sm:$0xff] }
 0x341   : > { %10485 = vpow2.f32 %v1166_v54 }
 0x342   : > { %v12589_v56 = vpop.eup %10475  ;;  %v1168_v5 = vmul.f32 1.442695, %v1058_v49  ;;  %v1170_v14 = vmul.f32 1.442695, %v1059_v41  ;;  %1262 = vadd.xlane.f32.xlu0 %v1261_v53  ;;  %v18155_v41 = vld [vmem:[#allocation15_spill] sm:$0xff] }
 0x343   : > { %18150 = vst [vmem:[#allocation24_spill] sm:$0xff] %v12589_v56  ;;  %v12591_v34 = vpop.eup %10477  ;;  %v990_v22 = vpop.xlane.xlu0 %989 }
 0x344   : > { %10487 = vpow2.f32 %v1168_v5  ;;  %v1060_v24 = vsub.f32 %v12347_v8, %v990_v22  ;;  %v1061_v45 = vsub.f32 %v18151_v0, %v990_v22  ;;  %v1264_v62 = vadd.f32 %v12591_v34, %v12589_v56 }
 0x345   : > { %10489 = vpow2.f32 %v1170_v14 }
 0x346   : > { %v12597_v2 = vpop.eup %10479  ;;  %v1172_v30 = vmul.f32 1.442695, %v1060_v24  ;;  %v1174_v44 = vmul.f32 1.442695, %v1061_v45  ;;  %1265 = vadd.xlane.f32.xlu1 %v1264_v62 }
 0x347   : > { %18152 = vst [vmem:[#allocation13_spill] sm:$0xff] %v12597_v2  ;;  %v12599_v10 = vpop.eup %10481  ;;  %v993_v54 = vpop.xlane.xlu0 %992 }
 0x348   : > { %18153 = vst [vmem:[#allocation25_spill] sm:$0xff] %v12599_v10  ;;  %10491 = vpow2.f32 %v1172_v30  ;;  %v1062_v49 = vsub.f32 %v18154_v55, %v993_v54  ;;  %v1063_v53 = vsub.f32 %v18155_v41, %v993_v54  ;;  %v1267_v8 = vadd.f32 %v12599_v10, %v12597_v2  ;;  %v18161_v41 = vld [vmem:[#allocation19_spill] sm:$0xff] }
 0x349   : > { %10493 = vpow2.f32 %v1174_v44  ;;  %v18160_v44 = vld [vmem:[#allocation18_spill] sm:$0xff] }
 0x34a   : > { %v12605_v5 = vpop.eup %10483  ;;  %v1176_v14 = vmul.f32 1.442695, %v1062_v49  ;;  %v1178_v22 = vmul.f32 1.442695, %v1063_v53  ;;  %1268 = vadd.xlane.f32.xlu0 %v1267_v8 }
 0x34b   : > { %18156 = vst [vmem:[#allocation14_spill] sm:$0xff] %v12605_v5  ;;  %v12607_v24 = vpop.eup %10485  ;;  %v996_v0 = vpop.xlane.xlu0 %995 }
 0x34c   : > { %18157 = vst [vmem:[#allocation15_spill] sm:$0xff] %v12607_v24  ;;  %10495 = vpow2.f32 %v1176_v14  ;;  %v1270_v45 = vadd.f32 %v12607_v24, %v12605_v5 }
 0x34d   : > { %10497 = vpow2.f32 %v1178_v22 }
 0x34e   : > { %v12611_v62 = vpop.eup %10487  ;;  %1271 = vadd.xlane.f32.xlu1 %v1270_v45 }
 0x34f   : > { %18158 = vst [vmem:[#allocation26_spill] sm:$0xff] %v12611_v62  ;;  %v12613_v30 = vpop.eup %10489  ;;  %v999_v54 = vpop.xlane.xlu0 %998 }
 0x350   : > { %18159 = vst [vmem:[#allocation27_spill] sm:$0xff] %v12613_v30  ;;  %v1066_v55 = vsub.f32 %v18160_v44, %v999_v54  ;;  %v1067_v49 = vsub.f32 %v18161_v41, %v999_v54  ;;  %v1273_v53 = vadd.f32 %v12613_v30, %v12611_v62  ;;  %v18171_v30 = vld [vmem:[#allocation21_spill] sm:$0xff] }
 0x352   : > { %v12619_v8 = vpop.eup %10491  ;;  %v1184_v14 = vmul.f32 1.442695, %v1066_v55  ;;  %v1186_v56 = vmul.f32 1.442695, %v1067_v49  ;;  %1274 = vadd.xlane.f32.xlu0 %v1273_v53  ;;  %v18168_v53 = vld [vmem:[#allocation16_spill] sm:$0xff] }
 0x353   : > { %18162 = vst [vmem:[#allocation18_spill] sm:$0xff] %v12619_v8  ;;  %v12621_v5 = vpop.eup %10493 }
 0x354   : > { %18163 = vst [vmem:[#allocation19_spill] sm:$0xff] %v12621_v5  ;;  %10499 = vpow2.f32 %v1184_v14  ;;  %v1276_v22 = vadd.f32 %v12621_v5, %v12619_v8  ;;  %v1064_v14 = vsub.f32 %v18168_v53, %v996_v0  ;;  %v1002_v5 = vpop.xlane.xlu1 %1001 }
 0x355   : > { %10501 = vpow2.f32 %v1186_v56  ;;  %v244_v56 = vld [vmem:[%s17617_s2 + $0x8] sm:$0xff]  ;;  %v1069_v24 = vsub.f32 %v18171_v30, %v1002_v5 }
 0x356   : > { %v12625_v45 = vpop.eup %10495  ;;  %1277 = vadd.xlane.f32.xlu1 %v1276_v22  ;;  %v18169_v22 = vld [vmem:[#allocation17_spill] sm:$0xff] }
 0x357   : > { %18164 = vst [vmem:[#allocation28_spill] sm:$0xff] %v12625_v45  ;;  %v12627_v44 = vpop.eup %10497  ;;  %v1065_v8 = vsub.f32 %v18169_v22, %v996_v0 }
 0x358   : > { %18165 = vst [vmem:[#allocation29_spill] sm:$0xff] %v12627_v44  ;;  %v1279_v54 = vadd.f32 %v12627_v44, %v12625_v45  ;;  %v1180_v45 = vmul.f32 1.442695, %v1064_v14 }
 0x359   : > { %v1182_v62 = vmul.f32 1.442695, %v1065_v8 }
 0x35a   : > { %1280 = vadd.xlane.f32.xlu0 %v1279_v54  ;;  %v18170_v54 = vld [vmem:[#allocation20_spill] sm:$0xff]  ;;  %10503 = vpow2.f32 %v1180_v45 }
 0x35b   : > { %v1068_v44 = vsub.f32 %v18170_v54, %v1002_v5  ;;  %10505 = vpow2.f32 %v1182_v62 }
 0x35d   : > { %v1188_v2 = vmul.f32 1.442695, %v1068_v44  ;;  %v1008_v44 = vpop.xlane.xlu1 %1007 }
 0x35e   : > { %v12631_v41 = vpop.eup %10499 }
 0x35f   : > { %18166 = vst [vmem:[#allocation30_spill] sm:$0xff] %v12631_v41  ;;  %v12633_v55 = vpop.eup %10501  ;;  %10507 = vpow2.f32 %v1188_v2 }
 0x360   : > { %18167 = vst [vmem:[#allocation31_spill] sm:$0xff] %v12633_v55  ;;  %v1285_v49 = vadd.f32 %v12633_v55, %v12631_v41 }
 0x362   : > { %1286 = vadd.xlane.f32.xlu0 %v1285_v49  ;;  %v1190_v49 = vmul.f32 1.442695, %v1069_v24 }
 0x364   : > { %10509 = vpow2.f32 %v1190_v49  ;;  %v12644_v55 = vpop.eup %10503 }
 0x365   : > { %18172 = vst [vmem:[#allocation16_spill] sm:$0xff] %v12644_v55 }
 0x367   : > { %262 = vperm.xlu1 %10394, %v244_v56   ;;  %v12646_v56 = vpop.eup %10505 }
 0x368   : > { %18173 = vst [vmem:[#allocation17_spill] sm:$0xff] %v12646_v56  ;;  %v1282_v8 = vadd.f32 %v12646_v56, %v12644_v55 }
 0x369   : > { %v12648_v53 = vpop.eup %10507 }
 0x36a   : > { %18174 = vst [vmem:[#allocation20_spill] sm:$0xff] %v12648_v53 }
 0x36e   : > { %v12652_v5 = vpop.eup %10509 }
 0x36f   : > { %18175 = vst [vmem:[#allocation21_spill] sm:$0xff] %v12652_v5  ;;  %v1288_v2 = vadd.f32 %v12652_v5, %v12648_v53 }
 0x383   : > { %v1206_v41 = vpop.xlane.xlu0 %1205 }
 0x384   : > { %10511 = vrcp.f32 %v1206_v41 }
 0x387   : > { %v1209_v0 = vpop.xlane.xlu0 %1208 }
 0x388   : > { %10513 = vrcp.f32 %v1209_v0  ;;  %v18176_v0 = vld [vmem:[#allocation22_spill] sm:$0xff] }
 0x38b   : > { %v1212_v30 = vpop.xlane.xlu0 %1211  ;;  %1283 = vadd.xlane.f32.xlu1 %v1282_v8  ;;  %v1072_v8 = vsub.f32 %v18176_v0, %v1008_v44 }
 0x38c   : > { %10515 = vrcp.f32 %v1212_v30  ;;  %v18177_v30 = vld [vmem:[#allocation23_spill] sm:$0xff] }
 0x38d   : > { %v1073_v5 = vsub.f32 %v18177_v30, %v1008_v44  ;;  %v1196_v56 = vmul.f32 1.442695, %v1072_v8 }
 0x38e   : > { %v10512_v62 = vpop.eup %10511 }
 0x38f   : > { %v1215_v24 = vpop.xlane.xlu0 %1214  ;;  %1289 = vadd.xlane.f32.xlu1 %v1288_v2  ;;  %v1333_v14 = vmul.f32 %v10512_v62, %v12425_v29  ;;  %v1332_v54 = vmul.f32 %v10512_v62, %v12423_v16  ;;  %v1198_v10 = vmul.f32 1.442695, %v1073_v5  ;;  %v248_v5 = vld [vmem:[%s17617_s2 + $0x28] sm:$0xff] }
 0x390   : > { %10517 = vrcp.f32 %v1215_v24 }
 0x392   : > { %v10514_v45 = vpop.eup %10513 }
 0x393   : > { %v1218_v41 = vpop.xlane.xlu0 %1217  ;;  %v1335_v22 = vmul.f32 %v10514_v45, %v12433_v31  ;;  %v1334_v49 = vmul.f32 %v10514_v45, %v12431_v20 }
 0x394   : > { %10519 = vrcp.f32 %v1218_v41 }
 0x395   : > { %v9780_v55 = vpack.c.bf16 %v1335_v22, %v1333_v14  ;;  %v9782_v53 = vpack.c.bf16 %v1334_v49, %v1332_v54 }
 0x396   : > { %v10516_v24 = vpop.eup %10515 }
 0x397   : > { %9781 = vmatprep.subr.bf16.mxu1 %v9780_v55  ;;  %v1221_v2 = vpop.xlane.xlu0 %1220  ;;  %v1337_v16 = vmul.f32 %v10516_v24, %v12441_v17  ;;  %v1336_v62 = vmul.f32 %v10516_v24, %v12439_v23 }
 0x398   : > { %10521 = vrcp.f32 %v1221_v2  ;;  %9783 = vmatpush1.bf16.xpose.msra.mxu1 %v9782_v53 }
 0x399   : > { %10523 = vpow2.f32 %v1196_v56 }
 0x39a   : > { %v10518_v29 = vpop.eup %10517  ;;  %10525 = vpow2.f32 %v1198_v10 }
 0x39b   : > { %v1005_v31 = vpop.xlane.xlu0 %1004  ;;  %v1339_v20 = vmul.f32 %v10518_v29, %v12449_v50  ;;  %v1338_v45 = vmul.f32 %v10518_v29, %v12447_v33  ;;  %v1224_v41 = vpop.xlane.xlu1 %1223 }
 0x39c   : > { %v1070_v44 = vsub.f32 %v12377_v40, %v1005_v31  ;;  %v1071_v55 = vsub.f32 %v12379_v26, %v1005_v31  ;;  %10527 = vrcp.f32 %v1224_v41  ;;  %v12671_v50 = vpop.f32.mrb[10].mxu0 }
 0x39d   : > { %v9784_v14 = vpack.c.bf16 %v1339_v20, %v1337_v16  ;;  %v9786_v53 = vpack.c.bf16 %v1338_v45, %v1336_v62  ;;  %v12673_v26 = vpop.f32.mrb[11].mxu0 }
 0x39e   : > { %v1192_v17 = vmul.f32 1.442695, %v1070_v44  ;;  %v1194_v22 = vmul.f32 1.442695, %v1071_v55  ;;  %v10520_v33 = vpop.eup %10519 }
 0x39f   : > { %9785 = vmatprep.subr.bf16.mxu1 %v9784_v14  ;;  %v1227_v23 = vpop.xlane.xlu0 %1226  ;;  %v1341_v54 = vmul.f32 %v10520_v33, %v12457_v25  ;;  %v1340_v49 = vmul.f32 %v10520_v33, %v12455_v36 }
 0x3a0   : > { %10529 = vpow2.f32 %v1192_v17  ;;  %9787 = vmatpush1.bf16.xpose.msra.mxu1 %v9786_v53  ;;  %282 = vperm.xlu1 %10394, %v248_v5  }
 0x3a1   : > { %10531 = vpow2.f32 %v1194_v22 }
 0x3a2   : > { %v10522_v40 = vpop.eup %10521  ;;  %10533 = vrcp.f32 %v1227_v23 }
 0x3a3   : > { %v1011_v56 = vpop.xlane.xlu0 %1010  ;;  %v1343_v10 = vmul.f32 %v10522_v40, %v12465_v11  ;;  %v1342_v0 = vmul.f32 %v10522_v40, %v12463_v39  ;;  %v1230_v2 = vpop.xlane.xlu1 %1229 }
 0x3a4   : > { %v1074_v8 = vsub.f32 %v12394_v27, %v1011_v56  ;;  %v1075_v30 = vsub.f32 %v12396_v28, %v1011_v56  ;;  %v12681_v20 = vpop.eup %10523  ;;  %10535 = vrcp.f32 %v1230_v2 }
 0x3a5   : > { %v9788_v24 = vpack.c.bf16 %v1343_v10, %v1341_v54  ;;  %v9790_v29 = vpack.c.bf16 %v1342_v0, %v1340_v49  ;;  %v12683_v62 = vpop.eup %10525 }
 0x3a6   : > { %v1200_v31 = vmul.f32 1.442695, %v1074_v8  ;;  %v1202_v16 = vmul.f32 1.442695, %v1075_v30  ;;  %v10528_v36 = vpop.eup %10527  ;;  %v1294_v22 = vadd.f32 %v12683_v62, %v12681_v20 }
 0x3a7   : > { %9789 = vmatprep.subr.bf16.mxu1 %v9788_v24  ;;  %v1233_v25 = vpop.xlane.xlu0 %1232  ;;  %v1345_v44 = vmul.f32 %v10528_v36, %v12473_v15  ;;  %v1344_v41 = vmul.f32 %v10528_v36, %v12471_v43 }
 0x3a8   : > { %10537 = vpow2.f32 %v1200_v31  ;;  %9791 = vmatpush1.bf16.xpose.msra.mxu1 %v9790_v29 }
 0x3a9   : > { %10539 = vpow2.f32 %v1202_v16 }
 0x3aa   : > { %v12685_v39 = vpop.eup %10529  ;;  %10541 = vrcp.f32 %v1233_v25 }
 0x3ab   : > { %v12687_v27 = vpop.eup %10531  ;;  %v1236_v28 = vpop.xlane.xlu1 %1235 }
 0x3ac   : > { %v10534_v11 = vpop.eup %10533  ;;  %v1291_v45 = vadd.f32 %v12687_v27, %v12685_v39  ;;  %10543 = vrcp.f32 %v1236_v28 }
 0x3ad   : > { %v1347_v55 = vmul.f32 %v10534_v11, %v12484_v32  ;;  %v1346_v14 = vmul.f32 %v10534_v11, %v12479_v46 }
 0x3ae   : > { %1292 = vadd.xlane.f32.xlu0 %v1291_v45  ;;  %v10536_v23 = vpop.eup %10535 }
 0x3af   : > { %v1239_v53 = vpop.xlane.xlu0 %1238  ;;  %v9792_v5 = vpack.c.bf16 %v1347_v55, %v1345_v44  ;;  %v9794_v17 = vpack.c.bf16 %v1346_v14, %v1344_v41  ;;  %v1349_v40 = vmul.f32 %v10536_v23, %v12492_v35  ;;  %v1348_v54 = vmul.f32 %v10536_v23, %v12490_v13  ;;  %v12725_v44 = vpop.f32.mrb[12].mxu0  ;;  %v242_v55 = vld [vmem:[%s17616_s1 + $0x58] sm:$0xff]  ;;  %v251_v23 = vld [vmem:[%s17617_s2 + $0x40] sm:$0xff] }
 0x3b0   : > { %10545 = vrcp.f32 %v1239_v53  ;;  %18178 = vst [vmem:[#allocation22_spill] sm:$0xff] %v12725_v44  ;;  %v12731_v14 = vpop.f32.mrb[13].mxu0 }
 0x3b1   : > { %9793 = vmatprep.subr.bf16.mxu1 %v9792_v5  ;;  %18179 = vst [vmem:[#allocation23_spill] sm:$0xff] %v12731_v14 }
 0x3b2   : > { %v12697_v33 = vpop.eup %10537  ;;  %9795 = vmatpush1.bf16.xpose.msra.mxu1 %v9794_v17  ;;  %1295 = vadd.xlane.f32.xlu0 %v1294_v22 }
 0x3b3   : > { %v12699_v15 = vpop.eup %10539  ;;  %v1242_v43 = vpop.xlane.xlu1 %1241 }
 0x3b4   : > { %v10542_v32 = vpop.eup %10541  ;;  %v1297_v46 = vadd.f32 %v12699_v15, %v12697_v33  ;;  %10547 = vrcp.f32 %v1242_v43 }
 0x3b5   : > { %v1351_v56 = vmul.f32 %v10542_v32, %v12503_v38  ;;  %v1350_v10 = vmul.f32 %v10542_v32, %v12498_v52  ;;  %v240_v52 = vld [vmem:[%s17616_s1 + $0x48] sm:$0xff] }
 0x3b6   : > { %1298 = vadd.xlane.f32.xlu0 %v1297_v46  ;;  %v10544_v30 = vpop.eup %10543  ;;  %9414 = vmatmul.mubr.msk.f32.gmra.mrb[18].mxu0 %vm315_vm0, %v240_v52 }
 0x3b7   : > { %v1245_v49 = vpop.xlane.xlu0 %1244  ;;  %v9796_v0 = vpack.c.bf16 %v1351_v56, %v1349_v40  ;;  %v9798_v8 = vpack.c.bf16 %v1350_v10, %v1348_v54  ;;  %v1353_v29 = vmul.f32 %v10544_v30, %v12511_v42  ;;  %v1352_v13 = vmul.f32 %v10544_v30, %v12509_v48  ;;  %476 = vmatprep.mubr.f32.mxu0 %v18148_v59 }
 0x3b8   : > { %10549 = vrcp.f32 %v1245_v49 }
 0x3b9   : > { %9797 = vmatprep.subr.bf16.mxu1 %v9796_v0 }
 0x3ba   : > { %v10546_v2 = vpop.eup %10545  ;;  %9799 = vmatpush1.bf16.xpose.msra.mxu1 %v9798_v8 }
 0x3bb   : > { %v1248_v24 = vpop.xlane.xlu1 %1247  ;;  %v1355_v35 = vmul.f32 %v10546_v2, %v12519_v51  ;;  %v1354_v38 = vmul.f32 %v10546_v2, %v12517_v58  ;;  %v241_v58 = vld [vmem:[%s17616_s1 + $0x50] sm:$0xff] }
 0x3bc   : > { %10551 = vrcp.f32 %v1248_v24  ;;  %9415 = vmatmul.mubr.msk.f32.gmra.mrb[20].mxu0 %vm315_vm0, %v241_v58 }
 0x3bd   : > { %v9800_v31 = vpack.c.bf16 %v1355_v35, %v1353_v29  ;;  %v9802_v16 = vpack.c.bf16 %v1354_v38, %v1352_v13  ;;  %482 = vmatprep.mubr.f32.mxu0 %v18148_v59 }
 0x3be   : > { %v10548_v42 = vpop.eup %10547 }
 0x3bf   : > { %v1251_v25 = vpop.xlane.xlu0 %1250  ;;  %9801 = vmatprep.subr.bf16.mxu1 %v9800_v31  ;;  %v1357_v36 = vmul.f32 %v10548_v42, %v12527_v19  ;;  %v1356_v45 = vmul.f32 %v10548_v42, %v12525_v61  ;;  %v12733_v19 = vpop.f32.mrb[14].mxu0 }
 0x3c0   : > { %10553 = vrcp.f32 %v1251_v25  ;;  %9416 = vmatmul.mubr.msk.f32.gmra.mrb[22].mxu0 %vm315_vm0, %v242_v55  ;;  %18180 = vst [vmem:[#allocation32_spill] sm:$0xff] %v12733_v19  ;;  %v12737_v5 = vpop.f32.mrb[15].mxu0 }
 0x3c1   : > { %1707 = vmatprep.mubr.f32.mxu0 %v18148_v59  ;;  %v12739_v22 = vpop.f32.mrb[16].mxu0 }
 0x3c2   : > { %v10550_v48 = vpop.eup %10549  ;;  %9803 = vmatpush1.bf16.xpose.msra.mxu1 %v9802_v16  ;;  %v12744_v43 = vpop.f32.mrb[17].mxu0 }
 0x3c3   : > { %v1254_v51 = vpop.xlane.xlu1 %1253  ;;  %v1359_v28 = vmul.f32 %v10550_v48, %v12535_v57  ;;  %v1358_v11 = vmul.f32 %v10550_v48, %v12533_v1  ;;  %v18181_v1 = vld [vmem:[#allocation5_spill] sm:$0xff] }
 0x3c4   : > { %10555 = vrcp.f32 %v1254_v51  ;;  %v1473_v57 = vrot.slane %v18181_v1, 4  ;;  %18182 = vst [vmem:[#allocation5_spill] sm:$0xff] %v12737_v5 }
 0x3c5   : > { %v9804_v41 = vpack.c.bf16 %v1359_v28, %v1357_v36  ;;  %v9806_v53 = vpack.c.bf16 %v1358_v11, %v1356_v45  ;;  %v18183_v28 = vld [vmem:[#allocation25_spill] sm:$0xff]  ;;  %v18185_v45 = vld [vmem:[#allocation24_spill] sm:$0xff] }
 0x3c6   : > { %v10552_v17 = vpop.eup %10551  ;;  %v18184_v11 = vld [vmem:[#allocation13_spill] sm:$0xff] }
 0x3c7   : > { %v1257_v61 = vpop.xlane.xlu0 %1256  ;;  %9805 = vmatprep.subr.bf16.mxu1 %v9804_v41  ;;  %v1361_v40 = vmul.f32 %v10552_v17, %v12543_v60  ;;  %v1360_v10 = vmul.f32 %v10552_v17, %v12541_v4 }
 0x3c8   : > { %10557 = vrcp.f32 %v1257_v61 }
 0x3c9   : > { %1477 = vxpose.xlu1.b32.start.end [1/1] (short) %v1473_v57, 128  ;;  %v18186_v57 = vld [vmem:[#allocation6_spill] sm:$0xff] }
 0x3ca   : > { %v10554_v32 = vpop.eup %10553  ;;  %9807 = vmatpush1.bf16.xpose.msra.mxu1 %v9806_v53 }
 0x3cb   : > { %v1260_v46 = vpop.xlane.xlu1 %1259  ;;  %v1363_v56 = vmul.f32 %v10554_v32, %v12551_v63  ;;  %v1362_v54 = vmul.f32 %v10554_v32, %v12549_v7 }
 0x3cc   : > { %297 = vperm.xlu0 %10393, %v251_v23   ;;  %10559 = vrcp.f32 %v1260_v46  ;;  %v18189_v46 = vld [vmem:[#allocation27_spill] sm:$0xff] }
 0x3cd   : > { %v9808_v49 = vpack.c.bf16 %v1363_v56, %v1361_v40  ;;  %v9810_v0 = vpack.c.bf16 %v1362_v54, %v1360_v10  ;;  %v18190_v56 = vld [vmem:[#allocation26_spill] sm:$0xff] }
 0x3ce   : > { %v10556_v30 = vpop.eup %10555  ;;  %v18191_v10 = vld [vmem:[#allocation14_spill] sm:$0xff] }
 0x3cf   : > { %v1263_v8 = vpop.xlane.xlu0 %1262  ;;  %9809 = vmatprep.subr.bf16.mxu1 %v9808_v49  ;;  %v1365_v29 = vmul.f32 %v10556_v30, %v12559_v3  ;;  %v1364_v7 = vmul.f32 %v10556_v30, %v12557_v12 }
 0x3d0   : > { %10561 = vrcp.f32 %v1263_v8 }
 0x3d2   : > { %v10558_v2 = vpop.eup %10557  ;;  %9811 = vmatpush1.bf16.xpose.msra.mxu1 %v9810_v0 }
 0x3d3   : > { %v1266_v24 = vpop.xlane.xlu1 %1265  ;;  %v1367_v60 = vmul.f32 %v10558_v2, %v12567_v6  ;;  %v1366_v63 = vmul.f32 %v10558_v2, %v12565_v21 }
 0x3d4   : > { %10563 = vrcp.f32 %v1266_v24  ;;  %v18192_v24 = vld [vmem:[#allocation19_spill] sm:$0xff] }
 0x3d5   : > { %v9812_v35 = vpack.c.bf16 %v1367_v60, %v1365_v29  ;;  %v9814_v4 = vpack.c.bf16 %v1366_v63, %v1364_v7  ;;  %v18193_v60 = vld [vmem:[#allocation29_spill] sm:$0xff]  ;;  %v18194_v7 = vld [vmem:[#allocation28_spill] sm:$0xff] }
 0x3d6   : > { %v10560_v13 = vpop.eup %10559 }
 0x3d7   : > { %v1269_v38 = vpop.xlane.xlu0 %1268  ;;  %9813 = vmatprep.subr.bf16.mxu1 %v9812_v35  ;;  %v1369_v16 = vmul.f32 %v10560_v13, %v12575_v9  ;;  %v1368_v21 = vmul.f32 %v10560_v13, %v12573_v37 }
 0x3d8   : > { %10565 = vrcp.f32 %v1269_v38 }
 0x3da   : > { %v10562_v52 = vpop.eup %10561  ;;  %9815 = vmatpush1.bf16.xpose.msra.mxu1 %v9814_v4  ;;  %v18195_v4 = vld [vmem:[#allocation18_spill] sm:$0xff] }
 0x3db   : > { %v1272_v31 = vpop.xlane.xlu1 %1271  ;;  %v1371_v3 = vmul.f32 %v10562_v52, %v12583_v18  ;;  %v1370_v6 = vmul.f32 %v10562_v52, %v12581_v47 }
 0x3dc   : > { %10567 = vrcp.f32 %v1272_v31  ;;  %v18196_v31 = vld [vmem:[#allocation12_spill] sm:$0xff] }
 0x3dd   : > { %v9816_v25 = vpack.c.bf16 %v1371_v3, %v1369_v16  ;;  %v9818_v12 = vpack.c.bf16 %v1370_v6, %v1368_v21  ;;  %v1474_v16 = vrot.slane %v18196_v31, 4 }
 0x3de   : > { %v10564_v58 = vpop.eup %10563 }
 0x3df   : > { %v1275_v42 = vpop.xlane.xlu0 %1274  ;;  %9817 = vmatprep.subr.bf16.mxu1 %v9816_v25  ;;  %v1373_v36 = vmul.f32 %v10564_v58, %v12591_v34  ;;  %v1372_v47 = vmul.f32 %v10564_v58, %v18185_v45  ;;  %v18188_v34 = vld [vmem:[#allocation15_spill] sm:$0xff]  ;;  %v18198_v58 = vld [vmem:[#allocation17_spill] sm:$0xff] }
 0x3e0   : > { %10569 = vrcp.f32 %v1275_v42 }
 0x3e2   : > { %v10566_v48 = vpop.eup %10565  ;;  %9819 = vmatpush1.bf16.xpose.msra.mxu1 %v9818_v12  ;;  %v18197_v12 = vld [vmem:[#allocation7_spill] sm:$0xff] }
 0x3e3   : > { %v1278_v51 = vpop.xlane.xlu1 %1277  ;;  %v1375_v9 = vmul.f32 %v10566_v48, %v18183_v28  ;;  %v1374_v18 = vmul.f32 %v10566_v48, %v18184_v11  ;;  %v18200_v28 = vld [vmem:[#allocation16_spill] sm:$0xff]  ;;  %v18201_v11 = vld [vmem:[#allocation30_spill] sm:$0xff] }
 0x3e4   : > { %10571 = vrcp.f32 %v1278_v51  ;;  %v18199_v51 = vld [vmem:[#allocation31_spill] sm:$0xff] }
 0x3e5   : > { %v9820_v55 = vpack.c.bf16 %v1375_v9, %v1373_v36  ;;  %v9822_v37 = vpack.c.bf16 %v1374_v18, %v1372_v47 }
 0x3e6   : > { %v10568_v1 = vpop.eup %10567 }
 0x3e7   : > { %v1281_v41 = vpop.xlane.xlu0 %1280  ;;  %9821 = vmatprep.subr.bf16.mxu1 %v9820_v55  ;;  %v263_v53 = vpop.permute.xlu1 %262  ;;  %v1377_v32 = vmul.f32 %v10568_v1, %v18188_v34  ;;  %v1376_v49 = vmul.f32 %v10568_v1, %v18191_v10  ;;  %v18203_v34 = vld [vmem:[#allocation21_spill] sm:$0xff] }
 0x3e8   : > { %10573 = vrcp.f32 %v1281_v41  ;;  %v425_v61 = vadd.f32 %v18186_v57, %v263_v53  ;;  %v427_v42 = vadd.f32 %v18197_v12, %v263_v53 }
 0x3ea   : > { %v10570_v17 = vpop.eup %10569  ;;  %v12763_v23 = vmul.f32 0.5, %v425_v61  ;;  %9823 = vmatpush1.bf16.xpose.msra.mxu1 %v9822_v37  ;;  %v12780_v55 = vmul.f32 0.5, %v427_v42 }
 0x3eb   : > { %v1379_v40 = vmul.f32 %v10570_v17, %v18189_v46  ;;  %v1378_v54 = vmul.f32 %v10570_v17, %v18190_v56 }
 0x3ec   : > { %18187 = vst [vmem:[#allocation25_spill] sm:$0xff] %v12763_v23  ;;  %2678 = vxpose.xlu0.b32.start.end [1/1] (short) %v12763_v23, 128  ;;  %18202 = vst [vmem:[#allocation13_spill] sm:$0xff] %v12780_v55 }
 0x3ed   : > { %v9824_v0 = vpack.c.bf16 %v1379_v40, %v1377_v32  ;;  %v9826_v8 = vpack.c.bf16 %v1378_v54, %v1376_v49  ;;  %v18204_v40 = vld [vmem:[#allocation20_spill] sm:$0xff] }
 0x3ee   : > { %v10572_v30 = vpop.eup %10571 }
 0x3ef   : > { %9825 = vmatprep.subr.bf16.mxu1 %v9824_v0  ;;  %v1381_v29 = vmul.f32 %v10572_v30, %v18192_v24  ;;  %v1380_v38 = vmul.f32 %v10572_v30, %v18195_v4  ;;  %v1287_v3 = vpop.xlane.xlu0 %1286 }
 0x3f0   : > { %10575 = vrcp.f32 %v1287_v3 }
 0x3f2   : > { %v10574_v2 = vpop.eup %10573  ;;  %9827 = vmatpush1.bf16.xpose.msra.mxu1 %v9826_v8 }
 0x3f3   : > { %v1383_v63 = vmul.f32 %v10574_v2, %v18193_v60  ;;  %v1382_v35 = vmul.f32 %v10574_v2, %v18194_v7 }
 0x3f5   : > { %v9828_v13 = vpack.c.bf16 %v1383_v63, %v1381_v29  ;;  %v9830_v52 = vpack.c.bf16 %v1382_v35, %v1380_v38 }
 0x3f7   : > { %9829 = vmatprep.subr.bf16.mxu1 %v9828_v13 }
 0x3fa   : > { %9831 = vmatpush1.bf16.xpose.msra.mxu1 %v9830_v52  ;;  %v10576_v21 = vpop.eup %10575 }
 0x3fb   : > { %v1387_v36 = vmul.f32 %v10576_v21, %v18199_v51  ;;  %v1386_v18 = vmul.f32 %v10576_v21, %v18201_v11 }
 0x406   : > { %1509 = vxpose.xlu1.b32.start.end [1/1] (short) %v1474_v16, 128 }
 0x418   : > { %v1284_v6 = vpop.xlane.xlu1 %1283 }
 0x419   : > { %10577 = vrcp.f32 %v1284_v6 }
 0x41c   : > { %v1290_v37 = vpop.xlane.xlu1 %1289 }
 0x41d   : > { %10579 = vrcp.f32 %v1290_v37 }
 0x420   : > { %v283_v61 = vpop.permute.xlu1 %282 }
 0x421   : > { %v12801_v4 = vadd.f32 %v12673_v26, %v283_v61 }
 0x423   : > { %v10578_v25 = vpop.eup %10577  ;;  %18205 = vst [vmem:[#allocation24_spill] sm:$0xff] %v12801_v4 }
 0x424   : > { %v1385_v48 = vmul.f32 %v10578_v25, %v18198_v58  ;;  %v1384_v9 = vmul.f32 %v10578_v25, %v18200_v28 }
 0x426   : > { %v9832_v45 = vpack.c.bf16 %v1387_v36, %v1385_v48  ;;  %v9834_v47 = vpack.c.bf16 %v1386_v18, %v1384_v9 }
 0x427   : > { %v10580_v57 = vpop.eup %10579 }
 0x428   : > { %9833 = vmatprep.subr.bf16.mxu1 %v9832_v45  ;;  %v1389_v32 = vmul.f32 %v10580_v57, %v18203_v34  ;;  %v1388_v56 = vmul.f32 %v10580_v57, %v18204_v40 }
 0x429   : > { %2710 = vxpose.xlu0.b32.start.end [1/1] (short) %v12780_v55, 128  ;;  %9835 = vmatpush1.bf16.xpose.msra.mxu1 %v9834_v47 }
 0x43b   : > { %v1293_v41 = vpop.xlane.xlu0 %1292 }
 0x43c   : > { %10581 = vrcp.f32 %v1293_v41 }
 0x43f   : > { %v1296_v53 = vpop.xlane.xlu0 %1295 }
 0x440   : > { %10583 = vrcp.f32 %v1296_v53 }
 0x443   : > { %v1299_v1 = vpop.xlane.xlu0 %1298 }
 0x444   : > { %10585 = vrcp.f32 %v1299_v1 }
 0x446   : > { %v10582_v17 = vpop.eup %10581 }
 0x447   : > { %v1391_v46 = vmul.f32 %v10582_v17, %v12687_v27  ;;  %v1390_v54 = vmul.f32 %v10582_v17, %v12685_v39 }
 0x449   : > { %v1493_v10 = vpop.trf.xlu1  ;;  %v9836_v49 = vpack.c.bf16 %v1391_v46, %v1389_v32  ;;  %v9838_v0 = vpack.c.bf16 %v1390_v54, %v1388_v56 }
 0x44a   : > { %9453 = vmatmul.mubr.msk.f32.vlgmr.msra.gmra.mrb[24].mxu0 %vm555_vm2, %v1493_v10  ;;  %v10584_v30 = vpop.eup %10583 }
 0x44b   : > { %v298_v8 = vpop.permute.xlu0 %297  ;;  %9837 = vmatprep.subr.bf16.mxu1 %v9836_v49  ;;  %1713 = vmatprep.mubr.f32.mxu0 %v18148_v59  ;;  %v1393_v39 = vmul.f32 %v10584_v30, %v12683_v62  ;;  %v1392_v60 = vmul.f32 %v10584_v30, %v12681_v20 }
 0x44c   : > { %v12790_v2 = vadd.f32 %v12744_v43, %v298_v8  ;;  %9839 = vmatpush1.bf16.xpose.msra.mxu1 %v9838_v0  ;;  %v12809_v20 = vadd.f32 %v12739_v22, %v298_v8 }
 0x44d   : > { %v1494_v24 = vpop.trf.xlu1 }
 0x44e   : > { %v10586_v27 = vpop.eup %10585  ;;  %1460 = vmatprep.mubr.f32.mxu1 %v12790_v2  ;;  %9454 = vmatmul.mubr.msk.f32.gmra.mrb[26].mxu0 %vm555_vm2, %v1494_v24  ;;  %18206 = vst [vmem:[#allocation6_spill] sm:$0xff] %v12809_v20 }
 0x44f   : > { %1719 = vmatprep.mubr.f32.mxu0 %v18148_v59  ;;  %v1395_v29 = vmul.f32 %v10586_v27, %v12699_v15  ;;  %v1394_v63 = vmul.f32 %v10586_v27, %v12697_v33  ;;  %v12812_v15 = vadd.f32 %v12671_v50, %v283_v61 }
 0x451   : > { %v1495_v7 = vpop.trf.xlu1  ;;  %v9840_v43 = vpack.c.bf16 %v1395_v29, %v1393_v39  ;;  %v9842_v35 = vpack.c.bf16 %v1394_v63, %v1392_v60  ;;  %18207 = vst [vmem:[#allocation15_spill] sm:$0xff] %v12812_v15 }
 0x452   : > { %9455 = vmatmul.mubr.msk.f32.gmra.mrb[28].mxu0 %vm555_vm2, %v1495_v7 }
 0x453   : > { %9841 = vmatprep.subr.bf16.mxu1 %v9840_v43  ;;  %1725 = vmatprep.mubr.f32.mxu0 %v18148_v59 }
 0x454   : > { %9843 = vmatpush1.bf16.xpose.msra.mxu1 %v9842_v35 }
 0x455   : > { %9501 = vmatprep.subr.msk.mxu1 %vm652_vm1, %v12801_v4  ;;  %v1496_v62 = vpop.trf.xlu1 }
 0x456   : > { %9456 = vmatmul.mubr.msk.f32.gmra.mrb[30].mxu0 %vm555_vm2, %v1496_v62 }
 0x457   : > { %1731 = vmatprep.mubr.f32.mxu0 %v18148_v59 }
 0x459   : > { %v1497_v33 = vpop.trf.xlu1 }
 0x45a   : > { %9457 = vmatmul.mubr.msk.f32.gmra.mrb[32].mxu0 %vm555_vm2, %v1497_v33 }
 0x45b   : > { %1461 = vmatmul.mubr.f32.vlgmr.msra.gmra.mrb[64].mxu1 %v12809_v20  ;;  %1737 = vmatprep.mubr.f32.mxu0 %v18148_v59 }
 0x45c   : > { %9502 = vmatpush1.msk.msra.mxu1 %vm652_vm1, %v12812_v15  ;;  %2908 = vmatprep.mubr.f32.mxu1 %v18148_v59 }
 0x45d   : > { %v1498_v26 = vpop.trf.xlu1 }
 0x45e   : > { %9458 = vmatmul.mubr.msk.f32.gmra.mrb[34].mxu0 %vm555_vm2, %v1498_v26 }
 0x45f   : > { %1743 = vmatprep.mubr.f32.mxu0 %v18148_v59 }
 0x461   : > { %v1499_v22 = vpop.trf.xlu1 }
 0x462   : > { %9459 = vmatmul.mubr.msk.f32.gmra.mrb[36].mxu0 %vm555_vm2, %v1499_v22 }
 0x463   : > { %1749 = vmatprep.mubr.f32.mxu0 %v18148_v59 }
 0x465   : > { %v1500_v50 = vpop.trf.xlu1 }
 0x466   : > { %9460 = vmatmul.mubr.msk.f32.gmra.mrb[38].mxu0 %vm555_vm2, %v1500_v50 }
 0x467   : > { %1755 = vmatprep.mubr.f32.mxu0 %v18148_v59 }
 0x469   : > { %v1501_v38 = vpop.trf.xlu1 }
 0x46a   : > { %9461 = vmatmul.mubr.msk.f32.gmra.mrb[40].mxu0 %vm555_vm2, %v1501_v38  ;;  %v2383_v38 = vrot.slane %v12790_v2, 4 }
 0x46b   : > { %1761 = vmatprep.mubr.f32.mxu0 %v18148_v59 }
 0x46c   : > { %v2694_v13 = vpop.trf.xlu0 }
 0x46d   : > { %v1502_v52 = vpop.trf.xlu1  ;;  %9503 = vmatmul.mubr.msk.f32.vlgmr.msra.gmra.mrb[66].mxu1 %vm555_vm2, %v2694_v13 }
 0x46e   : > { %9462 = vmatmul.mubr.msk.f32.gmra.mrb[42].mxu0 %vm555_vm2, %v1502_v52  ;;  %2914 = vmatprep.mubr.f32.mxu1 %v18148_v59 }
 0x46f   : > { %1767 = vmatprep.mubr.f32.mxu0 %v18148_v59 }
 0x470   : > { %v2695_v31 = vpop.trf.xlu0 }
 0x471   : > { %v1503_v16 = vpop.trf.xlu1  ;;  %9504 = vmatmul.mubr.msk.f32.gmra.mrb[68].mxu1 %vm555_vm2, %v2695_v31 }
 0x472   : > { %9463 = vmatmul.mubr.msk.f32.gmra.mrb[44].mxu0 %vm555_vm2, %v1503_v16  ;;  %2920 = vmatprep.mubr.f32.mxu1 %v18148_v59 }
 0x473   : > { %1773 = vmatprep.mubr.f32.mxu0 %v18148_v59 }
 0x474   : > { %v2696_v3 = vpop.trf.xlu0 }
 0x475   : > { %v1504_v6 = vpop.trf.xlu1  ;;  %9505 = vmatmul.mubr.msk.f32.gmra.mrb[70].mxu1 %vm555_vm2, %v2696_v3 }
 0x476   : > { %9464 = vmatmul.mubr.msk.f32.gmra.mrb[46].mxu0 %vm555_vm2, %v1504_v6  ;;  %2926 = vmatprep.mubr.f32.mxu1 %v18148_v59 }
 0x477   : > { %1779 = vmatprep.mubr.f32.mxu0 %v18148_v59 }
 0x478   : > { %v2697_v21 = vpop.trf.xlu0 }
 0x479   : > { %v1505_v25 = vpop.trf.xlu1  ;;  %9506 = vmatmul.mubr.msk.f32.gmra.mrb[72].mxu1 %vm555_vm2, %v2697_v21 }
 0x47a   : > { %9465 = vmatmul.mubr.msk.f32.gmra.mrb[48].mxu0 %vm555_vm2, %v1505_v25  ;;  %2932 = vmatprep.mubr.f32.mxu1 %v18148_v59 }
 0x47b   : > { %1785 = vmatprep.mubr.f32.mxu0 %v18148_v59 }
 0x47c   : > { %v2698_v12 = vpop.trf.xlu0 }
 0x47d   : > { %v1506_v42 = vpop.trf.xlu1  ;;  %9507 = vmatmul.mubr.msk.f32.gmra.mrb[74].mxu1 %vm555_vm2, %v2698_v12 }
 0x47e   : > { %9466 = vmatmul.mubr.msk.f32.gmra.mrb[50].mxu0 %vm555_vm2, %v1506_v42  ;;  %2938 = vmatprep.mubr.f32.mxu1 %v18148_v59 }
 0x47f   : > { %1791 = vmatprep.mubr.f32.mxu0 %v18148_v59 }
 0x480   : > { %v2699_v58 = vpop.trf.xlu0 }
 0x481   : > { %v1507_v48 = vpop.trf.xlu1  ;;  %9508 = vmatmul.mubr.msk.f32.gmra.mrb[76].mxu1 %vm555_vm2, %v2699_v58 }
 0x482   : > { %9467 = vmatmul.mubr.msk.f32.gmra.mrb[52].mxu0 %vm555_vm2, %v1507_v48  ;;  %2944 = vmatprep.mubr.f32.mxu1 %v18148_v59 }
 0x483   : > { %1797 = vmatprep.mubr.f32.mxu0 %v18148_v59 }
 0x484   : > { %v2700_v51 = vpop.trf.xlu0 }
 0x485   : > { %v1508_v36 = vpop.trf.xlu1  ;;  %9509 = vmatmul.mubr.msk.f32.gmra.mrb[78].mxu1 %vm555_vm2, %v2700_v51 }
 0x486   : > { %9468 = vmatmul.mubr.msk.f32.gmra.mrb[54].mxu0 %vm555_vm2, %v1508_v36  ;;  %2950 = vmatprep.mubr.f32.mxu1 %v18148_v59 }
 0x487   : > { %1803 = vmatprep.mubr.f32.mxu0 %v18148_v59 }
 0x488   : > { %v2701_v28 = vpop.trf.xlu0 }
 0x489   : > { %v1525_v9 = vpop.trf.xlu1  ;;  %9510 = vmatmul.mubr.msk.f32.gmra.mrb[80].mxu1 %vm555_vm2, %v2701_v28  ;;  %v12864_v47 = vpop.f32.mrb[18].mxu0 }
 0x48a   : > { %9469 = vmatmul.mubr.msk.f32.gmra.mrb[56].mxu0 %vm555_vm2, %v1525_v9  ;;  %2956 = vmatprep.mubr.f32.mxu1 %v18148_v59  ;;  %18208 = vst [vmem:[#allocation27_spill] sm:$0xff] %v12864_v47  ;;  %v12867_v41 = vpop.f32.mrb[19].mxu0 }
 0x48b   : > { %1809 = vmatprep.mubr.f32.mxu0 %v18148_v59  ;;  %18209 = vst [vmem:[#allocation26_spill] sm:$0xff] %v12867_v41 }
 0x48c   : > { %v2702_v11 = vpop.trf.xlu0 }
 0x48d   : > { %v1526_v18 = vpop.trf.xlu1  ;;  %9511 = vmatmul.mubr.msk.f32.gmra.mrb[82].mxu1 %vm555_vm2, %v2702_v11 }
 0x48e   : > { %9470 = vmatmul.mubr.msk.f32.gmra.mrb[58].mxu0 %vm555_vm2, %v1526_v18  ;;  %2962 = vmatprep.mubr.f32.mxu1 %v18148_v59 }
 0x48f   : > { %1815 = vmatprep.mubr.f32.mxu0 %v18148_v59  ;;  %v12872_v1 = vpop.f32.mrb[20].mxu0 }
 0x490   : > { %v2703_v45 = vpop.trf.xlu0  ;;  %18210 = vst [vmem:[#allocation14_spill] sm:$0xff] %v12872_v1  ;;  %v12875_v61 = vpop.f32.mrb[21].mxu0 }
 0x491   : > { %v1527_v37 = vpop.trf.xlu1  ;;  %9512 = vmatmul.mubr.msk.f32.gmra.mrb[84].mxu1 %vm555_vm2, %v2703_v45  ;;  %18211 = vst [vmem:[#allocation19_spill] sm:$0xff] %v12875_v61 }
 0x492   : > { %9471 = vmatmul.mubr.msk.f32.gmra.mrb[60].mxu0 %vm555_vm2, %v1527_v37  ;;  %2968 = vmatprep.mubr.f32.mxu1 %v18148_v59 }
 0x493   : > { %1821 = vmatprep.mubr.f32.mxu0 %v18148_v59  ;;  %v12880_v34 = vpop.f32.mrb[22].mxu0 }
 0x494   : > { %v2704_v53 = vpop.trf.xlu0  ;;  %18212 = vst [vmem:[#allocation29_spill] sm:$0xff] %v12880_v34  ;;  %v12883_v46 = vpop.f32.mrb[23].mxu0 }
 0x495   : > { %v1528_v57 = vpop.trf.xlu1  ;;  %9513 = vmatmul.mubr.msk.f32.gmra.mrb[86].mxu1 %vm555_vm2, %v2704_v53  ;;  %18213 = vst [vmem:[#allocation28_spill] sm:$0xff] %v12883_v46 }
 0x496   : > { %9472 = vmatmul.mubr.msk.f32.gmra.mrb[62].mxu0 %vm555_vm2, %v1528_v57  ;;  %2974 = vmatprep.mubr.f32.mxu1 %v18148_v59 }
 0x497   : > { %1827 = vmatprep.mubr.f32.mxu0 %v18148_v59 }
 0x498   : > { %v2705_v17 = vpop.trf.xlu0 }
 0x499   : > { %v1529_v32 = vpop.trf.xlu1  ;;  %9514 = vmatmul.mubr.msk.f32.gmra.mrb[88].mxu1 %vm555_vm2, %v2705_v17 }
 0x49a   : > { %9473 = vmatmul.mubr.msk.f32.gmra.mrb[64].mxu0 %vm555_vm2, %v1529_v32  ;;  %2980 = vmatprep.mubr.f32.mxu1 %v18148_v59 }
 0x49b   : > { %1833 = vmatprep.mubr.f32.mxu0 %v18148_v59 }
 0x49c   : > { %v2706_v40 = vpop.trf.xlu0 }
 0x49d   : > { %v1530_v56 = vpop.trf.xlu1  ;;  %9515 = vmatmul.mubr.msk.f32.gmra.mrb[90].mxu1 %vm555_vm2, %v2706_v40 }
 0x49e   : > { %9474 = vmatmul.mubr.msk.f32.gmra.mrb[66].mxu0 %vm555_vm2, %v1530_v56  ;;  %2986 = vmatprep.mubr.f32.mxu1 %v18148_v59 }
 0x49f   : > { %1839 = vmatprep.mubr.f32.mxu0 %v18148_v59 }
 0x4a0   : > { %v2707_v54 = vpop.trf.xlu0 }
 0x4a1   : > { %v1531_v10 = vpop.trf.xlu1  ;;  %9516 = vmatmul.mubr.msk.f32.gmra.mrb[92].mxu1 %vm555_vm2, %v2707_v54 }
 0x4a2   : > { %9475 = vmatmul.mubr.msk.f32.gmra.mrb[68].mxu0 %vm555_vm2, %v1531_v10  ;;  %2992 = vmatprep.mubr.f32.mxu1 %v18148_v59 }
 0x4a3   : > { %1845 = vmatprep.mubr.f32.mxu0 %v18148_v59 }
 0x4a4   : > { %v2708_v49 = vpop.trf.xlu0 }
 0x4a5   : > { %v1532_v0 = vpop.trf.xlu1  ;;  %9517 = vmatmul.mubr.msk.f32.gmra.mrb[94].mxu1 %vm555_vm2, %v2708_v49 }
 0x4a6   : > { %9476 = vmatmul.mubr.msk.f32.gmra.mrb[70].mxu0 %vm555_vm2, %v1532_v0  ;;  %2998 = vmatprep.mubr.f32.mxu1 %v18148_v59 }
 0x4a7   : > { %1851 = vmatprep.mubr.f32.mxu0 %v18148_v59 }
 0x4a8   : > { %v2709_v8 = vpop.trf.xlu0 }
 0x4a9   : > { %v1533_v30 = vpop.trf.xlu1  ;;  %9518 = vmatmul.mubr.msk.f32.gmra.mrb[96].mxu1 %vm555_vm2, %v2709_v8 }
 0x4aa   : > { %9477 = vmatmul.mubr.msk.f32.gmra.mrb[72].mxu0 %vm555_vm2, %v1533_v30  ;;  %3004 = vmatprep.mubr.f32.mxu1 %v18148_v59 }
 0x4ab   : > { %1857 = vmatprep.mubr.f32.mxu0 %v18148_v59 }
 0x4ac   : > { %v2726_v24 = vpop.trf.xlu0 }
 0x4ad   : > { %v1534_v27 = vpop.trf.xlu1  ;;  %9519 = vmatmul.mubr.msk.f32.gmra.mrb[98].mxu1 %vm555_vm2, %v2726_v24 }
 0x4ae   : > { %9478 = vmatmul.mubr.msk.f32.gmra.mrb[74].mxu0 %vm555_vm2, %v1534_v27  ;;  %3010 = vmatprep.mubr.f32.mxu1 %v18148_v59 }
 0x4af   : > { %1863 = vmatprep.mubr.f32.mxu0 %v18148_v59 }
 0x4b0   : > { %v2727_v39 = vpop.trf.xlu0 }
 0x4b1   : > { %v1535_v29 = vpop.trf.xlu1  ;;  %9520 = vmatmul.mubr.msk.f32.gmra.mrb[100].mxu1 %vm555_vm2, %v2727_v39 }
 0x4b2   : > { %9479 = vmatmul.mubr.msk.f32.gmra.mrb[76].mxu0 %vm555_vm2, %v1535_v29  ;;  %3016 = vmatprep.mubr.f32.mxu1 %v18148_v59 }
 0x4b3   : > { %1869 = vmatprep.mubr.f32.mxu0 %v18148_v59 }
 0x4b4   : > { %v2728_v60 = vpop.trf.xlu0 }
 0x4b5   : > { %v1536_v63 = vpop.trf.xlu1  ;;  %9521 = vmatmul.mubr.msk.f32.gmra.mrb[102].mxu1 %vm555_vm2, %v2728_v60 }
 0x4b6   : > { %9480 = vmatmul.mubr.msk.f32.gmra.mrb[78].mxu0 %vm555_vm2, %v1536_v63  ;;  %3022 = vmatprep.mubr.f32.mxu1 %v18148_v59 }
 0x4b7   : > { %1875 = vmatprep.mubr.f32.mxu0 %v18148_v59 }
 0x4b8   : > { %v2729_v7 = vpop.trf.xlu0 }
 0x4b9   : > { %v1537_v43 = vpop.trf.xlu1  ;;  %9522 = vmatmul.mubr.msk.f32.gmra.mrb[104].mxu1 %vm555_vm2, %v2729_v7 }
 0x4ba   : > { %9481 = vmatmul.mubr.msk.f32.gmra.mrb[80].mxu0 %vm555_vm2, %v1537_v43  ;;  %3028 = vmatprep.mubr.f32.mxu1 %v18148_v59 }
 0x4bb   : > { %1881 = vmatprep.mubr.f32.mxu0 %v18148_v59 }
 0x4bc   : > { %v2730_v35 = vpop.trf.xlu0 }
 0x4bd   : > { %v1538_v62 = vpop.trf.xlu1  ;;  %9523 = vmatmul.mubr.msk.f32.gmra.mrb[106].mxu1 %vm555_vm2, %v2730_v35 }
 0x4be   : > { %9482 = vmatmul.mubr.msk.f32.gmra.mrb[82].mxu0 %vm555_vm2, %v1538_v62  ;;  %3034 = vmatprep.mubr.f32.mxu1 %v18148_v59 }
 0x4bf   : > { %1887 = vmatprep.mubr.f32.mxu0 %v18148_v59 }
 0x4c0   : > { %v2731_v33 = vpop.trf.xlu0 }
 0x4c1   : > { %v1539_v26 = vpop.trf.xlu1  ;;  %9524 = vmatmul.mubr.msk.f32.gmra.mrb[108].mxu1 %vm555_vm2, %v2731_v33 }
 0x4c2   : > { %9483 = vmatmul.mubr.msk.f32.gmra.mrb[84].mxu0 %vm555_vm2, %v1539_v26  ;;  %3040 = vmatprep.mubr.f32.mxu1 %v18148_v59 }
 0x4c3   : > { %1893 = vmatprep.mubr.f32.mxu0 %v18148_v59 }
 0x4c4   : > { %v2732_v22 = vpop.trf.xlu0 }
 0x4c5   : > { %v1540_v50 = vpop.trf.xlu1  ;;  %9525 = vmatmul.mubr.msk.f32.gmra.mrb[110].mxu1 %vm555_vm2, %v2732_v22 }
 0x4c6   : > { %9484 = vmatmul.mubr.msk.f32.gmra.mrb[86].mxu0 %vm555_vm2, %v1540_v50  ;;  %3046 = vmatprep.mubr.f32.mxu1 %v18148_v59 }
 0x4c7   : > { %2450 = vmatprep.mubr.f32.mxu0 %v2383_v38 }
 0x4c8   : > { %v2733_v13 = vpop.trf.xlu0 }
 0x4c9   : > { %9526 = vmatmul.mubr.msk.f32.gmra.mrb[112].mxu1 %vm555_vm2, %v2733_v13 }
 0x4ca   : > { %3052 = vmatprep.mubr.f32.mxu1 %v18148_v59 }
 0x4cc   : > { %v2734_v52 = vpop.trf.xlu0 }
 0x4cd   : > { %9527 = vmatmul.mubr.msk.f32.gmra.mrb[114].mxu1 %vm555_vm2, %v2734_v52 }
 0x4ce   : > { %3058 = vmatprep.mubr.f32.mxu1 %v18148_v59 }
 0x4d0   : > { %v2735_v31 = vpop.trf.xlu0 }
 0x4d1   : > { %9528 = vmatmul.mubr.msk.f32.gmra.mrb[116].mxu1 %vm555_vm2, %v2735_v31 }
 0x4d2   : > { %3064 = vmatprep.mubr.f32.mxu1 %v18148_v59 }
 0x4d4   : > { %v2736_v2 = vpop.trf.xlu0 }
 0x4d5   : > { %9529 = vmatmul.mubr.msk.f32.gmra.mrb[118].mxu1 %vm555_vm2, %v2736_v2 }
 0x4d6   : > { %3070 = vmatprep.mubr.f32.mxu1 %v18148_v59 }
 0x4d8   : > { %v2737_v16 = vpop.trf.xlu0 }
 0x4d9   : > { %9530 = vmatmul.mubr.msk.f32.gmra.mrb[120].mxu1 %vm555_vm2, %v2737_v16 }
 0x4da   : > { %3076 = vmatprep.mubr.f32.mxu1 %v18148_v59 }
 0x4dc   : > { %v2738_v3 = vpop.trf.xlu0 }
 0x4dd   : > { %9531 = vmatmul.mubr.msk.f32.gmra.mrb[122].mxu1 %vm555_vm2, %v2738_v3 }
 0x4de   : > { %3082 = vmatprep.mubr.f32.mxu1 %v18148_v59 }
 0x4e0   : > { %v2739_v6 = vpop.trf.xlu0 }
 0x4e1   : > { %9532 = vmatmul.mubr.msk.f32.gmra.mrb[124].mxu1 %vm555_vm2, %v2739_v6 }
 0x4e2   : > { %3088 = vmatprep.mubr.f32.mxu1 %v18148_v59 }
 0x4e4   : > { %v2740_v21 = vpop.trf.xlu0 }
 0x4e5   : > { %9533 = vmatmul.mubr.msk.f32.gmra.mrb[126].mxu1 %vm555_vm2, %v2740_v21 }
 0x4e6   : > { %3094 = vmatprep.mubr.f32.mxu1 %v18148_v59 }
 0x4e8   : > { %v2741_v25 = vpop.trf.xlu0 }
 0x4e9   : > { %9534 = vmatmul.mubr.msk.f32.gmra.mrb[128].mxu1 %vm555_vm2, %v2741_v25 }
 0x51d   : > { %v12949_v12 = vpop.f32.mrb[24].mxu0 }
 0x51e   : > { %v12951_v42 = vpop.f32.mrb[25].mxu0 }
 0x51f   : > { %v1900_v58 = vmax.f32 %v12949_v12, %v12951_v42 }
 0x521   : > { %1901 = vmax.xlane.f32.xlu1 %v1900_v58  ;;  %v12955_v48 = vpop.f32.mrb[26].mxu0 }
 0x522   : > { %v12957_v51 = vpop.f32.mrb[27].mxu0 }
 0x523   : > { %v1903_v36 = vmax.f32 %v12955_v48, %v12957_v51 }
 0x525   : > { %1904 = vmax.xlane.f32.xlu0 %v1903_v36  ;;  %v12961_v28 = vpop.f32.mrb[28].mxu0 }
 0x526   : > { %v12963_v9 = vpop.f32.mrb[29].mxu0 }
 0x527   : > { %v1906_v11 = vmax.f32 %v12961_v28, %v12963_v9 }
 0x529   : > { %1907 = vmax.xlane.f32.xlu1 %v1906_v11  ;;  %v12967_v18 = vpop.f32.mrb[30].mxu0 }
 0x52a   : > { %v12969_v45 = vpop.f32.mrb[31].mxu0 }
 0x52b   : > { %v1909_v37 = vmax.f32 %v12967_v18, %v12969_v45 }
 0x52d   : > { %1910 = vmax.xlane.f32.xlu1 %v1909_v37  ;;  %v12973_v53 = vpop.f32.mrb[32].mxu0 }
 0x52e   : > { %v12975_v57 = vpop.f32.mrb[64].mxu1  ;;  %v12977_v17 = vpop.f32.mrb[33].mxu0 }
 0x52f   : > { %18214 = vst [vmem:[#allocation18_spill] sm:$0xff] %v12975_v57  ;;  %v12979_v32 = vpop.f32.mrb[65].mxu1  ;;  %v1912_v40 = vmax.f32 %v12973_v53, %v12977_v17 }
 0x530   : > { %18215 = vst [vmem:[#allocation12_spill] sm:$0xff] %v12979_v32 }
 0x531   : > { %1913 = vmax.xlane.f32.xlu0 %v1912_v40  ;;  %v12983_v56 = vpop.f32.mrb[34].mxu0 }
 0x532   : > { %v12985_v54 = vpop.f32.mrb[35].mxu0 }
 0x533   : > { %v1915_v10 = vmax.f32 %v12983_v56, %v12985_v54 }
 0x535   : > { %1916 = vmax.xlane.f32.xlu1 %v1915_v10  ;;  %v12989_v49 = vpop.f32.mrb[36].mxu0 }
 0x536   : > { %v12991_v0 = vpop.f32.mrb[37].mxu0 }
 0x537   : > { %v1918_v8 = vmax.f32 %v12989_v49, %v12991_v0 }
 0x539   : > { %1919 = vmax.xlane.f32.xlu0 %v1918_v8  ;;  %v12995_v30 = vpop.f32.mrb[38].mxu0 }
 0x53a   : > { %v12997_v24 = vpop.f32.mrb[39].mxu0 }
 0x53b   : > { %v1921_v27 = vmax.f32 %v12995_v30, %v12997_v24 }
 0x53d   : > { %1922 = vmax.xlane.f32.xlu1 %v1921_v27  ;;  %v13001_v39 = vpop.f32.mrb[40].mxu0 }
 0x53e   : > { %v13003_v29 = vpop.f32.mrb[41].mxu0 }
 0x53f   : > { %v1924_v60 = vmax.f32 %v13001_v39, %v13003_v29 }
 0x540   : > { %v13015_v62 = vpop.f32.mrb[66].mxu1 }
 0x541   : > { %1925 = vmax.xlane.f32.xlu0 %v1924_v60  ;;  %v13007_v63 = vpop.f32.mrb[42].mxu0  ;;  %v13019_v26 = vpop.f32.mrb[67].mxu1 }
 0x542   : > { %v13009_v7 = vpop.f32.mrb[43].mxu0 }
 0x543   : > { %18216 = vst [vmem:[#allocation7_spill] sm:$0xff] %v13009_v7  ;;  %v1927_v43 = vmax.f32 %v13007_v63, %v13009_v7 }
 0x544   : > { %v13027_v13 = vpop.f32.mrb[68].mxu1 }
 0x545   : > { %1928 = vmax.xlane.f32.xlu1 %v1927_v43  ;;  %v13013_v35 = vpop.f32.mrb[44].mxu0  ;;  %v13031_v31 = vpop.f32.mrb[69].mxu1 }
 0x546   : > { %18217 = vst [vmem:[#allocation17_spill] sm:$0xff] %v13013_v35  ;;  %v13017_v33 = vpop.f32.mrb[45].mxu0 }
 0x547   : > { %18218 = vst [vmem:[#allocation31_spill] sm:$0xff] %v13017_v33  ;;  %v1930_v22 = vmax.f32 %v13013_v35, %v13017_v33 }
 0x548   : > { %v13039_v6 = vpop.f32.mrb[70].mxu1 }
 0x549   : > { %1931 = vmax.xlane.f32.xlu0 %v1930_v22  ;;  %v13025_v38 = vpop.f32.mrb[46].mxu0  ;;  %v13043_v25 = vpop.f32.mrb[71].mxu1 }
 0x54a   : > { %18219 = vst [vmem:[#allocation16_spill] sm:$0xff] %v13025_v38  ;;  %v13029_v52 = vpop.f32.mrb[47].mxu0 }
 0x54b   : > { %18220 = vst [vmem:[#allocation30_spill] sm:$0xff] %v13029_v52  ;;  %v1933_v2 = vmax.f32 %v13025_v38, %v13029_v52 }
 0x54c   : > { %v13051_v37 = vpop.f32.mrb[72].mxu1 }
 0x54d   : > { %1934 = vmax.xlane.f32.xlu1 %v1933_v2  ;;  %v13037_v3 = vpop.f32.mrb[48].mxu0  ;;  %v13055_v10 = vpop.f32.mrb[73].mxu1 }
 0x54e   : > { %18221 = vst [vmem:[#allocation21_spill] sm:$0xff] %v13037_v3  ;;  %v13041_v21 = vpop.f32.mrb[49].mxu0 }
 0x54f   : > { %18222 = vst [vmem:[#allocation20_spill] sm:$0xff] %v13041_v21  ;;  %v1936_v58 = vmax.f32 %v13037_v3, %v13041_v21 }
 0x550   : > { %v13063_v43 = vpop.f32.mrb[74].mxu1 }
 0x551   : > { %1937 = vmax.xlane.f32.xlu0 %v1936_v58  ;;  %v13049_v11 = vpop.f32.mrb[50].mxu0  ;;  %v13067_v2 = vpop.f32.mrb[75].mxu1 }
 0x552   : > { %18223 = vst [vmem:[#allocation33_spill] sm:$0xff] %v13049_v11  ;;  %v13053_v40 = vpop.f32.mrb[51].mxu0 }
 0x553   : > { %18224 = vst [vmem:[#allocation34_spill] sm:$0xff] %v13053_v40  ;;  %v1939_v8 = vmax.f32 %v13049_v11, %v13053_v40 }
 0x554   : > { %v13075_v50 = vpop.f32.mrb[76].mxu1 }
 0x555   : > { %1940 = vmax.xlane.f32.xlu1 %v1939_v8  ;;  %v13061_v60 = vpop.f32.mrb[52].mxu0  ;;  %v13079_v27 = vpop.f32.mrb[77].mxu1 }
 0x556   : > { %18225 = vst [vmem:[#allocation35_spill] sm:$0xff] %v13061_v60  ;;  %v13065_v22 = vpop.f32.mrb[53].mxu0 }
 0x557   : > { %18226 = vst [vmem:[#allocation36_spill] sm:$0xff] %v13065_v22  ;;  %v1942_v58 = vmax.f32 %v13061_v60, %v13065_v22 }
 0x559   : > { %1943 = vmax.xlane.f32.xlu0 %v1942_v58  ;;  %v13073_v16 = vpop.f32.mrb[54].mxu0  ;;  %v13089_v58 = vpop.f32.mrb[78].mxu1 }
 0x55a   : > { %18227 = vst [vmem:[#allocation37_spill] sm:$0xff] %v13073_v16  ;;  %v13077_v8 = vpop.f32.mrb[55].mxu0  ;;  %v13093_v5 = vpop.f32.mrb[79].mxu1 }
 0x55b   : > { %18228 = vst [vmem:[#allocation38_spill] sm:$0xff] %v13077_v8  ;;  %v1945_v34 = vmax.f32 %v13073_v16, %v13077_v8 }
 0x55d   : > { %1946 = vmax.xlane.f32.xlu1 %v1945_v34  ;;  %v13085_v19 = vpop.f32.mrb[56].mxu0  ;;  %v13101_v34 = vpop.f32.mrb[80].mxu1 }
 0x55e   : > { %18229 = vst [vmem:[#allocation39_spill] sm:$0xff] %v13085_v19  ;;  %v13087_v1 = vpop.f32.mrb[57].mxu0  ;;  %v13105_v15 = vpop.f32.mrb[81].mxu1 }
 0x55f   : > { %18230 = vst [vmem:[#allocation40_spill] sm:$0xff] %v13087_v1  ;;  %v1948_v36 = vmax.f32 %v13085_v19, %v13087_v1 }
 0x561   : > { %1949 = vmax.xlane.f32.xlu0 %v1948_v36  ;;  %v13097_v44 = vpop.f32.mrb[58].mxu0  ;;  %v13113_v36 = vpop.f32.mrb[82].mxu1 }
 0x562   : > { %18231 = vst [vmem:[#allocation41_spill] sm:$0xff] %v13097_v44  ;;  %v13099_v14 = vpop.f32.mrb[59].mxu0  ;;  %v13117_v47 = vpop.f32.mrb[83].mxu1 }
 0x563   : > { %18232 = vst [vmem:[#allocation42_spill] sm:$0xff] %v13099_v14  ;;  %v1951_v46 = vmax.f32 %v13097_v44, %v13099_v14 }
 0x565   : > { %1952 = vmax.xlane.f32.xlu1 %v1951_v46  ;;  %v13109_v57 = vpop.f32.mrb[60].mxu0  ;;  %v13125_v46 = vpop.f32.mrb[84].mxu1 }
 0x566   : > { %18233 = vst [vmem:[#allocation43_spill] sm:$0xff] %v13109_v57  ;;  %v13111_v32 = vpop.f32.mrb[61].mxu0  ;;  %18237 = vst [vmem:[#allocation47_spill] sm:$0xff] %v13125_v46  ;;  %v13129_v23 = vpop.f32.mrb[85].mxu1 }
 0x567   : > { %18234 = vst [vmem:[#allocation44_spill] sm:$0xff] %v13111_v32  ;;  %v1954_v61 = vmax.f32 %v13109_v57, %v13111_v32  ;;  %18238 = vst [vmem:[#allocation48_spill] sm:$0xff] %v13129_v23 }
 0x569   : > { %1955 = vmax.xlane.f32.xlu0 %v1954_v61  ;;  %v13121_v59 = vpop.f32.mrb[62].mxu0  ;;  %v13137_v61 = vpop.f32.mrb[86].mxu1 }
 0x56a   : > { %18235 = vst [vmem:[#allocation45_spill] sm:$0xff] %v13121_v59  ;;  %v13123_v20 = vpop.f32.mrb[63].mxu0  ;;  %18241 = vst [vmem:[#allocation51_spill] sm:$0xff] %v13137_v61  ;;  %v13141_v14 = vpop.f32.mrb[87].mxu1 }
 0x56b   : > { %18236 = vst [vmem:[#allocation46_spill] sm:$0xff] %v13123_v20  ;;  %v1957_v4 = vmax.f32 %v13121_v59, %v13123_v20  ;;  %18242 = vst [vmem:[#allocation52_spill] sm:$0xff] %v13141_v14 }
 0x56d   : > { %1958 = vmax.xlane.f32.xlu1 %v1957_v4  ;;  %v13133_v32 = vpop.f32.mrb[64].mxu0  ;;  %v13149_v4 = vpop.f32.mrb[88].mxu1 }
 0x56e   : > { %18239 = vst [vmem:[#allocation49_spill] sm:$0xff] %v13133_v32  ;;  %v13135_v57 = vpop.f32.mrb[65].mxu0  ;;  %18245 = vst [vmem:[#allocation55_spill] sm:$0xff] %v13149_v4  ;;  %v13153_v1 = vpop.f32.mrb[89].mxu1 }
 0x56f   : > { %18240 = vst [vmem:[#allocation50_spill] sm:$0xff] %v13135_v57  ;;  %v1960_v41 = vmax.f32 %v13133_v32, %v13135_v57  ;;  %18246 = vst [vmem:[#allocation56_spill] sm:$0xff] %v13153_v1 }
 0x571   : > { %1961 = vmax.xlane.f32.xlu0 %v1960_v41  ;;  %v13145_v59 = vpop.f32.mrb[66].mxu0  ;;  %v13161_v41 = vpop.f32.mrb[90].mxu1 }
 0x572   : > { %18243 = vst [vmem:[#allocation53_spill] sm:$0xff] %v13145_v59  ;;  %v13147_v44 = vpop.f32.mrb[67].mxu0  ;;  %18249 = vst [vmem:[#allocation59_spill] sm:$0xff] %v13161_v41  ;;  %v13165_v8 = vpop.f32.mrb[91].mxu1 }
 0x573   : > { %18244 = vst [vmem:[#allocation54_spill] sm:$0xff] %v13147_v44  ;;  %v1963_v55 = vmax.f32 %v13145_v59, %v13147_v44  ;;  %18250 = vst [vmem:[#allocation60_spill] sm:$0xff] %v13165_v8 }
 0x575   : > { %1964 = vmax.xlane.f32.xlu1 %v1963_v55  ;;  %v13157_v32 = vpop.f32.mrb[68].mxu0  ;;  %v13173_v55 = vpop.f32.mrb[92].mxu1 }
 0x576   : > { %18247 = vst [vmem:[#allocation57_spill] sm:$0xff] %v13157_v32  ;;  %v13159_v19 = vpop.f32.mrb[69].mxu0  ;;  %18253 = vst [vmem:[#allocation63_spill] sm:$0xff] %v13173_v55  ;;  %v13177_v22 = vpop.f32.mrb[93].mxu1 }
 0x577   : > { %18248 = vst [vmem:[#allocation58_spill] sm:$0xff] %v13159_v19  ;;  %v1966_v20 = vmax.f32 %v13157_v32, %v13159_v19  ;;  %18254 = vst [vmem:[#allocation64_spill] sm:$0xff] %v13177_v22 }
 0x579   : > { %1967 = vmax.xlane.f32.xlu0 %v1966_v20  ;;  %v13169_v59 = vpop.f32.mrb[70].mxu0  ;;  %v13185_v20 = vpop.f32.mrb[94].mxu1 }
 0x57a   : > { %18251 = vst [vmem:[#allocation61_spill] sm:$0xff] %v13169_v59  ;;  %v13171_v16 = vpop.f32.mrb[71].mxu0  ;;  %18255 = vst [vmem:[#allocation65_spill] sm:$0xff] %v13185_v20  ;;  %v13189_v40 = vpop.f32.mrb[95].mxu1 }
 0x57b   : > { %18252 = vst [vmem:[#allocation62_spill] sm:$0xff] %v13171_v16  ;;  %v1969_v57 = vmax.f32 %v13169_v59, %v13171_v16  ;;  %18256 = vst [vmem:[#allocation66_spill] sm:$0xff] %v13189_v40 }
 0x57c   : > { %v13197_v19 = vpop.f32.mrb[96].mxu1 }
 0x57d   : > { %1970 = vmax.xlane.f32.xlu1 %v1969_v57  ;;  %v13181_v32 = vpop.f32.mrb[72].mxu0  ;;  %18257 = vst [vmem:[#allocation67_spill] sm:$0xff] %v13197_v19  ;;  %v13201_v22 = vpop.f32.mrb[97].mxu1 }
 0x57e   : > { %v13183_v60 = vpop.f32.mrb[73].mxu0  ;;  %18258 = vst [vmem:[#allocation68_spill] sm:$0xff] %v13201_v22 }
 0x580   : > { %v13209_v11 = vpop.f32.mrb[98].mxu1 }
 0x581   : > { %v13193_v59 = vpop.f32.mrb[74].mxu0  ;;  %18261 = vst [vmem:[#allocation71_spill] sm:$0xff] %v13209_v11  ;;  %v13213_v40 = vpop.f32.mrb[99].mxu1 }
 0x582   : > { %v13195_v8 = vpop.f32.mrb[75].mxu0  ;;  %18262 = vst [vmem:[#allocation72_spill] sm:$0xff] %v13213_v40 }
 0x584   : > { %v13221_v1 = vpop.f32.mrb[100].mxu1 }
 0x585   : > { %v13205_v44 = vpop.f32.mrb[76].mxu0  ;;  %18265 = vst [vmem:[#allocation75_spill] sm:$0xff] %v13221_v1  ;;  %v13225_v22 = vpop.f32.mrb[101].mxu1 }
 0x586   : > { %18259 = vst [vmem:[#allocation69_spill] sm:$0xff] %v13205_v44  ;;  %v13207_v41 = vpop.f32.mrb[77].mxu0  ;;  %18266 = vst [vmem:[#allocation76_spill] sm:$0xff] %v13225_v22 }
 0x587   : > { %18260 = vst [vmem:[#allocation70_spill] sm:$0xff] %v13207_v41 }
 0x588   : > { %v13233_v3 = vpop.f32.mrb[102].mxu1 }
 0x589   : > { %v13217_v57 = vpop.f32.mrb[78].mxu0  ;;  %18269 = vst [vmem:[#allocation79_spill] sm:$0xff] %v13233_v3  ;;  %v13237_v40 = vpop.f32.mrb[103].mxu1 }
 0x58a   : > { %18263 = vst [vmem:[#allocation73_spill] sm:$0xff] %v13217_v57  ;;  %v13219_v21 = vpop.f32.mrb[79].mxu0  ;;  %18270 = vst [vmem:[#allocation80_spill] sm:$0xff] %v13237_v40 }
 0x58b   : > { %18264 = vst [vmem:[#allocation74_spill] sm:$0xff] %v13219_v21 }
 0x58c   : > { %v13241_v55 = vpop.f32.mrb[104].mxu1 }
 0x58d   : > { %v13229_v16 = vpop.f32.mrb[80].mxu0  ;;  %18271 = vst [vmem:[#allocation81_spill] sm:$0xff] %v13241_v55  ;;  %v13245_v14 = vpop.f32.mrb[105].mxu1 }
 0x58e   : > { %18267 = vst [vmem:[#allocation77_spill] sm:$0xff] %v13229_v16  ;;  %v13231_v4 = vpop.f32.mrb[81].mxu0  ;;  %18273 = vst [vmem:[#allocation83_spill] sm:$0xff] %v13245_v14 }
 0x58f   : > { %18268 = vst [vmem:[#allocation78_spill] sm:$0xff] %v13231_v4 }
 0x590   : > { %v13251_v1 = vpop.f32.mrb[106].mxu1 }
 0x591   : > { %v13243_v52 = vpop.f32.mrb[82].mxu0  ;;  %18275 = vst [vmem:[#allocation85_spill] sm:$0xff] %v13251_v1  ;;  %v13255_v61 = vpop.f32.mrb[107].mxu1 }
 0x592   : > { %18272 = vst [vmem:[#allocation82_spill] sm:$0xff] %v13243_v52  ;;  %v13247_v19 = vpop.f32.mrb[83].mxu0  ;;  %18276 = vst [vmem:[#allocation86_spill] sm:$0xff] %v13255_v61 }
 0x593   : > { %18274 = vst [vmem:[#allocation84_spill] sm:$0xff] %v13247_v19 }
 0x594   : > { %v13259_v40 = vpop.f32.mrb[108].mxu1 }
 0x595   : > { %18277 = vst [vmem:[#allocation87_spill] sm:$0xff] %v13259_v40  ;;  %v13261_v3 = vpop.f32.mrb[84].mxu0  ;;  %v13263_v38 = vpop.f32.mrb[109].mxu1 }
 0x596   : > { %18278 = vst [vmem:[#allocation88_spill] sm:$0xff] %v13261_v3  ;;  %18279 = vst [vmem:[#allocation89_spill] sm:$0xff] %v13263_v38  ;;  %v13265_v33 = vpop.f32.mrb[85].mxu0 }
 0x597   : > { %18280 = vst [vmem:[#allocation90_spill] sm:$0xff] %v13265_v33 }
 0x598   : > { %v13271_v20 = vpop.f32.mrb[110].mxu1 }
 0x599   : > { %18281 = vst [vmem:[#allocation91_spill] sm:$0xff] %v13271_v20  ;;  %v13273_v55 = vpop.f32.mrb[86].mxu0  ;;  %v13275_v23 = vpop.f32.mrb[111].mxu1 }
 0x59a   : > { %18282 = vst [vmem:[#allocation92_spill] sm:$0xff] %v13273_v55  ;;  %18283 = vst [vmem:[#allocation93_spill] sm:$0xff] %v13275_v23  ;;  %v13277_v11 = vpop.f32.mrb[87].mxu0 }
 0x59b   : > { %18284 = vst [vmem:[#allocation94_spill] sm:$0xff] %v13277_v11 }
 0x59c   : > { %v13283_v46 = vpop.f32.mrb[112].mxu1 }
 0x59d   : > { %18285 = vst [vmem:[#allocation95_spill] sm:$0xff] %v13283_v46  ;;  %v13285_v22 = vpop.f32.mrb[113].mxu1 }
 0x59e   : > { %18286 = vst [vmem:[#allocation96_spill] sm:$0xff] %v13285_v22 }
 0x5a0   : > { %v13289_v38 = vpop.f32.mrb[114].mxu1 }
 0x5a1   : > { %18287 = vst [vmem:[#allocation97_spill] sm:$0xff] %v13289_v38  ;;  %v13291_v40 = vpop.f32.mrb[115].mxu1 }
 0x5a2   : > { %18288 = vst [vmem:[#allocation98_spill] sm:$0xff] %v13291_v40 }
 0x5a4   : > { %v13295_v3 = vpop.f32.mrb[116].mxu1 }
 0x5a5   : > { %18289 = vst [vmem:[#allocation99_spill] sm:$0xff] %v13295_v3  ;;  %v13297_v61 = vpop.f32.mrb[117].mxu1 }
 0x5a6   : > { %18290 = vst [vmem:[#allocation100_spill] sm:$0xff] %v13297_v61 }
 0x5a8   : > { %v13301_v23 = vpop.f32.mrb[118].mxu1 }
 0x5a9   : > { %18291 = vst [vmem:[#allocation101_spill] sm:$0xff] %v13301_v23  ;;  %v13303_v20 = vpop.f32.mrb[119].mxu1 }
 0x5aa   : > { %18292 = vst [vmem:[#allocation102_spill] sm:$0xff] %v13303_v20 }
 0x5ac   : > { %v13307_v22 = vpop.f32.mrb[120].mxu1 }
 0x5ad   : > { %18293 = vst [vmem:[#allocation103_spill] sm:$0xff] %v13307_v22  ;;  %v13309_v46 = vpop.f32.mrb[121].mxu1 }
 0x5ae   : > { %18294 = vst [vmem:[#allocation104_spill] sm:$0xff] %v13309_v46  ;;  %v1902_v11 = vpop.xlane.xlu1 %1901 }
 0x5af   : > { %v1996_v40 = vsub.f32 %v12949_v12, %v1902_v11  ;;  %v1997_v38 = vsub.f32 %v12951_v42, %v1902_v11 }
 0x5b1   : > { %v2060_v1 = vmul.f32 1.442695, %v1996_v40  ;;  %v2062_v61 = vmul.f32 1.442695, %v1997_v38 }
 0x5b2   : > { %v1905_v3 = vpop.xlane.xlu0 %1904 }
 0x5b3   : > { %10587 = vpow2.f32 %v2060_v1  ;;  %v1998_v55 = vsub.f32 %v12955_v48, %v1905_v3  ;;  %v1999_v14 = vsub.f32 %v12957_v51, %v1905_v3 }
 0x5b4   : > { %10589 = vpow2.f32 %v2062_v61 }
 0x5b5   : > { %v2064_v20 = vmul.f32 1.442695, %v1998_v55  ;;  %v2066_v23 = vmul.f32 1.442695, %v1999_v14 }
 0x5b6   : > { %v1908_v35 = vpop.xlane.xlu1 %1907 }
 0x5b7   : > { %10591 = vpow2.f32 %v2064_v20  ;;  %v2000_v7 = vsub.f32 %v12961_v28, %v1908_v35  ;;  %v2001_v33 = vsub.f32 %v12963_v9, %v1908_v35  ;;  %v18295_v35 = vmax.f32 %v13181_v32, %v13183_v60 }
 0x5b8   : > { %10593 = vpow2.f32 %v2066_v23 }
 0x5b9   : > { %v2068_v12 = vmul.f32 1.442695, %v2000_v7  ;;  %v2070_v42 = vmul.f32 1.442695, %v2001_v33 }
 0x5ba   : > { %v1911_v11 = vpop.xlane.xlu1 %1910 }
 0x5bb   : > { %v2002_v38 = vsub.f32 %v12967_v18, %v1911_v11  ;;  %v2003_v1 = vsub.f32 %v12969_v45, %v1911_v11  ;;  %10595 = vpow2.f32 %v2068_v12 }
 0x5bc   : > { %10597 = vpow2.f32 %v2070_v42  ;;  %v18296_v42 = vmax.f32 %v13193_v59, %v13195_v8 }
 0x5bd   : > { %v13321_v48 = vpop.eup %10587  ;;  %v2072_v51 = vmul.f32 1.442695, %v2002_v38  ;;  %v2074_v14 = vmul.f32 1.442695, %v2003_v1 }
 0x5be   : > { %v13323_v3 = vpop.eup %10589  ;;  %v1914_v18 = vpop.xlane.xlu0 %1913 }
 0x5bf   : > { %v2188_v28 = vadd.f32 %v13323_v3, %v13321_v48  ;;  %10599 = vpow2.f32 %v2072_v51  ;;  %v2004_v7 = vsub.f32 %v12973_v53, %v1914_v18  ;;  %v2005_v33 = vsub.f32 %v12977_v17, %v1914_v18 }
 0x5c0   : > { %10601 = vpow2.f32 %v2074_v14  ;;  %v18297_v53 = vmax.f32 %v13015_v62, %v13019_v26  ;;  %v18298_v14 = vmax.f32 %v13027_v13, %v13031_v31 }
 0x5c1   : > { %v13327_v9 = vpop.eup %10591  ;;  %2189 = vadd.xlane.f32.xlu0 %v2188_v28  ;;  %v2076_v20 = vmul.f32 1.442695, %v2004_v7  ;;  %v2078_v11 = vmul.f32 1.442695, %v2005_v33  ;;  %v18301_v33 = vmax.f32 %v13051_v37, %v13055_v10 }
 0x5c2   : > { %v13329_v23 = vpop.eup %10593  ;;  %v1917_v40 = vpop.xlane.xlu1 %1916 }
 0x5c3   : > { %v2191_v45 = vadd.f32 %v13329_v23, %v13327_v9  ;;  %v2006_v12 = vsub.f32 %v12983_v56, %v1917_v40  ;;  %v2007_v38 = vsub.f32 %v12985_v54, %v1917_v40  ;;  %10603 = vpow2.f32 %v2076_v20 }
 0x5c4   : > { %10605 = vpow2.f32 %v2078_v11  ;;  %v18299_v54 = vmax.f32 %v13039_v6, %v13043_v25 }
 0x5c5   : > { %2192 = vadd.xlane.f32.xlu1 %v2191_v45  ;;  %1973 = vmax.xlane.f32.xlu0 %v18295_v35  ;;  %v13338_v61 = vpop.eup %10595  ;;  %v2080_v56 = vmul.f32 1.442695, %v2006_v12  ;;  %v2082_v28 = vmul.f32 1.442695, %v2007_v38  ;;  %v18300_v35 = vmax.f32 %v13205_v44, %v13207_v41  ;;  %v18304_v38 = vmax.f32 %v13217_v57, %v13219_v21  ;;  %v18330_v57 = vld [vmem:[#allocation90_spill] sm:$0xff] }
 0x5c6   : > { %v13340_v55 = vpop.eup %10597  ;;  %v1920_v45 = vpop.xlane.xlu0 %1919  ;;  %v18410_v41 = vld [vmem:[#allocation42_spill] sm:$0xff] }
 0x5c7   : > { %v2194_v1 = vadd.f32 %v13340_v55, %v13338_v61  ;;  %10607 = vpow2.f32 %v2080_v56  ;;  %v2008_v7 = vsub.f32 %v12989_v49, %v1920_v45  ;;  %v2009_v40 = vsub.f32 %v12991_v0, %v1920_v45 }
 0x5c8   : > { %10609 = vpow2.f32 %v2082_v28  ;;  %v18303_v49 = vmax.f32 %v13063_v43, %v13067_v2 }
 0x5c9   : > { %1976 = vmax.xlane.f32.xlu1 %v18296_v42  ;;  %3102 = vmax.xlane.f32.xlu0 %v18297_v53  ;;  %v13350_v17 = vpop.eup %10599  ;;  %v2084_v53 = vmul.f32 1.442695, %v2008_v7 }
 0x5ca   : > { %v13354_v51 = vpop.eup %10601  ;;  %v1923_v20 = vpop.xlane.xlu1 %1922 }
 0x5cb   : > { %v2197_v18 = vadd.f32 %v13354_v51, %v13350_v17  ;;  %v2010_v11 = vsub.f32 %v12995_v30, %v1923_v20  ;;  %v2011_v56 = vsub.f32 %v12997_v24, %v1923_v20  ;;  %10611 = vpow2.f32 %v2084_v53 }
 0x5cc   : > { %v18308_v24 = vmax.f32 %v13089_v58, %v13093_v5 }
 0x5cd   : > { %3105 = vmax.xlane.f32.xlu1 %v18298_v14  ;;  %2195 = vadd.xlane.f32.xlu0 %v2194_v1  ;;  %v13372_v12 = vpop.eup %10603  ;;  %v2086_v1 = vmul.f32 1.442695, %v2009_v40  ;;  %v2088_v30 = vmul.f32 1.442695, %v2010_v11  ;;  %v18310_v40 = vmax.f32 %v13101_v34, %v13105_v15 }
 0x5ce   : > { %18302 = vst [vmem:[#allocation105_spill] sm:$0xff] %v13372_v12  ;;  %v13374_v42 = vpop.eup %10605  ;;  %v1926_v7 = vpop.xlane.xlu0 %1925 }
 0x5cf   : > { %v2200_v14 = vadd.f32 %v13374_v42, %v13372_v12  ;;  %10613 = vpow2.f32 %v2086_v1  ;;  %v2013_v20 = vsub.f32 %v13003_v29, %v1926_v7 }
 0x5d0   : > { %10615 = vpow2.f32 %v2088_v30  ;;  %v18315_v30 = vld [vmem:[#allocation7_spill] sm:$0xff] }
 0x5d1   : > { %3108 = vmax.xlane.f32.xlu0 %v18299_v54  ;;  %2198 = vadd.xlane.f32.xlu1 %v2197_v18  ;;  %v13384_v0 = vpop.eup %10607  ;;  %v18307_v18 = vmax.f32 %v13075_v50, %v13079_v27  ;;  %v2090_v54 = vmul.f32 1.442695, %v2011_v56  ;;  %v18314_v56 = vmax.f32 %v13243_v52, %v13247_v19  ;;  %v18322_v19 = vld [vmem:[#allocation31_spill] sm:$0xff] }
 0x5d2   : > { %18305 = vst [vmem:[#allocation106_spill] sm:$0xff] %v13384_v0  ;;  %v13388_v28 = vpop.eup %10609  ;;  %v1929_v53 = vpop.xlane.xlu1 %1928 }
 0x5d3   : > { %18306 = vst [vmem:[#allocation107_spill] sm:$0xff] %v13388_v28  ;;  %v2203_v45 = vadd.f32 %v13388_v28, %v13384_v0  ;;  %10617 = vpow2.f32 %v2090_v54  ;;  %v2014_v1 = vsub.f32 %v13007_v63, %v1929_v53  ;;  %v18332_v0 = vld [vmem:[#allocation55_spill] sm:$0xff]  ;;  %v18414_v28 = vld [vmem:[#allocation46_spill] sm:$0xff] }
 0x5d5   : > { %1979 = vmax.xlane.f32.xlu0 %v18300_v35  ;;  %3111 = vmax.xlane.f32.xlu1 %v18301_v33  ;;  %v2012_v35 = vsub.f32 %v13001_v39, %v1926_v7  ;;  %v18309_v33 = vmax.f32 %v13229_v16, %v13231_v4  ;;  %v13406_v11 = vpop.eup %10611  ;;  %v18313_v39 = vmax.f32 %v13113_v36, %v13117_v47 }
 0x5d6   : > { %18311 = vst [vmem:[#allocation108_spill] sm:$0xff] %v13406_v11  ;;  %v1932_v29 = vpop.xlane.xlu0 %1931 }
 0x5d7   : > { %v2017_v52 = vsub.f32 %v18322_v19, %v1932_v29  ;;  %v18335_v19 = vld [vmem:[#allocation20_spill] sm:$0xff] }
 0x5d9   : > { %3114 = vmax.xlane.f32.xlu0 %v18303_v49  ;;  %1982 = vmax.xlane.f32.xlu1 %v18304_v38  ;;  %v13408_v49 = vpop.eup %10613  ;;  %v2092_v38 = vmul.f32 1.442695, %v2012_v35  ;;  %v2096_v35 = vmul.f32 1.442695, %v2014_v1 }
 0x5da   : > { %18312 = vst [vmem:[#allocation109_spill] sm:$0xff] %v13408_v49  ;;  %v13418_v54 = vpop.eup %10615  ;;  %v1935_v4 = vpop.xlane.xlu1 %1934 }
 0x5db   : > { %18316 = vst [vmem:[#allocation7_spill] sm:$0xff] %v13418_v54  ;;  %10619 = vpow2.f32 %v2092_v38 }
 0x5dd   : > { %2201 = vadd.xlane.f32.xlu0 %v2200_v14  ;;  %3117 = vmax.xlane.f32.xlu1 %v18307_v18  ;;  %v2094_v14 = vmul.f32 1.442695, %v2013_v20  ;;  %v2015_v18 = vsub.f32 %v18315_v30, %v1929_v53  ;;  %v13424_v63 = vpop.eup %10617  ;;  %v18319_v20 = vld [vmem:[#allocation47_spill] sm:$0xff] }
 0x5de   : > { %18317 = vst [vmem:[#allocation110_spill] sm:$0xff] %v13424_v63 }
 0x5df   : > { %10621 = vpow2.f32 %v2094_v14  ;;  %v2098_v30 = vmul.f32 1.442695, %v2015_v18  ;;  %v2102_v14 = vmul.f32 1.442695, %v2017_v52  ;;  %v18327_v18 = vld [vmem:[#allocation30_spill] sm:$0xff] }
 0x5e0   : > { %10623 = vpow2.f32 %v2096_v35 }
 0x5e1   : > { %3120 = vmax.xlane.f32.xlu0 %v18308_v24  ;;  %2204 = vadd.xlane.f32.xlu1 %v2203_v45  ;;  %v2206_v45 = vadd.f32 %v13408_v49, %v13406_v11  ;;  %v13422_v24 = vpop.f32.mrb[122].mxu1  ;;  %v2209_v11 = vadd.f32 %v13424_v63, %v13418_v54  ;;  %v18325_v49 = vld [vmem:[#allocation52_spill] sm:$0xff]  ;;  %10625 = vpow2.f32 %v2098_v30  ;;  %v18328_v63 = vld [vmem:[#allocation21_spill] sm:$0xff] }
 0x5e2   : > { %v13426_v7 = vpop.f32.mrb[123].mxu1  ;;  %v1941_v52 = vpop.xlane.xlu1 %1940 }
 0x5e3   : > { %v13437_v38 = vpop.f32.mrb[124].mxu1 }
 0x5e4   : > { %v13439_v1 = vpop.f32.mrb[125].mxu1 }
 0x5e5   : > { %1985 = vmax.xlane.f32.xlu0 %v18309_v33  ;;  %3123 = vmax.xlane.f32.xlu1 %v18310_v40  ;;  %v18318_v33 = vld [vmem:[#allocation17_spill] sm:$0xff] }
 0x5e6   : > { %v2016_v40 = vsub.f32 %v18318_v33, %v1932_v29  ;;  %v18323_v33 = vld [vmem:[#allocation16_spill] sm:$0xff]  ;;  %v2019_v29 = vsub.f32 %v18327_v18, %v1935_v4  ;;  %v18339_v18 = vld [vmem:[#allocation59_spill] sm:$0xff] }
 0x5e7   : > { %v2018_v16 = vsub.f32 %v18323_v33, %v1935_v4 }
 0x5e9   : > { %3126 = vmax.xlane.f32.xlu0 %v18313_v39  ;;  %1988 = vmax.xlane.f32.xlu1 %v18314_v56  ;;  %v18320_v39 = vld [vmem:[#allocation48_spill] sm:$0xff]  ;;  %v1938_v56 = vpop.xlane.xlu0 %1937  ;;  %v2104_v54 = vmul.f32 1.442695, %v2018_v16 }
 0x5ea   : > { %v18321_v53 = vmax.f32 %v18319_v20, %v18320_v39  ;;  %v2020_v35 = vsub.f32 %v18328_v63, %v1938_v56  ;;  %v2021_v30 = vsub.f32 %v18335_v19, %v1938_v56  ;;  %v18338_v63 = vld [vmem:[#allocation33_spill] sm:$0xff]  ;;  %v18345_v56 = vld [vmem:[#allocation34_spill] sm:$0xff] }
 0x5eb   : > { %v2023_v19 = vsub.f32 %v18345_v56, %v1941_v52 }
 0x5ec   : > { %v2108_v16 = vmul.f32 1.442695, %v2020_v35  ;;  %v13472_v35 = vpop.f32.mrb[126].mxu1 }
 0x5ed   : > { %2207 = vadd.xlane.f32.xlu0 %v2206_v45  ;;  %3129 = vmax.xlane.f32.xlu1 %v18321_v53  ;;  %v2100_v45 = vmul.f32 1.442695, %v2016_v40  ;;  %v18324_v53 = vld [vmem:[#allocation51_spill] sm:$0xff]  ;;  %v18329_v40 = vld [vmem:[#allocation88_spill] sm:$0xff]  ;;  %18347 = vst [vmem:[#allocation31_spill] sm:$0xff] %v13472_v35 }
 0x5ee   : > { %v18326_v21 = vmax.f32 %v18324_v53, %v18325_v49  ;;  %v18331_v33 = vmax.f32 %v18329_v40, %v18330_v57  ;;  %v18333_v49 = vld [vmem:[#allocation56_spill] sm:$0xff]  ;;  %v13456_v53 = vpop.eup %10619 }
 0x5ef   : > { %10627 = vpow2.f32 %v2100_v45  ;;  %18336 = vst [vmem:[#allocation17_spill] sm:$0xff] %v13456_v53  ;;  %v13458_v4 = vpop.eup %10621  ;;  %v2022_v45 = vsub.f32 %v18338_v63, %v1941_v52  ;;  %v18340_v57 = vld [vmem:[#allocation60_spill] sm:$0xff]  ;;  %v2114_v52 = vmul.f32 1.442695, %v2023_v19 }
 0x5f0   : > { %10629 = vpow2.f32 %v2102_v14  ;;  %18337 = vst [vmem:[#allocation47_spill] sm:$0xff] %v13458_v4  ;;  %v18342_v40 = vld [vmem:[#allocation92_spill] sm:$0xff]  ;;  %v2110_v14 = vmul.f32 1.442695, %v2021_v30 }
 0x5f1   : > { %3132 = vmax.xlane.f32.xlu0 %v18326_v21  ;;  %2210 = vadd.xlane.f32.xlu1 %v2209_v11  ;;  %v18334_v21 = vmax.f32 %v18332_v0, %v18333_v49  ;;  %v2106_v11 = vmul.f32 1.442695, %v2019_v29  ;;  %10631 = vpow2.f32 %v2104_v54  ;;  %v18343_v49 = vld [vmem:[#allocation94_spill] sm:$0xff]  ;;  %v13468_v29 = vpop.eup %10623  ;;  %v2212_v54 = vadd.f32 %v13458_v4, %v13456_v53  ;;  %v13476_v0 = vpop.f32.mrb[127].mxu1 }
 0x5f2   : > { %18346 = vst [vmem:[#allocation48_spill] sm:$0xff] %v13468_v29  ;;  %v13474_v63 = vpop.eup %10625  ;;  %18349 = vst [vmem:[#allocation30_spill] sm:$0xff] %v13476_v0  ;;  %v13487_v53 = vpop.f32.mrb[128].mxu1 }
 0x5f3   : > { %10633 = vpow2.f32 %v2106_v11  ;;  %18348 = vst [vmem:[#allocation16_spill] sm:$0xff] %v13474_v63  ;;  %18354 = vst [vmem:[#allocation20_spill] sm:$0xff] %v13487_v53 }
 0x5f4   : > { %10635 = vpow2.f32 %v2108_v16  ;;  %v13491_v16 = vpop.f32.mrb[129].mxu1 }
 0x5f5   : > { %1991 = vmax.xlane.f32.xlu0 %v18331_v33  ;;  %3135 = vmax.xlane.f32.xlu1 %v18334_v21  ;;  %v18341_v33 = vmax.f32 %v18339_v18, %v18340_v57  ;;  %v18344_v21 = vmax.f32 %v18342_v40, %v18343_v49  ;;  %v18350_v49 = vld [vmem:[#allocation63_spill] sm:$0xff]  ;;  %10637 = vpow2.f32 %v2110_v14  ;;  %v2215_v40 = vadd.f32 %v13474_v63, %v13468_v29  ;;  %v18368_v14 = vld [vmem:[#allocation72_spill] sm:$0xff]  ;;  %v18385_v18 = vld [vmem:[#allocation93_spill] sm:$0xff] }
 0x5f6   : > { %18356 = vst [vmem:[#allocation34_spill] sm:$0xff] %v13491_v16  ;;  %v18362_v63 = vld [vmem:[#allocation67_spill] sm:$0xff]  ;;  %v18406_v16 = vld [vmem:[#allocation38_spill] sm:$0xff] }
 0x5f9   : > { %3138 = vmax.xlane.f32.xlu0 %v18341_v33  ;;  %1994 = vmax.xlane.f32.xlu1 %v18344_v21  ;;  %v2112_v33 = vmul.f32 1.442695, %v2022_v45  ;;  %v18351_v21 = vld [vmem:[#allocation64_spill] sm:$0xff]  ;;  %v13483_v56 = vpop.eup %10627  ;;  %v18357_v45 = vld [vmem:[#allocation65_spill] sm:$0xff] }
 0x5fa   : > { %v18352_v11 = vmax.f32 %v18350_v49, %v18351_v21  ;;  %18353 = vst [vmem:[#allocation21_spill] sm:$0xff] %v13483_v56  ;;  %v13489_v4 = vpop.eup %10629  ;;  %v18363_v21 = vld [vmem:[#allocation68_spill] sm:$0xff] }
 0x5fb   : > { %18355 = vst [vmem:[#allocation33_spill] sm:$0xff] %v13489_v4  ;;  %10639 = vpow2.f32 %v2112_v33  ;;  %v13498_v19 = vpop.eup %10631  ;;  %v2218_v30 = vadd.f32 %v13489_v4, %v13483_v56  ;;  %v18364_v33 = vmax.f32 %v18362_v63, %v18363_v21  ;;  %v18373_v21 = vld [vmem:[#allocation76_spill] sm:$0xff] }
 0x5fc   : > { %10641 = vpow2.f32 %v2114_v52  ;;  %18360 = vst [vmem:[#allocation111_spill] sm:$0xff] %v13498_v19  ;;  %v18367_v52 = vld [vmem:[#allocation71_spill] sm:$0xff] }
 0x5fd   : > { %2213 = vadd.xlane.f32.xlu0 %v2212_v54  ;;  %3141 = vmax.xlane.f32.xlu1 %v18352_v11  ;;  %v18358_v54 = vld [vmem:[#allocation66_spill] sm:$0xff]  ;;  %v13502_v29 = vpop.eup %10633 }
 0x5fe   : > { %v18359_v11 = vmax.f32 %v18357_v45, %v18358_v54  ;;  %18361 = vst [vmem:[#allocation112_spill] sm:$0xff] %v13502_v29  ;;  %v13507_v49 = vpop.eup %10635  ;;  %v18369_v54 = vmax.f32 %v18367_v52, %v18368_v14  ;;  %v18376_v45 = vld [vmem:[#allocation80_spill] sm:$0xff] }
 0x5ff   : > { %18365 = vst [vmem:[#allocation113_spill] sm:$0xff] %v13507_v49 }
 0x601   : > { %3144 = vmax.xlane.f32.xlu0 %v18359_v11  ;;  %2216 = vadd.xlane.f32.xlu1 %v2215_v40  ;;  %v2221_v40 = vadd.f32 %v13502_v29, %v13498_v19  ;;  %v13511_v11 = vpop.eup %10637  ;;  %v18375_v29 = vld [vmem:[#allocation79_spill] sm:$0xff] }
 0x602   : > { %18366 = vst [vmem:[#allocation114_spill] sm:$0xff] %v13511_v11  ;;  %v18377_v14 = vmax.f32 %v18375_v29, %v18376_v45  ;;  %v18391_v45 = vld [vmem:[#allocation98_spill] sm:$0xff]  ;;  %v18394_v29 = vld [vmem:[#allocation96_spill] sm:$0xff] }
 0x605   : > { %2219 = vadd.xlane.f32.xlu0 %v2218_v30  ;;  %3147 = vmax.xlane.f32.xlu1 %v18364_v33  ;;  %v13516_v56 = vpop.eup %10639  ;;  %v2224_v30 = vadd.f32 %v13511_v11, %v13507_v49  ;;  %v18372_v33 = vld [vmem:[#allocation75_spill] sm:$0xff]  ;;  %v18381_v49 = vld [vmem:[#allocation81_spill] sm:$0xff] }
 0x606   : > { %18370 = vst [vmem:[#allocation115_spill] sm:$0xff] %v13516_v56  ;;  %v13520_v4 = vpop.eup %10641  ;;  %v18374_v63 = vmax.f32 %v18372_v33, %v18373_v21  ;;  %v18382_v11 = vld [vmem:[#allocation83_spill] sm:$0xff]  ;;  %v18388_v33 = vld [vmem:[#allocation89_spill] sm:$0xff] }
 0x607   : > { %18371 = vst [vmem:[#allocation116_spill] sm:$0xff] %v13520_v4  ;;  %v2227_v19 = vadd.f32 %v13520_v4, %v13516_v56  ;;  %v18383_v57 = vmax.f32 %v18381_v49, %v18382_v11  ;;  %v18390_v4 = vld [vmem:[#allocation97_spill] sm:$0xff]  ;;  %v18400_v49 = vld [vmem:[#allocation100_spill] sm:$0xff] }
 0x609   : > { %3150 = vmax.xlane.f32.xlu0 %v18369_v54  ;;  %2222 = vadd.xlane.f32.xlu1 %v2221_v40  ;;  %v18378_v54 = vld [vmem:[#allocation85_spill] sm:$0xff]  ;;  %v18379_v40 = vld [vmem:[#allocation86_spill] sm:$0xff] }
 0x60a   : > { %v18380_v52 = vmax.f32 %v18378_v54, %v18379_v40  ;;  %v18397_v54 = vld [vmem:[#allocation102_spill] sm:$0xff] }
 0x60d   : > { %2225 = vadd.xlane.f32.xlu0 %v2224_v30  ;;  %3153 = vmax.xlane.f32.xlu1 %v18374_v63  ;;  %v18384_v30 = vld [vmem:[#allocation91_spill] sm:$0xff] }
 0x60e   : > { %v18386_v21 = vmax.f32 %v18384_v30, %v18385_v18  ;;  %v18387_v63 = vld [vmem:[#allocation87_spill] sm:$0xff]  ;;  %v1947_v30 = vpop.xlane.xlu1 %1946 }
 0x60f   : > { %v18389_v56 = vmax.f32 %v18387_v63, %v18388_v33  ;;  %v18403_v33 = vld [vmem:[#allocation35_spill] sm:$0xff]  ;;  %v18405_v63 = vld [vmem:[#allocation37_spill] sm:$0xff] }
 0x611   : > { %3156 = vmax.xlane.f32.xlu0 %v18377_v14  ;;  %2228 = vadd.xlane.f32.xlu1 %v2227_v19  ;;  %v18392_v14 = vmax.f32 %v18390_v4, %v18391_v45  ;;  %v18393_v19 = vld [vmem:[#allocation95_spill] sm:$0xff] }
 0x612   : > { %v18395_v40 = vmax.f32 %v18393_v19, %v18394_v29 }
 0x615   : > { %3162 = vmax.xlane.f32.xlu0 %v18380_v52  ;;  %3159 = vmax.xlane.f32.xlu1 %v18383_v57  ;;  %v18396_v52 = vld [vmem:[#allocation101_spill] sm:$0xff]  ;;  %v18399_v57 = vld [vmem:[#allocation99_spill] sm:$0xff] }
 0x616   : > { %v18398_v11 = vmax.f32 %v18396_v52, %v18397_v54  ;;  %v18401_v18 = vmax.f32 %v18399_v57, %v18400_v49  ;;  %v2026_v54 = vsub.f32 %v18405_v63, %v1947_v30  ;;  %v2027_v49 = vsub.f32 %v18406_v16, %v1947_v30  ;;  %v18407_v57 = vld [vmem:[#allocation39_spill] sm:$0xff] }
 0x617   : > { %v18411_v16 = vld [vmem:[#allocation43_spill] sm:$0xff] }
 0x619   : > { %3168 = vmax.xlane.f32.xlu0 %v18386_v21  ;;  %3165 = vmax.xlane.f32.xlu1 %v18389_v56  ;;  %v18402_v21 = vmax.f32 %v13307_v22, %v13309_v46  ;;  %v1944_v56 = vpop.xlane.xlu0 %1943  ;;  %v18408_v22 = vld [vmem:[#allocation40_spill] sm:$0xff] }
 0x61a   : > { %v2024_v29 = vsub.f32 %v18403_v33, %v1944_v56  ;;  %v2122_v33 = vmul.f32 1.442695, %v2027_v49  ;;  %v18413_v49 = vld [vmem:[#allocation45_spill] sm:$0xff] }
 0x61d   : > { %3174 = vmax.xlane.f32.xlu0 %v18392_v14  ;;  %3171 = vmax.xlane.f32.xlu1 %v18395_v40  ;;  %v1950_v45 = vpop.xlane.xlu0 %1949  ;;  %v1953_v14 = vpop.xlane.xlu1 %1952  ;;  %v18404_v40 = vld [vmem:[#allocation36_spill] sm:$0xff] }
 0x61e   : > { %v2025_v19 = vsub.f32 %v18404_v40, %v1944_v56  ;;  %v2028_v53 = vsub.f32 %v18407_v57, %v1950_v45  ;;  %v2029_v12 = vsub.f32 %v18408_v22, %v1950_v45  ;;  %v18409_v40 = vld [vmem:[#allocation41_spill] sm:$0xff]  ;;  %v2031_v44 = vsub.f32 %v18410_v41, %v1953_v14  ;;  %v18412_v22 = vld [vmem:[#allocation44_spill] sm:$0xff] }
 0x61f   : > { %v2030_v63 = vsub.f32 %v18409_v40, %v1953_v14  ;;  %v18415_v41 = vld [vmem:[#allocation49_spill] sm:$0xff] }
 0x620   : > { %v2118_v46 = vmul.f32 1.442695, %v2025_v19  ;;  %v2124_v56 = vmul.f32 1.442695, %v2028_v53  ;;  %v2130_v53 = vmul.f32 1.442695, %v2031_v44 }
 0x621   : > { %3180 = vmax.xlane.f32.xlu0 %v18398_v11  ;;  %3177 = vmax.xlane.f32.xlu1 %v18401_v18  ;;  %v1956_v4 = vpop.xlane.xlu0 %1955  ;;  %v1959_v11 = vpop.xlane.xlu1 %1958  ;;  %v2116_v18 = vmul.f32 1.442695, %v2024_v29  ;;  %v2126_v29 = vmul.f32 1.442695, %v2029_v12  ;;  %v2128_v57 = vmul.f32 1.442695, %v2030_v63 }
 0x622   : > { %v2032_v30 = vsub.f32 %v18411_v16, %v1956_v4  ;;  %v2033_v45 = vsub.f32 %v18412_v22, %v1956_v4  ;;  %v2035_v40 = vsub.f32 %v18414_v28, %v1959_v11 }
 0x623   : > { %10643 = vpow2.f32 %v2116_v18  ;;  %v2034_v18 = vsub.f32 %v18413_v49, %v1959_v11 }
 0x624   : > { %10645 = vpow2.f32 %v2118_v46  ;;  %v2132_v46 = vmul.f32 1.442695, %v2032_v30  ;;  %v2134_v16 = vmul.f32 1.442695, %v2033_v45  ;;  %v2138_v4 = vmul.f32 1.442695, %v2035_v40 }
 0x625   : > { %3183 = vmax.xlane.f32.xlu1 %v18402_v21  ;;  %v1962_v52 = vpop.xlane.xlu0 %1961  ;;  %v2120_v21 = vmul.f32 1.442695, %v2026_v54  ;;  %v13563_v0 = vpop.xlane.xlu1 %1964 }
 0x626   : > { %v2036_v12 = vsub.f32 %v18415_v41, %v1962_v52 }
 0x627   : > { %10647 = vpow2.f32 %v2120_v21 }
 0x628   : > { %10649 = vpow2.f32 %v2122_v33  ;;  %v2136_v33 = vmul.f32 1.442695, %v2034_v18  ;;  %v2140_v44 = vmul.f32 1.442695, %v2036_v12 }
 0x629   : > { %v13565_v35 = vpop.xlane.xlu0 %1967  ;;  %v13570_v19 = vpop.xlane.xlu1 %1970  ;;  %10651 = vpow2.f32 %v2124_v56  ;;  %v18416_v56 = vld [vmem:[#allocation50_spill] sm:$0xff] }
 0x62a   : > { %v2037_v63 = vsub.f32 %v18416_v56, %v1962_v52 }
 0x62c   : > { %v2142_v52 = vmul.f32 1.442695, %v2037_v63 }
 0x62d   : > { %v13579_v22 = vpop.eup %10643 }
 0x64e   : > { %v2190_v54 = vpop.xlane.xlu0 %2189 }
 0x64f   : > { %10653 = vrcp.f32 %v2190_v54 }
 0x650   : > { %10655 = vpow2.f32 %v2126_v29  ;;  %v13583_v29 = vpop.eup %10645 }
 0x651   : > { %v13587_v45 = vpop.eup %10647 }
 0x652   : > { %v13576_v14 = vpop.xlane.xlu0 %1973  ;;  %v2193_v21 = vpop.xlane.xlu1 %2192 }
 0x653   : > { %10657 = vrcp.f32 %v2193_v21  ;;  %v18419_v21 = vld [vmem:[#allocation53_spill] sm:$0xff] }
 0x654   : > { %10659 = vpow2.f32 %v2128_v57  ;;  %v13589_v57 = vpop.eup %10649 }
 0x655   : > { %10661 = vpow2.f32 %v2130_v53  ;;  %v13591_v53 = vpop.eup %10651 }
 0x656   : > { %10663 = vpow2.f32 %v2132_v46  ;;  %v3103_v28 = vpop.xlane.xlu0 %3102  ;;  %v13581_v11 = vpop.xlane.xlu1 %1976  ;;  %18417 = vst [vmem:[#allocation35_spill] sm:$0xff] %v13591_v53 }
 0x657   : > { %10665 = vpow2.f32 %v2134_v16  ;;  %v3197_v30 = vsub.f32 %v13015_v62, %v3103_v28  ;;  %v3198_v54 = vsub.f32 %v13019_v26, %v3103_v28  ;;  %v2038_v16 = vsub.f32 %v18419_v21, %v13563_v0 }
 0x658   : > { %10667 = vpow2.f32 %v2136_v33 }
 0x659   : > { %10669 = vpow2.f32 %v2138_v4  ;;  %v3261_v49 = vmul.f32 1.442695, %v3197_v30  ;;  %v3263_v18 = vmul.f32 1.442695, %v3198_v54  ;;  %v10654_v41 = vpop.eup %10653  ;;  %v18420_v4 = vld [vmem:[#allocation54_spill] sm:$0xff] }
 0x65a   : > { %10671 = vpow2.f32 %v2140_v44  ;;  %v2196_v40 = vpop.xlane.xlu0 %2195  ;;  %v3106_v46 = vpop.xlane.xlu1 %3105  ;;  %v2039_v56 = vsub.f32 %v18420_v4, %v13563_v0 }
 0x65b   : > { %10673 = vpow2.f32 %v3261_v49  ;;  %v3199_v62 = vsub.f32 %v13027_v13, %v3106_v46  ;;  %v3200_v26 = vsub.f32 %v13031_v31, %v3106_v46  ;;  %v13595_v12 = vpop.eup %10655  ;;  %v2317_v13 = vmul.f32 %v10654_v41, %v13323_v3  ;;  %v18425_v3 = vld [vmem:[#allocation58_spill] sm:$0xff] }
 0x65c   : > { %18418 = vst [vmem:[#allocation36_spill] sm:$0xff] %v13595_v12  ;;  %10675 = vpow2.f32 %v3263_v18  ;;  %v2316_v49 = vmul.f32 %v10654_v41, %v13321_v48  ;;  %v2041_v4 = vsub.f32 %v18425_v3, %v13565_v35 }
 0x65d   : > { %v10658_v33 = vpop.eup %10657  ;;  %10677 = vpow2.f32 %v2142_v52  ;;  %v3265_v63 = vmul.f32 1.442695, %v3199_v62  ;;  %v3267_v44 = vmul.f32 1.442695, %v3200_v26  ;;  %v18423_v52 = vld [vmem:[#allocation57_spill] sm:$0xff] }
 0x65e   : > { %v13601_v28 = vpop.eup %10659  ;;  %v3109_v30 = vpop.xlane.xlu0 %3108  ;;  %v2319_v31 = vmul.f32 %v10658_v33, %v13329_v23  ;;  %v2318_v46 = vmul.f32 %v10658_v33, %v13327_v9  ;;  %v2040_v21 = vsub.f32 %v18423_v52, %v13565_v35  ;;  %10679 = vrcp.f32 %v2196_v40 }
 0x65f   : > { %18421 = vst [vmem:[#allocation37_spill] sm:$0xff] %v13601_v28  ;;  %v2199_v54 = vpop.xlane.xlu1 %2198  ;;  %v13607_v18 = vpop.eup %10661  ;;  %v3201_v0 = vsub.f32 %v13039_v6, %v3109_v30  ;;  %v3202_v62 = vsub.f32 %v13043_v25, %v3109_v30  ;;  %10681 = vpow2.f32 %v3265_v63  ;;  %v2144_v9 = vmul.f32 1.442695, %v2038_v16 }
 0x660   : > { %18422 = vst [vmem:[#allocation38_spill] sm:$0xff] %v13607_v18  ;;  %v13613_v26 = vpop.eup %10663  ;;  %v9844_v23 = vpack.c.bf16 %v2319_v31, %v2317_v13  ;;  %v9846_v48 = vpack.c.bf16 %v2318_v46, %v2316_v49  ;;  %10683 = vpow2.f32 %v3267_v44  ;;  %v2146_v40 = vmul.f32 1.442695, %v2039_v56  ;;  %v18428_v49 = vld [vmem:[#allocation61_spill] sm:$0xff] }
 0x661   : > { %18424 = vst [vmem:[#allocation39_spill] sm:$0xff] %v13613_v26  ;;  %v13617_v41 = vpop.eup %10665  ;;  %v3269_v33 = vmul.f32 1.442695, %v3201_v0  ;;  %v3271_v18 = vmul.f32 1.442695, %v3202_v62  ;;  %10685 = vrcp.f32 %v2199_v54  ;;  %v2042_v46 = vsub.f32 %v18428_v49, %v13570_v19 }
 0x662   : > { %18426 = vst [vmem:[#allocation40_spill] sm:$0xff] %v13617_v41  ;;  %v13619_v52 = vpop.eup %10667  ;;  %v13621_v6 = vpop.xlane.xlu0 %1979  ;;  %9845 = vmatprep.subr.bf16.mxu0 %v9844_v23  ;;  %v2148_v35 = vmul.f32 1.442695, %v2040_v21  ;;  %v2150_v16 = vmul.f32 1.442695, %v2041_v4 }
 0x663   : > { %v3112_v25 = vpop.xlane.xlu1 %3111  ;;  %v13623_v30 = vpop.eup %10669  ;;  %10687 = vpow2.f32 %v3269_v33  ;;  %9847 = vmatpush1.bf16.xpose.msra.mxu0 %v9846_v48  ;;  %v2152_v33 = vmul.f32 1.442695, %v2042_v46 }
 0x664   : > { %v3203_v63 = vsub.f32 %v13051_v37, %v3112_v25  ;;  %v13626_v13 = vpop.eup %10671  ;;  %10689 = vpow2.f32 %v3271_v18  ;;  %v3204_v44 = vsub.f32 %v13055_v10, %v3112_v25 }
 0x665   : > { %18427 = vst [vmem:[#allocation41_spill] sm:$0xff] %v13626_v13  ;;  %v13629_v31 = vpop.eup %10673  ;;  %10691 = vpow2.f32 %v2144_v9 }
 0x666   : > { %v3273_v56 = vmul.f32 1.442695, %v3203_v63  ;;  %v13631_v54 = vpop.eup %10675  ;;  %10693 = vpow2.f32 %v2146_v40  ;;  %v3275_v21 = vmul.f32 1.442695, %v3204_v44  ;;  %v3115_v0 = vpop.xlane.xlu0 %3114 }
 0x667   : > { %v13635_v37 = vpop.xlane.xlu1 %1982  ;;  %v13637_v62 = vpop.eup %10677  ;;  %10695 = vpow2.f32 %v2148_v35  ;;  %v3205_v18 = vsub.f32 %v13063_v43, %v3115_v0  ;;  %v3206_v10 = vsub.f32 %v13067_v2, %v3115_v0  ;;  %v3389_v3 = vadd.f32 %v13631_v54, %v13629_v31 }
 0x668   : > { %18429 = vst [vmem:[#allocation42_spill] sm:$0xff] %v13637_v62  ;;  %10697 = vpow2.f32 %v2150_v16  ;;  %v10680_v4 = vpop.eup %10679  ;;  %v18430_v16 = vld [vmem:[#allocation62_spill] sm:$0xff] }
 0x669   : > { %10699 = vpow2.f32 %v3273_v56  ;;  %v3277_v23 = vmul.f32 1.442695, %v3205_v18  ;;  %v3279_v48 = vmul.f32 1.442695, %v3206_v10  ;;  %v13643_v9 = vpop.eup %10681  ;;  %3390 = vadd.xlane.f32.xlu0 %v3389_v3  ;;  %v2043_v44 = vsub.f32 %v18430_v16, %v13570_v19 }
 0x66a   : > { %10701 = vpow2.f32 %v3275_v21  ;;  %v2202_v40 = vpop.xlane.xlu0 %2201  ;;  %v13645_v35 = vpop.eup %10683  ;;  %v2044_v56 = vsub.f32 %v13181_v32, %v13576_v14  ;;  %v2321_v18 = vmul.f32 %v10680_v4, %v13340_v55  ;;  %v2045_v19 = vsub.f32 %v13183_v60, %v13576_v14 }
 0x66b   : > { %v3118_v25 = vpop.xlane.xlu1 %3117  ;;  %10703 = vpow2.f32 %v3277_v23  ;;  %v10686_v63 = vpop.eup %10685  ;;  %v3392_v49 = vadd.f32 %v13645_v35, %v13643_v9  ;;  %v18431_v32 = vmax.f32 %v13422_v24, %v13426_v7  ;;  %v2320_v23 = vmul.f32 %v10680_v4, %v13338_v61 }
 0x66c   : > { %v3207_v43 = vsub.f32 %v13075_v50, %v3118_v25  ;;  %v3208_v2 = vsub.f32 %v13079_v27, %v3118_v25  ;;  %10705 = vpow2.f32 %v3279_v48  ;;  %v2323_v50 = vmul.f32 %v10686_v63, %v13354_v51 }
 0x66d   : > { %v13655_v46 = vpop.eup %10687  ;;  %10707 = vpow2.f32 %v2152_v33  ;;  %3186 = vmax.xlane.f32.xlu0 %v18431_v32  ;;  %3393 = vadd.xlane.f32.xlu1 %v3392_v49  ;;  %v2322_v48 = vmul.f32 %v10686_v63, %v13350_v17  ;;  %v2046_v14 = vsub.f32 %v13193_v59, %v13581_v11  ;;  %v2154_v17 = vmul.f32 1.442695, %v2043_v44 }
 0x66e   : > { %v3281_v21 = vmul.f32 1.442695, %v3207_v43  ;;  %v3283_v0 = vmul.f32 1.442695, %v3208_v2  ;;  %v13659_v27 = vpop.eup %10689  ;;  %v3121_v10 = vpop.xlane.xlu0 %3120  ;;  %10709 = vrcp.f32 %v2202_v40  ;;  %v9848_v25 = vpack.c.bf16 %v2323_v50, %v2321_v18 }
 0x66f   : > { %v2205_v3 = vpop.xlane.xlu1 %2204  ;;  %v13668_v55 = vpop.eup %10691  ;;  %v3209_v51 = vsub.f32 %v13089_v58, %v3121_v10  ;;  %v3210_v33 = vsub.f32 %v13093_v5, %v3121_v10  ;;  %v9850_v43 = vpack.c.bf16 %v2322_v48, %v2320_v23  ;;  %v3395_v61 = vadd.f32 %v13659_v27, %v13655_v46 }
 0x670   : > { %18432 = vst [vmem:[#allocation43_spill] sm:$0xff] %v13668_v55  ;;  %v13672_v60 = vpop.eup %10693  ;;  %10711 = vpow2.f32 %v3281_v21  ;;  %9849 = vmatprep.subr.bf16.mxu0 %v9848_v25  ;;  %v2156_v5 = vmul.f32 1.442695, %v2044_v56  ;;  %v2158_v49 = vmul.f32 1.442695, %v2045_v19  ;;  %v18436_v44 = vmax.f32 %v13437_v38, %v13439_v1 }
 0x671   : > { %18433 = vst [vmem:[#allocation44_spill] sm:$0xff] %v13672_v60  ;;  %v13678_v4 = vpop.eup %10695  ;;  %10713 = vpow2.f32 %v3283_v0  ;;  %v3285_v40 = vmul.f32 1.442695, %v3209_v51  ;;  %v3287_v2 = vmul.f32 1.442695, %v3210_v33  ;;  %9851 = vmatpush1.bf16.xpose.msra.mxu0 %v9850_v43  ;;  %3396 = vadd.xlane.f32.xlu0 %v3395_v61  ;;  %v2230_v50 = vadd.f32 %v13583_v29, %v13579_v22 }
 0x672   : > { %18434 = vst [vmem:[#allocation45_spill] sm:$0xff] %v13678_v4  ;;  %v13680_v58 = vpop.eup %10697  ;;  %10715 = vrcp.f32 %v2205_v3  ;;  %v13682_v63 = vpop.xlane.xlu0 %1985  ;;  %3189 = vmax.xlane.f32.xlu1 %v18436_v44  ;;  %v2160_v18 = vmul.f32 1.442695, %v2046_v14  ;;  %v2047_v44 = vsub.f32 %v13195_v8, %v13581_v11  ;;  %v18447_v11 = vld [vmem:[#allocation31_spill] sm:$0xff] }
 0x673   : > { %18435 = vst [vmem:[#allocation46_spill] sm:$0xff] %v13680_v58  ;;  %v3124_v59 = vpop.xlane.xlu1 %3123  ;;  %v13684_v16 = vpop.eup %10699  ;;  %10717 = vpow2.f32 %v3285_v40 }
 0x674   : > { %v3211_v21 = vsub.f32 %v13101_v34, %v3124_v59  ;;  %v13690_v0 = vpop.eup %10701  ;;  %10719 = vpow2.f32 %v3287_v2  ;;  %v3212_v56 = vsub.f32 %v13105_v15, %v3124_v59 }
 0x675   : > { %v13695_v32 = vpop.eup %10703  ;;  %10721 = vpow2.f32 %v2154_v17  ;;  %v3398_v10 = vadd.f32 %v13690_v0, %v13684_v16  ;;  %2231 = vadd.xlane.f32.xlu0 %v2230_v50  ;;  %v2233_v17 = vadd.f32 %v13589_v57, %v13587_v45 }
 0x676   : > { %18437 = vst [vmem:[#allocation49_spill] sm:$0xff] %v13695_v32  ;;  %v3289_v19 = vmul.f32 1.442695, %v3211_v21  ;;  %v13699_v3 = vpop.eup %10705  ;;  %10723 = vpow2.f32 %v2156_v5  ;;  %v3291_v34 = vmul.f32 1.442695, %v3212_v56  ;;  %v3127_v23 = vpop.xlane.xlu0 %3126 }
 0x677   : > { %18438 = vst [vmem:[#allocation50_spill] sm:$0xff] %v13699_v3  ;;  %v13701_v48 = vpop.xlane.xlu1 %1988  ;;  %10725 = vpow2.f32 %v2158_v49  ;;  %3399 = vadd.xlane.f32.xlu1 %v3398_v10  ;;  %v3213_v15 = vsub.f32 %v13113_v36, %v3127_v23  ;;  %v3214_v51 = vsub.f32 %v13117_v47, %v3127_v23  ;;  %v13705_v33 = vpop.eup %10707  ;;  %v3401_v25 = vadd.f32 %v13699_v3, %v13695_v32  ;;  %v18443_v10 = vld [vmem:[#allocation107_spill] sm:$0xff] }
 0x678   : > { %18439 = vst [vmem:[#allocation53_spill] sm:$0xff] %v13705_v33  ;;  %10727 = vpow2.f32 %v2160_v18  ;;  %v10710_v14 = vpop.eup %10709 }
 0x679   : > { %10729 = vpow2.f32 %v3289_v19  ;;  %v3293_v43 = vmul.f32 1.442695, %v3213_v15  ;;  %v3295_v61 = vmul.f32 1.442695, %v3214_v51  ;;  %3402 = vadd.xlane.f32.xlu0 %v3401_v25  ;;  %v2325_v19 = vmul.f32 %v10710_v14, %v13374_v42  ;;  %v18446_v15 = vld [vmem:[#allocation70_spill] sm:$0xff] }
 0x67a   : > { %v13711_v40 = vpop.eup %10711  ;;  %10731 = vpow2.f32 %v3291_v34  ;;  %v2208_v36 = vpop.xlane.xlu0 %2207  ;;  %v2049_v8 = vsub.f32 %v18446_v15, %v13621_v6  ;;  %v18448_v51 = vld [vmem:[#allocation30_spill] sm:$0xff]  ;;  %v18455_v15 = vld [vmem:[#allocation73_spill] sm:$0xff] }
 0x67b   : > { %18440 = vst [vmem:[#allocation54_spill] sm:$0xff] %v13711_v40  ;;  %v3130_v2 = vpop.xlane.xlu1 %3129  ;;  %v13713_v47 = vpop.eup %10713  ;;  %10733 = vpow2.f32 %v3293_v43  ;;  %2234 = vadd.xlane.f32.xlu1 %v2233_v17  ;;  %v18449_v25 = vmax.f32 %v18447_v11, %v18448_v51  ;;  %v18450_v17 = vld [vmem:[#allocation105_spill] sm:$0xff] }
 0x67c   : > { %18441 = vst [vmem:[#allocation57_spill] sm:$0xff] %v13713_v47  ;;  %v3215_v5 = vsub.f32 %v18319_v20, %v3130_v2  ;;  %v3216_v59 = vsub.f32 %v18320_v39, %v3130_v2  ;;  %v10716_v49 = vpop.eup %10715  ;;  %10735 = vpow2.f32 %v3295_v61  ;;  %v3404_v21 = vadd.f32 %v13713_v47, %v13711_v40  ;;  %v18445_v20 = vld [vmem:[#allocation69_spill] sm:$0xff] }
 0x67d   : > { %v13721_v18 = vpop.eup %10717  ;;  %v2327_v34 = vmul.f32 %v10716_v49, %v18443_v10  ;;  %v2048_v39 = vsub.f32 %v18445_v20, %v13621_v6  ;;  %3192 = vmax.xlane.f32.xlu0 %v18449_v25  ;;  %v2324_v2 = vmul.f32 %v10710_v14, %v18450_v17  ;;  %10737 = vrcp.f32 %v2208_v36  ;;  %v18452_v10 = vld [vmem:[#allocation51_spill] sm:$0xff]  ;;  %v18453_v20 = vld [vmem:[#allocation52_spill] sm:$0xff] }
 0x67e   : > { %18442 = vst [vmem:[#allocation58_spill] sm:$0xff] %v13721_v18  ;;  %v3297_v56 = vmul.f32 1.442695, %v3215_v5  ;;  %v3299_v50 = vmul.f32 1.442695, %v3216_v59  ;;  %v13725_v23 = vpop.eup %10719  ;;  %v3133_v43 = vpop.xlane.xlu0 %3132  ;;  %v18451_v5 = vld [vmem:[#allocation106_spill] sm:$0xff]  ;;  %v2050_v25 = vsub.f32 %v18455_v15, %v13635_v37 }
 0x67f   : > { %18444 = vst [vmem:[#allocation61_spill] sm:$0xff] %v13725_v23  ;;  %v2211_v61 = vpop.xlane.xlu1 %2210  ;;  %v2326_v42 = vmul.f32 %v10716_v49, %v18451_v5  ;;  %v13736_v59 = vpop.eup %10721  ;;  %3405 = vadd.xlane.f32.xlu1 %v3404_v21  ;;  %v3217_v32 = vsub.f32 %v18452_v10, %v3133_v43  ;;  %v3218_v40 = vsub.f32 %v18453_v20, %v3133_v43  ;;  %v2162_v17 = vmul.f32 1.442695, %v2047_v44  ;;  %v18460_v10 = vld [vmem:[#allocation34_spill] sm:$0xff] }
 0x680   : > { %v9852_v47 = vpack.c.bf16 %v2327_v34, %v2325_v19  ;;  %v13740_v6 = vpop.eup %10723  ;;  %10739 = vpow2.f32 %v3297_v56  ;;  %v3407_v14 = vadd.f32 %v13725_v23, %v13721_v18  ;;  %v2164_v19 = vmul.f32 1.442695, %v2048_v39  ;;  %v18464_v39 = vld [vmem:[#allocation56_spill] sm:$0xff] }
 0x681   : > { %18454 = vst [vmem:[#allocation62_spill] sm:$0xff] %v13740_v6  ;;  %v9854_v3 = vpack.c.bf16 %v2326_v42, %v2324_v2  ;;  %v13746_v49 = vpop.eup %10725  ;;  %10741 = vpow2.f32 %v3299_v50  ;;  %v3301_v36 = vmul.f32 1.442695, %v3217_v32  ;;  %v3303_v21 = vmul.f32 1.442695, %v3218_v40  ;;  %v18459_v42 = vld [vmem:[#allocation20_spill] sm:$0xff] }
 0x682   : > { %18456 = vst [vmem:[#allocation107_spill] sm:$0xff] %v13746_v49  ;;  %9853 = vmatprep.subr.bf16.mxu0 %v9852_v47  ;;  %v13748_v5 = vpop.eup %10727  ;;  %10743 = vrcp.f32 %v2211_v61  ;;  %3408 = vadd.xlane.f32.xlu0 %v3407_v14  ;;  %v13750_v34 = vpop.xlane.xlu0 %1991  ;;  %v2166_v2 = vmul.f32 1.442695, %v2049_v8  ;;  %v18461_v44 = vmax.f32 %v18459_v42, %v18460_v10  ;;  %v18462_v32 = vld [vmem:[#allocation55_spill] sm:$0xff]  ;;  %v2168_v50 = vmul.f32 1.442695, %v2050_v25 }
 0x683   : > { %18457 = vst [vmem:[#allocation69_spill] sm:$0xff] %v13748_v5  ;;  %9855 = vmatpush1.bf16.xpose.msra.mxu0 %v9854_v3  ;;  %v3136_v56 = vpop.xlane.xlu1 %3135  ;;  %v13752_v43 = vpop.eup %10729  ;;  %10745 = vpow2.f32 %v3301_v36  ;;  %v2236_v61 = vadd.f32 %v13595_v12, %v13591_v53  ;;  %v18467_v36 = vld [vmem:[#allocation74_spill] sm:$0xff] }
 0x684   : > { %18458 = vst [vmem:[#allocation70_spill] sm:$0xff] %v13752_v43  ;;  %3195 = vmax.xlane.f32.xlu1 %v18461_v44  ;;  %v3219_v40 = vsub.f32 %v18462_v32, %v3136_v56  ;;  %v13758_v47 = vpop.eup %10731  ;;  %10747 = vpow2.f32 %v3303_v21  ;;  %v3220_v3 = vsub.f32 %v18464_v39, %v3136_v56  ;;  %v2051_v44 = vsub.f32 %v18467_v36, %v13635_v37  ;;  %v18468_v32 = vld [vmem:[#allocation59_spill] sm:$0xff]  ;;  %v18470_v37 = vld [vmem:[#allocation38_spill] sm:$0xff] }
 0x685   : > { %18463 = vst [vmem:[#allocation31_spill] sm:$0xff] %v13758_v47  ;;  %v13763_v20 = vpop.eup %10733  ;;  %10749 = vpow2.f32 %v2162_v17  ;;  %v3410_v15 = vadd.f32 %v13758_v47, %v13752_v43  ;;  %v18469_v17 = vld [vmem:[#allocation60_spill] sm:$0xff] }
 0x686   : > { %18465 = vst [vmem:[#allocation30_spill] sm:$0xff] %v13763_v20  ;;  %v3305_v8 = vmul.f32 1.442695, %v3219_v40  ;;  %v13767_v14 = vpop.eup %10735  ;;  %10751 = vpow2.f32 %v2164_v19  ;;  %v3307_v25 = vmul.f32 1.442695, %v3220_v3  ;;  %2237 = vadd.xlane.f32.xlu0 %v2236_v61  ;;  %v3139_v21 = vpop.xlane.xlu0 %3138  ;;  %v2239_v3 = vadd.f32 %v18470_v37, %v13601_v28 }
 0x687   : > { %18466 = vst [vmem:[#allocation105_spill] sm:$0xff] %v13767_v14  ;;  %v13771_v56 = vpop.xlane.xlu1 %1994  ;;  %10753 = vpow2.f32 %v2166_v2  ;;  %v3221_v39 = vsub.f32 %v18468_v32, %v3139_v21  ;;  %v3222_v40 = vsub.f32 %v18469_v17, %v3139_v21  ;;  %v3413_v53 = vadd.f32 %v13767_v14, %v13763_v20  ;;  %v10738_v12 = vpop.eup %10737  ;;  %v18474_v17 = vld [vmem:[#allocation64_spill] sm:$0xff]  ;;  %v18476_v14 = vld [vmem:[#allocation109_spill] sm:$0xff] }
 0x688   : > { %3411 = vadd.xlane.f32.xlu1 %v3410_v15  ;;  %10755 = vpow2.f32 %v2168_v50  ;;  %v2170_v36 = vmul.f32 1.442695, %v2051_v44  ;;  %v18473_v50 = vld [vmem:[#allocation63_spill] sm:$0xff]  ;;  %v2329_v28 = vmul.f32 %v10738_v12, %v18476_v14  ;;  %v18481_v14 = vld [vmem:[#allocation65_spill] sm:$0xff] }
 0x689   : > { %10757 = vpow2.f32 %v3305_v8  ;;  %v3309_v19 = vmul.f32 1.442695, %v3221_v39  ;;  %v3311_v43 = vmul.f32 1.442695, %v3222_v40  ;;  %v2242_v40 = vadd.f32 %v13617_v41, %v13613_v26  ;;  %v18479_v26 = vld [vmem:[#allocation108_spill] sm:$0xff] }
 0x68a   : > { %v13779_v61 = vpop.eup %10739  ;;  %10759 = vpow2.f32 %v3307_v25  ;;  %3414 = vadd.xlane.f32.xlu0 %v3413_v53  ;;  %v2214_v2 = vpop.xlane.xlu0 %2213  ;;  %v2328_v41 = vmul.f32 %v10738_v12, %v18479_v26 }
 0x68b   : > { %18471 = vst [vmem:[#allocation106_spill] sm:$0xff] %v13779_v61  ;;  %v3142_v15 = vpop.xlane.xlu1 %3141  ;;  %v13781_v32 = vpop.eup %10741  ;;  %10761 = vpow2.f32 %v3309_v19  ;;  %v18477_v19 = vld [vmem:[#allocation110_spill] sm:$0xff] }
 0x68c   : > { %18472 = vst [vmem:[#allocation51_spill] sm:$0xff] %v13781_v32  ;;  %2240 = vadd.xlane.f32.xlu1 %v2239_v3  ;;  %v3223_v21 = vsub.f32 %v18473_v50, %v3142_v15  ;;  %v3224_v8 = vsub.f32 %v18474_v17, %v3142_v15  ;;  %v10744_v39 = vpop.eup %10743  ;;  %10763 = vpow2.f32 %v3311_v43  ;;  %v3416_v44 = vadd.f32 %v13781_v32, %v13779_v61  ;;  %v18478_v15 = vld [vmem:[#allocation77_spill] sm:$0xff]  ;;  %v18480_v61 = vld [vmem:[#allocation7_spill] sm:$0xff] }
 0x68d   : > { %v13789_v25 = vpop.eup %10745  ;;  %v2331_v3 = vmul.f32 %v10744_v39, %v18477_v19  ;;  %10765 = vpow2.f32 %v2170_v36  ;;  %v2052_v43 = vsub.f32 %v18478_v15, %v13682_v63  ;;  %v2330_v32 = vmul.f32 %v10744_v39, %v18480_v61 }
 0x68e   : > { %18475 = vst [vmem:[#allocation52_spill] sm:$0xff] %v13789_v25  ;;  %v3313_v53 = vmul.f32 1.442695, %v3223_v21  ;;  %v3315_v20 = vmul.f32 1.442695, %v3224_v8  ;;  %v13793_v37 = vpop.eup %10747  ;;  %2243 = vadd.xlane.f32.xlu0 %v2242_v40  ;;  %v3145_v50 = vpop.xlane.xlu0 %3144  ;;  %10767 = vrcp.f32 %v2214_v2  ;;  %v18482_v8 = vld [vmem:[#allocation66_spill] sm:$0xff]  ;;  %v2245_v61 = vadd.f32 %v13623_v30, %v13619_v52 }
 0x68f   : > { %v2217_v17 = vpop.xlane.xlu1 %2216  ;;  %v13799_v18 = vpop.eup %10749  ;;  %v3225_v21 = vsub.f32 %v18481_v14, %v3145_v50  ;;  %v3226_v19 = vsub.f32 %v18482_v8, %v3145_v50  ;;  %v9856_v47 = vpack.c.bf16 %v2331_v3, %v2329_v28  ;;  %v9858_v15 = vpack.c.bf16 %v2330_v32, %v2328_v41  ;;  %v18485_v28 = vld [vmem:[#allocation78_spill] sm:$0xff]  ;;  %v18488_v3 = vld [vmem:[#allocation68_spill] sm:$0xff] }
 0x690   : > { %3417 = vadd.xlane.f32.xlu1 %v3416_v44  ;;  %v13803_v36 = vpop.eup %10751  ;;  %10769 = vpow2.f32 %v3313_v53  ;;  %v3419_v40 = vadd.f32 %v13793_v37, %v13789_v25  ;;  %v2053_v39 = vsub.f32 %v18485_v28, %v13682_v63  ;;  %v2172_v44 = vmul.f32 1.442695, %v2052_v43  ;;  %v18492_v28 = vld [vmem:[#allocation72_spill] sm:$0xff] }
 0x691   : > { %18483 = vst [vmem:[#allocation73_spill] sm:$0xff] %v13803_v36  ;;  %v13807_v23 = vpop.eup %10753  ;;  %10771 = vpow2.f32 %v3315_v20  ;;  %v3317_v12 = vmul.f32 1.442695, %v3225_v21  ;;  %v3319_v26 = vmul.f32 1.442695, %v3226_v19  ;;  %9857 = vmatprep.subr.bf16.mxu0 %v9856_v47  ;;  %v18487_v20 = vld [vmem:[#allocation67_spill] sm:$0xff]  ;;  %v2248_v63 = vadd.f32 %v13637_v62, %v13626_v13 }
 0x692   : > { %18484 = vst [vmem:[#allocation20_spill] sm:$0xff] %v13807_v23  ;;  %v13811_v2 = vpop.eup %10755  ;;  %10773 = vrcp.f32 %v2217_v17  ;;  %9859 = vmatpush1.bf16.xpose.msra.mxu0 %v9858_v15  ;;  %3420 = vadd.xlane.f32.xlu0 %v3419_v40  ;;  %v2220_v41 = vpop.xlane.xlu0 %2219  ;;  %v2174_v15 = vmul.f32 1.442695, %v2053_v39  ;;  %v18500_v13 = vld [vmem:[#allocation47_spill] sm:$0xff] }
 0x693   : > { %v3148_v32 = vpop.xlane.xlu1 %3147  ;;  %v13815_v53 = vpop.eup %10757  ;;  %10775 = vpow2.f32 %v3317_v12 }
 0x694   : > { %18486 = vst [vmem:[#allocation34_spill] sm:$0xff] %v13815_v53  ;;  %2246 = vadd.xlane.f32.xlu1 %v2245_v61  ;;  %v3227_v47 = vsub.f32 %v18487_v20, %v3148_v32  ;;  %v3228_v50 = vsub.f32 %v18488_v3, %v3148_v32  ;;  %v13819_v14 = vpop.eup %10759  ;;  %10777 = vpow2.f32 %v3319_v26  ;;  %v18491_v26 = vld [vmem:[#allocation71_spill] sm:$0xff] }
 0x695   : > { %v13823_v43 = vpop.eup %10761  ;;  %10779 = vrcp.f32 %v2220_v41  ;;  %v3422_v8 = vadd.f32 %v13819_v14, %v13815_v53 }
 0x696   : > { %18489 = vst [vmem:[#allocation55_spill] sm:$0xff] %v13823_v43  ;;  %v3321_v17 = vmul.f32 1.442695, %v3227_v47  ;;  %v3323_v21 = vmul.f32 1.442695, %v3228_v50  ;;  %v13827_v19 = vpop.eup %10763  ;;  %10781 = vpow2.f32 %v2172_v44  ;;  %2249 = vadd.xlane.f32.xlu0 %v2248_v63  ;;  %v3151_v40 = vpop.xlane.xlu0 %3150  ;;  %v18493_v47 = vld [vmem:[#allocation82_spill] sm:$0xff]  ;;  %v2251_v63 = vadd.f32 %v13672_v60, %v13668_v55 }
 0x697   : > { %18490 = vst [vmem:[#allocation56_spill] sm:$0xff] %v13827_v19  ;;  %v2223_v12 = vpop.xlane.xlu1 %2222  ;;  %v3229_v61 = vsub.f32 %v18491_v26, %v3151_v40  ;;  %v3230_v32 = vsub.f32 %v18492_v28, %v3151_v40  ;;  %v3425_v41 = vadd.f32 %v13827_v19, %v13823_v43  ;;  %v13833_v20 = vpop.eup %10765  ;;  %v2054_v3 = vsub.f32 %v18493_v47, %v13701_v48  ;;  %v18496_v28 = vld [vmem:[#allocation75_spill] sm:$0xff]  ;;  %v18501_v60 = vld [vmem:[#allocation16_spill] sm:$0xff] }
 0x698   : > { %10783 = vpow2.f32 %v3321_v17  ;;  %3423 = vadd.xlane.f32.xlu1 %v3422_v8  ;;  %v10768_v44 = vpop.eup %10767 }
 0x699   : > { %10785 = vpow2.f32 %v3323_v21  ;;  %v3325_v39 = vmul.f32 1.442695, %v3229_v61  ;;  %v3327_v50 = vmul.f32 1.442695, %v3230_v32  ;;  %v18497_v21 = vld [vmem:[#allocation76_spill] sm:$0xff] }
 0x69a   : > { %10787 = vrcp.f32 %v2223_v12  ;;  %v13839_v17 = vpop.eup %10769  ;;  %3426 = vadd.xlane.f32.xlu0 %v3425_v41  ;;  %v2226_v8 = vpop.xlane.xlu0 %2225  ;;  %v2254_v12 = vadd.f32 %v13680_v58, %v13678_v4  ;;  %v18498_v32 = vld [vmem:[#allocation84_spill] sm:$0xff]  ;;  %v2176_v55 = vmul.f32 1.442695, %v2054_v3 }
 0x69b   : > { %18494 = vst [vmem:[#allocation74_spill] sm:$0xff] %v13839_v17  ;;  %10789 = vpow2.f32 %v2174_v15  ;;  %v3154_v40 = vpop.xlane.xlu1 %3153  ;;  %v13841_v26 = vpop.eup %10771  ;;  %v2055_v19 = vsub.f32 %v18498_v32, %v13701_v48  ;;  %v18503_v4 = vld [vmem:[#allocation88_spill] sm:$0xff] }
 0x69c   : > { %18495 = vst [vmem:[#allocation59_spill] sm:$0xff] %v13841_v26  ;;  %10791 = vpow2.f32 %v3325_v39  ;;  %2252 = vadd.xlane.f32.xlu1 %v2251_v63  ;;  %v3231_v47 = vsub.f32 %v18496_v28, %v3154_v40  ;;  %v3232_v43 = vsub.f32 %v18497_v21, %v3154_v40  ;;  %v10774_v61 = vpop.eup %10773  ;;  %v3428_v15 = vadd.f32 %v13841_v26, %v13839_v17  ;;  %v18505_v17 = vld [vmem:[#allocation48_spill] sm:$0xff] }
 0x69d   : > { %10793 = vpow2.f32 %v3327_v50  ;;  %v13851_v41 = vpop.eup %10775  ;;  %v2333_v28 = vmul.f32 %v10768_v44, %v18500_v13  ;;  %v2335_v40 = vmul.f32 %v10774_v61, %v18501_v60  ;;  %v2056_v58 = vsub.f32 %v18503_v4, %v13750_v34  ;;  %v18504_v50 = vld [vmem:[#allocation17_spill] sm:$0xff] }
 0x69e   : > { %18499 = vst [vmem:[#allocation60_spill] sm:$0xff] %v13851_v41  ;;  %v3329_v39 = vmul.f32 1.442695, %v3231_v47  ;;  %v3331_v63 = vmul.f32 1.442695, %v3232_v43  ;;  %v13855_v21 = vpop.eup %10777  ;;  %10795 = vrcp.f32 %v2226_v8  ;;  %2255 = vadd.xlane.f32.xlu0 %v2254_v12  ;;  %v3157_v48 = vpop.xlane.xlu0 %3156  ;;  %v2332_v32 = vmul.f32 %v10768_v44, %v18504_v50  ;;  %v18506_v43 = vld [vmem:[#allocation79_spill] sm:$0xff] }
 0x69f   : > { %18502 = vst [vmem:[#allocation63_spill] sm:$0xff] %v13855_v21  ;;  %v2229_v3 = vpop.xlane.xlu1 %2228  ;;  %v2334_v26 = vmul.f32 %v10774_v61, %v18505_v17  ;;  %v10780_v62 = vpop.eup %10779  ;;  %v3233_v13 = vsub.f32 %v18506_v43, %v3157_v48  ;;  %v18507_v47 = vld [vmem:[#allocation80_spill] sm:$0xff]  ;;  %v9860_v25 = vpack.c.bf16 %v2335_v40, %v2333_v28  ;;  %v3431_v8 = vadd.f32 %v13855_v21, %v13851_v41  ;;  %v18511_v43 = vld [vmem:[#allocation85_spill] sm:$0xff]  ;;  %v18521_v21 = vld [vmem:[#allocation87_spill] sm:$0xff] }
 0x6a0   : > { %10797 = vpow2.f32 %v3329_v39  ;;  %3429 = vadd.xlane.f32.xlu1 %v3428_v15  ;;  %v3234_v60 = vsub.f32 %v18507_v47, %v3157_v48  ;;  %v13863_v53 = vpop.eup %10781  ;;  %v2257_v44 = vadd.f32 %v13736_v59, %v13705_v33  ;;  %v2260_v15 = vadd.f32 %v13746_v49, %v13740_v6  ;;  %v18510_v48 = vld [vmem:[#allocation33_spill] sm:$0xff] }
 0x6a1   : > { %10799 = vpow2.f32 %v3331_v63  ;;  %v9862_v4 = vpack.c.bf16 %v2334_v26, %v2332_v32  ;;  %v3333_v17 = vmul.f32 1.442695, %v3233_v13  ;;  %9861 = vmatprep.subr.bf16.mxu0 %v9860_v25  ;;  %v2178_v63 = vmul.f32 1.442695, %v2055_v19  ;;  %v18513_v47 = vld [vmem:[#allocation81_spill] sm:$0xff] }
 0x6a2   : > { %v13869_v12 = vpop.eup %10783  ;;  %v3335_v61 = vmul.f32 1.442695, %v3234_v60  ;;  %10801 = vrcp.f32 %v2229_v3  ;;  %v2180_v26 = vmul.f32 1.442695, %v2056_v58  ;;  %3432 = vadd.xlane.f32.xlu0 %v3431_v8  ;;  %v3163_v28 = vpop.xlane.xlu0 %3162  ;;  %v2337_v50 = vmul.f32 %v10780_v62, %v18510_v48  ;;  %v18512_v3 = vld [vmem:[#allocation86_spill] sm:$0xff] }
 0x6a3   : > { %18508 = vst [vmem:[#allocation64_spill] sm:$0xff] %v13869_v12  ;;  %v13873_v39 = vpop.eup %10785  ;;  %10803 = vpow2.f32 %v2176_v55  ;;  %9863 = vmatpush1.bf16.xpose.msra.mxu0 %v9862_v4  ;;  %v3160_v40 = vpop.xlane.xlu1 %3159  ;;  %v3237_v25 = vsub.f32 %v18511_v43, %v3163_v28  ;;  %v3238_v13 = vsub.f32 %v18512_v3, %v3163_v28  ;;  %v18514_v55 = vld [vmem:[#allocation83_spill] sm:$0xff]  ;;  %v18515_v4 = vld [vmem:[#allocation112_spill] sm:$0xff] }
 0x6a4   : > { %18509 = vst [vmem:[#allocation109_spill] sm:$0xff] %v13873_v39  ;;  %v10788_v32 = vpop.eup %10787  ;;  %10805 = vpow2.f32 %v3333_v17  ;;  %2258 = vadd.xlane.f32.xlu1 %v2257_v44  ;;  %v3235_v60 = vsub.f32 %v18513_v47, %v3160_v40  ;;  %v3236_v58 = vsub.f32 %v18514_v55, %v3160_v40  ;;  %v3434_v19 = vadd.f32 %v13873_v39, %v13869_v12  ;;  %v18517_v44 = vld [vmem:[#allocation90_spill] sm:$0xff]  ;;  %v18518_v28 = vld [vmem:[#allocation111_spill] sm:$0xff]  ;;  %v18520_v12 = vld [vmem:[#allocation21_spill] sm:$0xff] }
 0x6a5   : > { %v13879_v6 = vpop.eup %10789  ;;  %10807 = vpow2.f32 %v3335_v61  ;;  %v2339_v8 = vmul.f32 %v10788_v32, %v18515_v4  ;;  %v2057_v17 = vsub.f32 %v18517_v44, %v13750_v34  ;;  %v3341_v43 = vmul.f32 1.442695, %v3237_v25  ;;  %v18527_v44 = vld [vmem:[#allocation94_spill] sm:$0xff] }
 0x6a6   : > { %v13885_v48 = vpop.eup %10791  ;;  %v3337_v49 = vmul.f32 1.442695, %v3235_v60  ;;  %v2338_v3 = vmul.f32 %v10788_v32, %v18518_v28  ;;  %10809 = vpow2.f32 %v2178_v63  ;;  %v3339_v61 = vmul.f32 1.442695, %v3236_v58  ;;  %2261 = vadd.xlane.f32.xlu0 %v2260_v15  ;;  %v3169_v40 = vpop.xlane.xlu0 %3168  ;;  %v18522_v32 = vld [vmem:[#allocation89_spill] sm:$0xff] }
 0x6a7   : > { %18516 = vst [vmem:[#allocation110_spill] sm:$0xff] %v13885_v48  ;;  %v13890_v47 = vpop.eup %10793  ;;  %v9864_v55 = vpack.c.bf16 %v2339_v8, %v2337_v50  ;;  %v3166_v41 = vpop.xlane.xlu1 %3165  ;;  %v2336_v39 = vmul.f32 %v10780_v62, %v18520_v12  ;;  %10811 = vpow2.f32 %v2180_v26  ;;  %v3343_v4 = vmul.f32 1.442695, %v3238_v13  ;;  %v18524_v12 = vld [vmem:[#allocation92_spill] sm:$0xff] }
 0x6a8   : > { %18519 = vst [vmem:[#allocation77_spill] sm:$0xff] %v13890_v47  ;;  %3435 = vadd.xlane.f32.xlu1 %v3434_v19  ;;  %v3239_v33 = vsub.f32 %v18521_v21, %v3166_v41  ;;  %v2263_v34 = vadd.f32 %v13799_v18, %v13748_v5  ;;  %v10796_v25 = vpop.eup %10795  ;;  %10813 = vpow2.f32 %v3341_v43  ;;  %v3240_v63 = vsub.f32 %v18522_v32, %v3166_v41  ;;  %v18525_v21 = vld [vmem:[#allocation91_spill] sm:$0xff]  ;;  %v18528_v43 = vld [vmem:[#allocation93_spill] sm:$0xff]  ;;  %v18529_v32 = vld [vmem:[#allocation114_spill] sm:$0xff] }
 0x6a9   : > { %9865 = vmatprep.subr.bf16.mxu0 %v9864_v55  ;;  %v9866_v60 = vpack.c.bf16 %v2338_v3, %v2336_v39  ;;  %v3437_v15 = vadd.f32 %v13890_v47, %v13885_v48  ;;  %v2182_v62 = vmul.f32 1.442695, %v2057_v17  ;;  %v2058_v26 = vsub.f32 %v18524_v12, %v13771_v56  ;;  %v18533_v48 = vld [vmem:[#allocation113_spill] sm:$0xff] }
 0x6aa   : > { %v13899_v50 = vpop.eup %10797  ;;  %10815 = vpow2.f32 %v3337_v49  ;;  %v3241_v13 = vsub.f32 %v18525_v21, %v3169_v40  ;;  %v3175_v19 = vpop.xlane.xlu0 %3174  ;;  %v2266_v39 = vadd.f32 %v13807_v23, %v13803_v36  ;;  %v2059_v17 = vsub.f32 %v18527_v44, %v13771_v56 }
 0x6ab   : > { %18523 = vst [vmem:[#allocation108_spill] sm:$0xff] %v13899_v50  ;;  %v13904_v58 = vpop.eup %10799  ;;  %10817 = vpow2.f32 %v3339_v61  ;;  %9867 = vmatpush1.bf16.xpose.msra.mxu0 %v9866_v60  ;;  %3438 = vadd.xlane.f32.xlu0 %v3437_v15  ;;  %v3172_v41 = vpop.xlane.xlu1 %3171  ;;  %v3242_v28 = vsub.f32 %v18528_v43, %v3169_v40  ;;  %v3345_v49 = vmul.f32 1.442695, %v3239_v33  ;;  %v3347_v55 = vmul.f32 1.442695, %v3240_v63  ;;  %v18530_v15 = vld [vmem:[#allocation116_spill] sm:$0xff] }
 0x6ac   : > { %18526 = vst [vmem:[#allocation7_spill] sm:$0xff] %v13904_v58  ;;  %v10802_v8 = vpop.eup %10801  ;;  %10819 = vpow2.f32 %v3343_v4  ;;  %2264 = vadd.xlane.f32.xlu1 %v2263_v34  ;;  %v3440_v61 = vadd.f32 %v13904_v58, %v13899_v50  ;;  %v2341_v60 = vmul.f32 %v10796_v25, %v18529_v32  ;;  %v2184_v36 = vmul.f32 1.442695, %v2058_v26  ;;  %v18531_v4 = vld [vmem:[#allocation97_spill] sm:$0xff]  ;;  %v18532_v33 = vld [vmem:[#allocation98_spill] sm:$0xff]  ;;  %v18534_v32 = vld [vmem:[#allocation115_spill] sm:$0xff] }
 0x6ad   : > { %v13911_v3 = vpop.eup %10803  ;;  %v2343_v12 = vmul.f32 %v10802_v8, %v18530_v15  ;;  %10821 = vpow2.f32 %v2182_v62  ;;  %v3349_v56 = vmul.f32 1.442695, %v3241_v13  ;;  %v3245_v44 = vsub.f32 %v18531_v4, %v3175_v19  ;;  %v18535_v62 = vld [vmem:[#allocation95_spill] sm:$0xff]  ;;  %v18536_v4 = vld [vmem:[#allocation96_spill] sm:$0xff] }
 0x6ae   : > { %v13917_v21 = vpop.eup %10805  ;;  %v3246_v34 = vsub.f32 %v18532_v33, %v3175_v19  ;;  %v3181_v63 = vpop.xlane.xlu0 %3180  ;;  %v2340_v50 = vmul.f32 %v10796_v25, %v18533_v48  ;;  %v2342_v58 = vmul.f32 %v10802_v8, %v18534_v32  ;;  %v2186_v15 = vmul.f32 1.442695, %v2059_v17  ;;  %v18537_v25 = vld [vmem:[#allocation101_spill] sm:$0xff]  ;;  %v18540_v33 = vld [vmem:[#allocation100_spill] sm:$0xff] }
 0x6af   : > { %v13920_v40 = vpop.eup %10807  ;;  %2267 = vadd.xlane.f32.xlu0 %v2266_v39  ;;  %v9868_v43 = vpack.c.bf16 %v2343_v12, %v2341_v60  ;;  %v3178_v23 = vpop.xlane.xlu1 %3177  ;;  %v3351_v47 = vmul.f32 1.442695, %v3242_v28  ;;  %10823 = vpow2.f32 %v3345_v49  ;;  %v3243_v26 = vsub.f32 %v18535_v62, %v3172_v41 }
 0x6b0   : > { %3441 = vadd.xlane.f32.xlu1 %v3440_v61  ;;  %v13926_v13 = vpop.eup %10809  ;;  %10825 = vpow2.f32 %v3347_v55  ;;  %v3244_v5 = vsub.f32 %v18536_v4, %v3172_v41  ;;  %v9870_v19 = vpack.c.bf16 %v2342_v58, %v2340_v50  ;;  %v3443_v39 = vadd.f32 %v13920_v40, %v13917_v21  ;;  %v18538_v55 = vld [vmem:[#allocation102_spill] sm:$0xff]  ;;  %v18539_v61 = vld [vmem:[#allocation99_spill] sm:$0xff] }
 0x6b1   : > { %9869 = vmatprep.subr.bf16.mxu0 %v9868_v43  ;;  %v13931_v60 = vpop.eup %10811  ;;  %10827 = vpow2.f32 %v2184_v36  ;;  %v3357_v48 = vmul.f32 1.442695, %v3245_v44  ;;  %v3249_v8 = vsub.f32 %v18537_v25, %v3181_v63  ;;  %v2269_v17 = vadd.f32 %v13833_v20, %v13811_v2 }
 0x6b2   : > { %v13936_v28 = vpop.eup %10813  ;;  %10829 = vpow2.f32 %v3349_v56  ;;  %v3359_v49 = vmul.f32 1.442695, %v3246_v34  ;;  %v3250_v41 = vsub.f32 %v18538_v55, %v3181_v63  ;;  %v3353_v58 = vmul.f32 1.442695, %v3243_v26 }
 0x6b3   : > { %9871 = vmatpush1.bf16.xpose.msra.mxu0 %v9870_v19  ;;  %3444 = vadd.xlane.f32.xlu0 %v3443_v39  ;;  %10831 = vpow2.f32 %v3351_v47  ;;  %v3247_v36 = vsub.f32 %v18539_v61, %v3178_v23  ;;  %v3355_v44 = vmul.f32 1.442695, %v3244_v5  ;;  %v3248_v43 = vsub.f32 %v18540_v33, %v3178_v23  ;;  %v3184_v32 = vpop.xlane.xlu1 %3183  ;;  %v18542_v19 = vld [vmem:[#allocation104_spill] sm:$0xff] }
 0x6b4   : > { %v13939_v50 = vpop.eup %10815  ;;  %2270 = vadd.xlane.f32.xlu1 %v2269_v17  ;;  %10833 = vpow2.f32 %v2186_v15  ;;  %v2272_v56 = vadd.f32 %v13879_v6, %v13863_v53  ;;  %v3365_v63 = vmul.f32 1.442695, %v3249_v8  ;;  %v3367_v62 = vmul.f32 1.442695, %v3250_v41  ;;  %v18541_v15 = vld [vmem:[#allocation103_spill] sm:$0xff] }
 0x6b5   : > { %v13942_v12 = vpop.eup %10817  ;;  %10835 = vpow2.f32 %v3357_v48  ;;  %v3361_v5 = vmul.f32 1.442695, %v3247_v36  ;;  %v3251_v23 = vsub.f32 %v18541_v15, %v3184_v32  ;;  %v3363_v4 = vmul.f32 1.442695, %v3248_v43 }
 0x6b6   : > { %v13947_v34 = vpop.eup %10819  ;;  %v3446_v47 = vadd.f32 %v13942_v12, %v13939_v50  ;;  %10837 = vpow2.f32 %v3359_v49  ;;  %v3252_v39 = vsub.f32 %v18542_v19, %v3184_v32  ;;  %v2275_v8 = vadd.f32 %v13926_v13, %v13911_v3 }
 0x6b7   : > { %2273 = vadd.xlane.f32.xlu0 %v2272_v56  ;;  %v13951_v26 = vpop.eup %10821  ;;  %10839 = vpow2.f32 %v3353_v58  ;;  %v3449_v48 = vadd.f32 %v13947_v34, %v13936_v28  ;;  %v3369_v55 = vmul.f32 1.442695, %v3251_v23 }
 0x6b8   : > { %3447 = vadd.xlane.f32.xlu1 %v3446_v47  ;;  %10841 = vpow2.f32 %v3355_v44  ;;  %v3371_v58 = vmul.f32 1.442695, %v3252_v39  ;;  %v2278_v61 = vadd.f32 %v13951_v26, %v13931_v60 }
 0x6b9   : > { %v13957_v25 = vpop.eup %10823  ;;  %10843 = vpow2.f32 %v3365_v63 }
 0x6ba   : > { %v13961_v17 = vpop.eup %10825  ;;  %10845 = vpow2.f32 %v3367_v62 }
 0x6bb   : > { %3450 = vadd.xlane.f32.xlu0 %v3449_v48  ;;  %v13963_v49 = vpop.eup %10827  ;;  %10847 = vpow2.f32 %v3361_v5  ;;  %v3452_v44 = vadd.f32 %v13961_v17, %v13957_v25 }
 0x6bc   : > { %2276 = vadd.xlane.f32.xlu1 %v2275_v8  ;;  %v13965_v41 = vpop.eup %10829  ;;  %10849 = vpow2.f32 %v3363_v4 }
 0x6bd   : > { %v13969_v36 = vpop.eup %10831  ;;  %10851 = vpow2.f32 %v3369_v55 }
 0x6be   : > { %v13973_v33 = vpop.eup %10833  ;;  %10853 = vpow2.f32 %v3371_v58  ;;  %v3455_v56 = vadd.f32 %v13969_v36, %v13965_v41 }
 0x6bf   : > { %2279 = vadd.xlane.f32.xlu0 %v2278_v61  ;;  %v13975_v43 = vpop.eup %10835  ;;  %v2281_v47 = vadd.f32 %v13973_v33, %v13963_v49 }
 0x6c0   : > { %18543 = vst [vmem:[#allocation65_spill] sm:$0xff] %v13975_v43  ;;  %3453 = vadd.xlane.f32.xlu1 %v3452_v44  ;;  %v13977_v32 = vpop.eup %10837 }
 0x6c1   : > { %v13981_v63 = vpop.eup %10839  ;;  %v3461_v23 = vadd.f32 %v13977_v32, %v13975_v43 }
 0x6c2   : > { %v13985_v62 = vpop.eup %10841 }
 0x6c3   : > { %3456 = vadd.xlane.f32.xlu0 %v3455_v56  ;;  %v13987_v5 = vpop.eup %10843  ;;  %v3458_v19 = vadd.f32 %v13985_v62, %v13981_v63 }
 0x6c4   : > { %18544 = vst [vmem:[#allocation66_spill] sm:$0xff] %v13987_v5  ;;  %2282 = vadd.xlane.f32.xlu1 %v2281_v47  ;;  %v13989_v15 = vpop.eup %10845 }
 0x6c5   : > { %18545 = vst [vmem:[#allocation78_spill] sm:$0xff] %v13989_v15  ;;  %v13993_v4 = vpop.eup %10847  ;;  %v3467_v48 = vadd.f32 %v13989_v15, %v13987_v5 }
 0x6c6   : > { %18546 = vst [vmem:[#allocation67_spill] sm:$0xff] %v13993_v4  ;;  %v13997_v39 = vpop.eup %10849 }
 0x6c7   : > { %3462 = vadd.xlane.f32.xlu0 %v3461_v23  ;;  %v14001_v8 = vpop.eup %10851  ;;  %v3464_v55 = vadd.f32 %v13997_v39, %v13993_v4 }
 0x6c8   : > { %3459 = vadd.xlane.f32.xlu1 %v3458_v19  ;;  %18547 = vst [vmem:[#allocation68_spill] sm:$0xff] %v14001_v8  ;;  %v14005_v58 = vpop.eup %10853 }
 0x6c9   : > { %18548 = vst [vmem:[#allocation71_spill] sm:$0xff] %v14005_v58  ;;  %v3470_v61 = vadd.f32 %v14005_v58, %v14001_v8 }
 0x6cb   : > { %3468 = vadd.xlane.f32.xlu0 %v3467_v48 }
 0x6cc   : > { %3465 = vadd.xlane.f32.xlu1 %v3464_v55 }
 0x6d0   : > { %3471 = vadd.xlane.f32.xlu1 %v3470_v61 }
 0x6f6   : > { %v3391_v44 = vpop.xlane.xlu0 %3390 }
 0x6f7   : > { %10855 = vrcp.f32 %v3391_v44 }
 0x6fa   : > { %v3187_v56 = vpop.xlane.xlu0 %3186  ;;  %v3394_v47 = vpop.xlane.xlu1 %3393 }
 0x6fb   : > { %v3253_v23 = vsub.f32 %v13422_v24, %v3187_v56  ;;  %v3254_v19 = vsub.f32 %v13426_v7, %v3187_v56  ;;  %10857 = vrcp.f32 %v3394_v47 }
 0x6fd   : > { %v3373_v5 = vmul.f32 1.442695, %v3253_v23  ;;  %v3375_v15 = vmul.f32 1.442695, %v3254_v19 }
 0x6fe   : > { %v3397_v43 = vpop.xlane.xlu0 %3396 }
 0x6ff   : > { %10859 = vpow2.f32 %v3373_v5  ;;  %v3190_v4 = vpop.xlane.xlu1 %3189 }
 0x700   : > { %10861 = vpow2.f32 %v3375_v15  ;;  %v3255_v48 = vsub.f32 %v13437_v38, %v3190_v4  ;;  %v3256_v55 = vsub.f32 %v13439_v1, %v3190_v4 }
 0x701   : > { %v10856_v61 = vpop.eup %10855  ;;  %10863 = vrcp.f32 %v3397_v43 }
 0x702   : > { %v3377_v44 = vmul.f32 1.442695, %v3255_v48  ;;  %v3379_v8 = vmul.f32 1.442695, %v3256_v55  ;;  %v2232_v58 = vpop.xlane.xlu0 %2231  ;;  %v3518_v56 = vmul.f32 %v10856_v61, %v13631_v54  ;;  %v3517_v38 = vmul.f32 %v10856_v61, %v13629_v31 }
 0x703   : > { %10865 = vrcp.f32 %v2232_v58 }
 0x704   : > { %v3400_v24 = vpop.xlane.xlu1 %3399  ;;  %10867 = vpow2.f32 %v3377_v44 }
 0x705   : > { %v10858_v7 = vpop.eup %10857  ;;  %10869 = vpow2.f32 %v3379_v8 }
 0x706   : > { %10871 = vrcp.f32 %v3400_v24  ;;  %v3403_v5 = vpop.xlane.xlu0 %3402  ;;  %v3520_v15 = vmul.f32 %v10858_v7, %v13645_v35  ;;  %v3519_v1 = vmul.f32 %v10858_v7, %v13643_v9 }
 0x708   : > { %v2235_v4 = vpop.xlane.xlu1 %2234  ;;  %v9908_v43 = vpack.c.bf16 %v3520_v15, %v3518_v56  ;;  %v9910_v47 = vpack.c.bf16 %v3519_v1, %v3517_v38 }
 0x709   : > { %10873 = vrcp.f32 %v2235_v4  ;;  %v14017_v23 = vpop.eup %10859 }
 0x70a   : > { %v14019_v58 = vpop.eup %10861  ;;  %10875 = vrcp.f32 %v3403_v5  ;;  %v3193_v8 = vpop.xlane.xlu0 %3192  ;;  %9909 = vmatprep.subr.bf16.mxu1 %v9908_v43 }
 0x70b   : > { %v3257_v54 = vsub.f32 %v18447_v11, %v3193_v8  ;;  %v3258_v19 = vsub.f32 %v18448_v51, %v3193_v8  ;;  %9911 = vmatpush1.bf16.xpose.msra.mxu1 %v9910_v47  ;;  %v3473_v31 = vadd.f32 %v14019_v58, %v14017_v23  ;;  %v10864_v9 = vpop.eup %10863 }
 0x70c   : > { %v3406_v35 = vpop.xlane.xlu1 %3405  ;;  %v3522_v38 = vmul.f32 %v10864_v9, %v13659_v27  ;;  %v3521_v4 = vmul.f32 %v10864_v9, %v13655_v46 }
 0x70d   : > { %10877 = vrcp.f32 %v3406_v35  ;;  %v10866_v48 = vpop.eup %10865  ;;  %v3381_v55 = vmul.f32 1.442695, %v3257_v54  ;;  %v3383_v61 = vmul.f32 1.442695, %v3258_v19  ;;  %3474 = vadd.xlane.f32.xlu0 %v3473_v31 }
 0x70e   : > { %v14025_v44 = vpop.eup %10867  ;;  %v2344_v46 = vmul.f32 %v10866_v48, %v13579_v22  ;;  %v18552_v22 = vld [vmem:[#allocation49_spill] sm:$0xff] }
 0x70f   : > { %v3409_v24 = vpop.xlane.xlu0 %3408  ;;  %v14027_v7 = vpop.eup %10869  ;;  %10879 = vpow2.f32 %v3381_v55 }
 0x710   : > { %v10872_v56 = vpop.eup %10871  ;;  %10881 = vpow2.f32 %v3383_v61  ;;  %v3476_v15 = vadd.f32 %v14027_v7, %v14025_v44 }
 0x711   : > { %v3196_v11 = vpop.xlane.xlu1 %3195  ;;  %v3524_v1 = vmul.f32 %v10872_v56, %v13690_v0  ;;  %v3523_v43 = vmul.f32 %v10872_v56, %v13684_v16  ;;  %10883 = vrcp.f32 %v3409_v24 }
 0x712   : > { %v3259_v51 = vsub.f32 %v18459_v42, %v3196_v11  ;;  %v3260_v5 = vsub.f32 %v18460_v10, %v3196_v11  ;;  %3477 = vadd.xlane.f32.xlu1 %v3476_v15  ;;  %v2345_v42 = vmul.f32 %v10866_v48, %v13583_v29  ;;  %v18549_v11 = vld [vmem:[#allocation50_spill] sm:$0xff] }
 0x713   : > { %v10874_v47 = vpop.eup %10873  ;;  %v2238_v19 = vpop.xlane.xlu0 %2237  ;;  %v9912_v10 = vpack.c.bf16 %v3524_v1, %v3522_v38  ;;  %v9914_v31 = vpack.c.bf16 %v3523_v43, %v3521_v4 }
 0x714   : > { %v3385_v8 = vmul.f32 1.442695, %v3259_v51  ;;  %v3387_v54 = vmul.f32 1.442695, %v3260_v5  ;;  %10885 = vrcp.f32 %v2238_v19  ;;  %v2347_v27 = vmul.f32 %v10874_v47, %v13589_v57  ;;  %v10876_v55 = vpop.eup %10875  ;;  %v18550_v51 = vld [vmem:[#allocation57_spill] sm:$0xff]  ;;  %v18551_v5 = vld [vmem:[#allocation54_spill] sm:$0xff] }
 0x715   : > { %v3412_v35 = vpop.xlane.xlu1 %3411  ;;  %v2346_v16 = vmul.f32 %v10874_v47, %v13587_v45  ;;  %9913 = vmatprep.subr.bf16.mxu1 %v9912_v10  ;;  %v3526_v56 = vmul.f32 %v10876_v55, %v18549_v11  ;;  %v3525_v45 = vmul.f32 %v10876_v55, %v18552_v22  ;;  %v18557_v22 = vld [vmem:[#allocation36_spill] sm:$0xff] }
 0x716   : > { %10887 = vpow2.f32 %v3385_v8  ;;  %v9872_v0 = vpack.c.bf16 %v2347_v27, %v2345_v42  ;;  %9915 = vmatpush1.bf16.xpose.msra.mxu1 %v9914_v31 }
 0x717   : > { %10889 = vpow2.f32 %v3387_v54  ;;  %v10878_v9 = vpop.eup %10877  ;;  %v3415_v61 = vpop.xlane.xlu0 %3414  ;;  %v9874_v29 = vpack.c.bf16 %v2346_v16, %v2344_v46  ;;  %v18553_v46 = vld [vmem:[#allocation61_spill] sm:$0xff] }
 0x718   : > { %10891 = vrcp.f32 %v3412_v35  ;;  %9873 = vmatprep.subr.bf16.mxu0 %v9872_v0  ;;  %v3528_v57 = vmul.f32 %v10878_v9, %v18550_v51  ;;  %v3527_v15 = vmul.f32 %v10878_v9, %v18551_v5  ;;  %v18554_v0 = vld [vmem:[#allocation31_spill] sm:$0xff] }
 0x719   : > { %v2241_v24 = vpop.xlane.xlu1 %2240  ;;  %9875 = vmatpush1.bf16.xpose.msra.mxu0 %v9874_v29  ;;  %v14045_v48 = vpop.eup %10879 }
 0x71a   : > { %10893 = vrcp.f32 %v2241_v24  ;;  %v9916_v38 = vpack.c.bf16 %v3528_v57, %v3526_v56  ;;  %v14047_v1 = vpop.eup %10881  ;;  %v9918_v43 = vpack.c.bf16 %v3527_v15, %v3525_v45  ;;  %v18556_v24 = vld [vmem:[#allocation70_spill] sm:$0xff] }
 0x71b   : > { %10895 = vrcp.f32 %v3415_v61  ;;  %v2244_v4 = vpop.xlane.xlu0 %2243  ;;  %v3479_v8 = vadd.f32 %v14047_v1, %v14045_v48  ;;  %v10884_v54 = vpop.eup %10883  ;;  %v18555_v61 = vld [vmem:[#allocation58_spill] sm:$0xff] }
 0x71c   : > { %9917 = vmatprep.subr.bf16.mxu1 %v9916_v38  ;;  %v3530_v16 = vmul.f32 %v10884_v54, %v18553_v46  ;;  %v3529_v29 = vmul.f32 %v10884_v54, %v18555_v61  ;;  %v18558_v38 = vld [vmem:[#allocation38_spill] sm:$0xff]  ;;  %v18562_v61 = vld [vmem:[#allocation51_spill] sm:$0xff] }
 0x71d   : > { %v3418_v47 = vpop.xlane.xlu1 %3417  ;;  %3480 = vadd.xlane.f32.xlu0 %v3479_v8 }
 0x71e   : > { %10897 = vrcp.f32 %v3418_v47  ;;  %v10886_v19 = vpop.eup %10885  ;;  %9919 = vmatpush1.bf16.xpose.msra.mxu1 %v9918_v43  ;;  %v18559_v47 = vld [vmem:[#allocation35_spill] sm:$0xff] }
 0x71f   : > { %10899 = vrcp.f32 %v2244_v4  ;;  %v3421_v10 = vpop.xlane.xlu0 %3420  ;;  %v2349_v45 = vmul.f32 %v10886_v19, %v18557_v22  ;;  %v2348_v8 = vmul.f32 %v10886_v19, %v18559_v47  ;;  %v18564_v19 = vld [vmem:[#allocation30_spill] sm:$0xff] }
 0x720   : > { %v14051_v42 = vpop.eup %10887 }
 0x721   : > { %v14053_v35 = vpop.eup %10889  ;;  %v2247_v31 = vpop.xlane.xlu1 %2246 }
 0x722   : > { %v10892_v27 = vpop.eup %10891  ;;  %10901 = vrcp.f32 %v2247_v31  ;;  %v3482_v55 = vadd.f32 %v14053_v35, %v14051_v42  ;;  %v18560_v31 = vld [vmem:[#allocation37_spill] sm:$0xff] }
 0x723   : > { %v3532_v9 = vmul.f32 %v10892_v27, %v18554_v0  ;;  %v3531_v11 = vmul.f32 %v10892_v27, %v18556_v24  ;;  %10903 = vrcp.f32 %v3421_v10  ;;  %v2250_v51 = vpop.xlane.xlu0 %2249  ;;  %v18561_v0 = vld [vmem:[#allocation105_spill] sm:$0xff]  ;;  %v18563_v24 = vld [vmem:[#allocation106_spill] sm:$0xff] }
 0x724   : > { %v10894_v56 = vpop.eup %10893  ;;  %3483 = vadd.xlane.f32.xlu1 %v3482_v55 }
 0x725   : > { %v9920_v57 = vpack.c.bf16 %v3532_v9, %v3530_v16  ;;  %v3424_v5 = vpop.xlane.xlu1 %3423  ;;  %v9922_v15 = vpack.c.bf16 %v3531_v11, %v3529_v29  ;;  %v2351_v4 = vmul.f32 %v10894_v56, %v18558_v38  ;;  %v10896_v43 = vpop.eup %10895  ;;  %v2350_v46 = vmul.f32 %v10894_v56, %v18560_v31  ;;  %v18565_v38 = vld [vmem:[#allocation40_spill] sm:$0xff] }
 0x726   : > { %10905 = vrcp.f32 %v3424_v5  ;;  %v3534_v9 = vmul.f32 %v10896_v43, %v18561_v0  ;;  %v3533_v56 = vmul.f32 %v10896_v43, %v18564_v19 }
 0x727   : > { %10907 = vrcp.f32 %v2250_v51  ;;  %9921 = vmatprep.subr.bf16.mxu1 %v9920_v57  ;;  %v9876_v54 = vpack.c.bf16 %v2351_v4, %v2349_v45  ;;  %v3427_v10 = vpop.xlane.xlu0 %3426  ;;  %v9878_v55 = vpack.c.bf16 %v2350_v46, %v2348_v8  ;;  %v18566_v8 = vld [vmem:[#allocation39_spill] sm:$0xff] }
 0x728   : > { %v10898_v27 = vpop.eup %10897  ;;  %9923 = vmatpush1.bf16.xpose.msra.mxu1 %v9922_v15 }
 0x729   : > { %9877 = vmatprep.subr.bf16.mxu0 %v9876_v54  ;;  %v2253_v16 = vpop.xlane.xlu1 %2252  ;;  %v3536_v29 = vmul.f32 %v10898_v27, %v18562_v61  ;;  %v3535_v11 = vmul.f32 %v10898_v27, %v18563_v24  ;;  %v10900_v5 = vpop.eup %10899  ;;  %v18568_v24 = vld [vmem:[#allocation52_spill] sm:$0xff] }
 0x72a   : > { %10909 = vrcp.f32 %v2253_v16  ;;  %9879 = vmatpush1.bf16.xpose.msra.mxu0 %v9878_v55  ;;  %v2353_v4 = vmul.f32 %v10900_v5, %v18565_v38  ;;  %v2352_v31 = vmul.f32 %v10900_v5, %v18566_v8 }
 0x72b   : > { %v9924_v51 = vpack.c.bf16 %v3536_v29, %v3534_v9  ;;  %10911 = vrcp.f32 %v3427_v10  ;;  %v2256_v22 = vpop.xlane.xlu0 %2255  ;;  %v9926_v15 = vpack.c.bf16 %v3535_v11, %v3533_v56 }
 0x72c   : > { %v10902_v57 = vpop.eup %10901 }
 0x72d   : > { %9925 = vmatprep.subr.bf16.mxu1 %v9924_v51  ;;  %v3430_v45 = vpop.xlane.xlu1 %3429  ;;  %v2355_v47 = vmul.f32 %v10902_v57, %v13623_v30  ;;  %v2354_v46 = vmul.f32 %v10902_v57, %v13619_v52  ;;  %v10904_v54 = vpop.eup %10903  ;;  %v18567_v30 = vld [vmem:[#allocation34_spill] sm:$0xff] }
 0x72e   : > { %10913 = vrcp.f32 %v3430_v45  ;;  %v3538_v9 = vmul.f32 %v10904_v54, %v13793_v37  ;;  %v252_v52 = vld [vmem:[%s17617_s2 + $0x48] sm:$0xff]  ;;  %v3537_v11 = vmul.f32 %v10904_v54, %v18568_v24  ;;  %v18571_v45 = vld [vmem:[#allocation41_spill] sm:$0xff] }
 0x72f   : > { %v9880_v27 = vpack.c.bf16 %v2355_v47, %v2353_v4  ;;  %v9882_v55 = vpack.c.bf16 %v2354_v46, %v2352_v31  ;;  %10915 = vrcp.f32 %v2256_v22  ;;  %v3433_v10 = vpop.xlane.xlu0 %3432  ;;  %v18569_v57 = vld [vmem:[#allocation42_spill] sm:$0xff]  ;;  %v18572_v4 = vld [vmem:[#allocation43_spill] sm:$0xff] }
 0x730   : > { %v10906_v43 = vpop.eup %10905  ;;  %9927 = vmatpush1.bf16.xpose.msra.mxu1 %v9926_v15 }
 0x731   : > { %v10908_v16 = vpop.eup %10907  ;;  %9881 = vmatprep.subr.bf16.mxu0 %v9880_v27  ;;  %v2259_v0 = vpop.xlane.xlu1 %2258  ;;  %v3540_v61 = vmul.f32 %v10906_v43, %v13819_v14  ;;  %v3539_v29 = vmul.f32 %v10906_v43, %v18567_v30  ;;  %v18570_v14 = vld [vmem:[#allocation44_spill] sm:$0xff] }
 0x732   : > { %10917 = vrcp.f32 %v2259_v0  ;;  %9883 = vmatpush1.bf16.xpose.msra.mxu0 %v9882_v55  ;;  %v2357_v22 = vmul.f32 %v10908_v16, %v18569_v57  ;;  %v2356_v38 = vmul.f32 %v10908_v16, %v18571_v45  ;;  %v18573_v43 = vld [vmem:[#allocation56_spill] sm:$0xff]  ;;  %v18574_v0 = vld [vmem:[#allocation59_spill] sm:$0xff] }
 0x733   : > { %v9928_v5 = vpack.c.bf16 %v3540_v61, %v3538_v9  ;;  %10919 = vrcp.f32 %v3433_v10  ;;  %v2262_v56 = vpop.xlane.xlu0 %2261  ;;  %v9930_v51 = vpack.c.bf16 %v3539_v29, %v3537_v11  ;;  %302 = vperm.xlu0 %10393, %v252_v52   ;;  %v18575_v61 = vld [vmem:[#allocation74_spill] sm:$0xff]  ;;  %v18576_v16 = vld [vmem:[#allocation55_spill] sm:$0xff] }
 0x734   : > { %v10910_v19 = vpop.eup %10909 }
 0x735   : > { %9929 = vmatprep.subr.bf16.mxu1 %v9928_v5  ;;  %v3436_v37 = vpop.xlane.xlu1 %3435  ;;  %v2359_v15 = vmul.f32 %v10910_v19, %v18570_v14  ;;  %v2358_v47 = vmul.f32 %v10910_v19, %v18572_v4  ;;  %v10912_v8 = vpop.eup %10911 }
 0x736   : > { %10921 = vrcp.f32 %v3436_v37  ;;  %v3542_v10 = vmul.f32 %v10912_v8, %v18573_v43  ;;  %v3541_v52 = vmul.f32 %v10912_v8, %v18576_v16  ;;  %v18578_v37 = vld [vmem:[#allocation45_spill] sm:$0xff] }
 0x737   : > { %v9884_v31 = vpack.c.bf16 %v2359_v15, %v2357_v22  ;;  %v9886_v46 = vpack.c.bf16 %v2358_v47, %v2356_v38  ;;  %10923 = vrcp.f32 %v2262_v56  ;;  %v18579_v15 = vld [vmem:[#allocation53_spill] sm:$0xff] }
 0x738   : > { %v10914_v54 = vpop.eup %10913  ;;  %9931 = vmatpush1.bf16.xpose.msra.mxu1 %v9930_v51  ;;  %v3439_v27 = vpop.xlane.xlu0 %3438  ;;  %v18577_v51 = vld [vmem:[#allocation46_spill] sm:$0xff] }
 0x739   : > { %9885 = vmatprep.subr.bf16.mxu0 %v9884_v31  ;;  %v2265_v55 = vpop.xlane.xlu1 %2264  ;;  %v3544_v9 = vmul.f32 %v10914_v54, %v18574_v0  ;;  %v3543_v30 = vmul.f32 %v10914_v54, %v18575_v61  ;;  %v10916_v29 = vpop.eup %10915  ;;  %v18580_v54 = vld [vmem:[#allocation63_spill] sm:$0xff] }
 0x73a   : > { %10925 = vrcp.f32 %v2265_v55  ;;  %9887 = vmatpush1.bf16.xpose.msra.mxu0 %v9886_v46  ;;  %v2361_v57 = vmul.f32 %v10916_v29, %v18577_v51  ;;  %v2360_v14 = vmul.f32 %v10916_v29, %v18578_v37  ;;  %v18581_v55 = vld [vmem:[#allocation109_spill] sm:$0xff] }
 0x73b   : > { %v9932_v24 = vpack.c.bf16 %v3544_v9, %v3542_v10  ;;  %10927 = vrcp.f32 %v3439_v27  ;;  %v9934_v19 = vpack.c.bf16 %v3543_v30, %v3541_v52  ;;  %v18582_v10 = vld [vmem:[#allocation64_spill] sm:$0xff] }
 0x73c   : > { %v10918_v11 = vpop.eup %10917  ;;  %v2268_v5 = vpop.xlane.xlu0 %2267  ;;  %v18583_v9 = vld [vmem:[#allocation60_spill] sm:$0xff] }
 0x73d   : > { %9933 = vmatprep.subr.bf16.mxu1 %v9932_v24  ;;  %v3442_v56 = vpop.xlane.xlu1 %3441  ;;  %v2363_v22 = vmul.f32 %v10918_v11, %v13736_v59  ;;  %v2362_v45 = vmul.f32 %v10918_v11, %v18579_v15  ;;  %v10920_v38 = vpop.eup %10919  ;;  %v18584_v11 = vld [vmem:[#allocation107_spill] sm:$0xff] }
 0x73e   : > { %10929 = vrcp.f32 %v3442_v56  ;;  %v3546_v27 = vmul.f32 %v10920_v38, %v18580_v54  ;;  %v3545_v61 = vmul.f32 %v10920_v38, %v18583_v9  ;;  %v18585_v56 = vld [vmem:[#allocation62_spill] sm:$0xff]  ;;  %v18589_v54 = vld [vmem:[#allocation108_spill] sm:$0xff] }
 0x73f   : > { %v9888_v4 = vpack.c.bf16 %v2363_v22, %v2361_v57  ;;  %v9890_v47 = vpack.c.bf16 %v2362_v45, %v2360_v14  ;;  %10931 = vrcp.f32 %v2268_v5  ;;  %v18586_v57 = vld [vmem:[#allocation69_spill] sm:$0xff] }
 0x740   : > { %v10922_v8 = vpop.eup %10921  ;;  %9935 = vmatpush1.bf16.xpose.msra.mxu1 %v9934_v19  ;;  %v3445_v31 = vpop.xlane.xlu0 %3444 }
 0x741   : > { %9889 = vmatprep.subr.bf16.mxu0 %v9888_v4  ;;  %v2271_v46 = vpop.xlane.xlu1 %2270  ;;  %v3548_v43 = vmul.f32 %v10922_v8, %v18581_v55  ;;  %v3547_v59 = vmul.f32 %v10922_v8, %v18582_v10  ;;  %v10924_v0 = vpop.eup %10923  ;;  %v18590_v55 = vld [vmem:[#allocation110_spill] sm:$0xff] }
 0x742   : > { %10933 = vrcp.f32 %v2271_v46  ;;  %9891 = vmatpush1.bf16.xpose.msra.mxu0 %v9890_v47  ;;  %v2365_v5 = vmul.f32 %v10924_v0, %v18584_v11  ;;  %v2364_v51 = vmul.f32 %v10924_v0, %v18585_v56  ;;  %v18587_v47 = vld [vmem:[#allocation77_spill] sm:$0xff] }
 0x743   : > { %v9936_v30 = vpack.c.bf16 %v3548_v43, %v3546_v27  ;;  %10935 = vrcp.f32 %v3445_v31  ;;  %v9938_v52 = vpack.c.bf16 %v3547_v59, %v3545_v61  ;;  %v18588_v31 = vld [vmem:[#allocation7_spill] sm:$0xff] }
 0x744   : > { %v10926_v29 = vpop.eup %10925  ;;  %v2274_v16 = vpop.xlane.xlu0 %2273 }
 0x745   : > { %9937 = vmatprep.subr.bf16.mxu1 %v9936_v30  ;;  %v3448_v24 = vpop.xlane.xlu1 %3447  ;;  %v2367_v19 = vmul.f32 %v10926_v29, %v13799_v18  ;;  %v2366_v22 = vmul.f32 %v10926_v29, %v18586_v57  ;;  %v10928_v37 = vpop.eup %10927  ;;  %v18591_v30 = vld [vmem:[#allocation20_spill] sm:$0xff] }
 0x746   : > { %10937 = vrcp.f32 %v3448_v24  ;;  %v3550_v8 = vmul.f32 %v10928_v37, %v18587_v47  ;;  %v3549_v43 = vmul.f32 %v10928_v37, %v18590_v55 }
 0x747   : > { %v9892_v14 = vpack.c.bf16 %v2367_v19, %v2365_v5  ;;  %v9894_v15 = vpack.c.bf16 %v2366_v22, %v2364_v51  ;;  %10939 = vrcp.f32 %v2274_v16  ;;  %v18593_v22 = vld [vmem:[#allocation13_spill] sm:$0xff] }
 0x748   : > { %v10930_v45 = vpop.eup %10929  ;;  %9939 = vmatpush1.bf16.xpose.msra.mxu1 %v9938_v52  ;;  %v3451_v38 = vpop.xlane.xlu0 %3450  ;;  %v18592_v52 = vld [vmem:[#allocation73_spill] sm:$0xff]  ;;  %v3775_v37 = vrot.slane %v18593_v22, 4 }
 0x749   : > { %9893 = vmatprep.subr.bf16.mxu0 %v9892_v14  ;;  %v2277_v4 = vpop.xlane.xlu1 %2276  ;;  %v3552_v46 = vmul.f32 %v10930_v45, %v18588_v31  ;;  %v3551_v18 = vmul.f32 %v10930_v45, %v18589_v54  ;;  %v10932_v27 = vpop.eup %10931 }
 0x74a   : > { %10941 = vrcp.f32 %v2277_v4  ;;  %9895 = vmatpush1.bf16.xpose.msra.mxu0 %v9894_v15  ;;  %v2369_v29 = vmul.f32 %v10932_v27, %v18591_v30  ;;  %v2368_v24 = vmul.f32 %v10932_v27, %v18592_v52 }
 0x74b   : > { %v9940_v10 = vpack.c.bf16 %v3552_v46, %v3550_v8  ;;  %10943 = vrcp.f32 %v3451_v38  ;;  %v9942_v9 = vpack.c.bf16 %v3551_v18, %v3549_v43  ;;  %v18594_v8 = vld [vmem:[#allocation25_spill] sm:$0xff] }
 0x74c   : > { %v10934_v59 = vpop.eup %10933  ;;  %v2280_v0 = vpop.xlane.xlu0 %2279  ;;  %v3774_v31 = vrot.slane %v18594_v8, 4  ;;  %v18600_v8 = vld [vmem:[#allocation78_spill] sm:$0xff] }
 0x74d   : > { %9941 = vmatprep.subr.bf16.mxu1 %v9940_v10  ;;  %v3454_v61 = vpop.xlane.xlu1 %3453  ;;  %v2371_v16 = vmul.f32 %v10934_v59, %v13833_v20  ;;  %v2370_v11 = vmul.f32 %v10934_v59, %v13811_v2  ;;  %v10936_v5 = vpop.eup %10935 }
 0x74e   : > { %10945 = vrcp.f32 %v3454_v61  ;;  %v3554_v15 = vmul.f32 %v10936_v5, %v13920_v40  ;;  %v3553_v2 = vmul.f32 %v10936_v5, %v13917_v21 }
 0x74f   : > { %v9896_v19 = vpack.c.bf16 %v2371_v16, %v2369_v29  ;;  %v9898_v56 = vpack.c.bf16 %v2370_v11, %v2368_v24  ;;  %10947 = vrcp.f32 %v2280_v0 }
 0x750   : > { %v10938_v51 = vpop.eup %10937  ;;  %9943 = vmatpush1.bf16.xpose.msra.mxu1 %v9942_v9  ;;  %v3457_v57 = vpop.xlane.xlu0 %3456 }
 0x751   : > { %9897 = vmatprep.subr.bf16.mxu0 %v9896_v19  ;;  %v2283_v14 = vpop.xlane.xlu1 %2282  ;;  %v3556_v20 = vmul.f32 %v10938_v51, %v13942_v12  ;;  %v3555_v45 = vmul.f32 %v10938_v51, %v13939_v50  ;;  %v10940_v38 = vpop.eup %10939  ;;  %3810 = vxpose.xlu0.b32.start.end [1/1] (short) %v3775_v37, 128 }
 0x752   : > { %10949 = vrcp.f32 %v2283_v14  ;;  %9899 = vmatpush1.bf16.xpose.msra.mxu0 %v9898_v56  ;;  %v2373_v40 = vmul.f32 %v10940_v38, %v13879_v6  ;;  %v2372_v50 = vmul.f32 %v10940_v38, %v13863_v53  ;;  %v18595_v14 = vld [vmem:[#allocation6_spill] sm:$0xff]  ;;  %v18597_v38 = vmov 0.0  }
 0x753   : > { %v9944_v4 = vpack.c.bf16 %v3556_v20, %v3554_v15  ;;  %10951 = vrcp.f32 %v3457_v57  ;;  %v9946_v46 = vpack.c.bf16 %v3555_v45, %v3553_v2  ;;  %v2382_v15 = vrot.slane %v18595_v14, 4 }
 0x754   : > { %v10942_v47 = vpop.eup %10941  ;;  %v3463_v54 = vpop.xlane.xlu0 %3462 }
 0x755   : > { %9945 = vmatprep.subr.bf16.mxu1 %v9944_v4  ;;  %v3460_v18 = vpop.xlane.xlu1 %3459  ;;  %v2375_v12 = vmul.f32 %v10942_v47, %v13926_v13  ;;  %v2374_v27 = vmul.f32 %v10942_v47, %v13911_v3  ;;  %v10944_v55 = vpop.eup %10943  ;;  %v18599_v4 = vld [vmem:[#allocation65_spill] sm:$0xff] }
 0x756   : > { %10953 = vrcp.f32 %v3460_v18  ;;  %v3558_v0 = vmul.f32 %v10944_v55, %v13947_v34  ;;  %v3557_v53 = vmul.f32 %v10944_v55, %v13936_v28  ;;  %v18602_v18 = vld [vmem:[#allocation66_spill] sm:$0xff] }
 0x757   : > { %3778 = vxpose.xlu1.b32.start.end [1/1] (short) %v3774_v31, 128  ;;  %v9900_v21 = vpack.c.bf16 %v2375_v12, %v2373_v40  ;;  %v9902_v43 = vpack.c.bf16 %v2374_v27, %v2372_v50  ;;  %10955 = vrcp.f32 %v3463_v54 }
 0x758   : > { %v10946_v10 = vpop.eup %10945  ;;  %9947 = vmatpush1.bf16.xpose.msra.mxu1 %v9946_v46  ;;  %v3469_v29 = vpop.xlane.xlu0 %3468  ;;  %v18601_v46 = vld [vmem:[#allocation68_spill] sm:$0xff] }
 0x759   : > { %9901 = vmatprep.subr.bf16.mxu0 %v9900_v21  ;;  %v3466_v59 = vpop.xlane.xlu1 %3465  ;;  %v3560_v6 = vmul.f32 %v10946_v10, %v13961_v17  ;;  %v3559_v13 = vmul.f32 %v10946_v10, %v13957_v25  ;;  %v10948_v9 = vpop.eup %10947 }
 0x75a   : > { %10957 = vrcp.f32 %v3466_v59  ;;  %9903 = vmatpush1.bf16.xpose.msra.mxu0 %v9902_v43  ;;  %v2377_v52 = vmul.f32 %v10948_v9, %v13951_v26  ;;  %v2376_v34 = vmul.f32 %v10948_v9, %v13931_v60 }
 0x75b   : > { %v9948_v3 = vpack.c.bf16 %v3560_v6, %v3558_v0  ;;  %v9950_v30 = vpack.c.bf16 %v3559_v13, %v3557_v53 }
 0x75c   : > { %v10950_v61 = vpop.eup %10949 }
 0x75d   : > { %9949 = vmatprep.subr.bf16.mxu1 %v9948_v3  ;;  %v3472_v16 = vpop.xlane.xlu1 %3471  ;;  %v2379_v24 = vmul.f32 %v10950_v61, %v13973_v33  ;;  %v2378_v17 = vmul.f32 %v10950_v61, %v13963_v49  ;;  %v10952_v25 = vpop.eup %10951  ;;  %v18603_v61 = vld [vmem:[#allocation26_spill] sm:$0xff] }
 0x75e   : > { %10959 = vrcp.f32 %v3472_v16  ;;  %v3562_v28 = vmul.f32 %v10952_v25, %v13969_v36  ;;  %v3561_v60 = vmul.f32 %v10952_v25, %v13965_v41  ;;  %v18598_v41 = vld [vmem:[#allocation71_spill] sm:$0xff] }
 0x75f   : > { %v9904_v11 = vpack.c.bf16 %v2379_v24, %v2377_v52  ;;  %v9906_v5 = vpack.c.bf16 %v2378_v17, %v2376_v34  ;;  %10961 = vrcp.f32 %v3469_v29  ;;  %v18604_v34 = vld [vmem:[#allocation27_spill] sm:$0xff] }
 0x760   : > { %v10954_v19 = vpop.eup %10953  ;;  %9951 = vmatpush1.bf16.xpose.msra.mxu1 %v9950_v30 }
 0x761   : > { %9905 = vmatprep.subr.bf16.mxu0 %v9904_v11  ;;  %v3564_v56 = vmul.f32 %v10954_v19, %v13985_v62  ;;  %v3563_v26 = vmul.f32 %v10954_v19, %v13981_v63  ;;  %v10956_v51 = vpop.eup %10955  ;;  %v18596_v62 = vld [vmem:[#allocation67_spill] sm:$0xff]  ;;  %v9488_v19 = vld [vmem:[%s17618_s3 + $0x38] sm:$0xff] }
 0x762   : > { %9907 = vmatpush1.bf16.xpose.msra.mxu0 %v9906_v5  ;;  %v3566_v22 = vmul.f32 %v10956_v51, %v13977_v32  ;;  %v3565_v47 = vmul.f32 %v10956_v51, %v18599_v4  ;;  %v9487_v5 = vld [vmem:[%s17618_s3 + $0x30] sm:$0xff]  ;;  %v1470_v51 = vld [vmem:[%s17618_s3 + $0x18] sm:$0xff] }
 0x763   : > { %v9952_v33 = vpack.c.bf16 %v3564_v56, %v3562_v28  ;;  %v9954_v57 = vpack.c.bf16 %v3563_v26, %v3561_v60  ;;  %v1467_v28 = vld [vmem:[%s17618_s3] sm:$0xff]  ;;  %v1468_v56 = vld [vmem:[%s17618_s3 + $0x8] sm:$0xff]  ;;  %v1469_v26 = vld [vmem:[%s17618_s3 + $0x10] sm:$0xff] }
 0x764   : > { %v10958_v49 = vpop.eup %10957 }
 0x765   : > { %9953 = vmatprep.subr.bf16.mxu1 %v9952_v33  ;;  %v3568_v37 = vmul.f32 %v10958_v49, %v13997_v39  ;;  %v3567_v45 = vmul.f32 %v10958_v49, %v18596_v62 }
 0x767   : > { %v9956_v20 = vpack.c.bf16 %v3568_v37, %v3566_v22  ;;  %v9958_v31 = vpack.c.bf16 %v3567_v45, %v3565_v47 }
 0x768   : > { %v10960_v36 = vpop.eup %10959  ;;  %9955 = vmatpush1.bf16.xpose.msra.mxu1 %v9954_v57 }
 0x769   : > { %2451 = vmatmul.mubr.f32.vlgmr.msra.gmra.mrb[88].mxu0 %v2382_v15  ;;  %9957 = vmatprep.subr.bf16.mxu1 %v9956_v20  ;;  %v10962_v63 = vpop.eup %10961  ;;  %v3572_v2 = vmul.f32 %v10960_v36, %v18598_v41  ;;  %v3571_v54 = vmul.f32 %v10960_v36, %v18601_v46  ;;  %v9535_v15 = vld [vmem:[%s17618_s3 + $0x40] sm:$0xff]  ;;  %v18608_v20 = vld [vmem:[#allocation24_spill] sm:$0xff] }
 0x76a   : > { %2544 = vmatprep.mubr.f32.mxu0 %v18597_v38  ;;  %v3570_v32 = vmul.f32 %v10962_v63, %v18600_v8  ;;  %v3569_v40 = vmul.f32 %v10962_v63, %v18602_v18  ;;  %v3843_v36 = vrot.slane %v18608_v20, 4  ;;  %v18609_v63 = vld [vmem:[#allocation15_spill] sm:$0xff] }
 0x76b   : > { %v3842_v62 = vrot.slane %v18609_v63, 4 }
 0x76c   : > { %v9960_v39 = vpack.c.bf16 %v3572_v2, %v3570_v32  ;;  %v9962_v12 = vpack.c.bf16 %v3571_v54, %v3569_v40 }
 0x770   : > { %9959 = vmatpush1.bf16.xpose.msra.mxu1 %v9958_v31 }
 0x771   : > { %9961 = vmatprep.subr.bf16.mxu1 %v9960_v39 }
 0x778   : > { %9963 = vmatpush1.bf16.xpose.msra.mxu1 %v9962_v12 }
 0x79a   : > { %v3475_v50 = vpop.xlane.xlu0 %3474 }
 0x79b   : > { %10963 = vrcp.f32 %v3475_v50 }
 0x79f   : > { %v3478_v27 = vpop.xlane.xlu1 %3477 }
 0x7a0   : > { %10965 = vrcp.f32 %v3478_v27 }
 0x7a5   : > { %v10964_v55 = vpop.eup %10963 }
 0x7a6   : > { %v3574_v10 = vmul.f32 %v10964_v55, %v14019_v58  ;;  %v3573_v0 = vmul.f32 %v10964_v55, %v14017_v23 }
 0x7aa   : > { %v10966_v21 = vpop.eup %10965  ;;  %v3481_v43 = vpop.xlane.xlu0 %3480 }
 0x7ab   : > { %v3576_v59 = vmul.f32 %v10966_v21, %v14027_v7  ;;  %v3575_v6 = vmul.f32 %v10966_v21, %v14025_v44  ;;  %10967 = vrcp.f32 %v3481_v43 }
 0x7ad   : > { %v9964_v13 = vpack.c.bf16 %v3576_v59, %v3574_v10  ;;  %v9966_v9 = vpack.c.bf16 %v3575_v6, %v3573_v0 }
 0x7af   : > { %9965 = vmatprep.subr.bf16.mxu1 %v9964_v13 }
 0x7b0   : > { %9967 = vmatpush1.bf16.xpose.msra.mxu1 %v9966_v9 }
 0x7b1   : > { %v3484_v53 = vpop.xlane.xlu1 %3483 }
 0x7b2   : > { %10969 = vrcp.f32 %v3484_v53  ;;  %v303_v3 = vpop.permute.xlu0 %302 }
 0x7b3   : > { %v14145_v30 = vadd.f32 %v18603_v61, %v303_v3  ;;  %v14153_v17 = vadd.f32 %v18604_v34, %v303_v3 }
 0x7b5   : > { %3645 = vmatprep.mubr.f32.mxu1 %v14145_v30  ;;  %v10968_v58 = vpop.eup %10967  ;;  %18605 = vst [vmem:[#allocation72_spill] sm:$0xff] %v14153_v17  ;;  %v4684_v61 = vrot.slane %v14145_v30, 4 }
 0x7b6   : > { %v3578_v7 = vmul.f32 %v10968_v58, %v14047_v1  ;;  %v3577_v44 = vmul.f32 %v10968_v58, %v14045_v48  ;;  %v9485_v1 = vld [vmem:[%s17618_s3 + $0x20] sm:$0xff]  ;;  %v18606_v48 = vld [vmem:[#allocation12_spill] sm:$0xff] }
 0x7bc   : > { %v10970_v29 = vpop.eup %10969 }
 0x7bd   : > { %v3580_v23 = vmul.f32 %v10970_v29, %v14053_v35  ;;  %v3579_v16 = vmul.f32 %v10970_v29, %v14051_v42  ;;  %v18607_v42 = vld [vmem:[#allocation18_spill] sm:$0xff] }
 0x7be   : > { %v9486_v35 = vld [vmem:[%s17618_s3 + $0x28] sm:$0xff] }
 0x7bf   : > { %v9968_v52 = vpack.c.bf16 %v3580_v23, %v3578_v7  ;;  %v9970_v24 = vpack.c.bf16 %v3579_v16, %v3577_v44 }
 0x7c1   : > { %9969 = vmatprep.subr.bf16.mxu1 %v9968_v52 }
 0x7c2   : > { %9971 = vmatpush1.bf16.xpose.msra.mxu1 %v9970_v24 }
 0x7c9   : > { %3646 = vmatmul.mubr.f32.vlgmr.msra.gmra.mrb[130].mxu1 %v14153_v17 }
 0x7ca   : > { %3745 = vmatprep.mubr.f32.mxu1 %v18597_v38 }
 0x7d1   : > { %v3826_v32 = vpop.trf.xlu0 }
 0x7d5   : > { %v3827_v39 = vpop.trf.xlu0 }
 0x7d7   : > { %v3794_v60 = vpop.trf.xlu1 }
 0x7d9   : > { %v3828_v54 = vpop.trf.xlu0 }
 0x7db   : > { %v3795_v33 = vpop.trf.xlu1 }
 0x7dd   : > { %v3829_v40 = vpop.trf.xlu0 }
 0x7df   : > { %v3796_v49 = vpop.trf.xlu1 }
 0x7e1   : > { %v3830_v50 = vpop.trf.xlu0 }
 0x7e3   : > { %v3797_v57 = vpop.trf.xlu1 }
 0x7e5   : > { %v3831_v55 = vpop.trf.xlu0 }
 0x7e7   : > { %v3798_v22 = vpop.trf.xlu1 }
 0x7e9   : > { %v3832_v21 = vpop.trf.xlu0 }
 0x7eb   : > { %v3799_v45 = vpop.trf.xlu1 }
 0x7ed   : > { %v3833_v43 = vpop.trf.xlu0 }
 0x7ef   : > { %v3800_v41 = vpop.trf.xlu1 }
 0x7f1   : > { %v3834_v10 = vpop.trf.xlu0 }
 0x7f3   : > { %v3801_v2 = vpop.trf.xlu1 }
 0x7f5   : > { %v3835_v59 = vpop.trf.xlu0 }
 0x7f7   : > { %v3802_v4 = vpop.trf.xlu1 }
 0x7f9   : > { %v3836_v0 = vpop.trf.xlu0 }
 0x7fb   : > { %v3803_v47 = vpop.trf.xlu1 }
 0x7fd   : > { %v3837_v6 = vpop.trf.xlu0 }
 0x7ff   : > { %v3804_v8 = vpop.trf.xlu1 }
 0x801   : > { %v3838_v13 = vpop.trf.xlu0 }
 0x803   : > { %v3805_v31 = vpop.trf.xlu1 }
 0x805   : > { %v3839_v9 = vpop.trf.xlu0 }
 0x807   : > { %v3806_v46 = vpop.trf.xlu1 }
 0x809   : > { %v3840_v53 = vpop.trf.xlu0 }
 0x80b   : > { %v3807_v18 = vpop.trf.xlu1 }
 0x80d   : > { %v3841_v3 = vpop.trf.xlu0 }
 0x80f   : > { %v3808_v12 = vpop.trf.xlu1 }
 0x813   : > { %v3809_v27 = vpop.trf.xlu1 }
 0x83c   : > { %v2452_v25 = vpop.f32.mrb[88].mxu0 }
 0x83d   : > { %v2454_v11 = vpop.f32.mrb[89].mxu0 }
 0x83e   : > { %9489 = vmatprep.subr.msk.mxu0 %vm652_vm1, %v2454_v11 }
 0x83f   : > { %9490 = vmatpush1.msk.msra.mxu0 %vm652_vm1, %v2452_v25 }
 0x840   : > { %9495 = vmatprep.subr.msk.mxu0 %vm652_vm1, %v18606_v48  ;;  %9491 = vmatmul.mubr.msk.f32.vlgmr.msra.gmra.mrb[90].mxu0 %vm555_vm2, %v9485_v1 }
 0x841   : > { %9496 = vmatpush1.msk.msra.mxu0 %vm652_vm1, %v18607_v42  ;;  %2550 = vmatprep.mubr.f32.mxu0 %v18597_v38 }
 0x844   : > { %9492 = vmatmul.mubr.msk.f32.gmra.mrb[92].mxu0 %vm555_vm2, %v9486_v35 }
 0x845   : > { %2556 = vmatprep.mubr.f32.mxu0 %v18597_v38 }
 0x848   : > { %9493 = vmatmul.mubr.msk.f32.gmra.mrb[94].mxu0 %vm555_vm2, %v9487_v5 }
 0x849   : > { %2562 = vmatprep.mubr.f32.mxu0 %v18597_v38 }
 0x84c   : > { %9494 = vmatmul.mubr.msk.f32.gmra.mrb[96].mxu0 %vm555_vm2, %v9488_v19 }
 0x84d   : > { %2651 = vmatprep.mubr.f32.mxu0 %v18597_v38 }
 0x850   : > { %9497 = vmatmul.mubr.msk.f32.vlgmr.msra.gmra.mrb[90].mxu0 %vm555_vm2, %v1467_v28 }
 0x851   : > { %2657 = vmatprep.mubr.f32.mxu0 %v18597_v38 }
 0x854   : > { %9498 = vmatmul.mubr.msk.f32.gmra.mrb[92].mxu0 %vm555_vm2, %v1468_v56 }
 0x855   : > { %2663 = vmatprep.mubr.f32.mxu0 %v18597_v38 }
 0x858   : > { %9499 = vmatmul.mubr.msk.f32.gmra.mrb[94].mxu0 %vm555_vm2, %v1469_v26 }
 0x859   : > { %2669 = vmatprep.mubr.f32.mxu0 %v18597_v38 }
 0x85c   : > { %9500 = vmatmul.mubr.msk.f32.gmra.mrb[96].mxu0 %vm555_vm2, %v1470_v51 }
 0x85d   : > { %3739 = vmatprep.mubr.f32.mxu0 %v18597_v38 }
 0x89c   : > { %v3647_v37 = vpop.f32.mrb[130].mxu1 }
 0x89d   : > { %v3649_v14 = vpop.f32.mrb[131].mxu1 }
 0x89e   : > { %9539 = vmatprep.subr.msk.mxu0 %vm652_vm1, %v3649_v14  ;;  %10292 = vmatprep.subr.msk.mxu1 %vm652_vm1, %v3649_v14 }
 0x89f   : > { %9540 = vmatpush1.msk.msra.mxu0 %vm652_vm1, %v3647_v37  ;;  %10293 = vmatpush1.msk.msra.mxu1 %vm652_vm1, %v3647_v37 }
 0x8a0   : > { %9541 = vmatmul.mubr.msk.f32.vlgmr.msra.gmra.mrb[90].mxu0 %vm555_vm2, %v9535_v15  ;;  %9545 = vmatprep.subr.msk.mxu0 %vm652_vm1, %v3843_v36 }
 0x8a1   : > { %9546 = vmatpush1.msk.msra.mxu0 %vm652_vm1, %v3842_v62  ;;  %4008 = vmatprep.mubr.f32.mxu0 %v18597_v38 }
 0x8a4   : > { %9547 = vmatmul.mubr.msk.f32.vlgmr.msra.gmra.mrb[98].mxu0 %vm555_vm2, %v3794_v60 }
 0x8a5   : > { %4014 = vmatprep.mubr.f32.mxu0 %v18597_v38 }
 0x8a8   : > { %9548 = vmatmul.mubr.msk.f32.gmra.mrb[100].mxu0 %vm555_vm2, %v3795_v33 }
 0x8a9   : > { %4020 = vmatprep.mubr.f32.mxu0 %v18597_v38 }
 0x8ac   : > { %9549 = vmatmul.mubr.msk.f32.gmra.mrb[102].mxu0 %vm555_vm2, %v3796_v49 }
 0x8ad   : > { %4026 = vmatprep.mubr.f32.mxu0 %v18597_v38 }
 0x8b0   : > { %9550 = vmatmul.mubr.msk.f32.gmra.mrb[104].mxu0 %vm555_vm2, %v3797_v57 }
 0x8b1   : > { %4032 = vmatprep.mubr.f32.mxu0 %v18597_v38 }
 0x8b4   : > { %9551 = vmatmul.mubr.msk.f32.gmra.mrb[106].mxu0 %vm555_vm2, %v3798_v22 }
 0x8b5   : > { %4038 = vmatprep.mubr.f32.mxu0 %v18597_v38 }
 0x8b8   : > { %9552 = vmatmul.mubr.msk.f32.gmra.mrb[108].mxu0 %vm555_vm2, %v3799_v45 }
 0x8b9   : > { %4044 = vmatprep.mubr.f32.mxu0 %v18597_v38 }
 0x8bc   : > { %9553 = vmatmul.mubr.msk.f32.gmra.mrb[110].mxu0 %vm555_vm2, %v3800_v41 }
 0x8bd   : > { %4050 = vmatprep.mubr.f32.mxu0 %v18597_v38 }
 0x8c0   : > { %9554 = vmatmul.mubr.msk.f32.gmra.mrb[112].mxu0 %vm555_vm2, %v3801_v2 }
 0x8c1   : > { %4056 = vmatprep.mubr.f32.mxu0 %v18597_v38 }
 0x8c4   : > { %9555 = vmatmul.mubr.msk.f32.gmra.mrb[114].mxu0 %vm555_vm2, %v3802_v4 }
 0x8c5   : > { %4062 = vmatprep.mubr.f32.mxu0 %v18597_v38 }
 0x8c8   : > { %9556 = vmatmul.mubr.msk.f32.gmra.mrb[116].mxu0 %vm555_vm2, %v3803_v47 }
 0x8c9   : > { %4068 = vmatprep.mubr.f32.mxu0 %v18597_v38 }
 0x8cc   : > { %9557 = vmatmul.mubr.msk.f32.gmra.mrb[118].mxu0 %vm555_vm2, %v3804_v8 }
 0x8cd   : > { %4074 = vmatprep.mubr.f32.mxu0 %v18597_v38 }
 0x8d0   : > { %9558 = vmatmul.mubr.msk.f32.gmra.mrb[120].mxu0 %vm555_vm2, %v3805_v31 }
 0x8d1   : > { %4080 = vmatprep.mubr.f32.mxu0 %v18597_v38 }
 0x8d4   : > { %9559 = vmatmul.mubr.msk.f32.gmra.mrb[122].mxu0 %vm555_vm2, %v3806_v46 }
 0x8d5   : > { %4086 = vmatprep.mubr.f32.mxu0 %v18597_v38 }
 0x8d8   : > { %9560 = vmatmul.mubr.msk.f32.gmra.mrb[124].mxu0 %vm555_vm2, %v3807_v18 }
 0x8d9   : > { %4092 = vmatprep.mubr.f32.mxu0 %v18597_v38 }
 0x8dc   : > { %9561 = vmatmul.mubr.msk.f32.gmra.mrb[126].mxu0 %vm555_vm2, %v3808_v12 }
 0x8dd   : > { %4098 = vmatprep.mubr.f32.mxu0 %v18597_v38 }
 0x8e0   : > { %9562 = vmatmul.mubr.msk.f32.gmra.mrb[128].mxu0 %vm555_vm2, %v3809_v27 }
 0x8e1   : > { %4104 = vmatprep.mubr.f32.mxu0 %v18597_v38 }
 0x8e4   : > { %9563 = vmatmul.mubr.msk.f32.gmra.mrb[130].mxu0 %vm555_vm2, %v3826_v32 }
 0x8e5   : > { %4110 = vmatprep.mubr.f32.mxu0 %v18597_v38 }
 0x8e8   : > { %9564 = vmatmul.mubr.msk.f32.gmra.mrb[132].mxu0 %vm555_vm2, %v3827_v39 }
 0x8e9   : > { %4116 = vmatprep.mubr.f32.mxu0 %v18597_v38 }
 0x8ec   : > { %9565 = vmatmul.mubr.msk.f32.gmra.mrb[134].mxu0 %vm555_vm2, %v3828_v54 }
 0x8ed   : > { %4122 = vmatprep.mubr.f32.mxu0 %v18597_v38 }
 0x8f0   : > { %9566 = vmatmul.mubr.msk.f32.gmra.mrb[136].mxu0 %vm555_vm2, %v3829_v40 }
 0x8f1   : > { %4128 = vmatprep.mubr.f32.mxu0 %v18597_v38 }
 0x8f4   : > { %9567 = vmatmul.mubr.msk.f32.gmra.mrb[138].mxu0 %vm555_vm2, %v3830_v50 }
 0x8f5   : > { %4134 = vmatprep.mubr.f32.mxu0 %v18597_v38 }
 0x8f8   : > { %9568 = vmatmul.mubr.msk.f32.gmra.mrb[140].mxu0 %vm555_vm2, %v3831_v55 }
 0x8f9   : > { %4140 = vmatprep.mubr.f32.mxu0 %v18597_v38 }
 0x8fc   : > { %9569 = vmatmul.mubr.msk.f32.gmra.mrb[142].mxu0 %vm555_vm2, %v3832_v21 }
 0x8fd   : > { %4146 = vmatprep.mubr.f32.mxu0 %v18597_v38 }
 0x900   : > { %9570 = vmatmul.mubr.msk.f32.gmra.mrb[144].mxu0 %vm555_vm2, %v3833_v43 }
 0x901   : > { %4152 = vmatprep.mubr.f32.mxu0 %v18597_v38 }
 0x904   : > { %9571 = vmatmul.mubr.msk.f32.gmra.mrb[146].mxu0 %vm555_vm2, %v3834_v10 }
 0x905   : > { %4158 = vmatprep.mubr.f32.mxu0 %v18597_v38 }
 0x908   : > { %9572 = vmatmul.mubr.msk.f32.gmra.mrb[148].mxu0 %vm555_vm2, %v3835_v59 }
 0x909   : > { %4164 = vmatprep.mubr.f32.mxu0 %v18597_v38 }
 0x90c   : > { %9573 = vmatmul.mubr.msk.f32.gmra.mrb[150].mxu0 %vm555_vm2, %v3836_v0 }
 0x90d   : > { %4170 = vmatprep.mubr.f32.mxu0 %v18597_v38 }
 0x910   : > { %9574 = vmatmul.mubr.msk.f32.gmra.mrb[152].mxu0 %vm555_vm2, %v3837_v6 }
 0x911   : > { %4176 = vmatprep.mubr.f32.mxu0 %v18597_v38 }
 0x914   : > { %9575 = vmatmul.mubr.msk.f32.gmra.mrb[154].mxu0 %vm555_vm2, %v3838_v13 }
 0x915   : > { %4182 = vmatprep.mubr.f32.mxu0 %v18597_v38 }
 0x918   : > { %9576 = vmatmul.mubr.msk.f32.gmra.mrb[156].mxu0 %vm555_vm2, %v3839_v9 }
 0x919   : > { %4188 = vmatprep.mubr.f32.mxu0 %v18597_v38 }
 0x91c   : > { %9577 = vmatmul.mubr.msk.f32.gmra.mrb[158].mxu0 %vm555_vm2, %v3840_v53 }
 0x91d   : > { %4194 = vmatprep.mubr.f32.mxu0 %v18597_v38 }
 0x920   : > { %9578 = vmatmul.mubr.msk.f32.gmra.mrb[160].mxu0 %vm555_vm2, %v3841_v3 }
 0x921   : > { %4751 = vmatprep.mubr.f32.mxu0 %v4684_v61 }
 0x927   : > { %v14280_v58 = vpop.f32.mrb[92].mxu0 }
 0x928   : > { %18610 = vst [vmem:[#allocation82_spill] sm:$0xff] %v14280_v58  ;;  %v14282_v29 = vpop.f32.mrb[93].mxu0 }
 0x929   : > { %18611 = vst [vmem:[#allocation75_spill] sm:$0xff] %v14282_v29 }
 0x92b   : > { %v14284_v7 = vpop.f32.mrb[94].mxu0 }
 0x92c   : > { %18612 = vst [vmem:[#allocation76_spill] sm:$0xff] %v14284_v7  ;;  %v14286_v23 = vpop.f32.mrb[95].mxu0 }
 0x92d   : > { %18613 = vst [vmem:[#allocation84_spill] sm:$0xff] %v14286_v23 }
 0x92f   : > { %v14288_v44 = vpop.f32.mrb[96].mxu0 }
 0x930   : > { %18614 = vst [vmem:[#allocation47_spill] sm:$0xff] %v14288_v44  ;;  %v14290_v16 = vpop.f32.mrb[97].mxu0 }
 0x931   : > { %18615 = vst [vmem:[#allocation16_spill] sm:$0xff] %v14290_v16 }
 0x973   : > { %v14292_v52 = vpop.f32.mrb[90].mxu0 }
 0x974   : > { %18616 = vst [vmem:[#allocation88_spill] sm:$0xff] %v14292_v52  ;;  %v14294_v24 = vpop.f32.mrb[91].mxu0 }
 0x975   : > { %18617 = vst [vmem:[#allocation17_spill] sm:$0xff] %v14294_v24 }
 0x977   : > { %v14296_v30 = vpop.f32.mrb[98].mxu0 }
 0x978   : > { %v14298_v34 = vpop.f32.mrb[99].mxu0 }
 0x979   : > { %v4201_v25 = vmax.f32 %v14296_v30, %v14298_v34 }
 0x97b   : > { %4202 = vmax.xlane.f32.xlu0 %v4201_v25  ;;  %v14302_v11 = vpop.f32.mrb[100].mxu0 }
 0x97c   : > { %v14304_v1 = vpop.f32.mrb[101].mxu0 }
 0x97d   : > { %v4204_v48 = vmax.f32 %v14302_v11, %v14304_v1 }
 0x97f   : > { %4205 = vmax.xlane.f32.xlu1 %v4204_v48  ;;  %v14308_v42 = vpop.f32.mrb[102].mxu0 }
 0x980   : > { %v14310_v35 = vpop.f32.mrb[103].mxu0 }
 0x981   : > { %v4207_v5 = vmax.f32 %v14308_v42, %v14310_v35 }
 0x983   : > { %4208 = vmax.xlane.f32.xlu1 %v4207_v5  ;;  %v14314_v19 = vpop.f32.mrb[104].mxu0 }
 0x984   : > { %v14316_v28 = vpop.f32.mrb[105].mxu0 }
 0x985   : > { %v4210_v56 = vmax.f32 %v14314_v19, %v14316_v28 }
 0x987   : > { %4211 = vmax.xlane.f32.xlu1 %v4210_v56  ;;  %v14320_v26 = vpop.f32.mrb[106].mxu0 }
 0x988   : > { %v14322_v51 = vpop.f32.mrb[107].mxu0 }
 0x989   : > { %v4213_v60 = vmax.f32 %v14320_v26, %v14322_v51 }
 0x98b   : > { %4214 = vmax.xlane.f32.xlu0 %v4213_v60  ;;  %v14326_v33 = vpop.f32.mrb[108].mxu0 }
 0x98c   : > { %v14328_v49 = vpop.f32.mrb[109].mxu0 }
 0x98d   : > { %v4216_v57 = vmax.f32 %v14326_v33, %v14328_v49 }
 0x98f   : > { %4217 = vmax.xlane.f32.xlu1 %v4216_v57  ;;  %v14332_v22 = vpop.f32.mrb[110].mxu0 }
 0x990   : > { %v14334_v37 = vpop.f32.mrb[111].mxu0 }
 0x991   : > { %v4219_v14 = vmax.f32 %v14332_v22, %v14334_v37 }
 0x993   : > { %4220 = vmax.xlane.f32.xlu0 %v4219_v14  ;;  %v14338_v15 = vpop.f32.mrb[112].mxu0 }
 0x994   : > { %v14340_v20 = vpop.f32.mrb[113].mxu0 }
 0x995   : > { %v4222_v36 = vmax.f32 %v14338_v15, %v14340_v20 }
 0x997   : > { %4223 = vmax.xlane.f32.xlu1 %v4222_v36  ;;  %v14344_v63 = vpop.f32.mrb[114].mxu0 }
 0x998   : > { %v14346_v62 = vpop.f32.mrb[115].mxu0 }
 0x999   : > { %v4225_v45 = vmax.f32 %v14344_v63, %v14346_v62 }
 0x99b   : > { %4226 = vmax.xlane.f32.xlu0 %v4225_v45  ;;  %v14350_v41 = vpop.f32.mrb[116].mxu0 }
 0x99c   : > { %v14352_v2 = vpop.f32.mrb[117].mxu0 }
 0x99d   : > { %v4228_v4 = vmax.f32 %v14350_v41, %v14352_v2 }
 0x99f   : > { %4229 = vmax.xlane.f32.xlu1 %v4228_v4  ;;  %v14356_v47 = vpop.f32.mrb[118].mxu0 }
 0x9a0   : > { %v14358_v8 = vpop.f32.mrb[119].mxu0 }
 0x9a1   : > { %v4231_v32 = vmax.f32 %v14356_v47, %v14358_v8 }
 0x9a3   : > { %4232 = vmax.xlane.f32.xlu0 %v4231_v32  ;;  %v14362_v31 = vpop.f32.mrb[120].mxu0 }
 0x9a4   : > { %v14364_v39 = vpop.f32.mrb[121].mxu0 }
 0x9a5   : > { %v4234_v46 = vmax.f32 %v14362_v31, %v14364_v39 }
 0x9a7   : > { %4235 = vmax.xlane.f32.xlu1 %v4234_v46  ;;  %v14368_v54 = vpop.f32.mrb[122].mxu0 }
 0x9a8   : > { %v14370_v18 = vpop.f32.mrb[123].mxu0 }
 0x9a9   : > { %v4237_v40 = vmax.f32 %v14368_v54, %v14370_v18 }
 0x9ab   : > { %4238 = vmax.xlane.f32.xlu0 %v4237_v40  ;;  %v14374_v12 = vpop.f32.mrb[124].mxu0 }
 0x9ac   : > { %v14376_v50 = vpop.f32.mrb[125].mxu0 }
 0x9ad   : > { %v4240_v27 = vmax.f32 %v14374_v12, %v14376_v50 }
 0x9af   : > { %4241 = vmax.xlane.f32.xlu1 %v4240_v27  ;;  %v14380_v55 = vpop.f32.mrb[126].mxu0 }
 0x9b0   : > { %v14382_v21 = vpop.f32.mrb[127].mxu0 }
 0x9b1   : > { %v4243_v43 = vmax.f32 %v14380_v55, %v14382_v21 }
 0x9b3   : > { %4244 = vmax.xlane.f32.xlu0 %v4243_v43  ;;  %v14386_v10 = vpop.f32.mrb[128].mxu0 }
 0x9b4   : > { %v14388_v59 = vpop.f32.mrb[129].mxu0 }
 0x9b5   : > { %v4246_v0 = vmax.f32 %v14386_v10, %v14388_v59 }
 0x9b7   : > { %4247 = vmax.xlane.f32.xlu1 %v4246_v0  ;;  %v14392_v6 = vpop.f32.mrb[130].mxu0 }
 0x9b8   : > { %v14394_v13 = vpop.f32.mrb[131].mxu0 }
 0x9b9   : > { %v4249_v9 = vmax.f32 %v14392_v6, %v14394_v13 }
 0x9bb   : > { %4250 = vmax.xlane.f32.xlu0 %v4249_v9  ;;  %v14398_v53 = vpop.f32.mrb[132].mxu0 }
 0x9bc   : > { %v14400_v3 = vpop.f32.mrb[133].mxu0 }
 0x9bd   : > { %18618 = vst [vmem:[#allocation48_spill] sm:$0xff] %v14400_v3  ;;  %v4252_v61 = vmax.f32 %v14398_v53, %v14400_v3 }
 0x9bf   : > { %4253 = vmax.xlane.f32.xlu1 %v4252_v61  ;;  %v14404_v25 = vpop.f32.mrb[134].mxu0 }
 0x9c0   : > { %18619 = vst [vmem:[#allocation79_spill] sm:$0xff] %v14404_v25  ;;  %v14406_v48 = vpop.f32.mrb[135].mxu0 }
 0x9c1   : > { %18620 = vst [vmem:[#allocation80_spill] sm:$0xff] %v14406_v48  ;;  %v4255_v5 = vmax.f32 %v14404_v25, %v14406_v48 }
 0x9c3   : > { %4256 = vmax.xlane.f32.xlu0 %v4255_v5  ;;  %v14410_v56 = vpop.f32.mrb[136].mxu0 }
 0x9c4   : > { %18621 = vst [vmem:[#allocation33_spill] sm:$0xff] %v14410_v56  ;;  %v14412_v60 = vpop.f32.mrb[137].mxu0 }
 0x9c5   : > { %18622 = vst [vmem:[#allocation85_spill] sm:$0xff] %v14412_v60  ;;  %v4258_v57 = vmax.f32 %v14410_v56, %v14412_v60 }
 0x9c7   : > { %4259 = vmax.xlane.f32.xlu1 %v4258_v57  ;;  %v14416_v14 = vpop.f32.mrb[138].mxu0 }
 0x9c8   : > { %18623 = vst [vmem:[#allocation86_spill] sm:$0xff] %v14416_v14  ;;  %v14418_v36 = vpop.f32.mrb[139].mxu0 }
 0x9c9   : > { %18624 = vst [vmem:[#allocation81_spill] sm:$0xff] %v14418_v36  ;;  %v4261_v45 = vmax.f32 %v14416_v14, %v14418_v36 }
 0x9cb   : > { %4262 = vmax.xlane.f32.xlu0 %v4261_v45  ;;  %v14422_v4 = vpop.f32.mrb[140].mxu0 }
 0x9cc   : > { %18625 = vst [vmem:[#allocation83_spill] sm:$0xff] %v14422_v4  ;;  %v14424_v32 = vpop.f32.mrb[141].mxu0 }
 0x9cd   : > { %18626 = vst [vmem:[#allocation112_spill] sm:$0xff] %v14424_v32  ;;  %v4264_v46 = vmax.f32 %v14422_v4, %v14424_v32 }
 0x9cf   : > { %4265 = vmax.xlane.f32.xlu1 %v4264_v46  ;;  %v14428_v40 = vpop.f32.mrb[142].mxu0 }
 0x9d0   : > { %18627 = vst [vmem:[#allocation90_spill] sm:$0xff] %v14428_v40  ;;  %v14430_v27 = vpop.f32.mrb[143].mxu0 }
 0x9d1   : > { %18628 = vst [vmem:[#allocation111_spill] sm:$0xff] %v14430_v27  ;;  %v4267_v43 = vmax.f32 %v14428_v40, %v14430_v27 }
 0x9d3   : > { %4268 = vmax.xlane.f32.xlu0 %v4267_v43  ;;  %v14434_v0 = vpop.f32.mrb[144].mxu0 }
 0x9d4   : > { %18629 = vst [vmem:[#allocation21_spill] sm:$0xff] %v14434_v0  ;;  %v14436_v9 = vpop.f32.mrb[145].mxu0 }
 0x9d5   : > { %18630 = vst [vmem:[#allocation87_spill] sm:$0xff] %v14436_v9  ;;  %v4270_v61 = vmax.f32 %v14434_v0, %v14436_v9 }
 0x9d7   : > { %4271 = vmax.xlane.f32.xlu1 %v4270_v61  ;;  %v14440_v5 = vpop.f32.mrb[146].mxu0 }
 0x9d8   : > { %v14442_v57 = vpop.f32.mrb[147].mxu0 }
 0x9db   : > { %v14446_v46 = vpop.f32.mrb[148].mxu0 }
 0x9dc   : > { %v14448_v16 = vpop.f32.mrb[149].mxu0 }
 0x9df   : > { %v14452_v44 = vpop.f32.mrb[150].mxu0 }
 0x9e0   : > { %v14454_v23 = vpop.f32.mrb[151].mxu0 }
 0x9e3   : > { %v14458_v7 = vpop.f32.mrb[152].mxu0 }
 0x9e4   : > { %v14460_v29 = vpop.f32.mrb[153].mxu0 }
 0x9e7   : > { %v14464_v58 = vpop.f32.mrb[154].mxu0 }
 0x9e8   : > { %v14466_v24 = vpop.f32.mrb[155].mxu0 }
 0x9eb   : > { %v14470_v52 = vpop.f32.mrb[156].mxu0 }
 0x9ec   : > { %v14472_v38 = vpop.f32.mrb[157].mxu0 }
 0x9ef   : > { %v14476_v17 = vpop.f32.mrb[158].mxu0 }
 0x9f0   : > { %v14478_v9 = vpop.f32.mrb[159].mxu0 }
 0x9f3   : > { %v14482_v0 = vpop.f32.mrb[160].mxu0 }
 0x9f4   : > { %v14484_v27 = vpop.f32.mrb[161].mxu0 }
 0xa08   : > { %v4203_v40 = vpop.xlane.xlu0 %4202 }
 0xa09   : > { %v4297_v32 = vsub.f32 %v14296_v30, %v4203_v40  ;;  %v4298_v4 = vsub.f32 %v14298_v34, %v4203_v40 }
 0xa0b   : > { %v4361_v61 = vmul.f32 1.442695, %v4297_v32  ;;  %v4363_v36 = vmul.f32 1.442695, %v4298_v4 }
 0xa0c   : > { %v4206_v14 = vpop.xlane.xlu1 %4205 }
 0xa0d   : > { %10971 = vpow2.f32 %v4361_v61  ;;  %v4299_v60 = vsub.f32 %v14302_v11, %v4206_v14  ;;  %v4300_v45 = vsub.f32 %v14304_v1, %v4206_v14 }
 0xa0e   : > { %10973 = vpow2.f32 %v4363_v36 }
 0xa0f   : > { %v4365_v56 = vmul.f32 1.442695, %v4299_v60  ;;  %v4367_v48 = vmul.f32 1.442695, %v4300_v45 }
 0xa10   : > { %v4209_v25 = vpop.xlane.xlu1 %4208 }
 0xa11   : > { %10975 = vpow2.f32 %v4365_v56  ;;  %v4301_v43 = vsub.f32 %v14308_v42, %v4209_v25  ;;  %v4302_v3 = vsub.f32 %v14310_v35, %v4209_v25 }
 0xa12   : > { %10977 = vpow2.f32 %v4367_v48 }
 0xa13   : > { %v4369_v30 = vmul.f32 1.442695, %v4301_v43  ;;  %v4371_v34 = vmul.f32 1.442695, %v4302_v3 }
 0xa14   : > { %v4212_v32 = vpop.xlane.xlu1 %4211 }
 0xa15   : > { %10979 = vpow2.f32 %v4369_v30  ;;  %v4303_v4 = vsub.f32 %v14314_v19, %v4212_v32  ;;  %v4304_v11 = vsub.f32 %v14316_v28, %v4212_v32 }
 0xa16   : > { %10981 = vpow2.f32 %v4371_v34  ;;  %v18631_v34 = vmax.f32 %v14440_v5, %v14442_v57 }
 0xa17   : > { %v14496_v1 = vpop.eup %10971  ;;  %v4373_v60 = vmul.f32 1.442695, %v4303_v4  ;;  %v4375_v14 = vmul.f32 1.442695, %v4304_v11 }
 0xa18   : > { %v14498_v36 = vpop.eup %10973  ;;  %v4215_v56 = vpop.xlane.xlu0 %4214 }
 0xa19   : > { %10983 = vpow2.f32 %v4373_v60  ;;  %v4305_v42 = vsub.f32 %v14320_v26, %v4215_v56  ;;  %v4306_v35 = vsub.f32 %v14322_v51, %v4215_v56  ;;  %v4489_v3 = vadd.f32 %v14498_v36, %v14496_v1 }
 0xa1a   : > { %10985 = vpow2.f32 %v4375_v14 }
 0xa1b   : > { %v14504_v19 = vpop.eup %10975  ;;  %v4377_v28 = vmul.f32 1.442695, %v4305_v42  ;;  %v4379_v25 = vmul.f32 1.442695, %v4306_v35  ;;  %4490 = vadd.xlane.f32.xlu0 %v4489_v3  ;;  %v18632_v42 = vmax.f32 %v14446_v46, %v14448_v16 }
 0xa1c   : > { %v14506_v48 = vpop.eup %10977  ;;  %v4218_v40 = vpop.xlane.xlu1 %4217 }
 0xa1d   : > { %10987 = vpow2.f32 %v4377_v28  ;;  %v4307_v45 = vsub.f32 %v14326_v33, %v4218_v40  ;;  %v4308_v43 = vsub.f32 %v14328_v49, %v4218_v40  ;;  %v4492_v26 = vadd.f32 %v14506_v48, %v14504_v19 }
 0xa1e   : > { %10989 = vpow2.f32 %v4379_v25 }
 0xa1f   : > { %v14512_v51 = vpop.eup %10979  ;;  %v4381_v61 = vmul.f32 1.442695, %v4307_v45  ;;  %v4383_v30 = vmul.f32 1.442695, %v4308_v43  ;;  %4274 = vmax.xlane.f32.xlu0 %v18631_v34  ;;  %4493 = vadd.xlane.f32.xlu1 %v4492_v26  ;;  %v18633_v43 = vmax.f32 %v14452_v44, %v14454_v23 }
 0xa20   : > { %v14517_v32 = vpop.eup %10981  ;;  %v4221_v4 = vpop.xlane.xlu0 %4220 }
 0xa21   : > { %10991 = vpow2.f32 %v4381_v61  ;;  %v4309_v33 = vsub.f32 %v14332_v22, %v4221_v4  ;;  %v4310_v49 = vsub.f32 %v14334_v37, %v4221_v4  ;;  %v4495_v11 = vadd.f32 %v14517_v32, %v14512_v51 }
 0xa22   : > { %10993 = vpow2.f32 %v4383_v30 }
 0xa23   : > { %v14523_v60 = vpop.eup %10983  ;;  %v4385_v14 = vmul.f32 1.442695, %v4309_v33  ;;  %v4387_v56 = vmul.f32 1.442695, %v4310_v49  ;;  %4277 = vmax.xlane.f32.xlu1 %v18632_v42  ;;  %4496 = vadd.xlane.f32.xlu0 %v4495_v11  ;;  %v18634_v49 = vmax.f32 %v14458_v7, %v14460_v29 }
 0xa24   : > { %v14528_v35 = vpop.eup %10985  ;;  %v4224_v3 = vpop.xlane.xlu1 %4223 }
 0xa25   : > { %10995 = vpow2.f32 %v4385_v14  ;;  %v4311_v22 = vsub.f32 %v14338_v15, %v4224_v3  ;;  %v4312_v37 = vsub.f32 %v14340_v20, %v4224_v3  ;;  %v4498_v28 = vadd.f32 %v14528_v35, %v14523_v60 }
 0xa26   : > { %10997 = vpow2.f32 %v4387_v56 }
 0xa27   : > { %v14534_v25 = vpop.eup %10987  ;;  %v4389_v40 = vmul.f32 1.442695, %v4311_v22  ;;  %v4391_v45 = vmul.f32 1.442695, %v4312_v37  ;;  %4280 = vmax.xlane.f32.xlu0 %v18633_v43  ;;  %4499 = vadd.xlane.f32.xlu1 %v4498_v28  ;;  %v18635_v37 = vmax.f32 %v14464_v58, %v14466_v24 }
 0xa28   : > { %v14539_v26 = vpop.eup %10989  ;;  %v4227_v61 = vpop.xlane.xlu0 %4226 }
 0xa29   : > { %10999 = vpow2.f32 %v4389_v40  ;;  %v4313_v15 = vsub.f32 %v14344_v63, %v4227_v61  ;;  %v4314_v20 = vsub.f32 %v14346_v62, %v4227_v61  ;;  %v4501_v30 = vadd.f32 %v14539_v26, %v14534_v25 }
 0xa2a   : > { %11001 = vpow2.f32 %v4391_v45 }
 0xa2b   : > { %v14545_v34 = vpop.eup %10991  ;;  %v4393_v4 = vmul.f32 1.442695, %v4313_v15  ;;  %v4395_v33 = vmul.f32 1.442695, %v4314_v20  ;;  %4502 = vadd.xlane.f32.xlu0 %v4501_v30  ;;  %4283 = vmax.xlane.f32.xlu1 %v18634_v49  ;;  %v18636_v20 = vmax.f32 %v14470_v52, %v14472_v38 }
 0xa2c   : > { %v14550_v11 = vpop.eup %10993  ;;  %v4230_v14 = vpop.xlane.xlu1 %4229 }
 0xa2d   : > { %11003 = vpow2.f32 %v4393_v4  ;;  %v4315_v63 = vsub.f32 %v14350_v41, %v4230_v14  ;;  %v4316_v62 = vsub.f32 %v14352_v2, %v4230_v14  ;;  %v4504_v56 = vadd.f32 %v14550_v11, %v14545_v34 }
 0xa2e   : > { %11005 = vpow2.f32 %v4395_v33 }
 0xa2f   : > { %v14556_v42 = vpop.eup %10995  ;;  %v4397_v3 = vmul.f32 1.442695, %v4315_v63  ;;  %v4399_v22 = vmul.f32 1.442695, %v4316_v62  ;;  %4286 = vmax.xlane.f32.xlu0 %v18635_v37  ;;  %4505 = vadd.xlane.f32.xlu1 %v4504_v56  ;;  %v18637_v62 = vmax.f32 %v14476_v17, %v14478_v9 }
 0xa30   : > { %v14561_v28 = vpop.eup %10997  ;;  %v4233_v40 = vpop.xlane.xlu0 %4232 }
 0xa31   : > { %11007 = vpow2.f32 %v4397_v3  ;;  %v4317_v41 = vsub.f32 %v14356_v47, %v4233_v40  ;;  %v4318_v2 = vsub.f32 %v14358_v8, %v4233_v40  ;;  %v4507_v45 = vadd.f32 %v14561_v28, %v14556_v42 }
 0xa32   : > { %11009 = vpow2.f32 %v4399_v22 }
 0xa33   : > { %v14567_v43 = vpop.eup %10999  ;;  %v4401_v61 = vmul.f32 1.442695, %v4317_v41  ;;  %v4403_v15 = vmul.f32 1.442695, %v4318_v2  ;;  %4508 = vadd.xlane.f32.xlu0 %v4507_v45  ;;  %4289 = vmax.xlane.f32.xlu1 %v18636_v20  ;;  %v18638_v2 = vmax.f32 %v14482_v0, %v14484_v27 }
 0xa34   : > { %v14572_v30 = vpop.eup %11001  ;;  %v4236_v4 = vpop.xlane.xlu1 %4235 }
 0xa35   : > { %11011 = vpow2.f32 %v4401_v61  ;;  %v4319_v47 = vsub.f32 %v14362_v31, %v4236_v4  ;;  %v4320_v8 = vsub.f32 %v14364_v39, %v4236_v4  ;;  %v4510_v33 = vadd.f32 %v14572_v30, %v14567_v43 }
 0xa36   : > { %11013 = vpow2.f32 %v4403_v15 }
 0xa37   : > { %v14578_v49 = vpop.eup %11003  ;;  %v4405_v14 = vmul.f32 1.442695, %v4319_v47  ;;  %v4407_v63 = vmul.f32 1.442695, %v4320_v8  ;;  %4292 = vmax.xlane.f32.xlu0 %v18637_v62  ;;  %4511 = vadd.xlane.f32.xlu1 %v4510_v33 }
 0xa38   : > { %v14583_v56 = vpop.eup %11005  ;;  %v4239_v3 = vpop.xlane.xlu0 %4238 }
 0xa39   : > { %11015 = vpow2.f32 %v4405_v14  ;;  %v4321_v31 = vsub.f32 %v14368_v54, %v4239_v3  ;;  %v4322_v39 = vsub.f32 %v14370_v18, %v4239_v3  ;;  %v4513_v22 = vadd.f32 %v14583_v56, %v14578_v49 }
 0xa3a   : > { %11017 = vpow2.f32 %v4407_v63 }
 0xa3b   : > { %v14589_v37 = vpop.eup %11007  ;;  %v4409_v40 = vmul.f32 1.442695, %v4321_v31  ;;  %v4411_v41 = vmul.f32 1.442695, %v4322_v39  ;;  %4514 = vadd.xlane.f32.xlu0 %v4513_v22  ;;  %4295 = vmax.xlane.f32.xlu1 %v18638_v2 }
 0xa3c   : > { %v14594_v45 = vpop.eup %11009  ;;  %v4242_v61 = vpop.xlane.xlu1 %4241 }
 0xa3d   : > { %11019 = vpow2.f32 %v4409_v40  ;;  %v4323_v54 = vsub.f32 %v14374_v12, %v4242_v61  ;;  %v4324_v18 = vsub.f32 %v14376_v50, %v4242_v61  ;;  %v4516_v15 = vadd.f32 %v14594_v45, %v14589_v37 }
 0xa3e   : > { %11021 = vpow2.f32 %v4411_v41 }
 0xa3f   : > { %v14600_v20 = vpop.eup %11011  ;;  %v4413_v4 = vmul.f32 1.442695, %v4323_v54  ;;  %v4415_v47 = vmul.f32 1.442695, %v4324_v18  ;;  %4517 = vadd.xlane.f32.xlu1 %v4516_v15 }
 0xa40   : > { %v14602_v8 = vpop.eup %11013  ;;  %v4245_v33 = vpop.xlane.xlu0 %4244 }
 0xa41   : > { %11023 = vpow2.f32 %v4413_v4  ;;  %v4325_v14 = vsub.f32 %v14380_v55, %v4245_v33  ;;  %v4326_v63 = vsub.f32 %v14382_v21, %v4245_v33  ;;  %v4519_v12 = vadd.f32 %v14602_v8, %v14600_v20 }
 0xa42   : > { %11025 = vpow2.f32 %v4415_v47 }
 0xa43   : > { %v14608_v50 = vpop.eup %11015  ;;  %v4417_v62 = vmul.f32 1.442695, %v4325_v14  ;;  %v4419_v3 = vmul.f32 1.442695, %v4326_v63  ;;  %4520 = vadd.xlane.f32.xlu0 %v4519_v12  ;;  %v18639_v12 = vld [vmem:[#allocation48_spill] sm:$0xff] }
 0xa44   : > { %v14610_v31 = vpop.eup %11017  ;;  %v4248_v39 = vpop.xlane.xlu1 %4247 }
 0xa45   : > { %11027 = vpow2.f32 %v4417_v62  ;;  %v4327_v22 = vsub.f32 %v14386_v10, %v4248_v39  ;;  %v4328_v40 = vsub.f32 %v14388_v59, %v4248_v39  ;;  %v4522_v55 = vadd.f32 %v14610_v31, %v14608_v50 }
 0xa46   : > { %11029 = vpow2.f32 %v4419_v3 }
 0xa47   : > { %v14616_v21 = vpop.eup %11019  ;;  %v4421_v41 = vmul.f32 1.442695, %v4327_v22  ;;  %v4423_v2 = vmul.f32 1.442695, %v4328_v40  ;;  %4523 = vadd.xlane.f32.xlu1 %v4522_v55  ;;  %v18641_v55 = vld [vmem:[#allocation79_spill] sm:$0xff] }
 0xa48   : > { %v14618_v61 = vpop.eup %11021  ;;  %v4251_v54 = vpop.xlane.xlu0 %4250 }
 0xa49   : > { %11031 = vpow2.f32 %v4421_v41  ;;  %v4329_v18 = vsub.f32 %v14392_v6, %v4251_v54  ;;  %v4330_v15 = vsub.f32 %v14394_v13, %v4251_v54  ;;  %v4525_v10 = vadd.f32 %v14618_v61, %v14616_v21 }
 0xa4a   : > { %11033 = vpow2.f32 %v4423_v2  ;;  %v18642_v2 = vld [vmem:[#allocation80_spill] sm:$0xff] }
 0xa4b   : > { %v14624_v59 = vpop.eup %11023  ;;  %v4425_v4 = vmul.f32 1.442695, %v4329_v18  ;;  %v4427_v47 = vmul.f32 1.442695, %v4330_v15  ;;  %4526 = vadd.xlane.f32.xlu0 %v4525_v10 }
 0xa4c   : > { %v14626_v33 = vpop.eup %11025  ;;  %v4254_v14 = vpop.xlane.xlu1 %4253 }
 0xa4d   : > { %11035 = vpow2.f32 %v4425_v4  ;;  %v4331_v63 = vsub.f32 %v14398_v53, %v4254_v14  ;;  %v4332_v62 = vsub.f32 %v18639_v12, %v4254_v14  ;;  %v4528_v6 = vadd.f32 %v14626_v33, %v14624_v59  ;;  %v18644_v14 = vld [vmem:[#allocation33_spill] sm:$0xff] }
 0xa4e   : > { %11037 = vpow2.f32 %v4427_v47  ;;  %v18645_v12 = vld [vmem:[#allocation85_spill] sm:$0xff] }
 0xa4f   : > { %v14632_v13 = vpop.eup %11027  ;;  %v4429_v3 = vmul.f32 1.442695, %v4331_v63  ;;  %v4431_v39 = vmul.f32 1.442695, %v4332_v62  ;;  %4529 = vadd.xlane.f32.xlu1 %v4528_v6 }
 0xa50   : > { %18640 = vst [vmem:[#allocation89_spill] sm:$0xff] %v14632_v13  ;;  %v14634_v22 = vpop.eup %11029  ;;  %v4257_v40 = vpop.xlane.xlu0 %4256 }
 0xa51   : > { %11039 = vpow2.f32 %v4429_v3  ;;  %v4333_v41 = vsub.f32 %v18641_v55, %v4257_v40  ;;  %v4334_v54 = vsub.f32 %v18642_v2, %v4257_v40  ;;  %v4531_v53 = vadd.f32 %v14634_v22, %v14632_v13  ;;  %v18648_v2 = vld [vmem:[#allocation86_spill] sm:$0xff] }
 0xa52   : > { %11041 = vpow2.f32 %v4431_v39 }
 0xa53   : > { %v14640_v18 = vpop.eup %11031  ;;  %v4433_v15 = vmul.f32 1.442695, %v4333_v41  ;;  %v4435_v10 = vmul.f32 1.442695, %v4334_v54  ;;  %4532 = vadd.xlane.f32.xlu0 %v4531_v53  ;;  %v18649_v53 = vld [vmem:[#allocation81_spill] sm:$0xff] }
 0xa54   : > { %18643 = vst [vmem:[#allocation92_spill] sm:$0xff] %v14640_v18  ;;  %v14642_v4 = vpop.eup %11033  ;;  %v4260_v47 = vpop.xlane.xlu1 %4259 }
 0xa55   : > { %11043 = vpow2.f32 %v4433_v15  ;;  %v4335_v63 = vsub.f32 %v18644_v14, %v4260_v47  ;;  %v4336_v62 = vsub.f32 %v18645_v12, %v4260_v47  ;;  %v4534_v6 = vadd.f32 %v14642_v4, %v14640_v18 }
 0xa56   : > { %11045 = vpow2.f32 %v4435_v10 }
 0xa57   : > { %v14648_v3 = vpop.eup %11035  ;;  %v4437_v39 = vmul.f32 1.442695, %v4335_v63  ;;  %v4439_v40 = vmul.f32 1.442695, %v4336_v62  ;;  %4535 = vadd.xlane.f32.xlu1 %v4534_v6  ;;  %v18652_v6 = vld [vmem:[#allocation83_spill] sm:$0xff] }
 0xa58   : > { %18646 = vst [vmem:[#allocation91_spill] sm:$0xff] %v14648_v3  ;;  %v14650_v55 = vpop.eup %11037  ;;  %v4263_v41 = vpop.xlane.xlu0 %4262 }
 0xa59   : > { %18647 = vst [vmem:[#allocation94_spill] sm:$0xff] %v14650_v55  ;;  %11047 = vpow2.f32 %v4437_v39  ;;  %v4337_v54 = vsub.f32 %v18648_v2, %v4263_v41  ;;  %v4338_v15 = vsub.f32 %v18649_v53, %v4263_v41  ;;  %v4537_v47 = vadd.f32 %v14650_v55, %v14648_v3  ;;  %v18653_v39 = vld [vmem:[#allocation112_spill] sm:$0xff] }
 0xa5a   : > { %11049 = vpow2.f32 %v4439_v40 }
 0xa5b   : > { %v14656_v14 = vpop.eup %11039  ;;  %v4441_v10 = vmul.f32 1.442695, %v4337_v54  ;;  %v4443_v12 = vmul.f32 1.442695, %v4338_v15  ;;  %4538 = vadd.xlane.f32.xlu0 %v4537_v47  ;;  %v18655_v47 = vld [vmem:[#allocation90_spill] sm:$0xff] }
 0xa5c   : > { %18650 = vst [vmem:[#allocation93_spill] sm:$0xff] %v14656_v14  ;;  %v14658_v63 = vpop.eup %11041  ;;  %v4266_v62 = vpop.xlane.xlu1 %4265 }
 0xa5d   : > { %18651 = vst [vmem:[#allocation114_spill] sm:$0xff] %v14658_v63  ;;  %11051 = vpow2.f32 %v4441_v10  ;;  %v4339_v13 = vsub.f32 %v18652_v6, %v4266_v62  ;;  %v4340_v18 = vsub.f32 %v18653_v39, %v4266_v62  ;;  %v4540_v41 = vadd.f32 %v14658_v63, %v14656_v14  ;;  %v18656_v10 = vld [vmem:[#allocation111_spill] sm:$0xff] }
 0xa5e   : > { %11053 = vpow2.f32 %v4443_v12 }
 0xa5f   : > { %v14664_v2 = vpop.eup %11043  ;;  %v4445_v40 = vmul.f32 1.442695, %v4339_v13  ;;  %v4447_v53 = vmul.f32 1.442695, %v4340_v18  ;;  %4541 = vadd.xlane.f32.xlu1 %v4540_v41  ;;  %v18657_v41 = vld [vmem:[#allocation21_spill] sm:$0xff] }
 0xa60   : > { %18654 = vst [vmem:[#allocation116_spill] sm:$0xff] %v14664_v2  ;;  %v14666_v54 = vpop.eup %11045  ;;  %v4269_v15 = vpop.xlane.xlu0 %4268 }
 0xa61   : > { %11055 = vpow2.f32 %v4445_v40  ;;  %v4341_v3 = vsub.f32 %v18655_v47, %v4269_v15  ;;  %v4342_v55 = vsub.f32 %v18656_v10, %v4269_v15  ;;  %v4543_v62 = vadd.f32 %v14666_v54, %v14664_v2  ;;  %v18658_v40 = vld [vmem:[#allocation87_spill] sm:$0xff] }
 0xa62   : > { %11057 = vpow2.f32 %v4447_v53 }
 0xa63   : > { %v14672_v6 = vpop.eup %11047  ;;  %v4449_v12 = vmul.f32 1.442695, %v4341_v3  ;;  %v4451_v39 = vmul.f32 1.442695, %v4342_v55  ;;  %4544 = vadd.xlane.f32.xlu0 %v4543_v62 }
 0xa64   : > { %v14674_v13 = vpop.eup %11049  ;;  %v4272_v18 = vpop.xlane.xlu1 %4271 }
 0xa65   : > { %11059 = vpow2.f32 %v4449_v12  ;;  %v4343_v14 = vsub.f32 %v18657_v41, %v4272_v18  ;;  %v4344_v63 = vsub.f32 %v18658_v40, %v4272_v18  ;;  %v4546_v15 = vadd.f32 %v14674_v13, %v14672_v6 }
 0xa66   : > { %11061 = vpow2.f32 %v4451_v39 }
 0xa67   : > { %v14680_v47 = vpop.eup %11051  ;;  %v4453_v53 = vmul.f32 1.442695, %v4343_v14  ;;  %v4455_v10 = vmul.f32 1.442695, %v4344_v63  ;;  %4547 = vadd.xlane.f32.xlu1 %v4546_v15 }
 0xa68   : > { %18659 = vst [vmem:[#allocation97_spill] sm:$0xff] %v14680_v47  ;;  %v14682_v3 = vpop.eup %11053 }
 0xa69   : > { %18660 = vst [vmem:[#allocation98_spill] sm:$0xff] %v14682_v3  ;;  %11063 = vpow2.f32 %v4453_v53  ;;  %v4549_v55 = vadd.f32 %v14682_v3, %v14680_v47 }
 0xa6a   : > { %11065 = vpow2.f32 %v4455_v10 }
 0xa6b   : > { %v14686_v62 = vpop.eup %11055  ;;  %4550 = vadd.xlane.f32.xlu0 %v4549_v55 }
 0xa6c   : > { %18661 = vst [vmem:[#allocation113_spill] sm:$0xff] %v14686_v62  ;;  %v14688_v12 = vpop.eup %11057 }
 0xa6d   : > { %18662 = vst [vmem:[#allocation115_spill] sm:$0xff] %v14688_v12  ;;  %v4552_v39 = vadd.f32 %v14688_v12, %v14686_v62 }
 0xa6f   : > { %v14692_v18 = vpop.eup %11059  ;;  %4553 = vadd.xlane.f32.xlu1 %v4552_v39 }
 0xa70   : > { %18663 = vst [vmem:[#allocation95_spill] sm:$0xff] %v14692_v18  ;;  %v14694_v14 = vpop.eup %11061 }
 0xa71   : > { %18664 = vst [vmem:[#allocation96_spill] sm:$0xff] %v14694_v14  ;;  %v4555_v63 = vadd.f32 %v14694_v14, %v14692_v18 }
 0xa73   : > { %v14698_v41 = vpop.eup %11063  ;;  %4556 = vadd.xlane.f32.xlu0 %v4555_v63 }
 0xa74   : > { %18665 = vst [vmem:[#allocation101_spill] sm:$0xff] %v14698_v41  ;;  %v14700_v40 = vpop.eup %11065 }
 0xa75   : > { %18666 = vst [vmem:[#allocation102_spill] sm:$0xff] %v14700_v40  ;;  %v4558_v15 = vadd.f32 %v14700_v40, %v14698_v41 }
 0xa77   : > { %4559 = vadd.xlane.f32.xlu1 %v4558_v15 }
 0xaa8   : > { %v4491_v53 = vpop.xlane.xlu0 %4490 }
 0xaa9   : > { %11067 = vrcp.f32 %v4491_v53 }
 0xaac   : > { %v4275_v10 = vpop.xlane.xlu0 %4274  ;;  %v4494_v55 = vpop.xlane.xlu1 %4493 }
 0xaad   : > { %v4345_v39 = vsub.f32 %v14440_v5, %v4275_v10  ;;  %v4346_v47 = vsub.f32 %v14442_v57, %v4275_v10  ;;  %11069 = vrcp.f32 %v4494_v55 }
 0xaaf   : > { %v4457_v62 = vmul.f32 1.442695, %v4345_v39  ;;  %v4459_v18 = vmul.f32 1.442695, %v4346_v47 }
 0xab0   : > { %v4497_v14 = vpop.xlane.xlu0 %4496  ;;  %v4278_v12 = vpop.xlane.xlu1 %4277 }
 0xab1   : > { %11071 = vpow2.f32 %v4457_v62  ;;  %v4347_v63 = vsub.f32 %v14446_v46, %v4278_v12  ;;  %v4348_v3 = vsub.f32 %v14448_v16, %v4278_v12 }
 0xab2   : > { %11073 = vpow2.f32 %v4459_v18 }
 0xab3   : > { %11075 = vrcp.f32 %v4497_v14  ;;  %v4461_v15 = vmul.f32 1.442695, %v4347_v63  ;;  %v4463_v53 = vmul.f32 1.442695, %v4348_v3  ;;  %v11068_v2 = vpop.eup %11067 }
 0xab4   : > { %v4281_v41 = vpop.xlane.xlu0 %4280  ;;  %v4500_v40 = vpop.xlane.xlu1 %4499  ;;  %v4618_v16 = vmul.f32 %v11068_v2, %v14498_v36  ;;  %v4617_v3 = vmul.f32 %v11068_v2, %v14496_v1 }
 0xab5   : > { %11077 = vpow2.f32 %v4461_v15  ;;  %v4349_v5 = vsub.f32 %v14452_v44, %v4281_v41  ;;  %v4350_v57 = vsub.f32 %v14454_v23, %v4281_v41 }
 0xab6   : > { %11079 = vpow2.f32 %v4463_v53 }
 0xab7   : > { %v11070_v47 = vpop.eup %11069  ;;  %v4465_v10 = vmul.f32 1.442695, %v4349_v5  ;;  %v4467_v62 = vmul.f32 1.442695, %v4350_v57  ;;  %11081 = vrcp.f32 %v4500_v40 }
 0xab8   : > { %v4503_v46 = vpop.xlane.xlu0 %4502  ;;  %v4284_v55 = vpop.xlane.xlu1 %4283  ;;  %v4620_v12 = vmul.f32 %v11070_v47, %v14506_v48  ;;  %v4619_v18 = vmul.f32 %v11070_v47, %v14504_v19 }
 0xab9   : > { %11083 = vpow2.f32 %v4465_v10  ;;  %v4351_v44 = vsub.f32 %v14458_v7, %v4284_v55  ;;  %v4352_v23 = vsub.f32 %v14460_v29, %v4284_v55 }
 0xaba   : > { %11085 = vpow2.f32 %v4467_v62  ;;  %v9972_v14 = vpack.c.bf16 %v4620_v12, %v4618_v16  ;;  %v9974_v41 = vpack.c.bf16 %v4619_v18, %v4617_v3 }
 0xabb   : > { %v14716_v39 = vpop.eup %11071  ;;  %11087 = vrcp.f32 %v4503_v46  ;;  %v4469_v40 = vmul.f32 1.442695, %v4351_v44  ;;  %v4471_v63 = vmul.f32 1.442695, %v4352_v23 }
 0xabc   : > { %v14718_v36 = vpop.eup %11073  ;;  %v4287_v48 = vpop.xlane.xlu0 %4286  ;;  %9973 = vmatprep.subr.bf16.mxu0 %v9972_v14 }
 0xabd   : > { %v4506_v1 = vpop.xlane.xlu1 %4505  ;;  %v11076_v2 = vpop.eup %11075  ;;  %11089 = vpow2.f32 %v4469_v40  ;;  %v4353_v19 = vsub.f32 %v14464_v58, %v4287_v48  ;;  %v4354_v7 = vsub.f32 %v14466_v24, %v4287_v48  ;;  %9975 = vmatpush1.bf16.xpose.msra.mxu0 %v9974_v41  ;;  %v4561_v29 = vadd.f32 %v14718_v36, %v14716_v39 }
 0xabe   : > { %11091 = vpow2.f32 %v4471_v63  ;;  %v4622_v62 = vmul.f32 %v11076_v2, %v14517_v32  ;;  %v4621_v12 = vmul.f32 %v11076_v2, %v14512_v51 }
 0xabf   : > { %v14724_v15 = vpop.eup %11077  ;;  %v4473_v53 = vmul.f32 1.442695, %v4353_v19  ;;  %v4475_v5 = vmul.f32 1.442695, %v4354_v7  ;;  %11093 = vrcp.f32 %v4506_v1  ;;  %4562 = vadd.xlane.f32.xlu0 %v4561_v29 }
 0xac0   : > { %v14726_v57 = vpop.eup %11079  ;;  %v4509_v47 = vpop.xlane.xlu0 %4508 }
 0xac1   : > { %v4290_v10 = vpop.xlane.xlu1 %4289  ;;  %v11082_v58 = vpop.eup %11081  ;;  %11095 = vpow2.f32 %v4473_v53  ;;  %v4564_v55 = vadd.f32 %v14726_v57, %v14724_v15 }
 0xac2   : > { %v4355_v24 = vsub.f32 %v14470_v52, %v4290_v10  ;;  %v4356_v46 = vsub.f32 %v14472_v38, %v4290_v10  ;;  %11097 = vpow2.f32 %v4475_v5  ;;  %v4624_v16 = vmul.f32 %v11082_v58, %v14528_v35 }
 0xac3   : > { %v4623_v3 = vmul.f32 %v11082_v58, %v14523_v60  ;;  %v14736_v18 = vpop.eup %11083  ;;  %4565 = vadd.xlane.f32.xlu1 %v4564_v55  ;;  %11099 = vrcp.f32 %v4509_v47 }
 0xac4   : > { %v4477_v44 = vmul.f32 1.442695, %v4355_v24  ;;  %v4479_v32 = vmul.f32 1.442695, %v4356_v46  ;;  %v14738_v23 = vpop.eup %11085  ;;  %v4293_v52 = vpop.xlane.xlu0 %4292  ;;  %v9976_v38 = vpack.c.bf16 %v4624_v16, %v4622_v62 }
 0xac5   : > { %v4512_v14 = vpop.xlane.xlu1 %4511  ;;  %v9978_v41 = vpack.c.bf16 %v4623_v3, %v4621_v12  ;;  %v11088_v40 = vpop.eup %11087  ;;  %v4357_v35 = vsub.f32 %v14476_v17, %v4293_v52  ;;  %v4358_v51 = vsub.f32 %v14478_v9, %v4293_v52  ;;  %v4567_v60 = vadd.f32 %v14738_v23, %v14736_v18 }
 0xac6   : > { %11101 = vpow2.f32 %v4477_v44  ;;  %9977 = vmatprep.subr.bf16.mxu0 %v9976_v38  ;;  %v4626_v7 = vmul.f32 %v11088_v40, %v14539_v26  ;;  %v4625_v10 = vmul.f32 %v11088_v40, %v14534_v25 }
 0xac7   : > { %11103 = vpow2.f32 %v4479_v32  ;;  %v14744_v63 = vpop.eup %11089  ;;  %v4481_v48 = vmul.f32 1.442695, %v4357_v35  ;;  %v4483_v1 = vmul.f32 1.442695, %v4358_v51  ;;  %9979 = vmatpush1.bf16.xpose.msra.mxu0 %v9978_v41  ;;  %4568 = vadd.xlane.f32.xlu0 %v4567_v60 }
 0xac8   : > { %11105 = vrcp.f32 %v4512_v14  ;;  %v14746_v2 = vpop.eup %11091  ;;  %v4515_v9 = vpop.xlane.xlu0 %4514 }
 0xac9   : > { %v4296_v19 = vpop.xlane.xlu1 %4295  ;;  %v11094_v17 = vpop.eup %11093  ;;  %11107 = vpow2.f32 %v4481_v48  ;;  %v4570_v5 = vadd.f32 %v14746_v2, %v14744_v63 }
 0xaca   : > { %v4359_v29 = vsub.f32 %v14482_v0, %v4296_v19  ;;  %v4360_v53 = vsub.f32 %v14484_v27, %v4296_v19  ;;  %11109 = vpow2.f32 %v4483_v1  ;;  %v4628_v47 = vmul.f32 %v11094_v17, %v14550_v11 }
 0xacb   : > { %v4627_v62 = vmul.f32 %v11094_v17, %v14545_v34  ;;  %v14756_v58 = vpop.eup %11095  ;;  %4571 = vadd.xlane.f32.xlu1 %v4570_v5  ;;  %11111 = vrcp.f32 %v4515_v9 }
 0xacc   : > { %v4485_v26 = vmul.f32 1.442695, %v4359_v29  ;;  %v4487_v24 = vmul.f32 1.442695, %v4360_v53  ;;  %v14758_v46 = vpop.eup %11097  ;;  %v9980_v0 = vpack.c.bf16 %v4628_v47, %v4626_v7 }
 0xacd   : > { %v4518_v27 = vpop.xlane.xlu1 %4517  ;;  %v9982_v55 = vpack.c.bf16 %v4627_v62, %v4625_v10  ;;  %v4573_v16 = vadd.f32 %v14758_v46, %v14756_v58  ;;  %v11100_v11 = vpop.eup %11099 }
 0xace   : > { %11113 = vpow2.f32 %v4485_v26  ;;  %9981 = vmatprep.subr.bf16.mxu0 %v9980_v0  ;;  %v4630_v32 = vmul.f32 %v11100_v11, %v14561_v28  ;;  %v4629_v38 = vmul.f32 %v11100_v11, %v14556_v42 }
 0xacf   : > { %11115 = vpow2.f32 %v4487_v24  ;;  %9983 = vmatpush1.bf16.xpose.msra.mxu0 %v9982_v55  ;;  %4574 = vadd.xlane.f32.xlu0 %v4573_v16 }
 0xad0   : > { %v14762_v25 = vpop.eup %11101  ;;  %11117 = vrcp.f32 %v4518_v27  ;;  %v4521_v12 = vpop.xlane.xlu0 %4520 }
 0xad1   : > { %v14764_v34 = vpop.eup %11103  ;;  %11119 = vrcp.f32 %v4521_v12  ;;  %v249_v12 = vld [vmem:[%s17617_s2 + $0x30] sm:$0xff] }
 0xad2   : > { %v11106_v3 = vpop.eup %11105  ;;  %v4576_v44 = vadd.f32 %v14764_v34, %v14762_v25 }
 0xad3   : > { %v4632_v52 = vmul.f32 %v11106_v3, %v14572_v30  ;;  %v4631_v14 = vmul.f32 %v11106_v3, %v14567_v43  ;;  %v14772_v41 = vpop.eup %11107 }
 0xad4   : > { %4577 = vadd.xlane.f32.xlu1 %v4576_v44  ;;  %v14774_v40 = vpop.eup %11109  ;;  %v4524_v51 = vpop.xlane.xlu1 %4523 }
 0xad5   : > { %v9984_v35 = vpack.c.bf16 %v4632_v52, %v4630_v32  ;;  %v9986_v60 = vpack.c.bf16 %v4631_v14, %v4629_v38  ;;  %11121 = vrcp.f32 %v4524_v51  ;;  %v4579_v48 = vadd.f32 %v14774_v40, %v14772_v41  ;;  %v11112_v28 = vpop.eup %11111 }
 0xad6   : > { %v4634_v7 = vmul.f32 %v11112_v28, %v14583_v56  ;;  %v4633_v9 = vmul.f32 %v11112_v28, %v14578_v49 }
 0xad7   : > { %9985 = vmatprep.subr.bf16.mxu0 %v9984_v35  ;;  %v18667_v35 = vld [vmem:[#allocation92_spill] sm:$0xff] }
 0xad8   : > { %v14778_v30 = vpop.eup %11113  ;;  %9987 = vmatpush1.bf16.xpose.msra.mxu0 %v9986_v60  ;;  %4580 = vadd.xlane.f32.xlu1 %v4579_v48  ;;  %v4527_v43 = vpop.xlane.xlu0 %4526  ;;  %v18668_v60 = vld [vmem:[#allocation89_spill] sm:$0xff] }
 0xad9   : > { %v14780_v42 = vpop.eup %11115  ;;  %11123 = vrcp.f32 %v4527_v43 }
 0xada   : > { %v11118_v1 = vpop.eup %11117  ;;  %v4582_v19 = vadd.f32 %v14780_v42, %v14778_v30 }
 0xadb   : > { %v4636_v17 = vmul.f32 %v11118_v1, %v14594_v45  ;;  %v4635_v29 = vmul.f32 %v11118_v1, %v14589_v37  ;;  %v11120_v10 = vpop.eup %11119  ;;  %v245_v37 = vld [vmem:[%s17617_s2 + $0x10] sm:$0xff] }
 0xadc   : > { %4583 = vadd.xlane.f32.xlu1 %v4582_v19  ;;  %v4530_v5 = vpop.xlane.xlu1 %4529  ;;  %v4638_v24 = vmul.f32 %v11120_v10, %v14602_v8  ;;  %v4637_v49 = vmul.f32 %v11120_v10, %v14600_v20 }
 0xadd   : > { %v9988_v53 = vpack.c.bf16 %v4636_v17, %v4634_v7  ;;  %v9990_v47 = vpack.c.bf16 %v4635_v29, %v4633_v9  ;;  %11125 = vrcp.f32 %v4530_v5  ;;  %v18669_v17 = vld [vmem:[#allocation94_spill] sm:$0xff]  ;;  %v18672_v5 = vld [vmem:[#allocation91_spill] sm:$0xff] }
 0xade   : > { %v18670_v29 = vld [vmem:[#allocation114_spill] sm:$0xff] }
 0xadf   : > { %9989 = vmatprep.subr.bf16.mxu0 %v9988_v53  ;;  %v11122_v62 = vpop.eup %11121  ;;  %v18671_v53 = vld [vmem:[#allocation93_spill] sm:$0xff] }
 0xae0   : > { %9991 = vmatpush1.bf16.xpose.msra.mxu0 %v9990_v47  ;;  %v4533_v26 = vpop.xlane.xlu0 %4532  ;;  %v4640_v56 = vmul.f32 %v11122_v62, %v14610_v31  ;;  %v4639_v45 = vmul.f32 %v11122_v62, %v14608_v50 }
 0xae1   : > { %11127 = vrcp.f32 %v4533_v26 }
 0xae2   : > { %v9992_v0 = vpack.c.bf16 %v4640_v56, %v4638_v24  ;;  %v9994_v27 = vpack.c.bf16 %v4639_v45, %v4637_v49 }
 0xae3   : > { %v11124_v16 = vpop.eup %11123 }
 0xae4   : > { %9993 = vmatprep.subr.bf16.mxu0 %v9992_v0  ;;  %v4536_v55 = vpop.xlane.xlu1 %4535  ;;  %v4642_v31 = vmul.f32 %v11124_v16, %v14618_v61  ;;  %v4641_v3 = vmul.f32 %v11124_v16, %v14616_v21 }
 0xae5   : > { %267 = vperm.xlu0 %10393, %v245_v37   ;;  %11129 = vrcp.f32 %v4536_v55 }
 0xae7   : > { %v11126_v11 = vpop.eup %11125 }
 0xae8   : > { %9995 = vmatpush1.bf16.xpose.msra.mxu0 %v9994_v27  ;;  %v4539_v8 = vpop.xlane.xlu0 %4538  ;;  %v4644_v50 = vmul.f32 %v11126_v11, %v14626_v33  ;;  %v4643_v20 = vmul.f32 %v11126_v11, %v14624_v59  ;;  %v18673_v27 = vld [vmem:[#allocation116_spill] sm:$0xff] }
 0xae9   : > { %11131 = vrcp.f32 %v4539_v8 }
 0xaea   : > { %v9996_v44 = vpack.c.bf16 %v4644_v50, %v4642_v31  ;;  %v9998_v32 = vpack.c.bf16 %v4643_v20, %v4641_v3  ;;  %v18674_v20 = vld [vmem:[#allocation98_spill] sm:$0xff]  ;;  %v18675_v3 = vld [vmem:[#allocation115_spill] sm:$0xff] }
 0xaeb   : > { %v11128_v38 = vpop.eup %11127 }
 0xaec   : > { %9997 = vmatprep.subr.bf16.mxu0 %v9996_v44  ;;  %v4542_v52 = vpop.xlane.xlu1 %4541  ;;  %v4646_v33 = vmul.f32 %v11128_v38, %v14634_v22  ;;  %v4645_v48 = vmul.f32 %v11128_v38, %v18668_v60  ;;  %v18680_v60 = vld [vmem:[#allocation101_spill] sm:$0xff] }
 0xaed   : > { %287 = vperm.xlu1 %10394, %v249_v12   ;;  %11133 = vrcp.f32 %v4542_v52 }
 0xaef   : > { %v11130_v14 = vpop.eup %11129 }
 0xaf0   : > { %9999 = vmatpush1.bf16.xpose.msra.mxu0 %v9998_v32  ;;  %v4545_v61 = vpop.xlane.xlu0 %4544  ;;  %v4648_v59 = vmul.f32 %v11130_v14, %v14642_v4  ;;  %v4647_v51 = vmul.f32 %v11130_v14, %v18667_v35  ;;  %v18679_v35 = vld [vmem:[#allocation102_spill] sm:$0xff] }
 0xaf1   : > { %11135 = vrcp.f32 %v4545_v61 }
 0xaf2   : > { %v10000_v21 = vpack.c.bf16 %v4648_v59, %v4646_v33  ;;  %v10002_v28 = vpack.c.bf16 %v4647_v51, %v4645_v48  ;;  %v18678_v33 = vld [vmem:[#allocation96_spill] sm:$0xff] }
 0xaf3   : > { %v11132_v1 = vpop.eup %11131 }
 0xaf4   : > { %10001 = vmatprep.subr.bf16.mxu0 %v10000_v21  ;;  %v4548_v43 = vpop.xlane.xlu1 %4547  ;;  %v4650_v9 = vmul.f32 %v11132_v1, %v18669_v17  ;;  %v4649_v47 = vmul.f32 %v11132_v1, %v18672_v5  ;;  %v18681_v21 = vld [vmem:[#allocation95_spill] sm:$0xff] }
 0xaf5   : > { %11137 = vrcp.f32 %v4548_v43 }
 0xaf7   : > { %v11134_v19 = vpop.eup %11133 }
 0xaf8   : > { %10003 = vmatpush1.bf16.xpose.msra.mxu0 %v10002_v28  ;;  %v4551_v7 = vpop.xlane.xlu0 %4550  ;;  %v4652_v22 = vmul.f32 %v11134_v19, %v18670_v29  ;;  %v4651_v4 = vmul.f32 %v11134_v19, %v18671_v53 }
 0xaf9   : > { %11139 = vrcp.f32 %v4551_v7 }
 0xafa   : > { %v10004_v10 = vpack.c.bf16 %v4652_v22, %v4650_v9  ;;  %v10006_v62 = vpack.c.bf16 %v4651_v4, %v4649_v47 }
 0xafb   : > { %v11136_v24 = vpop.eup %11135 }
 0xafc   : > { %10005 = vmatprep.subr.bf16.mxu0 %v10004_v10  ;;  %v4554_v26 = vpop.xlane.xlu1 %4553  ;;  %v4654_v49 = vmul.f32 %v11136_v24, %v14666_v54  ;;  %v4653_v55 = vmul.f32 %v11136_v24, %v18673_v27  ;;  %v18676_v54 = vld [vmem:[#allocation113_spill] sm:$0xff] }
 0xafd   : > { %11141 = vrcp.f32 %v4554_v26 }
 0xaff   : > { %v11138_v56 = vpop.eup %11137 }
 0xb00   : > { %10007 = vmatpush1.bf16.xpose.msra.mxu0 %v10006_v62  ;;  %v4557_v45 = vpop.xlane.xlu0 %4556  ;;  %v4656_v37 = vmul.f32 %v11138_v56, %v14674_v13  ;;  %v4655_v0 = vmul.f32 %v11138_v56, %v14672_v6  ;;  %v18677_v13 = vld [vmem:[#allocation97_spill] sm:$0xff] }
 0xb01   : > { %11143 = vrcp.f32 %v4557_v45 }
 0xb02   : > { %v10008_v16 = vpack.c.bf16 %v4656_v37, %v4654_v49  ;;  %v10010_v11 = vpack.c.bf16 %v4655_v0, %v4653_v55  ;;  %v18683_v55 = vld [vmem:[#allocation9_spill] sm:$0xff] }
 0xb03   : > { %v11140_v31 = vpop.eup %11139 }
 0xb04   : > { %10009 = vmatprep.subr.bf16.mxu0 %v10008_v16  ;;  %v4560_v8 = vpop.xlane.xlu1 %4559  ;;  %v4658_v12 = vmul.f32 %v11140_v31, %v18674_v20  ;;  %v4657_v52 = vmul.f32 %v11140_v31, %v18677_v13 }
 0xb05   : > { %11145 = vrcp.f32 %v4560_v8 }
 0xb07   : > { %v11142_v50 = vpop.eup %11141 }
 0xb08   : > { %10011 = vmatpush1.bf16.xpose.msra.mxu0 %v10010_v11  ;;  %v4660_v44 = vmul.f32 %v11142_v50, %v18675_v3  ;;  %v4659_v32 = vmul.f32 %v11142_v50, %v18676_v54 }
 0xb0a   : > { %v10012_v6 = vpack.c.bf16 %v4660_v44, %v4658_v12  ;;  %v10014_v38 = vpack.c.bf16 %v4659_v32, %v4657_v52 }
 0xb0b   : > { %v11144_v14 = vpop.eup %11143 }
 0xb0c   : > { %10013 = vmatprep.subr.bf16.mxu0 %v10012_v6  ;;  %v4662_v59 = vmul.f32 %v11144_v14, %v18678_v33  ;;  %v4661_v28 = vmul.f32 %v11144_v14, %v18681_v21  ;;  %v18688_v33 = vld [vmem:[#allocation72_spill] sm:$0xff] }
 0xb0f   : > { %v11146_v61 = vpop.eup %11145 }
 0xb10   : > { %10015 = vmatpush1.bf16.xpose.msra.mxu0 %v10014_v38  ;;  %v4664_v51 = vmul.f32 %v11146_v61, %v18679_v35  ;;  %v4663_v48 = vmul.f32 %v11146_v61, %v18680_v60 }
 0xb12   : > { %v10016_v43 = vpack.c.bf16 %v4664_v51, %v4662_v59  ;;  %v10018_v1 = vpack.c.bf16 %v4663_v48, %v4661_v28  ;;  %v4683_v59 = vrot.slane %v18688_v33, 4 }
 0xb14   : > { %10017 = vmatprep.subr.bf16.mxu0 %v10016_v43 }
 0xb18   : > { %10019 = vmatpush1.bf16.xpose.msra.mxu0 %v10018_v1 }
 0xb4c   : > { %v4563_v19 = vpop.xlane.xlu0 %4562 }
 0xb4d   : > { %11147 = vrcp.f32 %v4563_v19 }
 0xb50   : > { %v4566_v7 = vpop.xlane.xlu1 %4565 }
 0xb51   : > { %11149 = vrcp.f32 %v4566_v7 }
 0xb54   : > { %v4569_v17 = vpop.xlane.xlu0 %4568 }
 0xb55   : > { %11151 = vrcp.f32 %v4569_v17 }
 0xb57   : > { %v11148_v29 = vpop.eup %11147 }
 0xb58   : > { %v4572_v9 = vpop.xlane.xlu1 %4571  ;;  %v4666_v4 = vmul.f32 %v11148_v29, %v14718_v36  ;;  %v4665_v47 = vmul.f32 %v11148_v29, %v14716_v39 }
 0xb59   : > { %11153 = vrcp.f32 %v4572_v9 }
 0xb5b   : > { %v11150_v22 = vpop.eup %11149 }
 0xb5c   : > { %v4575_v53 = vpop.xlane.xlu0 %4574  ;;  %v4668_v5 = vmul.f32 %v11150_v22, %v14726_v57  ;;  %v4667_v10 = vmul.f32 %v11150_v22, %v14724_v15  ;;  %v18682_v15 = vld [vmem:[#allocation8_spill] sm:$0xff] }
 0xb5d   : > { %11155 = vrcp.f32 %v4575_v53 }
 0xb5e   : > { %v10020_v62 = vpack.c.bf16 %v4668_v5, %v4666_v4  ;;  %v10022_v26 = vpack.c.bf16 %v4667_v10, %v4665_v47 }
 0xb5f   : > { %v11152_v56 = vpop.eup %11151 }
 0xb60   : > { %10021 = vmatprep.subr.bf16.mxu0 %v10020_v62  ;;  %v4670_v0 = vmul.f32 %v11152_v56, %v14738_v23  ;;  %v4669_v57 = vmul.f32 %v11152_v56, %v14736_v18 }
 0xb61   : > { %v4578_v24 = vpop.xlane.xlu1 %4577  ;;  %10023 = vmatpush1.bf16.xpose.msra.mxu0 %v10022_v26 }
 0xb62   : > { %11157 = vrcp.f32 %v4578_v24 }
 0xb63   : > { %v11154_v45 = vpop.eup %11153 }
 0xb64   : > { %v268_v49 = vpop.permute.xlu0 %267  ;;  %v4672_v36 = vmul.f32 %v11154_v45, %v14746_v2  ;;  %v4671_v39 = vmul.f32 %v11154_v45, %v14744_v63 }
 0xb65   : > { %v4581_v37 = vpop.xlane.xlu1 %4580  ;;  %v431_v27 = vadd.f32 %v18682_v15, %v268_v49  ;;  %v433_v16 = vadd.f32 %v18683_v55, %v268_v49 }
 0xb66   : > { %v10024_v11 = vpack.c.bf16 %v4672_v36, %v4670_v0  ;;  %v10026_v8 = vpack.c.bf16 %v4671_v39, %v4669_v57  ;;  %11159 = vrcp.f32 %v4581_v37 }
 0xb67   : > { %v14832_v31 = vmul.f32 0.5, %v431_v27  ;;  %v14834_v50 = vmul.f32 0.5, %v433_v16  ;;  %v11156_v23 = vpop.eup %11155 }
 0xb68   : > { %10025 = vmatprep.subr.bf16.mxu0 %v10024_v11  ;;  %v4674_v63 = vmul.f32 %v11156_v23, %v14758_v46  ;;  %v4673_v12 = vmul.f32 %v11156_v23, %v14756_v58  ;;  %v18686_v58 = vld [vmem:[#allocation23_spill] sm:$0xff] }
 0xb69   : > { %18684 = vst [vmem:[#allocation99_spill] sm:$0xff] %v14832_v31  ;;  %18685 = vst [vmem:[#allocation100_spill] sm:$0xff] %v14834_v50  ;;  %v4584_v20 = vpop.xlane.xlu1 %4583  ;;  %4880 = vxpose.xlu0.b32.start.end [1/1] (short) %v14832_v31, 128  ;;  %4912 = vxpose.xlu1.b32.start.end [1/1] (short) %v14834_v50, 128 }
 0xb6a   : > { %11161 = vrcp.f32 %v4584_v20  ;;  %10027 = vmatpush1.bf16.xpose.msra.mxu0 %v10026_v8 }
 0xb6c   : > { %v11158_v18 = vpop.eup %11157 }
 0xb6d   : > { %v4676_v2 = vmul.f32 %v11158_v18, %v14764_v34  ;;  %v4675_v3 = vmul.f32 %v11158_v18, %v14762_v25  ;;  %v288_v14 = vpop.permute.xlu1 %287 }
 0xb6e   : > { %v14847_v25 = vadd.f32 %v18686_v58, %v288_v14 }
 0xb6f   : > { %v10028_v44 = vpack.c.bf16 %v4676_v2, %v4674_v63  ;;  %v10030_v54 = vpack.c.bf16 %v4675_v3, %v4673_v12 }
 0xb70   : > { %v11160_v32 = vpop.eup %11159  ;;  %18687 = vst [vmem:[#allocation103_spill] sm:$0xff] %v14847_v25 }
 0xb71   : > { %10029 = vmatprep.subr.bf16.mxu0 %v10028_v44  ;;  %v4678_v52 = vmul.f32 %v11160_v32, %v14774_v40  ;;  %v4677_v38 = vmul.f32 %v11160_v32, %v14772_v41  ;;  %v18689_v40 = vld [vmem:[#allocation22_spill] sm:$0xff]  ;;  %v18691_v41 = vmov 0.0  }
 0xb72   : > { %10031 = vmatpush1.bf16.xpose.msra.mxu0 %v10030_v54  ;;  %v14853_v35 = vadd.f32 %v18689_v40, %v288_v14 }
 0xb74   : > { %v11162_v13 = vpop.eup %11161  ;;  %18690 = vst [vmem:[#allocation104_spill] sm:$0xff] %v14853_v35 }
 0xb75   : > { %v4680_v6 = vmul.f32 %v11162_v13, %v14780_v42  ;;  %v4679_v46 = vmul.f32 %v11162_v13, %v14778_v30  ;;  %v9536_v30 = vld [vmem:[%s17618_s3 + $0x48] sm:$0xff] }
 0xb76   : > { %9542 = vmatmul.mubr.msk.f32.vlgmr.msra.gmra.mrb[132].mxu1 %vm555_vm2, %v9536_v30 }
 0xb77   : > { %v10032_v34 = vpack.c.bf16 %v4680_v6, %v4678_v52  ;;  %v10034_v61 = vpack.c.bf16 %v4679_v46, %v4677_v38  ;;  %3751 = vmatprep.mubr.f32.mxu1 %v18691_v41 }
 0xb79   : > { %10033 = vmatprep.subr.bf16.mxu0 %v10032_v34 }
 0xb7a   : > { %10035 = vmatpush1.bf16.xpose.msra.mxu0 %v10034_v61 }
 0xb7b   : > { %9589 = vmatprep.subr.msk.mxu0 %vm652_vm1, %v14847_v25 }
 0xb81   : > { %4752 = vmatmul.mubr.f32.vlgmr.msra.gmra.mrb[162].mxu0 %v4683_v59 }
 0xb82   : > { %9590 = vmatpush1.msk.msra.mxu0 %vm652_vm1, %v14853_v35  ;;  %5110 = vmatprep.mubr.f32.mxu0 %v18691_v41 }
 0xbe9   : > { %v4896_v42 = vpop.trf.xlu0  ;;  %v4928_v7 = vpop.trf.xlu1 }
 0xbea   : > { %9591 = vmatmul.mubr.msk.f32.vlgmr.msra.gmra.mrb[164].mxu0 %vm555_vm2, %v4896_v42 }
 0xbeb   : > { %5116 = vmatprep.mubr.f32.mxu0 %v18691_v41 }
 0xbed   : > { %v4897_v51 = vpop.trf.xlu0  ;;  %v4929_v29 = vpop.trf.xlu1 }
 0xbee   : > { %9592 = vmatmul.mubr.msk.f32.gmra.mrb[166].mxu0 %vm555_vm2, %v4897_v51 }
 0xbef   : > { %5122 = vmatprep.mubr.f32.mxu0 %v18691_v41 }
 0xbf1   : > { %v4898_v60 = vpop.trf.xlu0  ;;  %v4930_v53 = vpop.trf.xlu1 }
 0xbf2   : > { %9593 = vmatmul.mubr.msk.f32.gmra.mrb[168].mxu0 %vm555_vm2, %v4898_v60 }
 0xbf3   : > { %5128 = vmatprep.mubr.f32.mxu0 %v18691_v41 }
 0xbf5   : > { %v4899_v48 = vpop.trf.xlu0  ;;  %v4931_v47 = vpop.trf.xlu1 }
 0xbf6   : > { %9594 = vmatmul.mubr.msk.f32.gmra.mrb[170].mxu0 %vm555_vm2, %v4899_v48 }
 0xbf7   : > { %5134 = vmatprep.mubr.f32.mxu0 %v18691_v41 }
 0xbf9   : > { %v4900_v21 = vpop.trf.xlu0  ;;  %v4932_v62 = vpop.trf.xlu1 }
 0xbfa   : > { %9595 = vmatmul.mubr.msk.f32.gmra.mrb[172].mxu0 %vm555_vm2, %v4900_v21 }
 0xbfb   : > { %5140 = vmatprep.mubr.f32.mxu0 %v18691_v41 }
 0xbfd   : > { %v4901_v28 = vpop.trf.xlu0  ;;  %v4933_v24 = vpop.trf.xlu1 }
 0xbfe   : > { %9596 = vmatmul.mubr.msk.f32.gmra.mrb[174].mxu0 %vm555_vm2, %v4901_v28 }
 0xbff   : > { %5146 = vmatprep.mubr.f32.mxu0 %v18691_v41 }
 0xc01   : > { %v4902_v43 = vpop.trf.xlu0  ;;  %v4934_v56 = vpop.trf.xlu1 }
 0xc02   : > { %9597 = vmatmul.mubr.msk.f32.gmra.mrb[176].mxu0 %vm555_vm2, %v4902_v43 }
 0xc03   : > { %5152 = vmatprep.mubr.f32.mxu0 %v18691_v41 }
 0xc05   : > { %v4903_v1 = vpop.trf.xlu0  ;;  %v4935_v45 = vpop.trf.xlu1 }
 0xc06   : > { %9598 = vmatmul.mubr.msk.f32.gmra.mrb[178].mxu0 %vm555_vm2, %v4903_v1 }
 0xc07   : > { %5158 = vmatprep.mubr.f32.mxu0 %v18691_v41 }
 0xc09   : > { %v4904_v19 = vpop.trf.xlu0  ;;  %v4936_v49 = vpop.trf.xlu1 }
 0xc0a   : > { %9599 = vmatmul.mubr.msk.f32.gmra.mrb[180].mxu0 %vm555_vm2, %v4904_v19 }
 0xc0b   : > { %5164 = vmatprep.mubr.f32.mxu0 %v18691_v41 }
 0xc0d   : > { %v4905_v17 = vpop.trf.xlu0  ;;  %v4937_v37 = vpop.trf.xlu1 }
 0xc0e   : > { %9600 = vmatmul.mubr.msk.f32.gmra.mrb[182].mxu0 %vm555_vm2, %v4905_v17 }
 0xc0f   : > { %5170 = vmatprep.mubr.f32.mxu0 %v18691_v41 }
 0xc11   : > { %v4906_v9 = vpop.trf.xlu0  ;;  %v4938_v0 = vpop.trf.xlu1 }
 0xc12   : > { %9601 = vmatmul.mubr.msk.f32.gmra.mrb[184].mxu0 %vm555_vm2, %v4906_v9 }
 0xc13   : > { %5176 = vmatprep.mubr.f32.mxu0 %v18691_v41 }
 0xc15   : > { %v4907_v22 = vpop.trf.xlu0  ;;  %v4939_v36 = vpop.trf.xlu1 }
 0xc16   : > { %9602 = vmatmul.mubr.msk.f32.gmra.mrb[186].mxu0 %vm555_vm2, %v4907_v22 }
 0xc17   : > { %5182 = vmatprep.mubr.f32.mxu0 %v18691_v41 }
 0xc19   : > { %v4908_v4 = vpop.trf.xlu0  ;;  %v4940_v57 = vpop.trf.xlu1 }
 0xc1a   : > { %9603 = vmatmul.mubr.msk.f32.gmra.mrb[188].mxu0 %vm555_vm2, %v4908_v4 }
 0xc1b   : > { %5188 = vmatprep.mubr.f32.mxu0 %v18691_v41 }
 0xc1d   : > { %v4909_v5 = vpop.trf.xlu0  ;;  %v4941_v27 = vpop.trf.xlu1 }
 0xc1e   : > { %9604 = vmatmul.mubr.msk.f32.gmra.mrb[190].mxu0 %vm555_vm2, %v4909_v5 }
 0xc1f   : > { %5194 = vmatprep.mubr.f32.mxu0 %v18691_v41 }
 0xc21   : > { %v4910_v10 = vpop.trf.xlu0  ;;  %v4942_v55 = vpop.trf.xlu1 }
 0xc22   : > { %9605 = vmatmul.mubr.msk.f32.gmra.mrb[192].mxu0 %vm555_vm2, %v4910_v10 }
 0xc23   : > { %5200 = vmatprep.mubr.f32.mxu0 %v18691_v41 }
 0xc25   : > { %v4911_v26 = vpop.trf.xlu0  ;;  %v4943_v16 = vpop.trf.xlu1 }
 0xc26   : > { %9606 = vmatmul.mubr.msk.f32.gmra.mrb[194].mxu0 %vm555_vm2, %v4911_v26 }
 0xc27   : > { %5206 = vmatprep.mubr.f32.mxu0 %v18691_v41 }
 0xc2a   : > { %9607 = vmatmul.mubr.msk.f32.gmra.mrb[196].mxu0 %vm555_vm2, %v4928_v7 }
 0xc2b   : > { %5212 = vmatprep.mubr.f32.mxu0 %v18691_v41 }
 0xc2e   : > { %9608 = vmatmul.mubr.msk.f32.gmra.mrb[198].mxu0 %vm555_vm2, %v4929_v29 }
 0xc2f   : > { %5218 = vmatprep.mubr.f32.mxu0 %v18691_v41 }
 0xc32   : > { %9609 = vmatmul.mubr.msk.f32.gmra.mrb[200].mxu0 %vm555_vm2, %v4930_v53 }
 0xc33   : > { %5224 = vmatprep.mubr.f32.mxu0 %v18691_v41 }
 0xc36   : > { %9610 = vmatmul.mubr.msk.f32.gmra.mrb[202].mxu0 %vm555_vm2, %v4931_v47 }
 0xc37   : > { %5230 = vmatprep.mubr.f32.mxu0 %v18691_v41 }
 0xc3a   : > { %9611 = vmatmul.mubr.msk.f32.gmra.mrb[204].mxu0 %vm555_vm2, %v4932_v62 }
 0xc3b   : > { %5236 = vmatprep.mubr.f32.mxu0 %v18691_v41 }
 0xc3e   : > { %9612 = vmatmul.mubr.msk.f32.gmra.mrb[206].mxu0 %vm555_vm2, %v4933_v24 }
 0xc3f   : > { %5242 = vmatprep.mubr.f32.mxu0 %v18691_v41 }
 0xc42   : > { %9613 = vmatmul.mubr.msk.f32.gmra.mrb[208].mxu0 %vm555_vm2, %v4934_v56 }
 0xc43   : > { %5248 = vmatprep.mubr.f32.mxu0 %v18691_v41 }
 0xc46   : > { %9614 = vmatmul.mubr.msk.f32.gmra.mrb[210].mxu0 %vm555_vm2, %v4935_v45 }
 0xc47   : > { %5254 = vmatprep.mubr.f32.mxu0 %v18691_v41 }
 0xc4a   : > { %9615 = vmatmul.mubr.msk.f32.gmra.mrb[212].mxu0 %vm555_vm2, %v4936_v49 }
 0xc4b   : > { %5260 = vmatprep.mubr.f32.mxu0 %v18691_v41 }
 0xc4e   : > { %9616 = vmatmul.mubr.msk.f32.gmra.mrb[214].mxu0 %vm555_vm2, %v4937_v37 }
 0xc4f   : > { %5266 = vmatprep.mubr.f32.mxu0 %v18691_v41 }
 0xc52   : > { %9617 = vmatmul.mubr.msk.f32.gmra.mrb[216].mxu0 %vm555_vm2, %v4938_v0 }
 0xc53   : > { %5272 = vmatprep.mubr.f32.mxu0 %v18691_v41 }
 0xc54   : > { %v4753_v39 = vpop.f32.mrb[162].mxu0 }
 0xc55   : > { %v4755_v15 = vpop.f32.mrb[163].mxu0 }
 0xc56   : > { %9583 = vmatprep.subr.msk.mxu1 %vm652_vm1, %v4755_v15  ;;  %9618 = vmatmul.mubr.msk.f32.gmra.mrb[218].mxu0 %vm555_vm2, %v4939_v36 }
 0xc57   : > { %9584 = vmatpush1.msk.msra.mxu1 %vm652_vm1, %v4753_v39  ;;  %5278 = vmatprep.mubr.f32.mxu0 %v18691_v41 }
 0xc5a   : > { %9619 = vmatmul.mubr.msk.f32.gmra.mrb[220].mxu0 %vm555_vm2, %v4940_v57 }
 0xc5b   : > { %5284 = vmatprep.mubr.f32.mxu0 %v18691_v41 }
 0xc5e   : > { %9620 = vmatmul.mubr.msk.f32.gmra.mrb[222].mxu0 %vm555_vm2, %v4941_v27 }
 0xc5f   : > { %5290 = vmatprep.mubr.f32.mxu0 %v18691_v41 }
 0xc62   : > { %9621 = vmatmul.mubr.msk.f32.gmra.mrb[224].mxu0 %vm555_vm2, %v4942_v55 }
 0xc63   : > { %5296 = vmatprep.mubr.f32.mxu0 %v18691_v41 }
 0xc66   : > { %9622 = vmatmul.mubr.msk.f32.gmra.mrb[226].mxu0 %vm555_vm2, %v4943_v16 }
 0xcbd   : > { %v14928_v11 = vpop.f32.mrb[164].mxu0 }
 0xcbe   : > { %v14930_v8 = vpop.f32.mrb[165].mxu0 }
 0xcbf   : > { %v5303_v20 = vmax.f32 %v14928_v11, %v14930_v8 }
 0xcc1   : > { %5304 = vmax.xlane.f32.xlu0 %v5303_v20  ;;  %v14934_v23 = vpop.f32.mrb[166].mxu0 }
 0xcc2   : > { %v14936_v18 = vpop.f32.mrb[167].mxu0 }
 0xcc3   : > { %v5306_v63 = vmax.f32 %v14934_v23, %v14936_v18 }
 0xcc5   : > { %5307 = vmax.xlane.f32.xlu1 %v5306_v63  ;;  %v14940_v2 = vpop.f32.mrb[168].mxu0 }
 0xcc6   : > { %v14942_v12 = vpop.f32.mrb[169].mxu0 }
 0xcc7   : > { %v5309_v3 = vmax.f32 %v14940_v2, %v14942_v12 }
 0xcc9   : > { %5310 = vmax.xlane.f32.xlu0 %v5309_v3  ;;  %v14946_v44 = vpop.f32.mrb[170].mxu0 }
 0xcca   : > { %v14948_v54 = vpop.f32.mrb[171].mxu0 }
 0xccb   : > { %v5312_v32 = vmax.f32 %v14946_v44, %v14948_v54 }
 0xccd   : > { %5313 = vmax.xlane.f32.xlu0 %v5312_v32  ;;  %v14952_v13 = vpop.f32.mrb[172].mxu0 }
 0xcce   : > { %v14954_v52 = vpop.f32.mrb[173].mxu0 }
 0xccf   : > { %v5315_v6 = vmax.f32 %v14952_v13, %v14954_v52 }
 0xcd1   : > { %5316 = vmax.xlane.f32.xlu0 %v5315_v6  ;;  %v14958_v38 = vpop.f32.mrb[174].mxu0 }
 0xcd2   : > { %v14960_v46 = vpop.f32.mrb[175].mxu0 }
 0xcd3   : > { %v5318_v14 = vmax.f32 %v14958_v38, %v14960_v46 }
 0xcd5   : > { %5319 = vmax.xlane.f32.xlu1 %v5318_v14  ;;  %v14964_v34 = vpop.f32.mrb[176].mxu0 }
 0xcd6   : > { %v14966_v61 = vpop.f32.mrb[177].mxu0 }
 0xcd7   : > { %v5321_v58 = vmax.f32 %v14964_v34, %v14966_v61 }
 0xcd9   : > { %5322 = vmax.xlane.f32.xlu0 %v5321_v58  ;;  %v14970_v33 = vpop.f32.mrb[178].mxu0 }
 0xcda   : > { %v14972_v59 = vpop.f32.mrb[179].mxu0 }
 0xcdb   : > { %v5324_v40 = vmax.f32 %v14970_v33, %v14972_v59 }
 0xcdd   : > { %5325 = vmax.xlane.f32.xlu1 %v5324_v40  ;;  %v14976_v30 = vpop.f32.mrb[180].mxu0 }
 0xcde   : > { %v14978_v42 = vpop.f32.mrb[181].mxu0 }
 0xcdf   : > { %v5327_v51 = vmax.f32 %v14976_v30, %v14978_v42 }
 0xce1   : > { %5328 = vmax.xlane.f32.xlu0 %v5327_v51  ;;  %v14982_v60 = vpop.f32.mrb[182].mxu0 }
 0xce2   : > { %v14984_v48 = vpop.f32.mrb[183].mxu0 }
 0xce3   : > { %v5330_v21 = vmax.f32 %v14982_v60, %v14984_v48 }
 0xce5   : > { %5331 = vmax.xlane.f32.xlu1 %v5330_v21  ;;  %v14988_v28 = vpop.f32.mrb[184].mxu0 }
 0xce6   : > { %v14990_v43 = vpop.f32.mrb[185].mxu0 }
 0xce7   : > { %v5333_v1 = vmax.f32 %v14988_v28, %v14990_v43 }
 0xce9   : > { %5334 = vmax.xlane.f32.xlu0 %v5333_v1  ;;  %v14994_v19 = vpop.f32.mrb[186].mxu0 }
 0xcea   : > { %v14996_v7 = vpop.f32.mrb[187].mxu0 }
 0xceb   : > { %v5336_v17 = vmax.f32 %v14994_v19, %v14996_v7 }
 0xced   : > { %5337 = vmax.xlane.f32.xlu1 %v5336_v17  ;;  %v15000_v9 = vpop.f32.mrb[188].mxu0 }
 0xcee   : > { %v15002_v29 = vpop.f32.mrb[189].mxu0 }
 0xcef   : > { %v5339_v22 = vmax.f32 %v15000_v9, %v15002_v29 }
 0xcf1   : > { %5340 = vmax.xlane.f32.xlu0 %v5339_v22  ;;  %v15006_v53 = vpop.f32.mrb[190].mxu0 }
 0xcf2   : > { %v15008_v4 = vpop.f32.mrb[191].mxu0 }
 0xcf3   : > { %v5342_v5 = vmax.f32 %v15006_v53, %v15008_v4 }
 0xcf5   : > { %5343 = vmax.xlane.f32.xlu1 %v5342_v5  ;;  %v15012_v47 = vpop.f32.mrb[192].mxu0 }
 0xcf6   : > { %v15014_v10 = vpop.f32.mrb[193].mxu0 }
 0xcf7   : > { %v5345_v62 = vmax.f32 %v15012_v47, %v15014_v10 }
 0xcf9   : > { %5346 = vmax.xlane.f32.xlu0 %v5345_v62  ;;  %v15018_v26 = vpop.f32.mrb[194].mxu0 }
 0xcfa   : > { %v15020_v24 = vpop.f32.mrb[195].mxu0 }
 0xcfb   : > { %v5348_v56 = vmax.f32 %v15018_v26, %v15020_v24 }
 0xcfd   : > { %5349 = vmax.xlane.f32.xlu1 %v5348_v56  ;;  %v15024_v45 = vpop.f32.mrb[196].mxu0 }
 0xcfe   : > { %v15026_v49 = vpop.f32.mrb[197].mxu0 }
 0xcff   : > { %v5351_v37 = vmax.f32 %v15024_v45, %v15026_v49 }
 0xd01   : > { %5352 = vmax.xlane.f32.xlu0 %v5351_v37  ;;  %v15030_v0 = vpop.f32.mrb[198].mxu0 }
 0xd02   : > { %v15032_v36 = vpop.f32.mrb[199].mxu0 }
 0xd03   : > { %18692 = vst [vmem:[#allocation50_spill] sm:$0xff] %v15032_v36  ;;  %v5354_v57 = vmax.f32 %v15030_v0, %v15032_v36 }
 0xd05   : > { %5355 = vmax.xlane.f32.xlu1 %v5354_v57  ;;  %v15036_v39 = vpop.f32.mrb[200].mxu0 }
 0xd06   : > { %18693 = vst [vmem:[#allocation57_spill] sm:$0xff] %v15036_v39  ;;  %v15038_v15 = vpop.f32.mrb[201].mxu0 }
 0xd07   : > { %18694 = vst [vmem:[#allocation54_spill] sm:$0xff] %v15038_v15  ;;  %v5357_v27 = vmax.f32 %v15036_v39, %v15038_v15 }
 0xd09   : > { %5358 = vmax.xlane.f32.xlu0 %v5357_v27  ;;  %v15042_v55 = vpop.f32.mrb[202].mxu0 }
 0xd0a   : > { %18695 = vst [vmem:[#allocation49_spill] sm:$0xff] %v15042_v55  ;;  %v15044_v16 = vpop.f32.mrb[203].mxu0 }
 0xd0b   : > { %18696 = vst [vmem:[#allocation61_spill] sm:$0xff] %v15044_v16  ;;  %v5360_v20 = vmax.f32 %v15042_v55, %v15044_v16 }
 0xd0d   : > { %5361 = vmax.xlane.f32.xlu1 %v5360_v20  ;;  %v15048_v63 = vpop.f32.mrb[204].mxu0 }
 0xd0e   : > { %18697 = vst [vmem:[#allocation31_spill] sm:$0xff] %v15048_v63  ;;  %v15050_v3 = vpop.f32.mrb[205].mxu0 }
 0xd0f   : > { %18698 = vst [vmem:[#allocation58_spill] sm:$0xff] %v15050_v3  ;;  %v5363_v32 = vmax.f32 %v15048_v63, %v15050_v3 }
 0xd11   : > { %5364 = vmax.xlane.f32.xlu0 %v5363_v32  ;;  %v15054_v6 = vpop.f32.mrb[206].mxu0 }
 0xd12   : > { %18699 = vst [vmem:[#allocation70_spill] sm:$0xff] %v15054_v6  ;;  %v15056_v14 = vpop.f32.mrb[207].mxu0 }
 0xd13   : > { %18700 = vst [vmem:[#allocation36_spill] sm:$0xff] %v15056_v14  ;;  %v5366_v58 = vmax.f32 %v15054_v6, %v15056_v14 }
 0xd15   : > { %5367 = vmax.xlane.f32.xlu1 %v5366_v58  ;;  %v15060_v40 = vpop.f32.mrb[208].mxu0 }
 0xd16   : > { %18701 = vst [vmem:[#allocation38_spill] sm:$0xff] %v15060_v40  ;;  %v15062_v51 = vpop.f32.mrb[209].mxu0 }
 0xd17   : > { %18702 = vst [vmem:[#allocation35_spill] sm:$0xff] %v15062_v51  ;;  %v5369_v21 = vmax.f32 %v15060_v40, %v15062_v51 }
 0xd19   : > { %5370 = vmax.xlane.f32.xlu0 %v5369_v21  ;;  %v15066_v1 = vpop.f32.mrb[210].mxu0 }
 0xd1a   : > { %18703 = vst [vmem:[#allocation37_spill] sm:$0xff] %v15066_v1  ;;  %v15068_v17 = vpop.f32.mrb[211].mxu0 }
 0xd1b   : > { %18704 = vst [vmem:[#allocation105_spill] sm:$0xff] %v15068_v17  ;;  %v5372_v22 = vmax.f32 %v15066_v1, %v15068_v17 }
 0xd1d   : > { %5373 = vmax.xlane.f32.xlu1 %v5372_v22  ;;  %v15072_v5 = vpop.f32.mrb[212].mxu0 }
 0xd1e   : > { %v15074_v62 = vpop.f32.mrb[213].mxu0 }
 0xd21   : > { %v15078_v37 = vpop.f32.mrb[214].mxu0 }
 0xd22   : > { %v15080_v57 = vpop.f32.mrb[215].mxu0 }
 0xd25   : > { %v15084_v20 = vpop.f32.mrb[216].mxu0 }
 0xd26   : > { %v15086_v32 = vpop.f32.mrb[217].mxu0 }
 0xd29   : > { %v15090_v21 = vpop.f32.mrb[218].mxu0 }
 0xd2a   : > { %v15092_v22 = vpop.f32.mrb[219].mxu0 }
 0xd2d   : > { %v15096_v35 = vpop.f32.mrb[220].mxu0 }
 0xd2e   : > { %v15098_v25 = vpop.f32.mrb[221].mxu0 }
 0xd31   : > { %v15102_v41 = vpop.f32.mrb[222].mxu0 }
 0xd32   : > { %v15104_v50 = vpop.f32.mrb[223].mxu0 }
 0xd35   : > { %v15108_v31 = vpop.f32.mrb[224].mxu0 }
 0xd36   : > { %v15110_v17 = vpop.f32.mrb[225].mxu0 }
 0xd39   : > { %v15114_v1 = vpop.f32.mrb[226].mxu0 }
 0xd3a   : > { %v15116_v51 = vpop.f32.mrb[227].mxu0 }
 0xd4e   : > { %v5305_v40 = vpop.xlane.xlu0 %5304 }
 0xd4f   : > { %v5399_v14 = vsub.f32 %v14928_v11, %v5305_v40  ;;  %v5400_v6 = vsub.f32 %v14930_v8, %v5305_v40 }
 0xd51   : > { %v5463_v58 = vmul.f32 1.442695, %v5399_v14  ;;  %v5465_v3 = vmul.f32 1.442695, %v5400_v6 }
 0xd52   : > { %v5308_v63 = vpop.xlane.xlu1 %5307 }
 0xd53   : > { %11163 = vpow2.f32 %v5463_v58  ;;  %v5401_v16 = vsub.f32 %v14934_v23, %v5308_v63  ;;  %v5402_v56 = vsub.f32 %v14936_v18, %v5308_v63 }
 0xd54   : > { %11165 = vpow2.f32 %v5465_v3 }
 0xd55   : > { %v5467_v55 = vmul.f32 1.442695, %v5401_v16  ;;  %v5469_v15 = vmul.f32 1.442695, %v5402_v56 }
 0xd56   : > { %v5311_v39 = vpop.xlane.xlu0 %5310 }
 0xd57   : > { %11167 = vpow2.f32 %v5467_v55  ;;  %v5403_v27 = vsub.f32 %v14940_v2, %v5311_v39  ;;  %v5404_v36 = vsub.f32 %v14942_v12, %v5311_v39 }
 0xd58   : > { %11169 = vpow2.f32 %v5469_v15 }
 0xd59   : > { %v5471_v11 = vmul.f32 1.442695, %v5403_v27  ;;  %v5473_v8 = vmul.f32 1.442695, %v5404_v36 }
 0xd5a   : > { %v5314_v14 = vpop.xlane.xlu0 %5313 }
 0xd5b   : > { %11171 = vpow2.f32 %v5471_v11  ;;  %v5405_v6 = vsub.f32 %v14946_v44, %v5314_v14  ;;  %v5406_v23 = vsub.f32 %v14948_v54, %v5314_v14 }
 0xd5c   : > { %11173 = vpow2.f32 %v5473_v8  ;;  %v18705_v8 = vmax.f32 %v15072_v5, %v15074_v62 }
 0xd5d   : > { %v15128_v18 = vpop.eup %11163  ;;  %v5475_v16 = vmul.f32 1.442695, %v5405_v6  ;;  %v5477_v63 = vmul.f32 1.442695, %v5406_v23 }
 0xd5e   : > { %v15130_v3 = vpop.eup %11165  ;;  %v5317_v55 = vpop.xlane.xlu0 %5316 }
 0xd5f   : > { %11175 = vpow2.f32 %v5475_v16  ;;  %v5407_v2 = vsub.f32 %v14952_v13, %v5317_v55  ;;  %v5408_v12 = vsub.f32 %v14954_v52, %v5317_v55  ;;  %v5591_v36 = vadd.f32 %v15130_v3, %v15128_v18 }
 0xd60   : > { %11177 = vpow2.f32 %v5477_v63 }
 0xd61   : > { %v15136_v44 = vpop.eup %11167  ;;  %v5479_v54 = vmul.f32 1.442695, %v5407_v2  ;;  %v5481_v39 = vmul.f32 1.442695, %v5408_v12  ;;  %5592 = vadd.xlane.f32.xlu0 %v5591_v36  ;;  %v18706_v2 = vmax.f32 %v15078_v37, %v15080_v57 }
 0xd62   : > { %v15138_v15 = vpop.eup %11169  ;;  %v5320_v40 = vpop.xlane.xlu1 %5319 }
 0xd63   : > { %11179 = vpow2.f32 %v5479_v54  ;;  %v5409_v56 = vsub.f32 %v14958_v38, %v5320_v40  ;;  %v5410_v27 = vsub.f32 %v14960_v46, %v5320_v40  ;;  %v5594_v13 = vadd.f32 %v15138_v15, %v15136_v44 }
 0xd64   : > { %11181 = vpow2.f32 %v5481_v39 }
 0xd65   : > { %v15144_v52 = vpop.eup %11171  ;;  %v5483_v58 = vmul.f32 1.442695, %v5409_v56  ;;  %v5485_v11 = vmul.f32 1.442695, %v5410_v27  ;;  %5376 = vmax.xlane.f32.xlu0 %v18705_v8  ;;  %5595 = vadd.xlane.f32.xlu1 %v5594_v13  ;;  %v18707_v27 = vmax.f32 %v15084_v20, %v15086_v32 }
 0xd66   : > { %v15149_v14 = vpop.eup %11173  ;;  %v5323_v6 = vpop.xlane.xlu0 %5322 }
 0xd67   : > { %11183 = vpow2.f32 %v5483_v58  ;;  %v5411_v38 = vsub.f32 %v14964_v34, %v5323_v6  ;;  %v5412_v46 = vsub.f32 %v14966_v61, %v5323_v6  ;;  %v5597_v23 = vadd.f32 %v15149_v14, %v15144_v52 }
 0xd68   : > { %11185 = vpow2.f32 %v5485_v11 }
 0xd69   : > { %v15155_v16 = vpop.eup %11175  ;;  %v5487_v63 = vmul.f32 1.442695, %v5411_v38  ;;  %v5489_v55 = vmul.f32 1.442695, %v5412_v46  ;;  %5598 = vadd.xlane.f32.xlu0 %v5597_v23  ;;  %5379 = vmax.xlane.f32.xlu1 %v18706_v2  ;;  %v18708_v46 = vmax.f32 %v15090_v21, %v15092_v22 }
 0xd6a   : > { %v15160_v12 = vpop.eup %11177  ;;  %v5326_v36 = vpop.xlane.xlu1 %5325 }
 0xd6b   : > { %11187 = vpow2.f32 %v5487_v63  ;;  %v5413_v34 = vsub.f32 %v14970_v33, %v5326_v36  ;;  %v5414_v61 = vsub.f32 %v14972_v59, %v5326_v36  ;;  %v5600_v54 = vadd.f32 %v15160_v12, %v15155_v16 }
 0xd6c   : > { %11189 = vpow2.f32 %v5489_v55 }
 0xd6d   : > { %v15166_v39 = vpop.eup %11179  ;;  %v5491_v40 = vmul.f32 1.442695, %v5413_v34  ;;  %v5493_v56 = vmul.f32 1.442695, %v5414_v61  ;;  %5382 = vmax.xlane.f32.xlu0 %v18707_v27  ;;  %5601 = vadd.xlane.f32.xlu1 %v5600_v54  ;;  %v18709_v61 = vmax.f32 %v15096_v35, %v15098_v25 }
 0xd6e   : > { %v15171_v13 = vpop.eup %11181  ;;  %v5329_v58 = vpop.xlane.xlu0 %5328 }
 0xd6f   : > { %11191 = vpow2.f32 %v5491_v40  ;;  %v5415_v33 = vsub.f32 %v14976_v30, %v5329_v58  ;;  %v5416_v59 = vsub.f32 %v14978_v42, %v5329_v58  ;;  %v5603_v11 = vadd.f32 %v15171_v13, %v15166_v39 }
 0xd70   : > { %11193 = vpow2.f32 %v5493_v56 }
 0xd71   : > { %v15177_v8 = vpop.eup %11183  ;;  %v5495_v6 = vmul.f32 1.442695, %v5415_v33  ;;  %v5497_v38 = vmul.f32 1.442695, %v5416_v59  ;;  %5604 = vadd.xlane.f32.xlu0 %v5603_v11  ;;  %5385 = vmax.xlane.f32.xlu1 %v18708_v46  ;;  %v18710_v59 = vmax.f32 %v15102_v41, %v15104_v50 }
 0xd72   : > { %v15182_v23 = vpop.eup %11185  ;;  %v5332_v63 = vpop.xlane.xlu1 %5331 }
 0xd73   : > { %11195 = vpow2.f32 %v5495_v6  ;;  %v5417_v30 = vsub.f32 %v14982_v60, %v5332_v63  ;;  %v5418_v42 = vsub.f32 %v14984_v48, %v5332_v63  ;;  %v5606_v55 = vadd.f32 %v15182_v23, %v15177_v8 }
 0xd74   : > { %11197 = vpow2.f32 %v5497_v38 }
 0xd75   : > { %v15188_v2 = vpop.eup %11187  ;;  %v5499_v36 = vmul.f32 1.442695, %v5417_v30  ;;  %v5501_v34 = vmul.f32 1.442695, %v5418_v42  ;;  %5388 = vmax.xlane.f32.xlu0 %v18709_v61  ;;  %5607 = vadd.xlane.f32.xlu1 %v5606_v55  ;;  %v18711_v42 = vmax.f32 %v15108_v31, %v15110_v17 }
 0xd76   : > { %v15193_v54 = vpop.eup %11189  ;;  %v5335_v40 = vpop.xlane.xlu0 %5334 }
 0xd77   : > { %11199 = vpow2.f32 %v5499_v36  ;;  %v5419_v60 = vsub.f32 %v14988_v28, %v5335_v40  ;;  %v5420_v48 = vsub.f32 %v14990_v43, %v5335_v40  ;;  %v5609_v56 = vadd.f32 %v15193_v54, %v15188_v2 }
 0xd78   : > { %11201 = vpow2.f32 %v5501_v34 }
 0xd79   : > { %v15199_v27 = vpop.eup %11191  ;;  %v5503_v58 = vmul.f32 1.442695, %v5419_v60  ;;  %v5505_v33 = vmul.f32 1.442695, %v5420_v48  ;;  %5610 = vadd.xlane.f32.xlu0 %v5609_v56  ;;  %5391 = vmax.xlane.f32.xlu1 %v18710_v59  ;;  %v18712_v48 = vmax.f32 %v15114_v1, %v15116_v51 }
 0xd7a   : > { %v15204_v11 = vpop.eup %11193  ;;  %v5338_v6 = vpop.xlane.xlu1 %5337 }
 0xd7b   : > { %11203 = vpow2.f32 %v5503_v58  ;;  %v5421_v28 = vsub.f32 %v14994_v19, %v5338_v6  ;;  %v5422_v43 = vsub.f32 %v14996_v7, %v5338_v6  ;;  %v5612_v38 = vadd.f32 %v15204_v11, %v15199_v27 }
 0xd7c   : > { %11205 = vpow2.f32 %v5505_v33 }
 0xd7d   : > { %v15210_v46 = vpop.eup %11195  ;;  %v5507_v63 = vmul.f32 1.442695, %v5421_v28  ;;  %v5509_v30 = vmul.f32 1.442695, %v5422_v43  ;;  %5394 = vmax.xlane.f32.xlu0 %v18711_v42  ;;  %5613 = vadd.xlane.f32.xlu1 %v5612_v38 }
 0xd7e   : > { %v15215_v55 = vpop.eup %11197  ;;  %v5341_v36 = vpop.xlane.xlu0 %5340 }
 0xd7f   : > { %11207 = vpow2.f32 %v5507_v63  ;;  %v5423_v19 = vsub.f32 %v15000_v9, %v5341_v36  ;;  %v5424_v7 = vsub.f32 %v15002_v29, %v5341_v36  ;;  %v5615_v34 = vadd.f32 %v15215_v55, %v15210_v46 }
 0xd80   : > { %11209 = vpow2.f32 %v5509_v30 }
 0xd81   : > { %v15221_v61 = vpop.eup %11199  ;;  %v5511_v40 = vmul.f32 1.442695, %v5423_v19  ;;  %v5513_v60 = vmul.f32 1.442695, %v5424_v7  ;;  %5616 = vadd.xlane.f32.xlu0 %v5615_v34  ;;  %5397 = vmax.xlane.f32.xlu1 %v18712_v48 }
 0xd82   : > { %v15226_v56 = vpop.eup %11201  ;;  %v5344_v58 = vpop.xlane.xlu1 %5343 }
 0xd83   : > { %11211 = vpow2.f32 %v5511_v40  ;;  %v5425_v9 = vsub.f32 %v15006_v53, %v5344_v58  ;;  %v5426_v29 = vsub.f32 %v15008_v4, %v5344_v58  ;;  %v5618_v33 = vadd.f32 %v15226_v56, %v15221_v61 }
 0xd84   : > { %11213 = vpow2.f32 %v5513_v60 }
 0xd85   : > { %v15232_v59 = vpop.eup %11203  ;;  %v5515_v6 = vmul.f32 1.442695, %v5425_v9  ;;  %v5517_v28 = vmul.f32 1.442695, %v5426_v29  ;;  %5619 = vadd.xlane.f32.xlu1 %v5618_v33 }
 0xd86   : > { %v15234_v43 = vpop.eup %11205  ;;  %v5347_v38 = vpop.xlane.xlu0 %5346 }
 0xd87   : > { %11215 = vpow2.f32 %v5515_v6  ;;  %v5427_v63 = vsub.f32 %v15012_v47, %v5347_v38  ;;  %v5428_v30 = vsub.f32 %v15014_v10, %v5347_v38  ;;  %v5621_v53 = vadd.f32 %v15234_v43, %v15232_v59 }
 0xd88   : > { %11217 = vpow2.f32 %v5517_v28 }
 0xd89   : > { %v15240_v4 = vpop.eup %11207  ;;  %v5519_v42 = vmul.f32 1.442695, %v5427_v63  ;;  %v5521_v36 = vmul.f32 1.442695, %v5428_v30  ;;  %5622 = vadd.xlane.f32.xlu0 %v5621_v53  ;;  %v18713_v53 = vld [vmem:[#allocation50_spill] sm:$0xff] }
 0xd8a   : > { %v15242_v19 = vpop.eup %11209  ;;  %v5350_v7 = vpop.xlane.xlu1 %5349 }
 0xd8b   : > { %11219 = vpow2.f32 %v5519_v42  ;;  %v5429_v34 = vsub.f32 %v15018_v26, %v5350_v7  ;;  %v5430_v40 = vsub.f32 %v15020_v24, %v5350_v7  ;;  %v5624_v47 = vadd.f32 %v15242_v19, %v15240_v4 }
 0xd8c   : > { %11221 = vpow2.f32 %v5521_v36 }
 0xd8d   : > { %v15248_v10 = vpop.eup %11211  ;;  %v5523_v60 = vmul.f32 1.442695, %v5429_v34  ;;  %v5525_v48 = vmul.f32 1.442695, %v5430_v40  ;;  %5625 = vadd.xlane.f32.xlu1 %v5624_v47  ;;  %v18715_v47 = vld [vmem:[#allocation57_spill] sm:$0xff] }
 0xd8e   : > { %v15250_v58 = vpop.eup %11213  ;;  %v5353_v9 = vpop.xlane.xlu0 %5352 }
 0xd8f   : > { %11223 = vpow2.f32 %v5523_v60  ;;  %v5431_v29 = vsub.f32 %v15024_v45, %v5353_v9  ;;  %v5432_v33 = vsub.f32 %v15026_v49, %v5353_v9  ;;  %v5627_v26 = vadd.f32 %v15250_v58, %v15248_v10 }
 0xd90   : > { %11225 = vpow2.f32 %v5525_v48  ;;  %v18716_v48 = vld [vmem:[#allocation54_spill] sm:$0xff] }
 0xd91   : > { %v15256_v24 = vpop.eup %11215  ;;  %v5527_v6 = vmul.f32 1.442695, %v5431_v29  ;;  %v5529_v28 = vmul.f32 1.442695, %v5432_v33  ;;  %5628 = vadd.xlane.f32.xlu0 %v5627_v26 }
 0xd92   : > { %v15258_v38 = vpop.eup %11217  ;;  %v5356_v63 = vpop.xlane.xlu1 %5355 }
 0xd93   : > { %11227 = vpow2.f32 %v5527_v6  ;;  %v5433_v30 = vsub.f32 %v15030_v0, %v5356_v63  ;;  %v5434_v42 = vsub.f32 %v18713_v53, %v5356_v63  ;;  %v5630_v45 = vadd.f32 %v15258_v38, %v15256_v24  ;;  %v18718_v63 = vld [vmem:[#allocation49_spill] sm:$0xff] }
 0xd94   : > { %11229 = vpow2.f32 %v5529_v28  ;;  %v18719_v53 = vld [vmem:[#allocation61_spill] sm:$0xff] }
 0xd95   : > { %v15264_v49 = vpop.eup %11219  ;;  %v5531_v36 = vmul.f32 1.442695, %v5433_v30  ;;  %v5533_v7 = vmul.f32 1.442695, %v5434_v42  ;;  %5631 = vadd.xlane.f32.xlu1 %v5630_v45 }
 0xd96   : > { %18714 = vst [vmem:[#allocation51_spill] sm:$0xff] %v15264_v49  ;;  %v15266_v34 = vpop.eup %11221  ;;  %v5359_v40 = vpop.xlane.xlu0 %5358 }
 0xd97   : > { %11231 = vpow2.f32 %v5531_v36  ;;  %v5435_v60 = vsub.f32 %v18715_v47, %v5359_v40  ;;  %v5436_v9 = vsub.f32 %v18716_v48, %v5359_v40  ;;  %v5633_v0 = vadd.f32 %v15266_v34, %v15264_v49  ;;  %v18722_v48 = vld [vmem:[#allocation31_spill] sm:$0xff] }
 0xd98   : > { %11233 = vpow2.f32 %v5533_v7 }
 0xd99   : > { %v15272_v29 = vpop.eup %11223  ;;  %v5535_v33 = vmul.f32 1.442695, %v5435_v60  ;;  %v5537_v26 = vmul.f32 1.442695, %v5436_v9  ;;  %5634 = vadd.xlane.f32.xlu0 %v5633_v0  ;;  %v18723_v0 = vld [vmem:[#allocation58_spill] sm:$0xff] }
 0xd9a   : > { %18717 = vst [vmem:[#allocation106_spill] sm:$0xff] %v15272_v29  ;;  %v15274_v6 = vpop.eup %11225  ;;  %v5362_v28 = vpop.xlane.xlu1 %5361 }
 0xd9b   : > { %11235 = vpow2.f32 %v5535_v33  ;;  %v5437_v30 = vsub.f32 %v18718_v63, %v5362_v28  ;;  %v5438_v42 = vsub.f32 %v18719_v53, %v5362_v28  ;;  %v5636_v45 = vadd.f32 %v15274_v6, %v15272_v29 }
 0xd9c   : > { %11237 = vpow2.f32 %v5537_v26 }
 0xd9d   : > { %v15280_v36 = vpop.eup %11227  ;;  %v5539_v7 = vmul.f32 1.442695, %v5437_v30  ;;  %v5541_v40 = vmul.f32 1.442695, %v5438_v42  ;;  %5637 = vadd.xlane.f32.xlu1 %v5636_v45  ;;  %v18726_v45 = vld [vmem:[#allocation70_spill] sm:$0xff] }
 0xd9e   : > { %18720 = vst [vmem:[#allocation30_spill] sm:$0xff] %v15280_v36  ;;  %v15282_v47 = vpop.eup %11229  ;;  %v5365_v60 = vpop.xlane.xlu0 %5364 }
 0xd9f   : > { %18721 = vst [vmem:[#allocation40_spill] sm:$0xff] %v15282_v47  ;;  %11239 = vpow2.f32 %v5539_v7  ;;  %v5439_v9 = vsub.f32 %v18722_v48, %v5365_v60  ;;  %v5440_v33 = vsub.f32 %v18723_v0, %v5365_v60  ;;  %v5639_v28 = vadd.f32 %v15282_v47, %v15280_v36  ;;  %v18727_v7 = vld [vmem:[#allocation36_spill] sm:$0xff] }
 0xda0   : > { %11241 = vpow2.f32 %v5541_v40 }
 0xda1   : > { %v15288_v63 = vpop.eup %11231  ;;  %v5543_v26 = vmul.f32 1.442695, %v5439_v9  ;;  %v5545_v53 = vmul.f32 1.442695, %v5440_v33  ;;  %5640 = vadd.xlane.f32.xlu0 %v5639_v28  ;;  %v18729_v28 = vld [vmem:[#allocation38_spill] sm:$0xff] }
 0xda2   : > { %18724 = vst [vmem:[#allocation39_spill] sm:$0xff] %v15288_v63  ;;  %v15290_v30 = vpop.eup %11233  ;;  %v5368_v42 = vpop.xlane.xlu1 %5367 }
 0xda3   : > { %18725 = vst [vmem:[#allocation34_spill] sm:$0xff] %v15290_v30  ;;  %11243 = vpow2.f32 %v5543_v26  ;;  %v5441_v49 = vsub.f32 %v18726_v45, %v5368_v42  ;;  %v5442_v29 = vsub.f32 %v18727_v7, %v5368_v42  ;;  %v5642_v60 = vadd.f32 %v15290_v30, %v15288_v63  ;;  %v18730_v26 = vld [vmem:[#allocation35_spill] sm:$0xff] }
 0xda4   : > { %11245 = vpow2.f32 %v5545_v53 }
 0xda5   : > { %v15296_v48 = vpop.eup %11235  ;;  %v5547_v40 = vmul.f32 1.442695, %v5441_v49  ;;  %v5549_v0 = vmul.f32 1.442695, %v5442_v29  ;;  %5643 = vadd.xlane.f32.xlu1 %v5642_v60  ;;  %v18731_v60 = vld [vmem:[#allocation37_spill] sm:$0xff] }
 0xda6   : > { %18728 = vst [vmem:[#allocation52_spill] sm:$0xff] %v15296_v48  ;;  %v15298_v9 = vpop.eup %11237  ;;  %v5371_v33 = vpop.xlane.xlu0 %5370 }
 0xda7   : > { %11247 = vpow2.f32 %v5547_v40  ;;  %v5443_v36 = vsub.f32 %v18729_v28, %v5371_v33  ;;  %v5444_v47 = vsub.f32 %v18730_v26, %v5371_v33  ;;  %v5645_v42 = vadd.f32 %v15298_v9, %v15296_v48  ;;  %v18732_v40 = vld [vmem:[#allocation105_spill] sm:$0xff] }
 0xda8   : > { %11249 = vpow2.f32 %v5549_v0 }
 0xda9   : > { %v15304_v45 = vpop.eup %11239  ;;  %v5551_v53 = vmul.f32 1.442695, %v5443_v36  ;;  %v5553_v7 = vmul.f32 1.442695, %v5444_v47  ;;  %5646 = vadd.xlane.f32.xlu0 %v5645_v42 }
 0xdaa   : > { %v15306_v49 = vpop.eup %11241  ;;  %v5374_v29 = vpop.xlane.xlu1 %5373 }
 0xdab   : > { %11251 = vpow2.f32 %v5551_v53  ;;  %v5445_v63 = vsub.f32 %v18731_v60, %v5374_v29  ;;  %v5446_v30 = vsub.f32 %v18732_v40, %v5374_v29  ;;  %v5648_v33 = vadd.f32 %v15306_v49, %v15304_v45 }
 0xdac   : > { %11253 = vpow2.f32 %v5553_v7 }
 0xdad   : > { %v15312_v28 = vpop.eup %11243  ;;  %v5555_v0 = vmul.f32 1.442695, %v5445_v63  ;;  %v5557_v26 = vmul.f32 1.442695, %v5446_v30  ;;  %5649 = vadd.xlane.f32.xlu1 %v5648_v33 }
 0xdae   : > { %18733 = vst [vmem:[#allocation42_spill] sm:$0xff] %v15312_v28  ;;  %v15314_v36 = vpop.eup %11245 }
 0xdaf   : > { %18734 = vst [vmem:[#allocation44_spill] sm:$0xff] %v15314_v36  ;;  %11255 = vpow2.f32 %v5555_v0  ;;  %v5651_v47 = vadd.f32 %v15314_v36, %v15312_v28 }
 0xdb0   : > { %11257 = vpow2.f32 %v5557_v26 }
 0xdb1   : > { %v15318_v42 = vpop.eup %11247  ;;  %5652 = vadd.xlane.f32.xlu0 %v5651_v47 }
 0xdb2   : > { %18735 = vst [vmem:[#allocation41_spill] sm:$0xff] %v15318_v42  ;;  %v15320_v53 = vpop.eup %11249 }
 0xdb3   : > { %18736 = vst [vmem:[#allocation43_spill] sm:$0xff] %v15320_v53  ;;  %v5654_v7 = vadd.f32 %v15320_v53, %v15318_v42 }
 0xdb5   : > { %v15324_v29 = vpop.eup %11251  ;;  %5655 = vadd.xlane.f32.xlu1 %v5654_v7 }
 0xdb6   : > { %18737 = vst [vmem:[#allocation56_spill] sm:$0xff] %v15324_v29  ;;  %v15326_v63 = vpop.eup %11253 }
 0xdb7   : > { %18738 = vst [vmem:[#allocation59_spill] sm:$0xff] %v15326_v63  ;;  %v5657_v30 = vadd.f32 %v15326_v63, %v15324_v29 }
 0xdb9   : > { %v15330_v60 = vpop.eup %11255  ;;  %5658 = vadd.xlane.f32.xlu0 %v5657_v30 }
 0xdba   : > { %18739 = vst [vmem:[#allocation74_spill] sm:$0xff] %v15330_v60  ;;  %v15332_v40 = vpop.eup %11257 }
 0xdbb   : > { %18740 = vst [vmem:[#allocation55_spill] sm:$0xff] %v15332_v40  ;;  %v5660_v33 = vadd.f32 %v15332_v40, %v15330_v60 }
 0xdbd   : > { %5661 = vadd.xlane.f32.xlu1 %v5660_v33 }
 0xdee   : > { %v5593_v0 = vpop.xlane.xlu0 %5592 }
 0xdef   : > { %11259 = vrcp.f32 %v5593_v0 }
 0xdf2   : > { %v5377_v26 = vpop.xlane.xlu0 %5376  ;;  %v5596_v47 = vpop.xlane.xlu1 %5595 }
 0xdf3   : > { %v5447_v7 = vsub.f32 %v15072_v5, %v5377_v26  ;;  %v5448_v28 = vsub.f32 %v15074_v62, %v5377_v26  ;;  %11261 = vrcp.f32 %v5596_v47 }
 0xdf5   : > { %v5559_v42 = vmul.f32 1.442695, %v5447_v7  ;;  %v5561_v29 = vmul.f32 1.442695, %v5448_v28 }
 0xdf6   : > { %v5599_v63 = vpop.xlane.xlu0 %5598  ;;  %v5380_v53 = vpop.xlane.xlu1 %5379 }
 0xdf7   : > { %11263 = vpow2.f32 %v5559_v42  ;;  %v5449_v30 = vsub.f32 %v15078_v37, %v5380_v53  ;;  %v5450_v36 = vsub.f32 %v15080_v57, %v5380_v53 }
 0xdf8   : > { %11265 = vpow2.f32 %v5561_v29 }
 0xdf9   : > { %11267 = vrcp.f32 %v5599_v63  ;;  %v5563_v33 = vmul.f32 1.442695, %v5449_v30  ;;  %v5565_v0 = vmul.f32 1.442695, %v5450_v36  ;;  %v11260_v48 = vpop.eup %11259 }
 0xdfa   : > { %v5383_v60 = vpop.xlane.xlu0 %5382  ;;  %v5602_v40 = vpop.xlane.xlu1 %5601  ;;  %v5720_v57 = vmul.f32 %v11260_v48, %v15130_v3  ;;  %v5719_v36 = vmul.f32 %v11260_v48, %v15128_v18 }
 0xdfb   : > { %11269 = vpow2.f32 %v5563_v33  ;;  %v5451_v5 = vsub.f32 %v15084_v20, %v5383_v60  ;;  %v5452_v62 = vsub.f32 %v15086_v32, %v5383_v60 }
 0xdfc   : > { %11271 = vpow2.f32 %v5565_v0 }
 0xdfd   : > { %v11262_v28 = vpop.eup %11261  ;;  %v5567_v26 = vmul.f32 1.442695, %v5451_v5  ;;  %v5569_v42 = vmul.f32 1.442695, %v5452_v62  ;;  %11273 = vrcp.f32 %v5602_v40 }
 0xdfe   : > { %v5605_v37 = vpop.xlane.xlu0 %5604  ;;  %v5386_v47 = vpop.xlane.xlu1 %5385  ;;  %v5722_v53 = vmul.f32 %v11262_v28, %v15138_v15  ;;  %v5721_v29 = vmul.f32 %v11262_v28, %v15136_v44 }
 0xdff   : > { %11275 = vpow2.f32 %v5567_v26  ;;  %v5453_v20 = vsub.f32 %v15090_v21, %v5386_v47  ;;  %v5454_v32 = vsub.f32 %v15092_v22, %v5386_v47 }
 0xe00   : > { %11277 = vpow2.f32 %v5569_v42  ;;  %v10036_v63 = vpack.c.bf16 %v5722_v53, %v5720_v57  ;;  %v10038_v60 = vpack.c.bf16 %v5721_v29, %v5719_v36 }
 0xe01   : > { %v15348_v7 = vpop.eup %11263  ;;  %11279 = vrcp.f32 %v5605_v37  ;;  %v5571_v40 = vmul.f32 1.442695, %v5453_v20  ;;  %v5573_v30 = vmul.f32 1.442695, %v5454_v32 }
 0xe02   : > { %v15350_v3 = vpop.eup %11265  ;;  %v5389_v15 = vpop.xlane.xlu0 %5388  ;;  %10037 = vmatprep.subr.bf16.mxu0 %v10036_v63 }
 0xe03   : > { %v5608_v18 = vpop.xlane.xlu1 %5607  ;;  %v11268_v48 = vpop.eup %11267  ;;  %11281 = vpow2.f32 %v5571_v40  ;;  %v5455_v44 = vsub.f32 %v15096_v35, %v5389_v15  ;;  %v5456_v21 = vsub.f32 %v15098_v25, %v5389_v15  ;;  %10039 = vmatpush1.bf16.xpose.msra.mxu0 %v10038_v60  ;;  %v5663_v22 = vadd.f32 %v15350_v3, %v15348_v7 }
 0xe04   : > { %11283 = vpow2.f32 %v5573_v30  ;;  %v5724_v42 = vmul.f32 %v11268_v48, %v15149_v14  ;;  %v5723_v53 = vmul.f32 %v11268_v48, %v15144_v52 }
 0xe05   : > { %v15356_v33 = vpop.eup %11269  ;;  %v5575_v0 = vmul.f32 1.442695, %v5455_v44  ;;  %v5577_v5 = vmul.f32 1.442695, %v5456_v21  ;;  %11285 = vrcp.f32 %v5608_v18  ;;  %5664 = vadd.xlane.f32.xlu0 %v5663_v22 }
 0xe06   : > { %v15358_v62 = vpop.eup %11271  ;;  %v5611_v28 = vpop.xlane.xlu0 %5610 }
 0xe07   : > { %v5392_v26 = vpop.xlane.xlu1 %5391  ;;  %v11274_v35 = vpop.eup %11273  ;;  %11287 = vpow2.f32 %v5575_v0  ;;  %v5666_v47 = vadd.f32 %v15358_v62, %v15356_v33 }
 0xe08   : > { %v5457_v25 = vsub.f32 %v15102_v41, %v5392_v26  ;;  %v5458_v37 = vsub.f32 %v15104_v50, %v5392_v26  ;;  %11289 = vpow2.f32 %v5577_v5  ;;  %v5726_v57 = vmul.f32 %v11274_v35, %v15160_v12 }
 0xe09   : > { %v5725_v36 = vmul.f32 %v11274_v35, %v15155_v16  ;;  %v15368_v29 = vpop.eup %11275  ;;  %5667 = vadd.xlane.f32.xlu1 %v5666_v47  ;;  %11291 = vrcp.f32 %v5611_v28 }
 0xe0a   : > { %v5579_v20 = vmul.f32 1.442695, %v5457_v25  ;;  %v5581_v14 = vmul.f32 1.442695, %v5458_v37  ;;  %v15370_v32 = vpop.eup %11277  ;;  %v5395_v41 = vpop.xlane.xlu0 %5394  ;;  %v10040_v50 = vpack.c.bf16 %v5726_v57, %v5724_v42 }
 0xe0b   : > { %v5614_v63 = vpop.xlane.xlu1 %5613  ;;  %v10042_v60 = vpack.c.bf16 %v5725_v36, %v5723_v53  ;;  %v11280_v40 = vpop.eup %11279  ;;  %v5459_v12 = vsub.f32 %v15108_v31, %v5395_v41  ;;  %v5460_v52 = vsub.f32 %v15110_v17, %v5395_v41  ;;  %v5669_v16 = vadd.f32 %v15370_v32, %v15368_v29 }
 0xe0c   : > { %11293 = vpow2.f32 %v5579_v20  ;;  %10041 = vmatprep.subr.bf16.mxu0 %v10040_v50  ;;  %v5728_v21 = vmul.f32 %v11280_v40, %v15171_v13  ;;  %v5727_v26 = vmul.f32 %v11280_v40, %v15166_v39 }
 0xe0d   : > { %11295 = vpow2.f32 %v5581_v14  ;;  %v15376_v30 = vpop.eup %11281  ;;  %v5583_v15 = vmul.f32 1.442695, %v5459_v12  ;;  %v5585_v18 = vmul.f32 1.442695, %v5460_v52  ;;  %10043 = vmatpush1.bf16.xpose.msra.mxu0 %v10042_v60  ;;  %5670 = vadd.xlane.f32.xlu0 %v5669_v16 }
 0xe0e   : > { %11297 = vrcp.f32 %v5614_v63  ;;  %v15378_v48 = vpop.eup %11283  ;;  %v5617_v17 = vpop.xlane.xlu0 %5616 }
 0xe0f   : > { %v5398_v44 = vpop.xlane.xlu1 %5397  ;;  %v11286_v31 = vpop.eup %11285  ;;  %11299 = vpow2.f32 %v5583_v15  ;;  %v5672_v5 = vadd.f32 %v15378_v48, %v15376_v30 }
 0xe10   : > { %v5461_v22 = vsub.f32 %v15114_v1, %v5398_v44  ;;  %v5462_v0 = vsub.f32 %v15116_v51, %v5398_v44  ;;  %11301 = vpow2.f32 %v5585_v18  ;;  %v5730_v28 = vmul.f32 %v11286_v31, %v15182_v23 }
 0xe11   : > { %v5729_v42 = vmul.f32 %v11286_v31, %v15177_v8  ;;  %v15388_v35 = vpop.eup %11287  ;;  %5673 = vadd.xlane.f32.xlu1 %v5672_v5  ;;  %11303 = vrcp.f32 %v5617_v17 }
 0xe12   : > { %v5587_v13 = vmul.f32 1.442695, %v5461_v22  ;;  %v5589_v25 = vmul.f32 1.442695, %v5462_v0  ;;  %v15390_v37 = vpop.eup %11289  ;;  %v10044_v1 = vpack.c.bf16 %v5730_v28, %v5728_v21 }
 0xe13   : > { %v5620_v51 = vpop.xlane.xlu1 %5619  ;;  %v10046_v47 = vpack.c.bf16 %v5729_v42, %v5727_v26  ;;  %v5675_v57 = vadd.f32 %v15390_v37, %v15388_v35  ;;  %v11292_v23 = vpop.eup %11291 }
 0xe14   : > { %11305 = vpow2.f32 %v5587_v13  ;;  %10045 = vmatprep.subr.bf16.mxu0 %v10044_v1  ;;  %v5732_v14 = vmul.f32 %v11292_v23, %v15193_v54  ;;  %v5731_v50 = vmul.f32 %v11292_v23, %v15188_v2 }
 0xe15   : > { %11307 = vpow2.f32 %v5589_v25  ;;  %10047 = vmatpush1.bf16.xpose.msra.mxu0 %v10046_v47  ;;  %5676 = vadd.xlane.f32.xlu0 %v5675_v57 }
 0xe16   : > { %v15394_v39 = vpop.eup %11293  ;;  %11309 = vrcp.f32 %v5620_v51  ;;  %v5623_v53 = vpop.xlane.xlu0 %5622 }
 0xe17   : > { %v15396_v8 = vpop.eup %11295  ;;  %11311 = vrcp.f32 %v5623_v53 }
 0xe18   : > { %v11298_v36 = vpop.eup %11297  ;;  %v5678_v20 = vadd.f32 %v15396_v8, %v15394_v39 }
 0xe19   : > { %v5734_v41 = vmul.f32 %v11298_v36, %v15204_v11  ;;  %v5733_v63 = vmul.f32 %v11298_v36, %v15199_v27  ;;  %v15404_v60 = vpop.eup %11299  ;;  %v253_v36 = vld [vmem:[%s17617_s2 + $0x50] sm:$0xff] }
 0xe1a   : > { %5679 = vadd.xlane.f32.xlu1 %v5678_v20  ;;  %v15406_v40 = vpop.eup %11301  ;;  %v5626_v52 = vpop.xlane.xlu1 %5625 }
 0xe1b   : > { %v10048_v12 = vpack.c.bf16 %v5734_v41, %v5732_v14  ;;  %v10050_v16 = vpack.c.bf16 %v5733_v63, %v5731_v50  ;;  %11313 = vrcp.f32 %v5626_v52  ;;  %v5681_v15 = vadd.f32 %v15406_v40, %v15404_v60  ;;  %v11304_v54 = vpop.eup %11303 }
 0xe1c   : > { %v5736_v21 = vmul.f32 %v11304_v54, %v15215_v55  ;;  %v5735_v17 = vmul.f32 %v11304_v54, %v15210_v46 }
 0xe1d   : > { %10049 = vmatprep.subr.bf16.mxu0 %v10048_v12  ;;  %5682 = vadd.xlane.f32.xlu0 %v5681_v15  ;;  %v18741_v12 = vld [vmem:[#allocation106_spill] sm:$0xff] }
 0xe1e   : > { %v15410_v11 = vpop.eup %11305  ;;  %10051 = vmatpush1.bf16.xpose.msra.mxu0 %v10050_v16  ;;  %v5629_v27 = vpop.xlane.xlu0 %5628  ;;  %v18742_v16 = vld [vmem:[#allocation51_spill] sm:$0xff] }
 0xe1f   : > { %v15412_v2 = vpop.eup %11307  ;;  %11315 = vrcp.f32 %v5629_v27 }
 0xe20   : > { %v11310_v18 = vpop.eup %11309  ;;  %v5684_v44 = vadd.f32 %v15412_v2, %v15410_v11 }
 0xe21   : > { %v5738_v31 = vmul.f32 %v11310_v18, %v15226_v56  ;;  %v5737_v22 = vmul.f32 %v11310_v18, %v15221_v61  ;;  %v11312_v26 = vpop.eup %11311 }
 0xe22   : > { %5685 = vadd.xlane.f32.xlu1 %v5684_v44  ;;  %v5632_v5 = vpop.xlane.xlu1 %5631  ;;  %v5740_v25 = vmul.f32 %v11312_v26, %v15234_v43  ;;  %v5739_v46 = vmul.f32 %v11312_v26, %v15232_v59  ;;  %v246_v59 = vld [vmem:[%s17617_s2 + $0x18] sm:$0xff] }
 0xe23   : > { %v10052_v0 = vpack.c.bf16 %v5738_v31, %v5736_v21  ;;  %v10054_v28 = vpack.c.bf16 %v5737_v22, %v5735_v17  ;;  %11317 = vrcp.f32 %v5632_v5  ;;  %v18743_v17 = vld [vmem:[#allocation40_spill] sm:$0xff]  ;;  %v18745_v5 = vld [vmem:[#allocation39_spill] sm:$0xff] }
 0xe25   : > { %10053 = vmatprep.subr.bf16.mxu0 %v10052_v0  ;;  %v11314_v42 = vpop.eup %11313  ;;  %v18744_v0 = vld [vmem:[#allocation34_spill] sm:$0xff] }
 0xe26   : > { %10055 = vmatpush1.bf16.xpose.msra.mxu0 %v10054_v28  ;;  %v5635_v13 = vpop.xlane.xlu0 %5634  ;;  %v5742_v55 = vmul.f32 %v11314_v42, %v15242_v19  ;;  %v5741_v56 = vmul.f32 %v11314_v42, %v15240_v4  ;;  %v18746_v28 = vld [vmem:[#allocation30_spill] sm:$0xff] }
 0xe27   : > { %11319 = vrcp.f32 %v5635_v13 }
 0xe28   : > { %v10056_v61 = vpack.c.bf16 %v5742_v55, %v5740_v25  ;;  %v10058_v1 = vpack.c.bf16 %v5741_v56, %v5739_v46 }
 0xe29   : > { %v11316_v47 = vpop.eup %11315 }
 0xe2a   : > { %10057 = vmatprep.subr.bf16.mxu0 %v10056_v61  ;;  %v5638_v51 = vpop.xlane.xlu1 %5637  ;;  %v5744_v53 = vmul.f32 %v11316_v47, %v15250_v58  ;;  %v5743_v4 = vmul.f32 %v11316_v47, %v15248_v10  ;;  %v18747_v47 = vld [vmem:[#allocation52_spill] sm:$0xff] }
 0xe2b   : > { %11321 = vrcp.f32 %v5638_v51 }
 0xe2d   : > { %v11318_v57 = vpop.eup %11317 }
 0xe2e   : > { %10059 = vmatpush1.bf16.xpose.msra.mxu0 %v10058_v1  ;;  %v5641_v23 = vpop.xlane.xlu0 %5640  ;;  %v5746_v43 = vmul.f32 %v11318_v57, %v15258_v38  ;;  %v5745_v19 = vmul.f32 %v11318_v57, %v15256_v24  ;;  %v250_v24 = vld [vmem:[%s17617_s2 + $0x38] sm:$0xff] }
 0xe2f   : > { %11323 = vrcp.f32 %v5641_v23 }
 0xe30   : > { %v10060_v20 = vpack.c.bf16 %v5746_v43, %v5744_v53  ;;  %v10062_v14 = vpack.c.bf16 %v5745_v19, %v5743_v4  ;;  %v18748_v4 = vld [vmem:[#allocation44_spill] sm:$0xff] }
 0xe31   : > { %v11320_v41 = vpop.eup %11319 }
 0xe32   : > { %10061 = vmatprep.subr.bf16.mxu0 %v10060_v20  ;;  %v5644_v58 = vpop.xlane.xlu1 %5643  ;;  %v5748_v50 = vmul.f32 %v11320_v41, %v15266_v34  ;;  %v5747_v15 = vmul.f32 %v11320_v41, %v18742_v16  ;;  %v18749_v20 = vld [vmem:[#allocation43_spill] sm:$0xff] }
 0xe33   : > { %272 = vperm.xlu1 %10394, %v246_v59   ;;  %307 = vperm.xlu0 %10393, %v253_v36   ;;  %11325 = vrcp.f32 %v5644_v58  ;;  %v18754_v16 = vld [vmem:[#allocation55_spill] sm:$0xff] }
 0xe35   : > { %v11322_v38 = vpop.eup %11321 }
 0xe36   : > { %10063 = vmatpush1.bf16.xpose.msra.mxu0 %v10062_v14  ;;  %v5647_v10 = vpop.xlane.xlu0 %5646  ;;  %v5750_v63 = vmul.f32 %v11322_v38, %v15274_v6  ;;  %v5749_v52 = vmul.f32 %v11322_v38, %v18741_v12  ;;  %v18753_v12 = vld [vmem:[#allocation59_spill] sm:$0xff] }
 0xe37   : > { %292 = vperm.xlu1 %10394, %v250_v24   ;;  %11327 = vrcp.f32 %v5647_v10 }
 0xe38   : > { %v10064_v54 = vpack.c.bf16 %v5750_v63, %v5748_v50  ;;  %v10066_v27 = vpack.c.bf16 %v5749_v52, %v5747_v15 }
 0xe39   : > { %v11324_v44 = vpop.eup %11323 }
 0xe3a   : > { %10065 = vmatprep.subr.bf16.mxu0 %v10064_v54  ;;  %v5650_v18 = vpop.xlane.xlu1 %5649  ;;  %v5752_v22 = vmul.f32 %v11324_v44, %v18743_v17  ;;  %v5751_v26 = vmul.f32 %v11324_v44, %v18746_v28  ;;  %v18755_v54 = vld [vmem:[#allocation74_spill] sm:$0xff]  ;;  %v18757_v17 = vld [vmem:[#allocation100_spill] sm:$0xff] }
 0xe3b   : > { %11329 = vrcp.f32 %v5650_v18  ;;  %v18756_v18 = vld [vmem:[#allocation56_spill] sm:$0xff] }
 0xe3d   : > { %v11326_v21 = vpop.eup %11325 }
 0xe3e   : > { %10067 = vmatpush1.bf16.xpose.msra.mxu0 %v10066_v27  ;;  %v5653_v31 = vpop.xlane.xlu0 %5652  ;;  %v5754_v34 = vmul.f32 %v11326_v21, %v18744_v0  ;;  %v5753_v6 = vmul.f32 %v11326_v21, %v18745_v5 }
 0xe3f   : > { %11331 = vrcp.f32 %v5653_v31 }
 0xe40   : > { %v10068_v42 = vpack.c.bf16 %v5754_v34, %v5752_v22  ;;  %v10070_v13 = vpack.c.bf16 %v5753_v6, %v5751_v26  ;;  %v5977_v22 = vrot.slane %v18757_v17, 4  ;;  %v9581_v17 = vld [vmem:[%s17618_s3 + $0x70] sm:$0xff] }
 0xe41   : > { %v11328_v55 = vpop.eup %11327 }
 0xe42   : > { %10069 = vmatprep.subr.bf16.mxu0 %v10068_v42  ;;  %v5656_v25 = vpop.xlane.xlu1 %5655  ;;  %v5756_v61 = vmul.f32 %v11328_v55, %v15298_v9  ;;  %v5755_v57 = vmul.f32 %v11328_v55, %v18747_v47  ;;  %v18750_v9 = vld [vmem:[#allocation41_spill] sm:$0xff] }
 0xe43   : > { %11333 = vrcp.f32 %v5656_v25 }
 0xe45   : > { %v11330_v56 = vpop.eup %11329 }
 0xe46   : > { %10071 = vmatpush1.bf16.xpose.msra.mxu0 %v10070_v13  ;;  %v5659_v46 = vpop.xlane.xlu0 %5658  ;;  %v5758_v1 = vmul.f32 %v11330_v56, %v15306_v49  ;;  %v5757_v51 = vmul.f32 %v11330_v56, %v15304_v45  ;;  %v18751_v49 = vld [vmem:[#allocation99_spill] sm:$0xff]  ;;  %v18752_v45 = vld [vmem:[#allocation42_spill] sm:$0xff] }
 0xe47   : > { %11335 = vrcp.f32 %v5659_v46  ;;  %v5976_v41 = vrot.slane %v18751_v49, 4 }
 0xe48   : > { %v10072_v23 = vpack.c.bf16 %v5758_v1, %v5756_v61  ;;  %v10074_v53 = vpack.c.bf16 %v5757_v51, %v5755_v57 }
 0xe49   : > { %v11332_v19 = vpop.eup %11331 }
 0xe4a   : > { %10073 = vmatprep.subr.bf16.mxu0 %v10072_v23  ;;  %v5662_v43 = vpop.xlane.xlu1 %5661  ;;  %v5760_v36 = vmul.f32 %v11332_v19, %v18748_v4  ;;  %v5759_v24 = vmul.f32 %v11332_v19, %v18752_v45 }
 0xe4b   : > { %11337 = vrcp.f32 %v5662_v43 }
 0xe4d   : > { %v11334_v59 = vpop.eup %11333 }
 0xe4e   : > { %10075 = vmatpush1.bf16.xpose.msra.mxu0 %v10074_v53  ;;  %v5762_v14 = vmul.f32 %v11334_v59, %v18749_v20  ;;  %v5761_v58 = vmul.f32 %v11334_v59, %v18750_v9  ;;  %v18759_v9 = vld [vmem:[#allocation10_spill] sm:$0xff] }
 0xe50   : > { %v10076_v38 = vpack.c.bf16 %v5762_v14, %v5760_v36  ;;  %v10078_v10 = vpack.c.bf16 %v5761_v58, %v5759_v24 }
 0xe51   : > { %5980 = vxpose.xlu0.b32.start.end [1/1] (short) %v5976_v41, 128  ;;  %v11336_v50 = vpop.eup %11335 }
 0xe52   : > { %10077 = vmatprep.subr.bf16.mxu0 %v10076_v38  ;;  %v5764_v52 = vmul.f32 %v11336_v50, %v18753_v12  ;;  %v5763_v44 = vmul.f32 %v11336_v50, %v18756_v18  ;;  %v18761_v12 = vld [vmem:[#allocation5_spill] sm:$0xff]  ;;  %v9537_v18 = vld [vmem:[%s17618_s3 + $0x50] sm:$0xff] }
 0xe53   : > { %9543 = vmatmul.mubr.msk.f32.gmra.mrb[134].mxu1 %vm555_vm2, %v9537_v18 }
 0xe55   : > { %v11338_v63 = vpop.eup %11337 }
 0xe56   : > { %10079 = vmatpush1.bf16.xpose.msra.mxu0 %v10078_v10  ;;  %v5766_v15 = vmul.f32 %v11338_v63, %v18754_v16  ;;  %v5765_v27 = vmul.f32 %v11338_v63, %v18755_v54  ;;  %v18763_v16 = vld [vmem:[#allocation14_spill] sm:$0xff] }
 0xe58   : > { %v10080_v21 = vpack.c.bf16 %v5766_v15, %v5764_v52  ;;  %v10082_v31 = vpack.c.bf16 %v5765_v27, %v5763_v44  ;;  %v9538_v44 = vld [vmem:[%s17618_s3 + $0x58] sm:$0xff] }
 0xe5a   : > { %10081 = vmatprep.subr.bf16.mxu0 %v10080_v21  ;;  %v9579_v21 = vld [vmem:[%s17618_s3 + $0x60] sm:$0xff] }
 0xe5e   : > { %10083 = vmatpush1.bf16.xpose.msra.mxu0 %v10082_v31  ;;  %v9580_v31 = vld [vmem:[%s17618_s3 + $0x68] sm:$0xff] }
 0xe8e   : > { %6012 = vxpose.xlu0.b32.start.end [1/1] (short) %v5977_v22, 128  ;;  %v9582_v22 = vld [vmem:[%s17618_s3 + $0x78] sm:$0xff] }
 0xe92   : > { %v5665_v0 = vpop.xlane.xlu0 %5664 }
 0xe93   : > { %11339 = vrcp.f32 %v5665_v0 }
 0xe96   : > { %v5668_v34 = vpop.xlane.xlu1 %5667 }
 0xe97   : > { %11341 = vrcp.f32 %v5668_v34 }
 0xe9a   : > { %v5671_v5 = vpop.xlane.xlu0 %5670 }
 0xe9b   : > { %11343 = vrcp.f32 %v5671_v5 }
 0xe9d   : > { %v11340_v28 = vpop.eup %11339 }
 0xe9e   : > { %v5674_v6 = vpop.xlane.xlu1 %5673  ;;  %v5768_v13 = vmul.f32 %v11340_v28, %v15350_v3  ;;  %v5767_v55 = vmul.f32 %v11340_v28, %v15348_v7 }
 0xe9f   : > { %11345 = vrcp.f32 %v5674_v6 }
 0xea1   : > { %v11342_v26 = vpop.eup %11341 }
 0xea2   : > { %v5677_v42 = vpop.xlane.xlu0 %5676  ;;  %v5770_v25 = vmul.f32 %v11342_v26, %v15358_v62  ;;  %v5769_v56 = vmul.f32 %v11342_v26, %v15356_v33 }
 0xea3   : > { %11347 = vrcp.f32 %v5677_v42 }
 0xea4   : > { %v10084_v46 = vpack.c.bf16 %v5770_v25, %v5768_v13  ;;  %v10086_v61 = vpack.c.bf16 %v5769_v56, %v5767_v55 }
 0xea5   : > { %v11344_v51 = vpop.eup %11343 }
 0xea6   : > { %10085 = vmatprep.subr.bf16.mxu0 %v10084_v46  ;;  %v5772_v23 = vmul.f32 %v11344_v51, %v15370_v32  ;;  %v5771_v62 = vmul.f32 %v11344_v51, %v15368_v29 }
 0xea7   : > { %v5680_v1 = vpop.xlane.xlu1 %5679  ;;  %10087 = vmatpush1.bf16.xpose.msra.mxu0 %v10086_v61 }
 0xea8   : > { %11349 = vrcp.f32 %v5680_v1 }
 0xea9   : > { %v11346_v47 = vpop.eup %11345 }
 0xeaa   : > { %v5683_v57 = vpop.xlane.xlu0 %5682  ;;  %v5774_v3 = vmul.f32 %v11346_v47, %v15378_v48  ;;  %v5773_v7 = vmul.f32 %v11346_v47, %v15376_v30  ;;  %v18758_v30 = vld [vmem:[#allocation19_spill] sm:$0xff] }
 0xeab   : > { %11351 = vrcp.f32 %v5683_v57 }
 0xeac   : > { %v10088_v53 = vpack.c.bf16 %v5774_v3, %v5772_v23  ;;  %v10090_v33 = vpack.c.bf16 %v5773_v7, %v5771_v62 }
 0xead   : > { %v11348_v19 = vpop.eup %11347 }
 0xeae   : > { %10089 = vmatprep.subr.bf16.mxu0 %v10088_v53  ;;  %v5776_v20 = vmul.f32 %v11348_v19, %v15390_v37  ;;  %v5775_v48 = vmul.f32 %v11348_v19, %v15388_v35 }
 0xeaf   : > { %v5686_v43 = vpop.xlane.xlu1 %5685  ;;  %10091 = vmatpush1.bf16.xpose.msra.mxu0 %v10090_v33 }
 0xeb0   : > { %11353 = vrcp.f32 %v5686_v43 }
 0xeb2   : > { %v11350_v59 = vpop.eup %11349  ;;  %v308_v4 = vpop.permute.xlu0 %307 }
 0xeb3   : > { %v273_v36 = vpop.permute.xlu1 %272  ;;  %v5778_v32 = vmul.f32 %v11350_v59, %v15396_v8  ;;  %v5777_v29 = vmul.f32 %v11350_v59, %v15394_v39  ;;  %v15472_v14 = vadd.f32 %v18758_v30, %v308_v4  ;;  %v15489_v15 = vadd.f32 %v18763_v16, %v308_v4 }
 0xeb4   : > { %v437_v58 = vadd.f32 %v18759_v9, %v273_v36 }
 0xeb5   : > { %v10092_v49 = vpack.c.bf16 %v5778_v32, %v5776_v20  ;;  %v10094_v41 = vpack.c.bf16 %v5777_v29, %v5775_v48  ;;  %5847 = vmatprep.mubr.f32.mxu0 %v15472_v14  ;;  %v11352_v24 = vpop.eup %11351  ;;  %18764 = vst [vmem:[#allocation53_spill] sm:$0xff] %v15489_v15 }
 0xeb6   : > { %v15475_v45 = vmul.f32 0.5, %v437_v58  ;;  %v5780_v35 = vmul.f32 %v11352_v24, %v15406_v40  ;;  %v5779_v8 = vmul.f32 %v11352_v24, %v15404_v60  ;;  %v18765_v40 = vld [vmem:[#allocation32_spill] sm:$0xff]  ;;  %v18767_v60 = vmov 0.0  }
 0xeb7   : > { %10093 = vmatprep.subr.bf16.mxu0 %v10092_v49  ;;  %v293_v10 = vpop.permute.xlu1 %292  ;;  %3757 = vmatprep.mubr.f32.mxu1 %v18767_v60  ;;  %v9623_v49 = vld [vmem:[%s17618_s3 + $0x80] sm:$0xff] }
 0xeb8   : > { %18760 = vst [vmem:[#allocation46_spill] sm:$0xff] %v15475_v45  ;;  %10095 = vmatpush1.bf16.xpose.msra.mxu0 %v10094_v41  ;;  %7082 = vxpose.xlu1.b32.start.end [1/1] (short) %v15475_v45, 128  ;;  %v15484_v52 = vadd.f32 %v18761_v12, %v293_v10  ;;  %v18770_v41 = vld [vmem:[#allocation103_spill] sm:$0xff] }
 0xeb9   : > { %9544 = vmatmul.mubr.msk.f32.gmra.mrb[136].mxu1 %vm555_vm2, %v9538_v44  ;;  %v6045_v24 = vrot.slane %v18770_v41, 4 }
 0xeba   : > { %v11354_v37 = vpop.eup %11353  ;;  %18762 = vst [vmem:[#allocation45_spill] sm:$0xff] %v15484_v52  ;;  %4845 = vmatprep.mubr.f32.mxu1 %v18767_v60 }
 0xebb   : > { %v5782_v39 = vmul.f32 %v11354_v37, %v15412_v2  ;;  %v5781_v38 = vmul.f32 %v11354_v37, %v15410_v11  ;;  %v15492_v2 = vadd.f32 %v18765_v40, %v293_v10  ;;  %v18768_v11 = vld [vmem:[#allocation11_spill] sm:$0xff] }
 0xebc   : > { %v439_v54 = vadd.f32 %v18768_v11, %v273_v36  ;;  %v9625_v10 = vld [vmem:[%s17618_s3 + $0x90] sm:$0xff] }
 0xebd   : > { %v10096_v50 = vpack.c.bf16 %v5782_v39, %v5780_v35  ;;  %v10098_v63 = vpack.c.bf16 %v5781_v38, %v5779_v8  ;;  %18766 = vst [vmem:[#allocation63_spill] sm:$0xff] %v15492_v2  ;;  %9585 = vmatmul.mubr.msk.f32.vlgmr.msra.gmra.mrb[138].mxu1 %vm555_vm2, %v9579_v21  ;;  %v18771_v35 = vld [vmem:[#allocation104_spill] sm:$0xff]  ;;  %v9624_v38 = vld [vmem:[%s17618_s3 + $0x88] sm:$0xff] }
 0xebe   : > { %v15499_v27 = vmul.f32 0.5, %v439_v54  ;;  %4851 = vmatprep.mubr.f32.mxu1 %v18767_v60  ;;  %v6044_v39 = vrot.slane %v18771_v35, 4 }
 0xebf   : > { %10097 = vmatprep.subr.bf16.mxu0 %v10096_v50 }
 0xec0   : > { %10099 = vmatpush1.bf16.xpose.msra.mxu0 %v10098_v63  ;;  %18769 = vst [vmem:[#allocation109_spill] sm:$0xff] %v15499_v27  ;;  %v9626_v63 = vld [vmem:[%s17618_s3 + $0x98] sm:$0xff] }
 0xec1   : > { %9677 = vmatprep.subr.msk.mxu0 %vm652_vm1, %v15484_v52  ;;  %9586 = vmatmul.mubr.msk.f32.gmra.mrb[132].mxu1 %vm555_vm2, %v9580_v31 }
 0xec2   : > { %4857 = vmatprep.mubr.f32.mxu1 %v18767_v60 }
 0xec5   : > { %9587 = vmatmul.mubr.msk.f32.gmra.mrb[134].mxu1 %vm555_vm2, %v9581_v17 }
 0xec6   : > { %4863 = vmatprep.mubr.f32.mxu1 %v18767_v60 }
 0xec7   : > { %5848 = vmatmul.mubr.f32.vlgmr.msra.gmra.mrb[228].mxu0 %v15489_v15 }
 0xec8   : > { %9678 = vmatpush1.msk.msra.mxu0 %vm652_vm1, %v15492_v2  ;;  %7312 = vmatprep.mubr.f32.mxu0 %v18767_v60 }
 0xec9   : > { %9588 = vmatmul.mubr.msk.f32.gmra.mrb[136].mxu1 %vm555_vm2, %v9582_v22 }
 0xeca   : > { %5941 = vmatprep.mubr.f32.mxu1 %v18767_v60 }
 0xed1   : > { %v15559_v51 = vpop.trf.xlu0 }
 0xed5   : > { %v15564_v57 = vpop.trf.xlu0 }
 0xed9   : > { %v15569_v62 = vpop.trf.xlu0 }
 0xedd   : > { %v5999_v53 = vpop.trf.xlu0 }
 0xee1   : > { %v6000_v19 = vpop.trf.xlu0 }
 0xee5   : > { %v6001_v4 = vpop.trf.xlu0 }
 0xee9   : > { %v6002_v32 = vpop.trf.xlu0 }
 0xeed   : > { %v6003_v29 = vpop.trf.xlu0 }
 0xef1   : > { %v6004_v8 = vpop.trf.xlu0 }
 0xef5   : > { %7114 = vxpose.xlu1.b32.start.end [1/1] (short) %v15499_v27, 128  ;;  %v6005_v50 = vpop.trf.xlu0 }
 0xef9   : > { %v6006_v12 = vpop.trf.xlu0 }
 0xefd   : > { %v6007_v16 = vpop.trf.xlu0 }
 0xf01   : > { %v6008_v40 = vpop.trf.xlu0 }
 0xf05   : > { %v6009_v11 = vpop.trf.xlu0 }
 0xf09   : > { %v6010_v54 = vpop.trf.xlu0 }
 0xf0d   : > { %v6011_v18 = vpop.trf.xlu0 }
 0xf11   : > { %v6028_v21 = vpop.trf.xlu0 }
 0xf15   : > { %v6029_v17 = vpop.trf.xlu0 }
 0xf38   : > { %v7098_v0 = vpop.trf.xlu1 }
 0xf39   : > { %9679 = vmatmul.mubr.msk.f32.vlgmr.msra.gmra.mrb[230].mxu0 %vm555_vm2, %v7098_v0 }
 0xf3a   : > { %7318 = vmatprep.mubr.f32.mxu0 %v18767_v60 }
 0xf3c   : > { %v7099_v34 = vpop.trf.xlu1 }
 0xf3d   : > { %9680 = vmatmul.mubr.msk.f32.gmra.mrb[232].mxu0 %vm555_vm2, %v7099_v34  ;;  %v6030_v34 = vpop.trf.xlu0 }
 0xf3e   : > { %7324 = vmatprep.mubr.f32.mxu0 %v18767_v60 }
 0xf40   : > { %v7100_v5 = vpop.trf.xlu1 }
 0xf41   : > { %9681 = vmatmul.mubr.msk.f32.gmra.mrb[234].mxu0 %vm555_vm2, %v7100_v5 }
 0xf42   : > { %7330 = vmatprep.mubr.f32.mxu0 %v18767_v60 }
 0xf44   : > { %v7101_v6 = vpop.trf.xlu1 }
 0xf45   : > { %9682 = vmatmul.mubr.msk.f32.gmra.mrb[236].mxu0 %vm555_vm2, %v7101_v6  ;;  %v6031_v6 = vpop.trf.xlu0 }
 0xf46   : > { %7336 = vmatprep.mubr.f32.mxu0 %v18767_v60 }
 0xf48   : > { %v7102_v28 = vpop.trf.xlu1 }
 0xf49   : > { %9683 = vmatmul.mubr.msk.f32.gmra.mrb[238].mxu0 %vm555_vm2, %v7102_v28 }
 0xf4a   : > { %7342 = vmatprep.mubr.f32.mxu0 %v18767_v60 }
 0xf4c   : > { %v7103_v26 = vpop.trf.xlu1 }
 0xf4d   : > { %9684 = vmatmul.mubr.msk.f32.gmra.mrb[240].mxu0 %vm555_vm2, %v7103_v26  ;;  %v6032_v26 = vpop.trf.xlu0 }
 0xf4e   : > { %7348 = vmatprep.mubr.f32.mxu0 %v18767_v60 }
 0xf50   : > { %v7104_v42 = vpop.trf.xlu1 }
 0xf51   : > { %9685 = vmatmul.mubr.msk.f32.gmra.mrb[242].mxu0 %vm555_vm2, %v7104_v42  ;;  %v6033_v42 = vpop.trf.xlu0 }
 0xf52   : > { %7354 = vmatprep.mubr.f32.mxu0 %v18767_v60 }
 0xf54   : > { %v7105_v13 = vpop.trf.xlu1 }
 0xf55   : > { %9686 = vmatmul.mubr.msk.f32.gmra.mrb[244].mxu0 %vm555_vm2, %v7105_v13  ;;  %v6034_v13 = vpop.trf.xlu0 }
 0xf56   : > { %7360 = vmatprep.mubr.f32.mxu0 %v18767_v60 }
 0xf58   : > { %v7106_v25 = vpop.trf.xlu1 }
 0xf59   : > { %9687 = vmatmul.mubr.msk.f32.gmra.mrb[246].mxu0 %vm555_vm2, %v7106_v25  ;;  %v6035_v25 = vpop.trf.xlu0 }
 0xf5a   : > { %7366 = vmatprep.mubr.f32.mxu0 %v18767_v60 }
 0xf5c   : > { %v7107_v55 = vpop.trf.xlu1 }
 0xf5d   : > { %9688 = vmatmul.mubr.msk.f32.gmra.mrb[248].mxu0 %vm555_vm2, %v7107_v55  ;;  %v6036_v55 = vpop.trf.xlu0 }
 0xf5e   : > { %7372 = vmatprep.mubr.f32.mxu0 %v18767_v60 }
 0xf60   : > { %v7108_v56 = vpop.trf.xlu1 }
 0xf61   : > { %9689 = vmatmul.mubr.msk.f32.gmra.mrb[250].mxu0 %vm555_vm2, %v7108_v56  ;;  %v6037_v56 = vpop.trf.xlu0 }
 0xf62   : > { %7378 = vmatprep.mubr.f32.mxu0 %v18767_v60 }
 0xf64   : > { %v7109_v46 = vpop.trf.xlu1 }
 0xf65   : > { %9690 = vmatmul.mubr.msk.f32.gmra.mrb[252].mxu0 %vm555_vm2, %v7109_v46  ;;  %v6038_v46 = vpop.trf.xlu0 }
 0xf66   : > { %7384 = vmatprep.mubr.f32.mxu0 %v18767_v60 }
 0xf68   : > { %v7110_v61 = vpop.trf.xlu1 }
 0xf69   : > { %9691 = vmatmul.mubr.msk.f32.gmra.mrb[254].mxu0 %vm555_vm2, %v7110_v61 }
 0xf6a   : > { %7390 = vmatprep.mubr.f32.mxu0 %v18767_v60 }
 0xf6c   : > { %v7111_v1 = vpop.trf.xlu1 }
 0xf6d   : > { %9692 = vmatmul.mubr.msk.f32.gmra.mrb[0].mxu0 %vm555_vm2, %v7111_v1 }
 0xf6e   : > { %7396 = vmatprep.mubr.f32.mxu0 %v18767_v60 }
 0xf70   : > { %v7112_v47 = vpop.trf.xlu1 }
 0xf71   : > { %9693 = vmatmul.mubr.msk.f32.gmra.mrb[2].mxu0 %vm555_vm2, %v7112_v47  ;;  %v6039_v47 = vpop.trf.xlu0 }
 0xf72   : > { %7402 = vmatprep.mubr.f32.mxu0 %v18767_v60 }
 0xf74   : > { %v7113_v23 = vpop.trf.xlu1 }
 0xf75   : > { %9694 = vmatmul.mubr.msk.f32.gmra.mrb[4].mxu0 %vm555_vm2, %v7113_v23 }
 0xf76   : > { %7408 = vmatprep.mubr.f32.mxu0 %v18767_v60 }
 0xf78   : > { %v7130_v3 = vpop.trf.xlu1 }
 0xf79   : > { %9695 = vmatmul.mubr.msk.f32.gmra.mrb[6].mxu0 %vm555_vm2, %v7130_v3 }
 0xf7a   : > { %7414 = vmatprep.mubr.f32.mxu0 %v18767_v60 }
 0xf7c   : > { %v7131_v7 = vpop.trf.xlu1 }
 0xf7d   : > { %9696 = vmatmul.mubr.msk.f32.gmra.mrb[8].mxu0 %vm555_vm2, %v7131_v7 }
 0xf7e   : > { %7420 = vmatprep.mubr.f32.mxu0 %v18767_v60 }
 0xf80   : > { %v7132_v33 = vpop.trf.xlu1 }
 0xf81   : > { %9697 = vmatmul.mubr.msk.f32.gmra.mrb[10].mxu0 %vm555_vm2, %v7132_v33 }
 0xf82   : > { %7426 = vmatprep.mubr.f32.mxu0 %v18767_v60 }
 0xf84   : > { %v7133_v43 = vpop.trf.xlu1 }
 0xf85   : > { %9698 = vmatmul.mubr.msk.f32.gmra.mrb[12].mxu0 %vm555_vm2, %v7133_v43 }
 0xf86   : > { %7432 = vmatprep.mubr.f32.mxu0 %v18767_v60 }
 0xf88   : > { %v7134_v59 = vpop.trf.xlu1 }
 0xf89   : > { %9699 = vmatmul.mubr.msk.f32.gmra.mrb[14].mxu0 %vm555_vm2, %v7134_v59 }
 0xf8a   : > { %7438 = vmatprep.mubr.f32.mxu0 %v18767_v60 }
 0xf8c   : > { %v7135_v36 = vpop.trf.xlu1 }
 0xf8d   : > { %9700 = vmatmul.mubr.msk.f32.gmra.mrb[16].mxu0 %vm555_vm2, %v7135_v36 }
 0xf8e   : > { %7444 = vmatprep.mubr.f32.mxu0 %v18767_v60 }
 0xf90   : > { %v7136_v20 = vpop.trf.xlu1 }
 0xf91   : > { %9701 = vmatmul.mubr.msk.f32.gmra.mrb[18].mxu0 %vm555_vm2, %v7136_v20 }
 0xf92   : > { %7450 = vmatprep.mubr.f32.mxu0 %v18767_v60 }
 0xf94   : > { %v7137_v48 = vpop.trf.xlu1 }
 0xf95   : > { %9702 = vmatmul.mubr.msk.f32.gmra.mrb[20].mxu0 %vm555_vm2, %v7137_v48 }
 0xf96   : > { %7456 = vmatprep.mubr.f32.mxu0 %v18767_v60 }
 0xf98   : > { %v7138_v30 = vpop.trf.xlu1 }
 0xf99   : > { %9703 = vmatmul.mubr.msk.f32.gmra.mrb[22].mxu0 %vm555_vm2, %v7138_v30 }
 0xf9a   : > { %v5849_v9 = vpop.f32.mrb[228].mxu0  ;;  %7462 = vmatprep.mubr.f32.mxu0 %v18767_v60 }
 0xf9b   : > { %v5851_v58 = vpop.f32.mrb[229].mxu0 }
 0xf9c   : > { %9627 = vmatprep.subr.msk.mxu1 %vm652_vm1, %v5851_v58  ;;  %v7139_v37 = vpop.trf.xlu1 }
 0xf9d   : > { %9628 = vmatpush1.msk.msra.mxu1 %vm652_vm1, %v5849_v9  ;;  %9704 = vmatmul.mubr.msk.f32.gmra.mrb[24].mxu0 %vm555_vm2, %v7139_v37 }
 0xf9e   : > { %9629 = vmatmul.mubr.msk.f32.vlgmr.msra.gmra.mrb[138].mxu1 %vm555_vm2, %v9623_v49  ;;  %9633 = vmatprep.subr.msk.mxu1 %vm652_vm1, %v6045_v24 }
 0xf9f   : > { %9634 = vmatpush1.msk.msra.mxu1 %vm652_vm1, %v6044_v39  ;;  %5947 = vmatprep.mubr.f32.mxu1 %v18767_v60  ;;  %v6886_v39 = vrot.slane %v15472_v14, 4 }
 0xfa0   : > { %7468 = vmatprep.mubr.f32.mxu0 %v18767_v60  ;;  %v7140_v44 = vpop.trf.xlu1 }
 0xfa1   : > { %9705 = vmatmul.mubr.msk.f32.gmra.mrb[26].mxu0 %vm555_vm2, %v7140_v44 }
 0xfa2   : > { %9630 = vmatmul.mubr.msk.f32.gmra.mrb[132].mxu1 %vm555_vm2, %v9624_v38  ;;  %7474 = vmatprep.mubr.f32.mxu0 %v18767_v60 }
 0xfa3   : > { %5953 = vmatprep.mubr.f32.mxu1 %v18767_v60 }
 0xfa4   : > { %v7141_v31 = vpop.trf.xlu1 }
 0xfa5   : > { %9706 = vmatmul.mubr.msk.f32.gmra.mrb[28].mxu0 %vm555_vm2, %v7141_v31 }
 0xfa6   : > { %9631 = vmatmul.mubr.msk.f32.gmra.mrb[134].mxu1 %vm555_vm2, %v9625_v10  ;;  %7480 = vmatprep.mubr.f32.mxu0 %v18767_v60 }
 0xfa7   : > { %5959 = vmatprep.mubr.f32.mxu1 %v18767_v60 }
 0xfa8   : > { %v7142_v22 = vpop.trf.xlu1 }
 0xfa9   : > { %9707 = vmatmul.mubr.msk.f32.gmra.mrb[30].mxu0 %vm555_vm2, %v7142_v22 }
 0xfaa   : > { %9632 = vmatmul.mubr.msk.f32.gmra.mrb[136].mxu1 %vm555_vm2, %v9626_v63  ;;  %7486 = vmatprep.mubr.f32.mxu0 %v18767_v60 }
 0xfab   : > { %6210 = vmatprep.mubr.f32.mxu1 %v18767_v60 }
 0xfac   : > { %v7143_v0 = vpop.trf.xlu1 }
 0xfad   : > { %9708 = vmatmul.mubr.msk.f32.gmra.mrb[32].mxu0 %vm555_vm2, %v7143_v0 }
 0xfae   : > { %9635 = vmatmul.mubr.msk.f32.vlgmr.msra.gmra.mrb[140].mxu1 %vm555_vm2, %v15559_v51  ;;  %7492 = vmatprep.mubr.f32.mxu0 %v18767_v60 }
 0xfaf   : > { %6216 = vmatprep.mubr.f32.mxu1 %v18767_v60 }
 0xfb0   : > { %v7144_v5 = vpop.trf.xlu1 }
 0xfb1   : > { %9709 = vmatmul.mubr.msk.f32.gmra.mrb[34].mxu0 %vm555_vm2, %v7144_v5 }
 0xfb2   : > { %9636 = vmatmul.mubr.msk.f32.gmra.mrb[142].mxu1 %vm555_vm2, %v15564_v57  ;;  %7498 = vmatprep.mubr.f32.mxu0 %v18767_v60 }
 0xfb3   : > { %6222 = vmatprep.mubr.f32.mxu1 %v18767_v60 }
 0xfb4   : > { %v7145_v28 = vpop.trf.xlu1 }
 0xfb5   : > { %9710 = vmatmul.mubr.msk.f32.gmra.mrb[36].mxu0 %vm555_vm2, %v7145_v28 }
 0xfb6   : > { %9637 = vmatmul.mubr.msk.f32.gmra.mrb[144].mxu1 %vm555_vm2, %v15569_v62 }
 0xfb7   : > { %6228 = vmatprep.mubr.f32.mxu1 %v18767_v60 }
 0xfba   : > { %9638 = vmatmul.mubr.msk.f32.gmra.mrb[146].mxu1 %vm555_vm2, %v5999_v53  ;;  %v6040_v53 = vpop.trf.xlu0 }
 0xfbb   : > { %6234 = vmatprep.mubr.f32.mxu1 %v18767_v60 }
 0xfbe   : > { %9639 = vmatmul.mubr.msk.f32.gmra.mrb[148].mxu1 %vm555_vm2, %v6000_v19 }
 0xfbf   : > { %6240 = vmatprep.mubr.f32.mxu1 %v18767_v60 }
 0xfc2   : > { %9640 = vmatmul.mubr.msk.f32.gmra.mrb[150].mxu1 %vm555_vm2, %v6001_v4  ;;  %v6041_v4 = vpop.trf.xlu0 }
 0xfc3   : > { %6246 = vmatprep.mubr.f32.mxu1 %v18767_v60 }
 0xfc6   : > { %9641 = vmatmul.mubr.msk.f32.gmra.mrb[152].mxu1 %vm555_vm2, %v6002_v32  ;;  %v6042_v30 = vpop.trf.xlu0 }
 0xfc7   : > { %6252 = vmatprep.mubr.f32.mxu1 %v18767_v60 }
 0xfca   : > { %9642 = vmatmul.mubr.msk.f32.gmra.mrb[154].mxu1 %vm555_vm2, %v6003_v29  ;;  %v6043_v24 = vpop.trf.xlu0 }
 0xfcb   : > { %6258 = vmatprep.mubr.f32.mxu1 %v18767_v60 }
 0xfce   : > { %9643 = vmatmul.mubr.msk.f32.gmra.mrb[156].mxu1 %vm555_vm2, %v6004_v8 }
 0xfcf   : > { %6264 = vmatprep.mubr.f32.mxu1 %v18767_v60 }
 0xfd2   : > { %9644 = vmatmul.mubr.msk.f32.gmra.mrb[158].mxu1 %vm555_vm2, %v6005_v50 }
 0xfd3   : > { %6270 = vmatprep.mubr.f32.mxu1 %v18767_v60 }
 0xfd6   : > { %9645 = vmatmul.mubr.msk.f32.gmra.mrb[160].mxu1 %vm555_vm2, %v6006_v12 }
 0xfd7   : > { %6276 = vmatprep.mubr.f32.mxu1 %v18767_v60 }
 0xfda   : > { %9646 = vmatmul.mubr.msk.f32.gmra.mrb[162].mxu1 %vm555_vm2, %v6007_v16 }
 0xfdb   : > { %6282 = vmatprep.mubr.f32.mxu1 %v18767_v60 }
 0xfde   : > { %9647 = vmatmul.mubr.msk.f32.gmra.mrb[164].mxu1 %vm555_vm2, %v6008_v40 }
 0xfdf   : > { %6288 = vmatprep.mubr.f32.mxu1 %v18767_v60 }
 0xfe2   : > { %9648 = vmatmul.mubr.msk.f32.gmra.mrb[166].mxu1 %vm555_vm2, %v6009_v11 }
 0xfe3   : > { %6294 = vmatprep.mubr.f32.mxu1 %v18767_v60 }
 0xfe6   : > { %9649 = vmatmul.mubr.msk.f32.gmra.mrb[168].mxu1 %vm555_vm2, %v6010_v54 }
 0xfe7   : > { %6300 = vmatprep.mubr.f32.mxu1 %v18767_v60 }
 0xfea   : > { %9650 = vmatmul.mubr.msk.f32.gmra.mrb[170].mxu1 %vm555_vm2, %v6011_v18 }
 0xfeb   : > { %6306 = vmatprep.mubr.f32.mxu1 %v18767_v60 }
 0xfee   : > { %9651 = vmatmul.mubr.msk.f32.gmra.mrb[172].mxu1 %vm555_vm2, %v6028_v21 }
 0xfef   : > { %6312 = vmatprep.mubr.f32.mxu1 %v18767_v60 }
 0xff2   : > { %9652 = vmatmul.mubr.msk.f32.gmra.mrb[174].mxu1 %vm555_vm2, %v6029_v17 }
 0xff3   : > { %6318 = vmatprep.mubr.f32.mxu1 %v18767_v60 }
 0xff6   : > { %9653 = vmatmul.mubr.msk.f32.gmra.mrb[176].mxu1 %vm555_vm2, %v6030_v34 }
 0xff7   : > { %6324 = vmatprep.mubr.f32.mxu1 %v18767_v60 }
 0xffa   : > { %9654 = vmatmul.mubr.msk.f32.gmra.mrb[178].mxu1 %vm555_vm2, %v6031_v6 }
 0xffb   : > { %6330 = vmatprep.mubr.f32.mxu1 %v18767_v60 }
 0xffe   : > { %9655 = vmatmul.mubr.msk.f32.gmra.mrb[180].mxu1 %vm555_vm2, %v6032_v26 }
 0xfff   : > { %6336 = vmatprep.mubr.f32.mxu1 %v18767_v60 }
0x1002   : > { %9656 = vmatmul.mubr.msk.f32.gmra.mrb[182].mxu1 %vm555_vm2, %v6033_v42 }
0x1003   : > { %6342 = vmatprep.mubr.f32.mxu1 %v18767_v60 }
0x1006   : > { %9657 = vmatmul.mubr.msk.f32.gmra.mrb[184].mxu1 %vm555_vm2, %v6034_v13 }
0x1007   : > { %6348 = vmatprep.mubr.f32.mxu1 %v18767_v60 }
0x100a   : > { %9658 = vmatmul.mubr.msk.f32.gmra.mrb[186].mxu1 %vm555_vm2, %v6035_v25 }
0x100b   : > { %6354 = vmatprep.mubr.f32.mxu1 %v18767_v60 }
0x100c   : > { %v15678_v61 = vpop.f32.mrb[230].mxu0 }
0x100d   : > { %v15680_v1 = vpop.f32.mrb[231].mxu0 }
0x100e   : > { %v7505_v51 = vmax.f32 %v15678_v61, %v15680_v1  ;;  %9659 = vmatmul.mubr.msk.f32.gmra.mrb[188].mxu1 %vm555_vm2, %v6036_v55 }
0x100f   : > { %6360 = vmatprep.mubr.f32.mxu1 %v18767_v60 }
0x1010   : > { %7506 = vmax.xlane.f32.xlu1 %v7505_v51  ;;  %v15686_v57 = vpop.f32.mrb[232].mxu0 }
0x1011   : > { %v15688_v23 = vpop.f32.mrb[233].mxu0 }
0x1012   : > { %v7508_v3 = vmax.f32 %v15686_v57, %v15688_v23  ;;  %9660 = vmatmul.mubr.msk.f32.gmra.mrb[190].mxu1 %vm555_vm2, %v6037_v56 }
0x1013   : > { %6366 = vmatprep.mubr.f32.mxu1 %v18767_v60 }
0x1014   : > { %7509 = vmax.xlane.f32.xlu0 %v7508_v3  ;;  %v15694_v62 = vpop.f32.mrb[234].mxu0 }
0x1015   : > { %v15696_v7 = vpop.f32.mrb[235].mxu0 }
0x1016   : > { %v7511_v33 = vmax.f32 %v15694_v62, %v15696_v7  ;;  %9661 = vmatmul.mubr.msk.f32.gmra.mrb[192].mxu1 %vm555_vm2, %v6038_v46 }
0x1017   : > { %6372 = vmatprep.mubr.f32.mxu1 %v18767_v60 }
0x1018   : > { %7512 = vmax.xlane.f32.xlu1 %v7511_v33  ;;  %v15702_v43 = vpop.f32.mrb[236].mxu0 }
0x1019   : > { %v15704_v19 = vpop.f32.mrb[237].mxu0 }
0x101a   : > { %v7514_v59 = vmax.f32 %v15702_v43, %v15704_v19  ;;  %9662 = vmatmul.mubr.msk.f32.gmra.mrb[194].mxu1 %vm555_vm2, %v6039_v47 }
0x101b   : > { %6378 = vmatprep.mubr.f32.mxu1 %v18767_v60 }
0x101c   : > { %7515 = vmax.xlane.f32.xlu0 %v7514_v59  ;;  %v15710_v36 = vpop.f32.mrb[238].mxu0 }
0x101d   : > { %v15712_v20 = vpop.f32.mrb[239].mxu0 }
0x101e   : > { %v7517_v32 = vmax.f32 %v15710_v36, %v15712_v20  ;;  %9663 = vmatmul.mubr.msk.f32.gmra.mrb[196].mxu1 %vm555_vm2, %v6040_v53 }
0x101f   : > { %6384 = vmatprep.mubr.f32.mxu1 %v18767_v60 }
0x1020   : > { %7518 = vmax.xlane.f32.xlu1 %v7517_v32  ;;  %v15718_v48 = vpop.f32.mrb[240].mxu0 }
0x1021   : > { %v15720_v29 = vpop.f32.mrb[241].mxu0 }
0x1022   : > { %v7520_v9 = vmax.f32 %v15718_v48, %v15720_v29  ;;  %9664 = vmatmul.mubr.msk.f32.gmra.mrb[198].mxu1 %vm555_vm2, %v6041_v4 }
0x1023   : > { %6390 = vmatprep.mubr.f32.mxu1 %v18767_v60 }
0x1024   : > { %7521 = vmax.xlane.f32.xlu0 %v7520_v9  ;;  %v15726_v58 = vpop.f32.mrb[242].mxu0 }
0x1025   : > { %v15728_v49 = vpop.f32.mrb[243].mxu0 }
0x1026   : > { %v7523_v41 = vmax.f32 %v15726_v58, %v15728_v49  ;;  %9665 = vmatmul.mubr.msk.f32.gmra.mrb[200].mxu1 %vm555_vm2, %v6042_v30 }
0x1027   : > { %6396 = vmatprep.mubr.f32.mxu1 %v18767_v60 }
0x1028   : > { %7524 = vmax.xlane.f32.xlu1 %v7523_v41  ;;  %v15734_v37 = vpop.f32.mrb[244].mxu0 }
0x1029   : > { %v15736_v35 = vpop.f32.mrb[245].mxu0 }
0x102a   : > { %v7526_v8 = vmax.f32 %v15734_v37, %v15736_v35  ;;  %9666 = vmatmul.mubr.msk.f32.gmra.mrb[202].mxu1 %vm555_vm2, %v6043_v24 }
0x102b   : > { %6953 = vmatprep.mubr.f32.mxu1 %v6886_v39 }
0x102c   : > { %7527 = vmax.xlane.f32.xlu0 %v7526_v8  ;;  %v15742_v38 = vpop.f32.mrb[246].mxu0 }
0x102d   : > { %v15744_v10 = vpop.f32.mrb[247].mxu0 }
0x102e   : > { %v7529_v50 = vmax.f32 %v15742_v38, %v15744_v10 }
0x1030   : > { %7530 = vmax.xlane.f32.xlu1 %v7529_v50  ;;  %v15748_v63 = vpop.f32.mrb[248].mxu0 }
0x1031   : > { %v15750_v12 = vpop.f32.mrb[249].mxu0 }
0x1032   : > { %v7532_v14 = vmax.f32 %v15748_v63, %v15750_v12 }
0x1034   : > { %7533 = vmax.xlane.f32.xlu0 %v7532_v14  ;;  %v15754_v16 = vpop.f32.mrb[250].mxu0 }
0x1035   : > { %v15756_v40 = vpop.f32.mrb[251].mxu0 }
0x1036   : > { %v7535_v11 = vmax.f32 %v15754_v16, %v15756_v40 }
0x1038   : > { %7536 = vmax.xlane.f32.xlu1 %v7535_v11  ;;  %v15760_v54 = vpop.f32.mrb[252].mxu0 }
0x1039   : > { %18772 = vst [vmem:[#allocation64_spill] sm:$0xff] %v15760_v54  ;;  %v15762_v18 = vpop.f32.mrb[253].mxu0 }
0x103a   : > { %18773 = vst [vmem:[#allocation60_spill] sm:$0xff] %v15762_v18  ;;  %v7538_v44 = vmax.f32 %v15760_v54, %v15762_v18 }
0x103c   : > { %7539 = vmax.xlane.f32.xlu0 %v7538_v44  ;;  %v15766_v21 = vpop.f32.mrb[254].mxu0 }
0x103d   : > { %18774 = vst [vmem:[#allocation107_spill] sm:$0xff] %v15766_v21  ;;  %v15768_v31 = vpop.f32.mrb[255].mxu0 }
0x103e   : > { %18775 = vst [vmem:[#allocation62_spill] sm:$0xff] %v15768_v31  ;;  %v7541_v17 = vmax.f32 %v15766_v21, %v15768_v31 }
0x1040   : > { %7542 = vmax.xlane.f32.xlu1 %v7541_v17  ;;  %v15772_v22 = vpop.f32.mrb[0].mxu0 }
0x1041   : > { %18776 = vst [vmem:[#allocation69_spill] sm:$0xff] %v15772_v22  ;;  %v15774_v0 = vpop.f32.mrb[1].mxu0 }
0x1042   : > { %18777 = vst [vmem:[#allocation77_spill] sm:$0xff] %v15774_v0  ;;  %v7544_v34 = vmax.f32 %v15772_v22, %v15774_v0 }
0x1044   : > { %7545 = vmax.xlane.f32.xlu0 %v7544_v34  ;;  %v15778_v5 = vpop.f32.mrb[2].mxu0 }
0x1045   : > { %18778 = vst [vmem:[#allocation7_spill] sm:$0xff] %v15778_v5  ;;  %v15780_v6 = vpop.f32.mrb[3].mxu0 }
0x1046   : > { %18779 = vst [vmem:[#allocation108_spill] sm:$0xff] %v15780_v6  ;;  %v7547_v28 = vmax.f32 %v15778_v5, %v15780_v6 }
0x1048   : > { %7548 = vmax.xlane.f32.xlu1 %v7547_v28  ;;  %v15784_v26 = vpop.f32.mrb[4].mxu0 }
0x1049   : > { %18780 = vst [vmem:[#allocation110_spill] sm:$0xff] %v15784_v26  ;;  %v15786_v42 = vpop.f32.mrb[5].mxu0 }
0x104a   : > { %18781 = vst [vmem:[#allocation20_spill] sm:$0xff] %v15786_v42  ;;  %v7550_v13 = vmax.f32 %v15784_v26, %v15786_v42 }
0x104c   : > { %7551 = vmax.xlane.f32.xlu0 %v7550_v13  ;;  %v15790_v25 = vpop.f32.mrb[6].mxu0 }
0x104d   : > { %18782 = vst [vmem:[#allocation73_spill] sm:$0xff] %v15790_v25  ;;  %v15792_v55 = vpop.f32.mrb[7].mxu0 }
0x104e   : > { %18783 = vst [vmem:[#allocation13_spill] sm:$0xff] %v15792_v55  ;;  %v7553_v56 = vmax.f32 %v15790_v25, %v15792_v55 }
0x1050   : > { %v15796_v46 = vpop.f32.mrb[8].mxu0 }
0x1051   : > { %18784 = vst [vmem:[#allocation25_spill] sm:$0xff] %v15796_v46  ;;  %v15798_v51 = vpop.f32.mrb[9].mxu0 }
0x1052   : > { %18785 = vst [vmem:[#allocation6_spill] sm:$0xff] %v15798_v51  ;;  %v7556_v47 = vmax.f32 %v15796_v46, %v15798_v51 }
0x1054   : > { %v15802_v3 = vpop.f32.mrb[10].mxu0 }
0x1055   : > { %18786 = vst [vmem:[#allocation67_spill] sm:$0xff] %v15802_v3  ;;  %v15804_v53 = vpop.f32.mrb[11].mxu0 }
0x1056   : > { %18787 = vst [vmem:[#allocation71_spill] sm:$0xff] %v15804_v53  ;;  %v7559_v33 = vmax.f32 %v15802_v3, %v15804_v53 }
0x1058   : > { %v15808_v59 = vpop.f32.mrb[12].mxu0 }
0x1059   : > { %18788 = vst [vmem:[#allocation65_spill] sm:$0xff] %v15808_v59  ;;  %v15810_v4 = vpop.f32.mrb[13].mxu0 }
0x105a   : > { %18789 = vst [vmem:[#allocation78_spill] sm:$0xff] %v15810_v4  ;;  %v7562_v32 = vmax.f32 %v15808_v59, %v15810_v4 }
0x105c   : > { %v15814_v30 = vpop.f32.mrb[14].mxu0 }
0x105d   : > { %18790 = vst [vmem:[#allocation68_spill] sm:$0xff] %v15814_v30  ;;  %v15816_v9 = vpop.f32.mrb[15].mxu0 }
0x105e   : > { %18791 = vst [vmem:[#allocation66_spill] sm:$0xff] %v15816_v9  ;;  %v7565_v41 = vmax.f32 %v15814_v30, %v15816_v9 }
0x1060   : > { %v15820_v24 = vpop.f32.mrb[16].mxu0 }
0x1061   : > { %18792 = vst [vmem:[#allocation26_spill] sm:$0xff] %v15820_v24  ;;  %v15822_v39 = vpop.f32.mrb[17].mxu0 }
0x1062   : > { %18793 = vst [vmem:[#allocation27_spill] sm:$0xff] %v15822_v39  ;;  %v7568_v8 = vmax.f32 %v15820_v24, %v15822_v39 }
0x1064   : > { %v15826_v50 = vpop.f32.mrb[18].mxu0 }
0x1065   : > { %18794 = vst [vmem:[#allocation12_spill] sm:$0xff] %v15826_v50  ;;  %v15828_v14 = vpop.f32.mrb[19].mxu0 }
0x1066   : > { %18795 = vst [vmem:[#allocation18_spill] sm:$0xff] %v15828_v14  ;;  %v7571_v11 = vmax.f32 %v15826_v50, %v15828_v14 }
0x1068   : > { %v15832_v44 = vpop.f32.mrb[20].mxu0 }
0x1069   : > { %v15834_v17 = vpop.f32.mrb[21].mxu0 }
0x106a   : > { %v7574_v34 = vmax.f32 %v15832_v44, %v15834_v17 }
0x106c   : > { %v15838_v28 = vpop.f32.mrb[22].mxu0 }
0x106d   : > { %18796 = vst [vmem:[#allocation24_spill] sm:$0xff] %v15838_v28  ;;  %v15840_v13 = vpop.f32.mrb[23].mxu0 }
0x106e   : > { %18797 = vst [vmem:[#allocation15_spill] sm:$0xff] %v15840_v13 }
0x1070   : > { %v15844_v52 = vpop.f32.mrb[24].mxu0 }
0x1071   : > { %18798 = vst [vmem:[#allocation48_spill] sm:$0xff] %v15844_v52  ;;  %v15846_v60 = vpop.f32.mrb[25].mxu0 }
0x1072   : > { %18799 = vst [vmem:[#allocation79_spill] sm:$0xff] %v15846_v60 }
0x1081   : > { %v15850_v27 = vpop.f32.mrb[140].mxu1 }
0x1082   : > { %v15852_v45 = vpop.f32.mrb[141].mxu1 }
0x1083   : > { %v6403_v14 = vmax.f32 %v15850_v27, %v15852_v45 }
0x1085   : > { %v15856_v50 = vpop.f32.mrb[142].mxu1  ;;  %6404 = vmax.xlane.f32.xlu0 %v6403_v14 }
0x1086   : > { %v15858_v9 = vpop.f32.mrb[143].mxu1 }
0x1087   : > { %v6406_v2 = vmax.f32 %v15856_v50, %v15858_v9 }
0x1089   : > { %v15862_v39 = vpop.f32.mrb[144].mxu1  ;;  %6407 = vmax.xlane.f32.xlu1 %v6406_v2  ;;  %7557 = vmax.xlane.f32.xlu0 %v7556_v47 }
0x108a   : > { %v15864_v15 = vpop.f32.mrb[145].mxu1 }
0x108b   : > { %v6409_v24 = vmax.f32 %v15862_v39, %v15864_v15 }
0x108d   : > { %v15868_v30 = vpop.f32.mrb[146].mxu1  ;;  %7554 = vmax.xlane.f32.xlu1 %v7553_v56  ;;  %6410 = vmax.xlane.f32.xlu0 %v6409_v24 }
0x108e   : > { %v15870_v53 = vpop.f32.mrb[147].mxu1 }
0x108f   : > { %v6412_v14 = vmax.f32 %v15868_v30, %v15870_v53 }
0x1091   : > { %6413 = vmax.xlane.f32.xlu0 %v6412_v14  ;;  %7560 = vmax.xlane.f32.xlu1 %v7559_v33  ;;  %v15874_v4 = vpop.f32.mrb[148].mxu1 }
0x1092   : > { %v15876_v2 = vpop.f32.mrb[149].mxu1 }
0x1093   : > { %v6415_v47 = vmax.f32 %v15874_v4, %v15876_v2 }
0x1095   : > { %v15880_v59 = vpop.f32.mrb[150].mxu1  ;;  %7563 = vmax.xlane.f32.xlu0 %v7562_v32  ;;  %7566 = vmax.xlane.f32.xlu1 %v7565_v41 }
0x1096   : > { %v15882_v56 = vpop.f32.mrb[151].mxu1 }
0x1097   : > { %v6418_v24 = vmax.f32 %v15880_v59, %v15882_v56 }
0x1099   : > { %6419 = vmax.xlane.f32.xlu0 %v6418_v24  ;;  %6416 = vmax.xlane.f32.xlu1 %v6415_v47  ;;  %v15886_v14 = vpop.f32.mrb[152].mxu1 }
0x109a   : > { %v15888_v33 = vpop.f32.mrb[153].mxu1 }
0x109b   : > { %v6421_v3 = vmax.f32 %v15886_v14, %v15888_v33 }
0x109d   : > { %v15892_v55 = vpop.f32.mrb[154].mxu1  ;;  %7569 = vmax.xlane.f32.xlu0 %v7568_v8  ;;  %7572 = vmax.xlane.f32.xlu1 %v7571_v11  ;;  %v7507_v32 = vpop.xlane.xlu1 %7506 }
0x109e   : > { %v7601_v41 = vsub.f32 %v15678_v61, %v7507_v32  ;;  %v7602_v25 = vsub.f32 %v15680_v1, %v7507_v32  ;;  %v15896_v51 = vpop.f32.mrb[155].mxu1 }
0x109f   : > { %v6424_v47 = vmax.f32 %v15892_v55, %v15896_v51 }
0x10a0   : > { %v7665_v24 = vmul.f32 1.442695, %v7601_v41  ;;  %v7667_v46 = vmul.f32 1.442695, %v7602_v25 }
0x10a1   : > { %v7510_v6 = vpop.xlane.xlu0 %7509  ;;  %6425 = vmax.xlane.f32.xlu0 %v6424_v47  ;;  %6422 = vmax.xlane.f32.xlu1 %v6421_v3  ;;  %v15900_v42 = vpop.f32.mrb[156].mxu1 }
0x10a2   : > { %11355 = vpow2.f32 %v7665_v24  ;;  %v7603_v8 = vsub.f32 %v15686_v57, %v7510_v6  ;;  %v7604_v11 = vsub.f32 %v15688_v23, %v7510_v6  ;;  %v15904_v61 = vpop.f32.mrb[157].mxu1  ;;  %v15914_v23 = vpop.f32.mrb[26].mxu0 }
0x10a3   : > { %18800 = vst [vmem:[#allocation80_spill] sm:$0xff] %v15904_v61  ;;  %11357 = vpow2.f32 %v7667_v46  ;;  %v6427_v1 = vmax.f32 %v15900_v42, %v15904_v61  ;;  %v15917_v46 = vpop.f32.mrb[27].mxu0 }
0x10a4   : > { %v7669_v32 = vmul.f32 1.442695, %v7603_v8  ;;  %v7671_v26 = vmul.f32 1.442695, %v7604_v11 }
0x10a5   : > { %v15908_v41 = vpop.f32.mrb[158].mxu1  ;;  %7575 = vmax.xlane.f32.xlu0 %v7574_v34  ;;  %v7513_v25 = vpop.xlane.xlu1 %7512 }
0x10a6   : > { %11359 = vpow2.f32 %v7669_v32  ;;  %v15910_v3 = vpop.f32.mrb[159].mxu1  ;;  %v7605_v6 = vsub.f32 %v15694_v62, %v7513_v25  ;;  %v7606_v47 = vsub.f32 %v15696_v7, %v7513_v25  ;;  %v15928_v32 = vpop.f32.mrb[28].mxu0 }
0x10a7   : > { %11361 = vpow2.f32 %v7671_v26  ;;  %v6430_v57 = vmax.f32 %v15908_v41, %v15910_v3 }
0x10a8   : > { %v7673_v62 = vmul.f32 1.442695, %v7605_v6  ;;  %v7675_v25 = vmul.f32 1.442695, %v7606_v47 }
0x10a9   : > { %v7516_v24 = vpop.xlane.xlu0 %7515  ;;  %6431 = vmax.xlane.f32.xlu0 %v6430_v57  ;;  %v15920_v8 = vpop.f32.mrb[160].mxu1 }
0x10aa   : > { %18801 = vst [vmem:[#allocation33_spill] sm:$0xff] %v15920_v8  ;;  %v15924_v11 = vpop.f32.mrb[161].mxu1  ;;  %v7607_v0 = vsub.f32 %v15702_v43, %v7516_v24  ;;  %v7608_v57 = vsub.f32 %v15704_v19, %v7516_v24  ;;  %11363 = vpow2.f32 %v7673_v62 }
0x10ab   : > { %18802 = vst [vmem:[#allocation85_spill] sm:$0xff] %v15924_v11  ;;  %v6433_v26 = vmax.f32 %v15920_v8, %v15924_v11  ;;  %v15942_v11 = vpop.f32.mrb[29].mxu0  ;;  %11365 = vpow2.f32 %v7675_v25  ;;  %v18813_v25 = vmax.f32 %v15838_v28, %v15840_v13 }
0x10ac   : > { %v15930_v5 = vpop.eup %11355  ;;  %v7677_v47 = vmul.f32 1.442695, %v7607_v0  ;;  %v7679_v24 = vmul.f32 1.442695, %v7608_v57 }
0x10ad   : > { %18803 = vst [vmem:[#allocation86_spill] sm:$0xff] %v15930_v5  ;;  %v15933_v7 = vpop.eup %11357  ;;  %v15936_v22 = vpop.f32.mrb[162].mxu1 }
0x10ae   : > { %18804 = vst [vmem:[#allocation81_spill] sm:$0xff] %v15933_v7  ;;  %18805 = vst [vmem:[#allocation83_spill] sm:$0xff] %v15936_v22  ;;  %v7793_v34 = vadd.f32 %v15933_v7, %v15930_v5  ;;  %v15940_v31 = vpop.f32.mrb[163].mxu1  ;;  %11367 = vpow2.f32 %v7677_v47 }
0x10af   : > { %18806 = vst [vmem:[#allocation112_spill] sm:$0xff] %v15940_v31  ;;  %v6436_v8 = vmax.f32 %v15936_v22, %v15940_v31  ;;  %11369 = vpow2.f32 %v7679_v24 }
0x10b0   : > { %v15948_v6 = vpop.eup %11359  ;;  %7794 = vadd.xlane.f32.xlu1 %v7793_v34 }
0x10b1   : > { %18807 = vst [vmem:[#allocation90_spill] sm:$0xff] %v15948_v6  ;;  %v15950_v19 = vpop.eup %11361  ;;  %v15952_v5 = vpop.f32.mrb[164].mxu1 }
0x10b2   : > { %18808 = vst [vmem:[#allocation111_spill] sm:$0xff] %v15950_v19  ;;  %18809 = vst [vmem:[#allocation21_spill] sm:$0xff] %v15952_v5  ;;  %v7796_v7 = vadd.f32 %v15950_v19, %v15948_v6  ;;  %v15956_v21 = vpop.f32.mrb[165].mxu1 }
0x10b3   : > { %18810 = vst [vmem:[#allocation87_spill] sm:$0xff] %v15956_v21  ;;  %v6439_v31 = vmax.f32 %v15952_v5, %v15956_v21 }
0x10b4   : > { %7797 = vadd.xlane.f32.xlu0 %v7796_v7  ;;  %6428 = vmax.xlane.f32.xlu1 %v6427_v1  ;;  %v15971_v43 = vpop.eup %11363  ;;  %v15975_v1 = vpop.f32.mrb[30].mxu0 }
0x10b5   : > { %v15960_v0 = vpop.f32.mrb[166].mxu1  ;;  %18815 = vst [vmem:[#allocation114_spill] sm:$0xff] %v15971_v43  ;;  %v15977_v7 = vpop.eup %11365 }
0x10b6   : > { %18811 = vst [vmem:[#allocation92_spill] sm:$0xff] %v15960_v0  ;;  %v15962_v34 = vpop.f32.mrb[167].mxu1  ;;  %18817 = vst [vmem:[#allocation91_spill] sm:$0xff] %v15977_v7  ;;  %v15981_v21 = vpop.f32.mrb[31].mxu0  ;;  %v7799_v6 = vadd.f32 %v15977_v7, %v15971_v43 }
0x10b7   : > { %18812 = vst [vmem:[#allocation89_spill] sm:$0xff] %v15962_v34  ;;  %v6442_v62 = vmax.f32 %v15960_v0, %v15962_v34  ;;  %v15988_v5 = vpop.f32.mrb[32].mxu0 }
0x10b8   : > { %6437 = vmax.xlane.f32.xlu0 %v6436_v8  ;;  %7578 = vmax.xlane.f32.xlu1 %v18813_v25  ;;  %v18818_v8 = vmax.f32 %v15844_v52, %v15846_v60  ;;  %v15992_v0 = vpop.eup %11367 }
0x10b9   : > { %v15969_v57 = vpop.f32.mrb[168].mxu1  ;;  %18820 = vst [vmem:[#allocation98_spill] sm:$0xff] %v15992_v0  ;;  %v16000_v19 = vpop.eup %11369 }
0x10ba   : > { %18814 = vst [vmem:[#allocation94_spill] sm:$0xff] %v15969_v57  ;;  %v15973_v47 = vpop.f32.mrb[169].mxu1  ;;  %18822 = vst [vmem:[#allocation113_spill] sm:$0xff] %v16000_v19  ;;  %v7802_v60 = vadd.f32 %v16000_v19, %v15992_v0 }
0x10bb   : > { %18816 = vst [vmem:[#allocation93_spill] sm:$0xff] %v15973_v47  ;;  %v6445_v24 = vmax.f32 %v15969_v57, %v15973_v47  ;;  %v15998_v57 = vpop.f32.mrb[33].mxu0 }
0x10bc   : > { %7581 = vmax.xlane.f32.xlu0 %v18818_v8  ;;  %6434 = vmax.xlane.f32.xlu1 %v6433_v26  ;;  %v16024_v0 = vpop.f32.mrb[34].mxu0 }
0x10bd   : > { %v15990_v34 = vpop.f32.mrb[170].mxu1  ;;  %18829 = vst [vmem:[#allocation9_spill] sm:$0xff] %v16024_v0 }
0x10be   : > { %18819 = vst [vmem:[#allocation116_spill] sm:$0xff] %v15990_v34  ;;  %v15996_v47 = vpop.f32.mrb[171].mxu1 }
0x10bf   : > { %18821 = vst [vmem:[#allocation115_spill] sm:$0xff] %v15996_v47  ;;  %v6448_v26 = vmax.f32 %v15990_v34, %v15996_v47 }
0x10c0   : > { %6443 = vmax.xlane.f32.xlu0 %v6442_v62  ;;  %7800 = vadd.xlane.f32.xlu1 %v7799_v6 }
0x10c1   : > { %v16006_v25 = vpop.f32.mrb[172].mxu1 }
0x10c2   : > { %18823 = vst [vmem:[#allocation97_spill] sm:$0xff] %v16006_v25  ;;  %v16010_v43 = vpop.f32.mrb[173].mxu1 }
0x10c3   : > { %18824 = vst [vmem:[#allocation96_spill] sm:$0xff] %v16010_v43  ;;  %v6451_v7 = vmax.f32 %v16006_v25, %v16010_v43 }
0x10c4   : > { %7803 = vadd.xlane.f32.xlu0 %v7802_v60  ;;  %6440 = vmax.xlane.f32.xlu1 %v6439_v31  ;;  %v16028_v60 = vpop.f32.mrb[35].mxu0 }
0x10c5   : > { %v16014_v52 = vpop.f32.mrb[174].mxu1  ;;  %18830 = vst [vmem:[#allocation23_spill] sm:$0xff] %v16028_v60  ;;  %v16030_v31 = vpop.f32.mrb[36].mxu0 }
0x10c6   : > { %18825 = vst [vmem:[#allocation102_spill] sm:$0xff] %v16014_v52  ;;  %v16016_v47 = vpop.f32.mrb[175].mxu1  ;;  %18831 = vst [vmem:[#allocation72_spill] sm:$0xff] %v16030_v31  ;;  %v16038_v25 = vpop.f32.mrb[37].mxu0 }
0x10c7   : > { %18826 = vst [vmem:[#allocation101_spill] sm:$0xff] %v16016_v47  ;;  %v6454_v62 = vmax.f32 %v16014_v52, %v16016_v47  ;;  %18834 = vst [vmem:[#allocation57_spill] sm:$0xff] %v16038_v25  ;;  %v7519_v60 = vpop.xlane.xlu1 %7518 }
0x10c8   : > { %6449 = vmax.xlane.f32.xlu0 %v6448_v26  ;;  %6446 = vmax.xlane.f32.xlu1 %v6445_v24 }
0x10c9   : > { %v16020_v6 = vpop.f32.mrb[176].mxu1 }
0x10ca   : > { %18827 = vst [vmem:[#allocation95_spill] sm:$0xff] %v16020_v6  ;;  %v16022_v8 = vpop.f32.mrb[177].mxu1 }
0x10cb   : > { %18828 = vst [vmem:[#allocation8_spill] sm:$0xff] %v16022_v8  ;;  %v6457_v19 = vmax.f32 %v16020_v6, %v16022_v8 }
0x10cc   : > { %6455 = vmax.xlane.f32.xlu0 %v6454_v62  ;;  %6452 = vmax.xlane.f32.xlu1 %v6451_v7 }
0x10cd   : > { %v16032_v43 = vpop.f32.mrb[178].mxu1 }
0x10ce   : > { %18832 = vst [vmem:[#allocation22_spill] sm:$0xff] %v16032_v43  ;;  %v16036_v26 = vpop.f32.mrb[179].mxu1 }
0x10cf   : > { %18833 = vst [vmem:[#allocation50_spill] sm:$0xff] %v16036_v26  ;;  %v6460_v47 = vmax.f32 %v16032_v43, %v16036_v26 }
0x10d0   : > { %6458 = vmax.xlane.f32.xlu1 %v6457_v19 }
0x10d1   : > { %v16044_v62 = vpop.f32.mrb[180].mxu1  ;;  %6461 = vmax.xlane.f32.xlu0 %v6460_v47 }
0x10d2   : > { %18835 = vst [vmem:[#allocation54_spill] sm:$0xff] %v16044_v62  ;;  %v16046_v7 = vpop.f32.mrb[181].mxu1 }
0x10d3   : > { %18836 = vst [vmem:[#allocation49_spill] sm:$0xff] %v16046_v7  ;;  %v6463_v6 = vmax.f32 %v16044_v62, %v16046_v7 }
0x10d5   : > { %v16050_v24 = vpop.f32.mrb[182].mxu1  ;;  %6464 = vmax.xlane.f32.xlu1 %v6463_v6 }
0x10d6   : > { %18837 = vst [vmem:[#allocation61_spill] sm:$0xff] %v16050_v24  ;;  %v16052_v52 = vpop.f32.mrb[183].mxu1 }
0x10d7   : > { %18838 = vst [vmem:[#allocation31_spill] sm:$0xff] %v16052_v52  ;;  %v6466_v26 = vmax.f32 %v16050_v24, %v16052_v52 }
0x10d9   : > { %v16056_v43 = vpop.f32.mrb[184].mxu1  ;;  %6467 = vmax.xlane.f32.xlu0 %v6466_v26 }
0x10da   : > { %18839 = vst [vmem:[#allocation58_spill] sm:$0xff] %v16056_v43  ;;  %v16058_v19 = vpop.f32.mrb[185].mxu1 }
0x10db   : > { %18840 = vst [vmem:[#allocation70_spill] sm:$0xff] %v16058_v19  ;;  %v6469_v47 = vmax.f32 %v16056_v43, %v16058_v19 }
0x10dd   : > { %v16062_v8 = vpop.f32.mrb[186].mxu1  ;;  %6470 = vmax.xlane.f32.xlu1 %v6469_v47 }
0x10de   : > { %18841 = vst [vmem:[#allocation36_spill] sm:$0xff] %v16062_v8  ;;  %v16064_v7 = vpop.f32.mrb[187].mxu1 }
0x10df   : > { %18842 = vst [vmem:[#allocation38_spill] sm:$0xff] %v16064_v7  ;;  %v6472_v6 = vmax.f32 %v16062_v8, %v16064_v7 }
0x10e1   : > { %v16068_v62 = vpop.f32.mrb[188].mxu1  ;;  %6473 = vmax.xlane.f32.xlu0 %v6472_v6 }
0x10e2   : > { %18843 = vst [vmem:[#allocation35_spill] sm:$0xff] %v16068_v62  ;;  %v16070_v52 = vpop.f32.mrb[189].mxu1 }
0x10e3   : > { %18844 = vst [vmem:[#allocation37_spill] sm:$0xff] %v16070_v52  ;;  %v6475_v26 = vmax.f32 %v16068_v62, %v16070_v52 }
0x10e5   : > { %v16074_v24 = vpop.f32.mrb[190].mxu1  ;;  %6476 = vmax.xlane.f32.xlu1 %v6475_v26 }
0x10e6   : > { %18845 = vst [vmem:[#allocation105_spill] sm:$0xff] %v16074_v24  ;;  %v16076_v19 = vpop.f32.mrb[191].mxu1 }
0x10e7   : > { %18846 = vst [vmem:[#allocation106_spill] sm:$0xff] %v16076_v19  ;;  %v6478_v47 = vmax.f32 %v16074_v24, %v16076_v19 }
0x10e9   : > { %v16080_v43 = vpop.f32.mrb[192].mxu1  ;;  %6479 = vmax.xlane.f32.xlu0 %v6478_v47 }
0x10ea   : > { %18847 = vst [vmem:[#allocation51_spill] sm:$0xff] %v16080_v43  ;;  %v16082_v7 = vpop.f32.mrb[193].mxu1 }
0x10eb   : > { %18848 = vst [vmem:[#allocation40_spill] sm:$0xff] %v16082_v7  ;;  %v6481_v6 = vmax.f32 %v16080_v43, %v16082_v7 }
0x10ed   : > { %v16086_v8 = vpop.f32.mrb[194].mxu1  ;;  %6482 = vmax.xlane.f32.xlu1 %v6481_v6 }
0x10ee   : > { %18849 = vst [vmem:[#allocation34_spill] sm:$0xff] %v16086_v8  ;;  %v16088_v52 = vpop.f32.mrb[195].mxu1 }
0x10ef   : > { %18850 = vst [vmem:[#allocation39_spill] sm:$0xff] %v16088_v52  ;;  %v6484_v26 = vmax.f32 %v16086_v8, %v16088_v52  ;;  %v16106_v52 = vpop.xlane.xlu0 %7521 }
0x10f1   : > { %v16092_v62 = vpop.f32.mrb[196].mxu1  ;;  %6485 = vmax.xlane.f32.xlu0 %v6484_v26 }
0x10f2   : > { %18851 = vst [vmem:[#allocation30_spill] sm:$0xff] %v16092_v62  ;;  %v16094_v19 = vpop.f32.mrb[197].mxu1 }
0x10f3   : > { %18852 = vst [vmem:[#allocation52_spill] sm:$0xff] %v16094_v19  ;;  %v6487_v47 = vmax.f32 %v16092_v62, %v16094_v19 }
0x10f5   : > { %v16098_v24 = vpop.f32.mrb[198].mxu1  ;;  %6488 = vmax.xlane.f32.xlu1 %v6487_v47  ;;  %v16114_v47 = vpop.xlane.xlu0 %7527 }
0x10f6   : > { %18853 = vst [vmem:[#allocation44_spill] sm:$0xff] %v16098_v24  ;;  %v16100_v7 = vpop.f32.mrb[199].mxu1 }
0x10f7   : > { %18854 = vst [vmem:[#allocation43_spill] sm:$0xff] %v16100_v7  ;;  %v6490_v6 = vmax.f32 %v16098_v24, %v16100_v7 }
0x10f9   : > { %v16104_v43 = vpop.f32.mrb[200].mxu1  ;;  %6491 = vmax.xlane.f32.xlu0 %v6490_v6  ;;  %v16120_v6 = vpop.xlane.xlu1 %7524 }
0x10fa   : > { %18855 = vst [vmem:[#allocation41_spill] sm:$0xff] %v16104_v43  ;;  %v16108_v8 = vpop.f32.mrb[201].mxu1  ;;  %v16122_v24 = vpop.xlane.xlu0 %7533 }
0x10fb   : > { %18856 = vst [vmem:[#allocation99_spill] sm:$0xff] %v16108_v8  ;;  %v6493_v26 = vmax.f32 %v16104_v43, %v16108_v8 }
0x10fd   : > { %v16112_v19 = vpop.f32.mrb[202].mxu1  ;;  %6494 = vmax.xlane.f32.xlu1 %v6493_v26  ;;  %v16124_v0 = vpop.xlane.xlu1 %7530 }
0x10fe   : > { %18857 = vst [vmem:[#allocation42_spill] sm:$0xff] %v16112_v19  ;;  %v16116_v62 = vpop.f32.mrb[203].mxu1  ;;  %v16126_v34 = vpop.xlane.xlu0 %7539 }
0x10ff   : > { %18858 = vst [vmem:[#allocation59_spill] sm:$0xff] %v16116_v62  ;;  %v6496_v7 = vmax.f32 %v16112_v19, %v16116_v62  ;;  %18859 = vst [vmem:[#allocation55_spill] sm:$0xff] %v16126_v34 }
0x1101   : > { %6497 = vmax.xlane.f32.xlu0 %v6496_v7  ;;  %v16128_v8 = vpop.xlane.xlu1 %7536 }
0x1102   : > { %v16130_v43 = vpop.xlane.xlu0 %7545 }
0x1103   : > { %18860 = vst [vmem:[#allocation74_spill] sm:$0xff] %v16130_v43 }
0x1105   : > { %v16132_v26 = vpop.xlane.xlu1 %7542 }
0x1106   : > { %18861 = vst [vmem:[#allocation56_spill] sm:$0xff] %v16132_v26  ;;  %v16134_v25 = vpop.xlane.xlu0 %7551 }
0x1107   : > { %18862 = vst [vmem:[#allocation100_spill] sm:$0xff] %v16134_v25  ;;  %v7609_v25 = vsub.f32 %v15710_v36, %v7519_v60 }
0x1109   : > { %v16136_v31 = vpop.xlane.xlu1 %7548 }
0x110a   : > { %18863 = vst [vmem:[#allocation19_spill] sm:$0xff] %v16136_v31  ;;  %v7610_v31 = vsub.f32 %v15712_v20, %v7519_v60 }
0x1112   : > { %v6405_v62 = vpop.xlane.xlu0 %6404 }
0x1113   : > { %v6499_v7 = vsub.f32 %v15850_v27, %v6405_v62  ;;  %v6500_v19 = vsub.f32 %v15852_v45, %v6405_v62 }
0x1115   : > { %v6563_v13 = vmul.f32 1.442695, %v6499_v7  ;;  %v6565_v28 = vmul.f32 1.442695, %v6500_v19  ;;  %v7681_v19 = vmul.f32 1.442695, %v7609_v25 }
0x1116   : > { %v16140_v22 = vpop.xlane.xlu0 %7557  ;;  %v6408_v18 = vpop.xlane.xlu1 %6407 }
0x1117   : > { %11371 = vpow2.f32 %v6563_v13  ;;  %v6501_v54 = vsub.f32 %v15856_v50, %v6408_v18  ;;  %v6502_v43 = vsub.f32 %v15858_v9, %v6408_v18 }
0x1118   : > { %11373 = vpow2.f32 %v6565_v28  ;;  %v7683_v28 = vmul.f32 1.442695, %v7610_v31 }
0x1119   : > { %v6567_v26 = vmul.f32 1.442695, %v6501_v54  ;;  %v6569_v34 = vmul.f32 1.442695, %v6502_v43  ;;  %v7611_v54 = vsub.f32 %v15718_v48, %v16106_v52 }
0x111a   : > { %v6411_v27 = vpop.xlane.xlu0 %6410  ;;  %v16146_v61 = vpop.xlane.xlu1 %7554 }
0x111b   : > { %v6503_v45 = vsub.f32 %v15862_v39, %v6411_v27  ;;  %v6504_v62 = vsub.f32 %v15864_v15, %v6411_v27  ;;  %11375 = vpow2.f32 %v6567_v26  ;;  %v7612_v15 = vsub.f32 %v15720_v29, %v16106_v52 }
0x111c   : > { %11377 = vpow2.f32 %v6569_v34 }
0x111d   : > { %v6571_v13 = vmul.f32 1.442695, %v6503_v45  ;;  %v6573_v50 = vmul.f32 1.442695, %v6504_v62  ;;  %v7687_v31 = vmul.f32 1.442695, %v7612_v15 }
0x111e   : > { %v6414_v18 = vpop.xlane.xlu0 %6413  ;;  %v16150_v9 = vpop.xlane.xlu1 %7560 }
0x111f   : > { %11379 = vpow2.f32 %v6571_v13  ;;  %v6505_v36 = vsub.f32 %v15868_v30, %v6414_v18  ;;  %v6506_v20 = vsub.f32 %v15870_v53, %v6414_v18  ;;  %v7685_v53 = vmul.f32 1.442695, %v7611_v54 }
0x1120   : > { %11381 = vpow2.f32 %v6573_v50 }
0x1121   : > { %v16156_v39 = vpop.eup %11371  ;;  %11383 = vpow2.f32 %v7681_v19  ;;  %v6575_v43 = vmul.f32 1.442695, %v6505_v36  ;;  %v6577_v34 = vmul.f32 1.442695, %v6506_v20  ;;  %v7613_v19 = vsub.f32 %v15726_v58, %v16120_v6 }
0x1122   : > { %v16160_v25 = vpop.eup %11373  ;;  %11385 = vpow2.f32 %v7683_v28  ;;  %v16162_v60 = vpop.xlane.xlu0 %7563 }
0x1123   : > { %v16164_v30 = vpop.xlane.xlu1 %7566  ;;  %11387 = vpow2.f32 %v6575_v43  ;;  %v6691_v48 = vadd.f32 %v16160_v25, %v16156_v39 }
0x1124   : > { %11389 = vpow2.f32 %v6577_v34  ;;  %v7689_v34 = vmul.f32 1.442695, %v7613_v19  ;;  %v7616_v19 = vsub.f32 %v15736_v35, %v16114_v47 }
0x1125   : > { %6692 = vadd.xlane.f32.xlu1 %v6691_v48  ;;  %v16168_v52 = vpop.eup %11375  ;;  %11391 = vpow2.f32 %v7685_v53 }
0x1126   : > { %v6420_v26 = vpop.xlane.xlu0 %6419  ;;  %v16173_v62 = vpop.eup %11377  ;;  %11393 = vpow2.f32 %v7687_v31 }
0x1127   : > { %v6417_v7 = vpop.xlane.xlu1 %6416  ;;  %v6509_v29 = vsub.f32 %v15880_v59, %v6420_v26  ;;  %v6510_v27 = vsub.f32 %v15882_v56, %v6420_v26  ;;  %v7614_v59 = vsub.f32 %v15728_v49, %v16120_v6  ;;  %v18866_v56 = vmax.f32 %v15914_v23, %v15917_v46 }
0x1128   : > { %v6507_v45 = vsub.f32 %v15874_v4, %v6417_v7  ;;  %v6508_v13 = vsub.f32 %v15876_v2, %v6417_v7  ;;  %v6694_v58 = vadd.f32 %v16173_v62, %v16168_v52  ;;  %v7615_v7 = vsub.f32 %v15734_v37, %v16114_v47 }
0x1129   : > { %v16178_v50 = vpop.eup %11379  ;;  %v6583_v28 = vmul.f32 1.442695, %v6509_v29  ;;  %v6585_v18 = vmul.f32 1.442695, %v6510_v27  ;;  %7584 = vmax.xlane.f32.xlu1 %v18866_v56  ;;  %v7691_v48 = vmul.f32 1.442695, %v7614_v59 }
0x112a   : > { %18864 = vst [vmem:[#allocation10_spill] sm:$0xff] %v16178_v50  ;;  %v6579_v36 = vmul.f32 1.442695, %v6507_v45  ;;  %v16180_v20 = vpop.eup %11381  ;;  %v6581_v4 = vmul.f32 1.442695, %v6508_v13  ;;  %v16189_v2 = vpop.xlane.xlu0 %7569  ;;  %6695 = vadd.xlane.f32.xlu0 %v6694_v58  ;;  %v18871_v13 = vmax.f32 %v15928_v32, %v15942_v11  ;;  %v18898_v56 = vld [vmem:[#allocation107_spill] sm:$0xff] }
0x112b   : > { %18865 = vst [vmem:[#allocation5_spill] sm:$0xff] %v16180_v20  ;;  %v16191_v54 = vpop.xlane.xlu1 %7572  ;;  %v16193_v15 = vpop.eup %11383  ;;  %11395 = vpow2.f32 %v6583_v28  ;;  %v6697_v49 = vadd.f32 %v16180_v20, %v16178_v50  ;;  %v7695_v58 = vmul.f32 1.442695, %v7616_v19 }
0x112c   : > { %18867 = vst [vmem:[#allocation14_spill] sm:$0xff] %v16193_v15  ;;  %v16195_v43 = vpop.eup %11385  ;;  %11397 = vpow2.f32 %v6585_v18 }
0x112d   : > { %18868 = vst [vmem:[#allocation32_spill] sm:$0xff] %v16195_v43  ;;  %v16199_v6 = vpop.eup %11387  ;;  %11399 = vpow2.f32 %v6579_v36  ;;  %6698 = vadd.xlane.f32.xlu1 %v6697_v49  ;;  %v7805_v18 = vadd.f32 %v16195_v43, %v16193_v15 }
0x112e   : > { %18869 = vst [vmem:[#allocation11_spill] sm:$0xff] %v16199_v6  ;;  %v16201_v53 = vpop.eup %11389  ;;  %11401 = vpow2.f32 %v6581_v4  ;;  %v6426_v31 = vpop.xlane.xlu0 %6425  ;;  %7587 = vmax.xlane.f32.xlu0 %v18871_v13  ;;  %v7618_v13 = vsub.f32 %v15744_v10, %v16124_v0 }
0x112f   : > { %18870 = vst [vmem:[#allocation103_spill] sm:$0xff] %v16201_v53  ;;  %v6423_v26 = vpop.xlane.xlu1 %6422  ;;  %v6513_v29 = vsub.f32 %v15892_v55, %v6426_v31  ;;  %v6514_v27 = vsub.f32 %v15896_v51, %v6426_v31  ;;  %v6700_v37 = vadd.f32 %v16201_v53, %v16199_v6  ;;  %11403 = vpow2.f32 %v7689_v34 }
0x1130   : > { %v6511_v45 = vsub.f32 %v15886_v14, %v6423_v26  ;;  %v6512_v28 = vsub.f32 %v15888_v33, %v6423_v26  ;;  %v16218_v14 = vpop.eup %11391  ;;  %11405 = vpow2.f32 %v7691_v48  ;;  %v7693_v33 = vmul.f32 1.442695, %v7615_v7 }
0x1131   : > { %v6591_v55 = vmul.f32 1.442695, %v6513_v29  ;;  %v6593_v51 = vmul.f32 1.442695, %v6514_v27  ;;  %18872 = vst [vmem:[#allocation104_spill] sm:$0xff] %v16218_v14  ;;  %7806 = vadd.xlane.f32.xlu1 %v7805_v18  ;;  %v16222_v59 = vpop.eup %11393 }
0x1132   : > { %v6587_v36 = vmul.f32 1.442695, %v6511_v45  ;;  %v6589_v35 = vmul.f32 1.442695, %v6512_v28  ;;  %v16220_v47 = vpop.xlane.xlu0 %7575  ;;  %18873 = vst [vmem:[#allocation117_spill] sm:$0xff] %v16222_v59  ;;  %6701 = vadd.xlane.f32.xlu0 %v6700_v37  ;;  %v7808_v48 = vadd.f32 %v16222_v59, %v16218_v14  ;;  %v7617_v45 = vsub.f32 %v15742_v38, %v16124_v0 }
0x1133   : > { %11407 = vpow2.f32 %v6591_v55  ;;  %v7699_v0 = vmul.f32 1.442695, %v7618_v13 }
0x1134   : > { %11409 = vpow2.f32 %v6593_v51  ;;  %v7697_v55 = vmul.f32 1.442695, %v7617_v45  ;;  %v7620_v51 = vsub.f32 %v15750_v12, %v16122_v24 }
0x1135   : > { %v16228_v49 = vpop.eup %11395  ;;  %11411 = vpow2.f32 %v6587_v36  ;;  %v7621_v36 = vsub.f32 %v15754_v16, %v16128_v8 }
0x1136   : > { %18874 = vst [vmem:[#allocation118_spill] sm:$0xff] %v16228_v49  ;;  %v16230_v34 = vpop.eup %11397  ;;  %11413 = vpow2.f32 %v6589_v35  ;;  %v6432_v31 = vpop.xlane.xlu0 %6431  ;;  %7809 = vadd.xlane.f32.xlu0 %v7808_v48  ;;  %v18883_v48 = vmax.f32 %v15975_v1, %v15981_v21 }
0x1137   : > { %18875 = vst [vmem:[#allocation119_spill] sm:$0xff] %v16230_v34  ;;  %v16234_v26 = vpop.eup %11399  ;;  %11415 = vpow2.f32 %v7693_v33  ;;  %v6517_v7 = vsub.f32 %v15908_v41, %v6432_v31  ;;  %v6518_v29 = vsub.f32 %v15910_v3, %v6432_v31  ;;  %v6706_v19 = vadd.f32 %v16230_v34, %v16228_v49 }
0x1138   : > { %18876 = vst [vmem:[#allocation120_spill] sm:$0xff] %v16234_v26  ;;  %v16238_v27 = vpop.eup %11401  ;;  %11417 = vpow2.f32 %v7695_v58  ;;  %v7619_v3 = vsub.f32 %v15748_v63, %v16122_v24  ;;  %v7703_v24 = vmul.f32 1.442695, %v7620_v51  ;;  %v18885_v31 = vmax.f32 %v15988_v5, %v15998_v57 }
0x1139   : > { %18877 = vst [vmem:[#allocation121_spill] sm:$0xff] %v16238_v27  ;;  %v6599_v28 = vmul.f32 1.442695, %v6517_v7  ;;  %v6601_v18 = vmul.f32 1.442695, %v6518_v29  ;;  %v6703_v41 = vadd.f32 %v16238_v27, %v16234_v26  ;;  %v16248_v37 = vpop.eup %11403  ;;  %v7622_v29 = vsub.f32 %v15756_v40, %v16128_v8  ;;  %v18889_v40 = vld [vmem:[#allocation55_spill] sm:$0xff] }
0x113a   : > { %18878 = vst [vmem:[#allocation122_spill] sm:$0xff] %v16248_v37  ;;  %v16252_v38 = vpop.eup %11405  ;;  %6707 = vadd.xlane.f32.xlu0 %v6706_v19  ;;  %v7701_v58 = vmul.f32 1.442695, %v7619_v3  ;;  %v7705_v45 = vmul.f32 1.442695, %v7621_v36  ;;  %v18888_v3 = vld [vmem:[#allocation80_spill] sm:$0xff] }
0x113b   : > { %11419 = vpow2.f32 %v6599_v28  ;;  %6704 = vadd.xlane.f32.xlu1 %v6703_v41  ;;  %18879 = vst [vmem:[#allocation123_spill] sm:$0xff] %v16252_v38  ;;  %v7811_v51 = vadd.f32 %v16252_v38, %v16248_v37  ;;  %v18890_v8 = vld [vmem:[#allocation64_spill] sm:$0xff]  ;;  %v18910_v26 = vld [vmem:[#allocation90_spill] sm:$0xff] }
0x113c   : > { %11421 = vpow2.f32 %v6601_v18 }
0x113d   : > { %v16256_v10 = vpop.eup %11407  ;;  %v7795_v35 = vpop.xlane.xlu1 %7794 }
0x113e   : > { %18880 = vst [vmem:[#allocation124_spill] sm:$0xff] %v16256_v10  ;;  %v16260_v33 = vpop.eup %11409  ;;  %11423 = vrcp.f32 %v7795_v35  ;;  %7593 = vmax.xlane.f32.xlu0 %v18885_v31  ;;  %v7707_v31 = vmul.f32 1.442695, %v7622_v29  ;;  %v18897_v29 = vld [vmem:[#allocation56_spill] sm:$0xff] }
0x113f   : > { %18881 = vst [vmem:[#allocation125_spill] sm:$0xff] %v16260_v33  ;;  %v16262_v63 = vpop.eup %11411  ;;  %7590 = vmax.xlane.f32.xlu1 %v18883_v48  ;;  %11425 = vpow2.f32 %v7697_v55  ;;  %v6712_v16 = vadd.f32 %v16260_v33, %v16256_v10  ;;  %v7625_v4 = vsub.f32 %v18898_v56, %v18897_v29  ;;  %v18901_v56 = vld [vmem:[#allocation48_spill] sm:$0xff] }
0x1140   : > { %18882 = vst [vmem:[#allocation126_spill] sm:$0xff] %v16262_v63  ;;  %v16267_v12 = vpop.eup %11413  ;;  %11427 = vpow2.f32 %v7699_v0  ;;  %v7623_v0 = vsub.f32 %v18890_v8, %v18889_v40  ;;  %v18896_v8 = vld [vmem:[#allocation24_spill] sm:$0xff] }
0x1141   : > { %18884 = vst [vmem:[#allocation127_spill] sm:$0xff] %v16267_v12  ;;  %v16274_v7 = vpop.eup %11415  ;;  %v7798_v19 = vpop.xlane.xlu0 %7797  ;;  %v6709_v13 = vadd.f32 %v16267_v12, %v16262_v63  ;;  %v18906_v63 = vld [vmem:[#allocation81_spill] sm:$0xff] }
0x1142   : > { %18886 = vst [vmem:[#allocation128_spill] sm:$0xff] %v16274_v7  ;;  %v6429_v28 = vpop.xlane.xlu1 %6428  ;;  %v16280_v18 = vpop.eup %11417  ;;  %11429 = vrcp.f32 %v7798_v19  ;;  %6713 = vadd.xlane.f32.xlu0 %v6712_v16  ;;  %v7709_v37 = vmul.f32 1.442695, %v7623_v0  ;;  %v18902_v0 = vld [vmem:[#allocation79_spill] sm:$0xff] }
0x1143   : > { %18887 = vst [vmem:[#allocation129_spill] sm:$0xff] %v16280_v18  ;;  %v6515_v41 = vsub.f32 %v15900_v42, %v6429_v28  ;;  %v6516_v55 = vsub.f32 %v18888_v3, %v6429_v28  ;;  %11431 = vpow2.f32 %v7701_v58  ;;  %6710 = vadd.xlane.f32.xlu1 %v6709_v13  ;;  %v18892_v42 = vld [vmem:[#allocation60_spill] sm:$0xff]  ;;  %v7814_v58 = vadd.f32 %v16280_v18, %v16274_v7  ;;  %v18894_v3 = vld [vmem:[#allocation83_spill] sm:$0xff] }
0x1144   : > { %11433 = vpow2.f32 %v7703_v24  ;;  %v7624_v19 = vsub.f32 %v18892_v42, %v18889_v40  ;;  %v18899_v40 = vld [vmem:[#allocation15_spill] sm:$0xff]  ;;  %v7713_v42 = vmul.f32 1.442695, %v7625_v4 }
0x1145   : > { %v6595_v36 = vmul.f32 1.442695, %v6515_v41  ;;  %v6597_v35 = vmul.f32 1.442695, %v6516_v55  ;;  %v16288_v48 = vpop.eup %11419  ;;  %11435 = vpow2.f32 %v7705_v45  ;;  %v6438_v28 = vpop.xlane.xlu0 %6437  ;;  %v18895_v41 = vld [vmem:[#allocation112_spill] sm:$0xff] }
0x1146   : > { %18891 = vst [vmem:[#allocation80_spill] sm:$0xff] %v16288_v48  ;;  %v16294_v13 = vpop.xlane.xlu1 %7578  ;;  %v16296_v24 = vpop.eup %11421  ;;  %v6521_v16 = vsub.f32 %v18894_v3, %v6438_v28  ;;  %v6522_v55 = vsub.f32 %v18895_v41, %v6438_v28  ;;  %7815 = vadd.xlane.f32.xlu0 %v7814_v58  ;;  %v7711_v28 = vmul.f32 1.442695, %v7624_v19 }
0x1147   : > { %18893 = vst [vmem:[#allocation55_spill] sm:$0xff] %v16296_v24  ;;  %11437 = vpow2.f32 %v6595_v36  ;;  %7812 = vadd.xlane.f32.xlu1 %v7811_v51  ;;  %v6718_v36 = vadd.f32 %v16296_v24, %v16288_v48 }
0x1148   : > { %11439 = vpow2.f32 %v6597_v35  ;;  %v6607_v38 = vmul.f32 1.442695, %v6521_v16  ;;  %v6609_v7 = vmul.f32 1.442695, %v6522_v55  ;;  %v11424_v3 = vpop.eup %11423  ;;  %v18903_v16 = vld [vmem:[#allocation33_spill] sm:$0xff]  ;;  %v18908_v35 = vld [vmem:[#allocation111_spill] sm:$0xff] }
0x1149   : > { %11441 = vpow2.f32 %v7707_v31  ;;  %v16308_v41 = vpop.xlane.xlu0 %7581  ;;  %v16310_v18 = vpop.eup %11425  ;;  %v18905_v31 = vld [vmem:[#allocation85_spill] sm:$0xff] }
0x114a   : > { %v6435_v45 = vpop.xlane.xlu1 %6434  ;;  %18900 = vst [vmem:[#allocation64_spill] sm:$0xff] %v16310_v18  ;;  %11443 = vpow2.f32 %v6607_v38  ;;  %v16317_v55 = vpop.eup %11427  ;;  %6719 = vadd.xlane.f32.xlu0 %v6718_v36  ;;  %v7922_v38 = vmul.f32 %v11424_v3, %v18906_v63  ;;  %v18913_v36 = vld [vmem:[#allocation89_spill] sm:$0xff]  ;;  %v18914_v63 = vld [vmem:[#allocation62_spill] sm:$0xff] }
0x114b   : > { %v6519_v58 = vsub.f32 %v18903_v16, %v6435_v45  ;;  %18904 = vst [vmem:[#allocation60_spill] sm:$0xff] %v16317_v55  ;;  %11445 = vpow2.f32 %v6609_v7  ;;  %v6520_v19 = vsub.f32 %v18905_v31, %v6435_v45  ;;  %v18909_v16 = vld [vmem:[#allocation86_spill] sm:$0xff]  ;;  %v18912_v45 = vld [vmem:[#allocation92_spill] sm:$0xff] }
0x114c   : > { %v11430_v48 = vpop.eup %11429  ;;  %11447 = vpow2.f32 %v7709_v37  ;;  %v7921_v34 = vmul.f32 %v11424_v3, %v18909_v16  ;;  %v18917_v16 = vld [vmem:[#allocation57_spill] sm:$0xff] }
0x114d   : > { %v6603_v24 = vmul.f32 1.442695, %v6519_v58  ;;  %v16321_v12 = vpop.eup %11431  ;;  %v6605_v51 = vmul.f32 1.442695, %v6520_v19  ;;  %v6444_v10 = vpop.xlane.xlu0 %6443  ;;  %v7924_v49 = vmul.f32 %v11430_v48, %v18908_v35  ;;  %v7923_v4 = vmul.f32 %v11430_v48, %v18910_v26  ;;  %v18916_v48 = vld [vmem:[#allocation72_spill] sm:$0xff] }
0x114e   : > { %18907 = vst [vmem:[#allocation83_spill] sm:$0xff] %v16321_v12  ;;  %v7801_v33 = vpop.xlane.xlu1 %7800  ;;  %v16326_v7 = vpop.eup %11433  ;;  %11449 = vpow2.f32 %v7711_v28  ;;  %v6525_v37 = vsub.f32 %v18912_v45, %v6444_v10  ;;  %v6526_v58 = vsub.f32 %v18913_v36, %v6444_v10  ;;  %v7626_v19 = vsub.f32 %v18914_v63, %v18897_v29  ;;  %v18920_v10 = vld [vmem:[#allocation74_spill] sm:$0xff]  ;;  %v18921_v36 = vld [vmem:[#allocation69_spill] sm:$0xff] }
0x114f   : > { %18911 = vst [vmem:[#allocation112_spill] sm:$0xff] %v16326_v7  ;;  %v16330_v31 = vpop.eup %11435  ;;  %11451 = vpow2.f32 %v7713_v42  ;;  %v10164_v27 = vpack.c.bf16 %v7924_v49, %v7922_v38  ;;  %v10166_v14 = vpack.c.bf16 %v7923_v4, %v7921_v34  ;;  %v18918_v28 = vmax.f32 %v18916_v48, %v18917_v16  ;;  %v18922_v49 = vld [vmem:[#allocation21_spill] sm:$0xff]  ;;  %v18923_v42 = vld [vmem:[#allocation87_spill] sm:$0xff] }
0x1150   : > { %11453 = vpow2.f32 %v6603_v24  ;;  %v6615_v3 = vmul.f32 1.442695, %v6525_v37  ;;  %v6617_v26 = vmul.f32 1.442695, %v6526_v58  ;;  %v7627_v15 = vsub.f32 %v18921_v36, %v18920_v10 }
0x1151   : > { %v16334_v35 = vpop.eup %11437  ;;  %7599 = vmax.xlane.f32.xlu0 %v18918_v28  ;;  %11455 = vpow2.f32 %v6605_v51  ;;  %v7804_v59 = vpop.xlane.xlu0 %7803  ;;  %10165 = vmatprep.subr.bf16.mxu0 %v10164_v27  ;;  %v7715_v37 = vmul.f32 1.442695, %v7626_v19  ;;  %v18925_v51 = vld [vmem:[#allocation77_spill] sm:$0xff]  ;;  %v18927_v19 = vld [vmem:[#allocation116_spill] sm:$0xff] }
0x1152   : > { %18915 = vst [vmem:[#allocation24_spill] sm:$0xff] %v16334_v35  ;;  %v16339_v45 = vpop.eup %11439  ;;  %v6441_v29 = vpop.xlane.xlu1 %6440  ;;  %11457 = vpow2.f32 %v6615_v3  ;;  %10167 = vmatpush1.bf16.xpose.msra.mxu0 %v10166_v14  ;;  %v7628_v63 = vsub.f32 %v18925_v51, %v18920_v10  ;;  %v7717_v36 = vmul.f32 1.442695, %v7627_v15  ;;  %v18931_v51 = vld [vmem:[#allocation9_spill] sm:$0xff] }
0x1153   : > { %18919 = vst [vmem:[#allocation56_spill] sm:$0xff] %v16339_v45  ;;  %v6523_v34 = vsub.f32 %v18922_v49, %v6441_v29  ;;  %v6524_v24 = vsub.f32 %v18923_v42, %v6441_v29  ;;  %v6715_v38 = vadd.f32 %v16339_v45, %v16334_v35  ;;  %v16347_v4 = vpop.eup %11441  ;;  %11459 = vpow2.f32 %v6617_v26  ;;  %v18928_v42 = vld [vmem:[#allocation115_spill] sm:$0xff]  ;;  %v18929_v45 = vld [vmem:[#allocation94_spill] sm:$0xff] }
0x1154   : > { %v16349_v58 = vpop.eup %11443  ;;  %11461 = vrcp.f32 %v7801_v33  ;;  %v18930_v33 = vld [vmem:[#allocation93_spill] sm:$0xff]  ;;  %v7719_v15 = vmul.f32 1.442695, %v7628_v63 }
0x1155   : > { %18924 = vst [vmem:[#allocation107_spill] sm:$0xff] %v16349_v58  ;;  %v6611_v27 = vmul.f32 1.442695, %v6523_v34  ;;  %v6613_v3 = vmul.f32 1.442695, %v6524_v24  ;;  %6716 = vadd.xlane.f32.xlu1 %v6715_v38  ;;  %v16353_v28 = vpop.eup %11445  ;;  %11463 = vrcp.f32 %v7804_v59  ;;  %v6450_v14 = vpop.xlane.xlu0 %6449 }
0x1156   : > { %18926 = vst [vmem:[#allocation15_spill] sm:$0xff] %v16353_v28  ;;  %v6447_v29 = vpop.xlane.xlu1 %6446  ;;  %v16355_v49 = vpop.eup %11447  ;;  %v6529_v26 = vsub.f32 %v18927_v19, %v6450_v14  ;;  %v6530_v35 = vsub.f32 %v18928_v42, %v6450_v14  ;;  %v6724_v34 = vadd.f32 %v16353_v28, %v16349_v58 }
0x1157   : > { %11465 = vpow2.f32 %v6611_v27  ;;  %v6527_v16 = vsub.f32 %v18929_v45, %v6447_v29  ;;  %v6528_v10 = vsub.f32 %v18930_v33, %v6447_v29  ;;  %v18932_v27 = vld [vmem:[#allocation23_spill] sm:$0xff]  ;;  %v18935_v29 = vld [vmem:[#allocation102_spill] sm:$0xff]  ;;  %v18936_v33 = vld [vmem:[#allocation101_spill] sm:$0xff] }
0x1158   : > { %11467 = vpow2.f32 %v6613_v3  ;;  %v16363_v24 = vpop.eup %11449  ;;  %v6623_v59 = vmul.f32 1.442695, %v6529_v26  ;;  %v6625_v38 = vmul.f32 1.442695, %v6530_v35  ;;  %v18933_v48 = vmax.f32 %v18931_v51, %v18932_v27  ;;  %6725 = vadd.xlane.f32.xlu0 %v6724_v34  ;;  %v18938_v35 = vld [vmem:[#allocation19_spill] sm:$0xff]  ;;  %v18943_v27 = vld [vmem:[#allocation110_spill] sm:$0xff] }
0x1159   : > { %11469 = vpow2.f32 %v7715_v37  ;;  %v16368_v19 = vpop.eup %11451  ;;  %v6456_v45 = vpop.xlane.xlu0 %6455  ;;  %v6619_v14 = vmul.f32 1.442695, %v6527_v16  ;;  %v18939_v26 = vld [vmem:[#allocation7_spill] sm:$0xff] }
0x115a   : > { %7596 = vmax.xlane.f32.xlu1 %v18933_v48  ;;  %11471 = vpow2.f32 %v7717_v36  ;;  %v16370_v3 = vpop.eup %11453  ;;  %v6533_v42 = vsub.f32 %v18935_v29, %v6456_v45  ;;  %v6534_v37 = vsub.f32 %v18936_v33, %v6456_v45  ;;  %v7629_v58 = vsub.f32 %v18939_v26, %v18938_v35  ;;  %v18942_v29 = vld [vmem:[#allocation100_spill] sm:$0xff] }
0x115b   : > { %18934 = vst [vmem:[#allocation48_spill] sm:$0xff] %v16370_v3  ;;  %11473 = vpow2.f32 %v6623_v59  ;;  %v16374_v63 = vpop.eup %11455  ;;  %v6621_v48 = vmul.f32 1.442695, %v6528_v10  ;;  %v7820_v36 = vadd.f32 %v16326_v7, %v16321_v12  ;;  %v6453_v59 = vpop.xlane.xlu1 %6452  ;;  %v7631_v45 = vsub.f32 %v18943_v27, %v18942_v29  ;;  %v18944_v33 = vld [vmem:[#allocation20_spill] sm:$0xff]  ;;  %v18945_v7 = vld [vmem:[#allocation97_spill] sm:$0xff] }
0x115c   : > { %18937 = vst [vmem:[#allocation79_spill] sm:$0xff] %v16374_v63  ;;  %11475 = vpow2.f32 %v6625_v38  ;;  %v16380_v34 = vpop.eup %11457  ;;  %v6631_v28 = vmul.f32 1.442695, %v6533_v42  ;;  %v7632_v51 = vsub.f32 %v18944_v33, %v18942_v29  ;;  %v6633_v43 = vmul.f32 1.442695, %v6534_v37  ;;  %v18947_v33 = vld [vmem:[#allocation91_spill] sm:$0xff] }
0x115d   : > { %18940 = vst [vmem:[#allocation33_spill] sm:$0xff] %v16380_v34  ;;  %11477 = vpow2.f32 %v7719_v15  ;;  %v16382_v16 = vpop.eup %11459  ;;  %7821 = vadd.xlane.f32.xlu0 %v7820_v36  ;;  %v6721_v10 = vadd.f32 %v16374_v63, %v16370_v3  ;;  %v7721_v12 = vmul.f32 1.442695, %v7629_v58  ;;  %v6531_v6 = vsub.f32 %v18945_v7, %v6453_v59  ;;  %v18946_v36 = vld [vmem:[#allocation96_spill] sm:$0xff]  ;;  %v18948_v3 = vld [vmem:[#allocation113_spill] sm:$0xff] }
0x115e   : > { %18941 = vst [vmem:[#allocation85_spill] sm:$0xff] %v16382_v16  ;;  %v11462_v38 = vpop.eup %11461  ;;  %11479 = vpow2.f32 %v6619_v14  ;;  %v6462_v26 = vpop.xlane.xlu0 %6461  ;;  %v6730_v15 = vadd.f32 %v16382_v16, %v16380_v34  ;;  %v7817_v27 = vadd.f32 %v16317_v55, %v16310_v18  ;;  %v6532_v29 = vsub.f32 %v18946_v36, %v6453_v59  ;;  %v18950_v16 = vld [vmem:[#allocation50_spill] sm:$0xff] }
0x115f   : > { %v11464_v42 = vpop.eup %11463  ;;  %11481 = vpow2.f32 %v6621_v48  ;;  %6722 = vadd.xlane.f32.xlu1 %v6721_v10  ;;  %v7926_v14 = vmul.f32 %v11462_v38, %v18947_v33  ;;  %v7725_v34 = vmul.f32 1.442695, %v7631_v45  ;;  %v7727_v58 = vmul.f32 1.442695, %v7632_v51  ;;  %v18949_v48 = vld [vmem:[#allocation22_spill] sm:$0xff] }
0x1160   : > { %11483 = vpow2.f32 %v6631_v28  ;;  %v7928_v63 = vmul.f32 %v11464_v42, %v18948_v3  ;;  %v6537_v7 = vsub.f32 %v18949_v48, %v6462_v26  ;;  %v6538_v18 = vsub.f32 %v18950_v16, %v6462_v26  ;;  %v18951_v28 = vld [vmem:[#allocation114_spill] sm:$0xff]  ;;  %v18954_v3 = vld [vmem:[#allocation108_spill] sm:$0xff]  ;;  %v6459_v26 = vpop.xlane.xlu1 %6458 }
0x1161   : > { %v16395_v37 = vpop.eup %11465  ;;  %11485 = vpow2.f32 %v6633_v43  ;;  %6731 = vadd.xlane.f32.xlu0 %v6730_v15  ;;  %v7925_v53 = vmul.f32 %v11462_v38, %v18951_v28  ;;  %v18952_v59 = vld [vmem:[#allocation98_spill] sm:$0xff]  ;;  %v7630_v20 = vsub.f32 %v18954_v3, %v18938_v35  ;;  %v6627_v45 = vmul.f32 1.442695, %v6531_v6  ;;  %v18960_v3 = vld [vmem:[#allocation8_spill] sm:$0xff] }
0x1162   : > { %v16400_v50 = vpop.eup %11467  ;;  %v10168_v55 = vpack.c.bf16 %v7928_v63, %v7926_v14  ;;  %v7927_v36 = vmul.f32 %v11464_v42, %v18952_v59  ;;  %v7826_v43 = vadd.f32 %v16363_v24, %v16355_v49  ;;  %11487 = vpow2.f32 %v7721_v12  ;;  %v18955_v63 = vld [vmem:[#allocation25_spill] sm:$0xff]  ;;  %v18956_v6 = vld [vmem:[#allocation6_spill] sm:$0xff] }
0x1163   : > { %v16403_v10 = vpop.eup %11469  ;;  %7818 = vadd.xlane.f32.xlu1 %v7817_v27  ;;  %v6727_v51 = vadd.f32 %v16400_v50, %v16395_v37  ;;  %v7635_v16 = vsub.f32 %v18955_v63, %v16140_v22  ;;  %v6629_v38 = vmul.f32 1.442695, %v6532_v29  ;;  %11489 = vpow2.f32 %v7725_v34  ;;  %v18958_v12 = vld [vmem:[#allocation73_spill] sm:$0xff]  ;;  %v18959_v34 = vld [vmem:[#allocation95_spill] sm:$0xff] }
0x1164   : > { %v16408_v33 = vpop.eup %11471  ;;  %10169 = vmatprep.subr.bf16.mxu0 %v10168_v55  ;;  %v10170_v42 = vpack.c.bf16 %v7927_v36, %v7925_v53  ;;  %v7636_v35 = vsub.f32 %v18956_v6, %v16140_v22  ;;  %v6639_v27 = vmul.f32 1.442695, %v6537_v7  ;;  %11491 = vpow2.f32 %v7727_v58 }
0x1165   : > { %18953 = vst [vmem:[#allocation81_spill] sm:$0xff] %v16408_v33  ;;  %v16416_v15 = vpop.eup %11473  ;;  %7827 = vadd.xlane.f32.xlu0 %v7826_v43  ;;  %v7633_v28 = vsub.f32 %v18958_v12, %v16146_v61  ;;  %v6641_v59 = vmul.f32 1.442695, %v6538_v18  ;;  %v7723_v55 = vmul.f32 1.442695, %v7630_v20  ;;  %11493 = vpow2.f32 %v6627_v45  ;;  %v18961_v18 = vld [vmem:[#allocation61_spill] sm:$0xff] }
0x1166   : > { %v16420_v14 = vpop.eup %11475  ;;  %10171 = vmatpush1.bf16.xpose.msra.mxu0 %v10170_v42  ;;  %v6468_v29 = vpop.xlane.xlu0 %6467  ;;  %v6535_v36 = vsub.f32 %v18959_v34, %v6459_v26  ;;  %v7733_v7 = vmul.f32 1.442695, %v7635_v16  ;;  %11495 = vpow2.f32 %v6629_v38  ;;  %v6536_v58 = vsub.f32 %v18960_v3, %v6459_v26  ;;  %v18965_v38 = vld [vmem:[#allocation13_spill] sm:$0xff] }
0x1167   : > { %v16424_v48 = vpop.eup %11477  ;;  %v6736_v53 = vadd.f32 %v16420_v14, %v16416_v15  ;;  %6728 = vadd.xlane.f32.xlu1 %v6727_v51  ;;  %v7735_v63 = vmul.f32 1.442695, %v7636_v35  ;;  %11497 = vpow2.f32 %v6639_v27  ;;  %v6541_v42 = vsub.f32 %v18961_v18, %v6468_v29  ;;  %v18963_v51 = vld [vmem:[#allocation31_spill] sm:$0xff] }
0x1168   : > { %18957 = vst [vmem:[#allocation111_spill] sm:$0xff] %v16424_v48  ;;  %v16431_v22 = vpop.eup %11479  ;;  %v7823_v20 = vadd.f32 %v16347_v4, %v16330_v31  ;;  %v7729_v6 = vmul.f32 1.442695, %v7633_v28  ;;  %11499 = vpow2.f32 %v6641_v59  ;;  %v6542_v12 = vsub.f32 %v18963_v51, %v6468_v29  ;;  %v6465_v28 = vpop.xlane.xlu1 %6464  ;;  %v18967_v59 = vld [vmem:[#allocation65_spill] sm:$0xff] }
0x1169   : > { %v16434_v43 = vpop.eup %11481  ;;  %6737 = vadd.xlane.f32.xlu0 %v6736_v53  ;;  %11501 = vpow2.f32 %v7723_v55  ;;  %v7634_v26 = vsub.f32 %v18965_v38, %v16146_v61  ;;  %v6635_v35 = vmul.f32 1.442695, %v6535_v36  ;;  %v7832_v27 = vadd.f32 %v16424_v48, %v16408_v33  ;;  %v18966_v53 = vld [vmem:[#allocation67_spill] sm:$0xff]  ;;  %v18968_v36 = vld [vmem:[#allocation78_spill] sm:$0xff] }
0x116a   : > { %v16439_v45 = vpop.eup %11483  ;;  %11503 = vpow2.f32 %v7733_v7  ;;  %v7637_v34 = vsub.f32 %v18966_v53, %v16150_v9  ;;  %v6637_v3 = vmul.f32 1.442695, %v6536_v58  ;;  %v7639_v29 = vsub.f32 %v18967_v59, %v16162_v60 }
0x116b   : > { %18962 = vst [vmem:[#allocation86_spill] sm:$0xff] %v16439_v45  ;;  %v16442_v16 = vpop.eup %11485  ;;  %7824 = vadd.xlane.f32.xlu1 %v7823_v20  ;;  %11505 = vpow2.f32 %v7735_v63  ;;  %v6647_v18 = vmul.f32 1.442695, %v6541_v42  ;;  %v6733_v61 = vadd.f32 %v16434_v43, %v16431_v22  ;;  %v7640_v7 = vsub.f32 %v18968_v36, %v16162_v60  ;;  %v18970_v63 = vld [vmem:[#allocation54_spill] sm:$0xff] }
0x116c   : > { %18964 = vst [vmem:[#allocation90_spill] sm:$0xff] %v16442_v16  ;;  %v16454_v55 = vpop.eup %11487  ;;  %11507 = vpow2.f32 %v7729_v6  ;;  %v6649_v20 = vmul.f32 1.442695, %v6542_v12  ;;  %v7731_v58 = vmul.f32 1.442695, %v7634_v26  ;;  %v6539_v53 = vsub.f32 %v18970_v63, %v6465_v28  ;;  %v18972_v6 = vld [vmem:[#allocation49_spill] sm:$0xff] }
0x116d   : > { %7833 = vadd.xlane.f32.xlu0 %v7832_v27  ;;  %v16458_v38 = vpop.eup %11489  ;;  %11509 = vpow2.f32 %v6635_v35  ;;  %v6742_v42 = vadd.f32 %v16442_v16, %v16439_v45  ;;  %v7737_v59 = vmul.f32 1.442695, %v7637_v34  ;;  %v6540_v33 = vsub.f32 %v18972_v6, %v6465_v28  ;;  %v18974_v12 = vld [vmem:[#allocation36_spill] sm:$0xff]  ;;  %v18976_v63 = vld [vmem:[#allocation38_spill] sm:$0xff] }
0x116e   : > { %v6474_v51 = vpop.xlane.xlu0 %6473  ;;  %18969 = vst [vmem:[#allocation92_spill] sm:$0xff] %v16458_v38  ;;  %v16463_v27 = vpop.eup %11491  ;;  %11511 = vpow2.f32 %v6637_v3  ;;  %v7741_v60 = vmul.f32 1.442695, %v7639_v29  ;;  %v7829_v26 = vadd.f32 %v16403_v10, %v16368_v19  ;;  %v18978_v3 = vld [vmem:[#allocation71_spill] sm:$0xff]  ;;  %v6643_v29 = vmul.f32 1.442695, %v6539_v53 }
0x116f   : > { %6734 = vadd.xlane.f32.xlu1 %v6733_v61  ;;  %18971 = vst [vmem:[#allocation89_spill] sm:$0xff] %v16463_v27  ;;  %v16466_v48 = vpop.eup %11493  ;;  %11513 = vpow2.f32 %v6647_v18  ;;  %v6545_v36 = vsub.f32 %v18974_v12, %v6474_v51  ;;  %v7743_v61 = vmul.f32 1.442695, %v7640_v7  ;;  %v6546_v45 = vsub.f32 %v18976_v63, %v6474_v51  ;;  %v18979_v6 = vld [vmem:[#allocation68_spill] sm:$0xff]  ;;  %v6471_v12 = vpop.xlane.xlu1 %6470 }
0x1170   : > { %18973 = vst [vmem:[#allocation62_spill] sm:$0xff] %v16466_v48  ;;  %v16471_v35 = vpop.eup %11495  ;;  %11515 = vpow2.f32 %v6649_v20  ;;  %v7638_v28 = vsub.f32 %v18978_v3, %v16150_v9  ;;  %v7838_v18 = vadd.f32 %v16463_v27, %v16458_v38  ;;  %v7641_v7 = vsub.f32 %v18979_v6, %v16164_v30 }
0x1171   : > { %6743 = vadd.xlane.f32.xlu0 %v6742_v42  ;;  %18975 = vst [vmem:[#allocation74_spill] sm:$0xff] %v16471_v35  ;;  %v16474_v34 = vpop.eup %11497  ;;  %11517 = vpow2.f32 %v7731_v58  ;;  %v6645_v20 = vmul.f32 1.442695, %v6540_v33  ;;  %v18980_v58 = vld [vmem:[#allocation26_spill] sm:$0xff]  ;;  %v6655_v9 = vmul.f32 1.442695, %v6545_v36  ;;  %v6739_v53 = vadd.f32 %v16471_v35, %v16466_v48 }
0x1172   : > { %18977 = vst [vmem:[#allocation69_spill] sm:$0xff] %v16474_v34  ;;  %v16480_v42 = vpop.eup %11499  ;;  %11519 = vpow2.f32 %v7737_v59  ;;  %v7643_v63 = vsub.f32 %v18980_v58, %v16189_v2  ;;  %v18982_v59 = vld [vmem:[#allocation27_spill] sm:$0xff]  ;;  %v6657_v6 = vmul.f32 1.442695, %v6546_v45  ;;  %v7739_v27 = vmul.f32 1.442695, %v7638_v28 }
0x1173   : > { %7830 = vadd.xlane.f32.xlu1 %v7829_v26  ;;  %v16484_v51 = vpop.eup %11501  ;;  %11521 = vpow2.f32 %v7741_v60  ;;  %v7644_v3 = vsub.f32 %v18982_v59, %v16189_v2  ;;  %v18984_v60 = vld [vmem:[#allocation58_spill] sm:$0xff]  ;;  %v6748_v36 = vadd.f32 %v16480_v42, %v16474_v34  ;;  %v7745_v58 = vmul.f32 1.442695, %v7641_v7  ;;  %v18987_v45 = vld [vmem:[#allocation105_spill] sm:$0xff] }
0x1174   : > { %v16490_v26 = vpop.eup %11503  ;;  %11523 = vpow2.f32 %v7743_v61  ;;  %v6543_v16 = vsub.f32 %v18984_v60, %v6471_v12  ;;  %v18985_v61 = vld [vmem:[#allocation70_spill] sm:$0xff]  ;;  %v7749_v2 = vmul.f32 1.442695, %v7643_v63  ;;  %v7835_v28 = vadd.f32 %v16484_v51, %v16454_v55 }
0x1175   : > { %7839 = vadd.xlane.f32.xlu0 %v7838_v18  ;;  %18981 = vst [vmem:[#allocation21_spill] sm:$0xff] %v16490_v26  ;;  %v16494_v38 = vpop.eup %11505  ;;  %11525 = vpow2.f32 %v6643_v29  ;;  %v6544_v48 = vsub.f32 %v18985_v61, %v6471_v12  ;;  %v18988_v60 = vld [vmem:[#allocation106_spill] sm:$0xff]  ;;  %v18992_v61 = vld [vmem:[#allocation12_spill] sm:$0xff] }
0x1176   : > { %v6480_v33 = vpop.xlane.xlu0 %6479  ;;  %18983 = vst [vmem:[#allocation87_spill] sm:$0xff] %v16494_v38  ;;  %v16499_v18 = vpop.eup %11507  ;;  %11527 = vpow2.f32 %v6645_v20  ;;  %v18990_v20 = vld [vmem:[#allocation66_spill] sm:$0xff]  ;;  %v6651_v63 = vmul.f32 1.442695, %v6543_v16 }
0x1177   : > { %6740 = vadd.xlane.f32.xlu1 %v6739_v53  ;;  %v16502_v35 = vpop.eup %11509  ;;  %11529 = vpow2.f32 %v6655_v9  ;;  %v6549_v59 = vsub.f32 %v18987_v45, %v6480_v33  ;;  %v7751_v53 = vmul.f32 1.442695, %v7644_v3  ;;  %v6550_v34 = vsub.f32 %v18988_v60, %v6480_v33  ;;  %v6477_v45 = vpop.xlane.xlu1 %6476 }
0x1178   : > { %18986 = vst [vmem:[#allocation77_spill] sm:$0xff] %v16502_v35  ;;  %v16507_v29 = vpop.eup %11511  ;;  %11531 = vpow2.f32 %v6657_v6  ;;  %v7642_v12 = vsub.f32 %v18990_v20, %v16164_v30  ;;  %v7844_v9 = vadd.f32 %v16494_v38, %v16490_v26  ;;  %v7645_v3 = vsub.f32 %v18992_v61, %v16191_v54  ;;  %v18993_v61 = vld [vmem:[#allocation35_spill] sm:$0xff]  ;;  %v18994_v26 = vld [vmem:[#allocation37_spill] sm:$0xff] }
0x1179   : > { %6749 = vadd.xlane.f32.xlu0 %v6748_v36  ;;  %v16510_v7 = vpop.eup %11513  ;;  %11533 = vpow2.f32 %v7739_v27  ;;  %v6653_v6 = vmul.f32 1.442695, %v6544_v48  ;;  %v6663_v27 = vmul.f32 1.442695, %v6549_v59  ;;  %v6745_v30 = vadd.f32 %v16507_v29, %v16502_v35 }
0x117a   : > { %18989 = vst [vmem:[#allocation116_spill] sm:$0xff] %v16510_v7  ;;  %v16516_v36 = vpop.eup %11515  ;;  %11535 = vpow2.f32 %v7745_v58  ;;  %v7747_v58 = vmul.f32 1.442695, %v7642_v12  ;;  %v6547_v48 = vsub.f32 %v18993_v61, %v6477_v45  ;;  %v6548_v38 = vsub.f32 %v18994_v26, %v6477_v45  ;;  %v18996_v12 = vld [vmem:[#allocation34_spill] sm:$0xff]  ;;  %v18998_v26 = vld [vmem:[#allocation39_spill] sm:$0xff] }
0x117b   : > { %7836 = vadd.xlane.f32.xlu1 %v7835_v28  ;;  %18991 = vst [vmem:[#allocation115_spill] sm:$0xff] %v16516_v36  ;;  %v16520_v33 = vpop.eup %11517  ;;  %11537 = vpow2.f32 %v7749_v2  ;;  %v6665_v28 = vmul.f32 1.442695, %v6550_v34  ;;  %v6754_v2 = vadd.f32 %v16516_v36, %v16510_v7  ;;  %v18995_v34 = vsub.f32 %v15832_v44, %v16220_v47  ;;  %v19000_v44 = vld [vmem:[#allocation18_spill] sm:$0xff] }
0x117c   : > { %v16524_v16 = vpop.eup %11519  ;;  %11539 = vpow2.f32 %v7751_v53 }
0x117d   : > { %7845 = vadd.xlane.f32.xlu0 %v7844_v9  ;;  %v16526_v20 = vpop.eup %11521  ;;  %11541 = vpow2.f32 %v6651_v63  ;;  %v7753_v9 = vmul.f32 1.442695, %v7645_v3  ;;  %v7757_v53 = vmul.f32 1.442695, %v18995_v34  ;;  %v18997_v3 = vsub.f32 %v15834_v17, %v16220_v47 }
0x117e   : > { %v6486_v60 = vpop.xlane.xlu0 %6485  ;;  %v16531_v59 = vpop.eup %11523  ;;  %11543 = vpow2.f32 %v6653_v6  ;;  %v6659_v34 = vmul.f32 1.442695, %v6547_v48  ;;  %v6661_v17 = vmul.f32 1.442695, %v6548_v38 }
0x117f   : > { %6746 = vadd.xlane.f32.xlu1 %v6745_v30  ;;  %v16534_v35 = vpop.eup %11525  ;;  %11545 = vpow2.f32 %v6663_v27  ;;  %v6553_v63 = vsub.f32 %v18996_v12, %v6486_v60  ;;  %v7841_v30 = vadd.f32 %v16520_v33, %v16499_v18  ;;  %v7759_v6 = vmul.f32 1.442695, %v18997_v3 }
0x1180   : > { %v16542_v61 = vpop.eup %11527  ;;  %11547 = vpow2.f32 %v6665_v28  ;;  %v6554_v45 = vsub.f32 %v18998_v26, %v6486_v60  ;;  %v7646_v27 = vsub.f32 %v19000_v44, %v16191_v54  ;;  %v7850_v12 = vadd.f32 %v16531_v59, %v16526_v20  ;;  %v19002_v54 = vld [vmem:[#allocation51_spill] sm:$0xff] }
0x1181   : > { %6755 = vadd.xlane.f32.xlu0 %v6754_v2  ;;  %v16548_v7 = vpop.eup %11529  ;;  %11549 = vpow2.f32 %v7747_v58  ;;  %v6483_v2 = vpop.xlane.xlu1 %6482  ;;  %v6671_v28 = vmul.f32 1.442695, %v6553_v63  ;;  %v6751_v60 = vadd.f32 %v16542_v61, %v16534_v35 }
0x1182   : > { %18999 = vst [vmem:[#allocation94_spill] sm:$0xff] %v16548_v7  ;;  %v16554_v36 = vpop.eup %11531  ;;  %11551 = vpow2.f32 %v7753_v9  ;;  %v6551_v48 = vsub.f32 %v19002_v54, %v6483_v2  ;;  %v7755_v44 = vmul.f32 1.442695, %v7646_v27 }
0x1183   : > { %7842 = vadd.xlane.f32.xlu1 %v7841_v30  ;;  %19001 = vst [vmem:[#allocation93_spill] sm:$0xff] %v16554_v36  ;;  %v16556_v47 = vpop.eup %11533  ;;  %11553 = vpow2.f32 %v7757_v53  ;;  %v6673_v30 = vmul.f32 1.442695, %v6554_v45  ;;  %v6760_v38 = vadd.f32 %v16554_v36, %v16548_v7  ;;  %v19005_v53 = vsub.f32 %v18901_v56, %v16308_v41 }
0x1184   : > { %v16560_v58 = vpop.eup %11535  ;;  %11555 = vpow2.f32 %v7759_v6  ;;  %v19006_v6 = vld [vmem:[#allocation40_spill] sm:$0xff]  ;;  %v19008_v45 = vsub.f32 %v18902_v0, %v16308_v41  ;;  %v7847_v7 = vadd.f32 %v16556_v47, %v16524_v16  ;;  %v6667_v56 = vmul.f32 1.442695, %v6551_v48 }
0x1185   : > { %7851 = vadd.xlane.f32.xlu0 %v7850_v12  ;;  %v16563_v26 = vpop.eup %11537  ;;  %11557 = vpow2.f32 %v6659_v34  ;;  %v7765_v63 = vmul.f32 1.442695, %v19005_v53  ;;  %v6552_v12 = vsub.f32 %v19006_v6, %v6483_v2  ;;  %v19009_v34 = vld [vmem:[#allocation44_spill] sm:$0xff] }
0x1186   : > { %v6492_v3 = vpop.xlane.xlu0 %6491  ;;  %19003 = vst [vmem:[#allocation102_spill] sm:$0xff] %v16563_v26  ;;  %v16567_v9 = vpop.eup %11539  ;;  %11559 = vpow2.f32 %v6661_v17  ;;  %v7767_v27 = vmul.f32 1.442695, %v19008_v45  ;;  %v19011_v17 = vld [vmem:[#allocation43_spill] sm:$0xff] }
0x1187   : > { %6752 = vadd.xlane.f32.xlu1 %v6751_v60  ;;  %19004 = vst [vmem:[#allocation101_spill] sm:$0xff] %v16567_v9  ;;  %v16573_v54 = vpop.eup %11541  ;;  %11561 = vpow2.f32 %v6671_v28  ;;  %v6557_v60 = vsub.f32 %v19009_v34, %v6492_v3  ;;  %v6558_v53 = vsub.f32 %v19011_v17, %v6492_v3  ;;  %v7856_v41 = vadd.f32 %v16567_v9, %v16563_v26 }
0x1188   : > { %19007 = vst [vmem:[#allocation19_spill] sm:$0xff] %v16573_v54  ;;  %v16581_v36 = vpop.eup %11543  ;;  %11563 = vpow2.f32 %v6673_v30  ;;  %v6669_v28 = vmul.f32 1.442695, %v6552_v12  ;;  %v19013_v12 = vld [vmem:[#allocation30_spill] sm:$0xff] }
0x1189   : > { %6761 = vadd.xlane.f32.xlu0 %v6760_v38  ;;  %19010 = vst [vmem:[#allocation7_spill] sm:$0xff] %v16581_v36  ;;  %v16584_v2 = vpop.eup %11545  ;;  %11565 = vpow2.f32 %v7755_v44  ;;  %v6489_v38 = vpop.xlane.xlu1 %6488  ;;  %v6679_v45 = vmul.f32 1.442695, %v6557_v60  ;;  %v6757_v48 = vadd.f32 %v16581_v36, %v16573_v54  ;;  %v6681_v44 = vmul.f32 1.442695, %v6558_v53  ;;  %v19017_v53 = vld [vmem:[#allocation52_spill] sm:$0xff] }
0x118a   : > { %v16588_v0 = vpop.eup %11547  ;;  %11567 = vpow2.f32 %v7765_v63  ;;  %v6555_v17 = vsub.f32 %v19013_v12, %v6489_v38 }
0x118b   : > { %7848 = vadd.xlane.f32.xlu1 %v7847_v7  ;;  %v16590_v6 = vpop.eup %11549  ;;  %11569 = vpow2.f32 %v7767_v27  ;;  %v19012_v7 = vsub.f32 %v18896_v8, %v16294_v13  ;;  %v19014_v27 = vld [vmem:[#allocation42_spill] sm:$0xff]  ;;  %v6766_v9 = vadd.f32 %v16588_v0, %v16584_v2  ;;  %v19016_v8 = vsub.f32 %v18899_v40, %v16294_v13 }
0x118c   : > { %v16594_v30 = vpop.eup %11551  ;;  %11571 = vpow2.f32 %v6667_v56  ;;  %v6675_v13 = vmul.f32 1.442695, %v6555_v17 }
0x118d   : > { %7857 = vadd.xlane.f32.xlu0 %v7856_v41  ;;  %v7761_v3 = vmul.f32 1.442695, %v19012_v7  ;;  %v16599_v63 = vpop.eup %11553  ;;  %v19015_v41 = vld [vmem:[#allocation59_spill] sm:$0xff]  ;;  %v7763_v56 = vmul.f32 1.442695, %v19016_v8  ;;  %11573 = vpow2.f32 %v6669_v28  ;;  %v6556_v7 = vsub.f32 %v19017_v53, %v6489_v38 }
0x118e   : > { %v6498_v34 = vpop.xlane.xlu0 %6497  ;;  %v16606_v54 = vpop.eup %11555  ;;  %11575 = vpow2.f32 %v6679_v45 }
0x118f   : > { %6758 = vadd.xlane.f32.xlu1 %v6757_v48  ;;  %v6561_v60 = vsub.f32 %v19014_v27, %v6498_v34  ;;  %v6562_v26 = vsub.f32 %v19015_v41, %v6498_v34  ;;  %v16612_v36 = vpop.eup %11557  ;;  %v7853_v34 = vadd.f32 %v16590_v6, %v16560_v58  ;;  %11577 = vpow2.f32 %v6681_v44 }
0x1190   : > { %v16616_v12 = vpop.eup %11559  ;;  %11579 = vpow2.f32 %v7761_v3  ;;  %v7862_v40 = vadd.f32 %v16606_v54, %v16599_v63  ;;  %v6677_v38 = vmul.f32 1.442695, %v6556_v7 }
0x1191   : > { %v6687_v48 = vmul.f32 1.442695, %v6561_v60  ;;  %6767 = vadd.xlane.f32.xlu0 %v6766_v9  ;;  %v6689_v27 = vmul.f32 1.442695, %v6562_v26  ;;  %v16618_v41 = vpop.eup %11561  ;;  %11581 = vpow2.f32 %v7763_v56  ;;  %v6763_v45 = vadd.f32 %v16616_v12, %v16612_v36 }
0x1192   : > { %19018 = vst [vmem:[#allocation100_spill] sm:$0xff] %v16618_v41  ;;  %v16622_v28 = vpop.eup %11563 }
0x1193   : > { %7854 = vadd.xlane.f32.xlu1 %v7853_v34  ;;  %19019 = vst [vmem:[#allocation110_spill] sm:$0xff] %v16622_v28  ;;  %v16624_v9 = vpop.eup %11565  ;;  %11583 = vpow2.f32 %v6687_v48  ;;  %v6772_v44 = vadd.f32 %v16622_v28, %v16618_v41  ;;  %v19031_v41 = vld [vmem:[#allocation99_spill] sm:$0xff] }
0x1194   : > { %v16628_v26 = vpop.eup %11567  ;;  %11585 = vpow2.f32 %v6689_v27  ;;  %v7859_v60 = vadd.f32 %v16624_v9, %v16594_v30 }
0x1195   : > { %7863 = vadd.xlane.f32.xlu0 %v7862_v40  ;;  %19020 = vst [vmem:[#allocation20_spill] sm:$0xff] %v16628_v26  ;;  %v16630_v3 = vpop.eup %11569  ;;  %11587 = vpow2.f32 %v6675_v13 }
0x1196   : > { %19021 = vst [vmem:[#allocation97_spill] sm:$0xff] %v16630_v3  ;;  %v16634_v17 = vpop.eup %11571  ;;  %11589 = vpow2.f32 %v6677_v38  ;;  %v7868_v53 = vadd.f32 %v16630_v3, %v16628_v26  ;;  %v19030_v26 = vld [vmem:[#allocation41_spill] sm:$0xff] }
0x1197   : > { %6764 = vadd.xlane.f32.xlu1 %v6763_v45  ;;  %19022 = vst [vmem:[#allocation96_spill] sm:$0xff] %v16634_v17  ;;  %v16638_v8 = vpop.eup %11573 }
0x1198   : > { %v16640_v56 = vpop.eup %11575  ;;  %v6769_v34 = vadd.f32 %v16638_v8, %v16634_v17 }
0x1199   : > { %6773 = vadd.xlane.f32.xlu0 %v6772_v44  ;;  %19023 = vst [vmem:[#allocation91_spill] sm:$0xff] %v16640_v56  ;;  %v16644_v7 = vpop.eup %11577 }
0x119a   : > { %19024 = vst [vmem:[#allocation113_spill] sm:$0xff] %v16644_v7  ;;  %v16646_v48 = vpop.eup %11579  ;;  %v6778_v40 = vadd.f32 %v16644_v7, %v16640_v56  ;;  %v6495_v56 = vpop.xlane.xlu1 %6494 }
0x119b   : > { %7860 = vadd.xlane.f32.xlu1 %v7859_v60  ;;  %19025 = vst [vmem:[#allocation22_spill] sm:$0xff] %v16646_v48  ;;  %v16650_v27 = vpop.eup %11581  ;;  %v6559_v3 = vsub.f32 %v19030_v26, %v6495_v56 }
0x119c   : > { %19026 = vst [vmem:[#allocation50_spill] sm:$0xff] %v16650_v27  ;;  %v7865_v44 = vadd.f32 %v16650_v27, %v16646_v48 }
0x119d   : > { %7869 = vadd.xlane.f32.xlu0 %v7868_v53  ;;  %v16652_v13 = vpop.eup %11583  ;;  %v6683_v28 = vmul.f32 1.442695, %v6559_v3 }
0x119e   : > { %19027 = vst [vmem:[#allocation114_spill] sm:$0xff] %v16652_v13  ;;  %v16656_v38 = vpop.eup %11585 }
0x119f   : > { %6770 = vadd.xlane.f32.xlu1 %v6769_v34  ;;  %19028 = vst [vmem:[#allocation98_spill] sm:$0xff] %v16656_v38  ;;  %v16658_v45 = vpop.eup %11587  ;;  %v6784_v53 = vadd.f32 %v16656_v38, %v16652_v13 }
0x11a0   : > { %19029 = vst [vmem:[#allocation108_spill] sm:$0xff] %v16658_v45  ;;  %v16662_v60 = vpop.eup %11589 }
0x11a1   : > { %6779 = vadd.xlane.f32.xlu0 %v6778_v40  ;;  %v6775_v34 = vadd.f32 %v16662_v60, %v16658_v45  ;;  %v6560_v40 = vsub.f32 %v19031_v41, %v6495_v56 }
0x11a3   : > { %7866 = vadd.xlane.f32.xlu1 %v7865_v44  ;;  %v6685_v38 = vmul.f32 1.442695, %v6560_v40 }
0x11a5   : > { %6785 = vadd.xlane.f32.xlu0 %v6784_v53 }
0x11a7   : > { %6776 = vadd.xlane.f32.xlu1 %v6775_v34 }
0x11b2   : > { %v6693_v7 = vpop.xlane.xlu1 %6692 }
0x11b3   : > { %11591 = vrcp.f32 %v6693_v7 }
0x11b6   : > { %v7585_v17 = vpop.xlane.xlu1 %7584 }
0x11b7   : > { %v7653_v48 = vsub.f32 %v15914_v23, %v7585_v17  ;;  %v7654_v44 = vsub.f32 %v15917_v46, %v7585_v17  ;;  %v6696_v27 = vpop.xlane.xlu0 %6695 }
0x11b8   : > { %11593 = vrcp.f32 %v6696_v27 }
0x11b9   : > { %v7769_v53 = vmul.f32 1.442695, %v7653_v48  ;;  %v7771_v13 = vmul.f32 1.442695, %v7654_v44 }
0x11ba   : > { %v6699_v45 = vpop.xlane.xlu1 %6698 }
0x11bb   : > { %11595 = vpow2.f32 %v7769_v53  ;;  %v7588_v34 = vpop.xlane.xlu0 %7587 }
0x11bc   : > { %11597 = vpow2.f32 %v7771_v13  ;;  %v7655_v26 = vsub.f32 %v15928_v32, %v7588_v34  ;;  %v7656_v41 = vsub.f32 %v15942_v11, %v7588_v34 }
0x11bd   : > { %11599 = vpow2.f32 %v6683_v28  ;;  %v11592_v3 = vpop.eup %11591 }
0x11be   : > { %11601 = vpow2.f32 %v6685_v38  ;;  %v7807_v56 = vpop.xlane.xlu1 %7806  ;;  %v7773_v23 = vmul.f32 1.442695, %v7655_v26  ;;  %v7775_v7 = vmul.f32 1.442695, %v7656_v41  ;;  %v6820_v27 = vmul.f32 %v11592_v3, %v16160_v25 }
0x11bf   : > { %11603 = vrcp.f32 %v6699_v45  ;;  %v6702_v46 = vpop.xlane.xlu0 %6701  ;;  %v6819_v32 = vmul.f32 %v11592_v3, %v16156_v39 }
0x11c0   : > { %11605 = vrcp.f32 %v7807_v56 }
0x11c1   : > { %11607 = vpow2.f32 %v7773_v23 }
0x11c2   : > { %11609 = vpow2.f32 %v7775_v7  ;;  %v11594_v17 = vpop.eup %11593 }
0x11c3   : > { %11611 = vrcp.f32 %v6702_v46  ;;  %v7810_v48 = vpop.xlane.xlu0 %7809  ;;  %v6822_v28 = vmul.f32 %v11594_v17, %v16173_v62  ;;  %v6821_v11 = vmul.f32 %v11594_v17, %v16168_v52 }
0x11c4   : > { %11613 = vrcp.f32 %v7810_v48 }
0x11c5   : > { %v16678_v13 = vpop.eup %11595  ;;  %v10100_v45 = vpack.c.bf16 %v6822_v28, %v6820_v27  ;;  %v10102_v40 = vpack.c.bf16 %v6821_v11, %v6819_v32  ;;  %v19038_v32 = vld [vmem:[#allocation5_spill] sm:$0xff] }
0x11c6   : > { %19032 = vst [vmem:[#allocation25_spill] sm:$0xff] %v16678_v13  ;;  %v16680_v38 = vpop.eup %11597 }
0x11c7   : > { %19033 = vst [vmem:[#allocation6_spill] sm:$0xff] %v16680_v38  ;;  %v16682_v44 = vpop.eup %11599  ;;  %v7871_v34 = vadd.f32 %v16680_v38, %v16678_v13  ;;  %v6708_v62 = vpop.xlane.xlu0 %6707  ;;  %10101 = vmatprep.subr.bf16.mxu1 %v10100_v45  ;;  %v19041_v13 = vld [vmem:[#allocation11_spill] sm:$0xff] }
0x11c8   : > { %19034 = vst [vmem:[#allocation73_spill] sm:$0xff] %v16682_v44  ;;  %v6705_v53 = vpop.xlane.xlu1 %6704  ;;  %v16686_v25 = vpop.eup %11601  ;;  %10103 = vmatpush1.bf16.xpose.msra.mxu1 %v10102_v40  ;;  %v19039_v40 = vld [vmem:[#allocation103_spill] sm:$0xff] }
0x11c9   : > { %19035 = vst [vmem:[#allocation95_spill] sm:$0xff] %v16686_v25  ;;  %11615 = vrcp.f32 %v6705_v53  ;;  %v11604_v39 = vpop.eup %11603  ;;  %7872 = vadd.xlane.f32.xlu1 %v7871_v34  ;;  %v6781_v56 = vadd.f32 %v16686_v25, %v16682_v44  ;;  %v19040_v34 = vld [vmem:[#allocation10_spill] sm:$0xff] }
0x11ca   : > { %11617 = vrcp.f32 %v6708_v62  ;;  %v11606_v52 = vpop.eup %11605  ;;  %v6824_v11 = vmul.f32 %v11604_v39, %v19038_v32  ;;  %v6823_v62 = vmul.f32 %v11604_v39, %v19040_v34  ;;  %v19043_v32 = vld [vmem:[#allocation117_spill] sm:$0xff]  ;;  %v19045_v39 = vld [vmem:[#allocation104_spill] sm:$0xff] }
0x11cb   : > { %v16688_v26 = vpop.eup %11607  ;;  %v7594_v7 = vpop.xlane.xlu0 %7593 }
0x11cc   : > { %19036 = vst [vmem:[#allocation8_spill] sm:$0xff] %v16688_v26  ;;  %v7591_v41 = vpop.xlane.xlu1 %7590  ;;  %v16692_v23 = vpop.eup %11609  ;;  %v7659_v48 = vsub.f32 %v15988_v5, %v7594_v7  ;;  %v7660_v27 = vsub.f32 %v15998_v57, %v7594_v7  ;;  %v19042_v57 = vld [vmem:[#allocation32_spill] sm:$0xff] }
0x11cd   : > { %19037 = vst [vmem:[#allocation61_spill] sm:$0xff] %v16692_v23  ;;  %v7657_v46 = vsub.f32 %v15975_v1, %v7591_v41  ;;  %v7658_v3 = vsub.f32 %v15981_v21, %v7591_v41  ;;  %v11612_v17 = vpop.eup %11611  ;;  %v7874_v28 = vadd.f32 %v16692_v23, %v16688_v26  ;;  %6782 = vadd.xlane.f32.xlu1 %v6781_v56 }
0x11ce   : > { %v6826_v53 = vmul.f32 %v11612_v17, %v19039_v40  ;;  %v6825_v1 = vmul.f32 %v11612_v17, %v19041_v13  ;;  %v11614_v38 = vpop.eup %11613  ;;  %v7781_v21 = vmul.f32 1.442695, %v7659_v48  ;;  %v7783_v41 = vmul.f32 1.442695, %v7660_v27  ;;  %v19044_v40 = vld [vmem:[#allocation14_spill] sm:$0xff]  ;;  %v19046_v27 = vld [vmem:[#allocation121_spill] sm:$0xff] }
0x11cf   : > { %v7777_v45 = vmul.f32 1.442695, %v7657_v46  ;;  %v7779_v44 = vmul.f32 1.442695, %v7658_v3  ;;  %7875 = vadd.xlane.f32.xlu0 %v7874_v28  ;;  %v7930_v7 = vmul.f32 %v11606_v52, %v19042_v57  ;;  %v6714_v26 = vpop.xlane.xlu0 %6713  ;;  %v7932_v46 = vmul.f32 %v11614_v38, %v19043_v32  ;;  %v19051_v32 = vld [vmem:[#allocation72_spill] sm:$0xff] }
0x11d0   : > { %v6711_v5 = vpop.xlane.xlu1 %6710  ;;  %v10104_v56 = vpack.c.bf16 %v6826_v53, %v6824_v11  ;;  %v10106_v23 = vpack.c.bf16 %v6825_v1, %v6823_v62  ;;  %v7929_v25 = vmul.f32 %v11606_v52, %v19044_v40  ;;  %v7931_v34 = vmul.f32 %v11614_v38, %v19045_v39  ;;  %v19048_v1 = vld [vmem:[#allocation119_spill] sm:$0xff] }
0x11d1   : > { %11619 = vpow2.f32 %v7777_v45  ;;  %v10172_v17 = vpack.c.bf16 %v7932_v46, %v7930_v7  ;;  %v19047_v45 = vld [vmem:[#allocation120_spill] sm:$0xff] }
0x11d2   : > { %11621 = vpow2.f32 %v7781_v21  ;;  %10105 = vmatprep.subr.bf16.mxu1 %v10104_v56  ;;  %v10174_v48 = vpack.c.bf16 %v7931_v34, %v7929_v25  ;;  %v19049_v21 = vld [vmem:[#allocation118_spill] sm:$0xff] }
0x11d3   : > { %v11616_v13 = vpop.eup %11615  ;;  %11623 = vpow2.f32 %v7783_v41  ;;  %10107 = vmatpush1.bf16.xpose.msra.mxu1 %v10106_v23  ;;  %v7816_v53 = vpop.xlane.xlu0 %7815  ;;  %10173 = vmatprep.subr.bf16.mxu0 %v10172_v17 }
0x11d4   : > { %v11618_v3 = vpop.eup %11617  ;;  %11625 = vpow2.f32 %v7779_v44  ;;  %v6828_v28 = vmul.f32 %v11616_v13, %v19046_v27  ;;  %v6827_v11 = vmul.f32 %v11616_v13, %v19047_v45  ;;  %v7813_v62 = vpop.xlane.xlu1 %7812  ;;  %10175 = vmatpush1.bf16.xpose.msra.mxu0 %v10174_v48  ;;  %v19053_v27 = vld [vmem:[#allocation125_spill] sm:$0xff]  ;;  %v19054_v45 = vld [vmem:[#allocation124_spill] sm:$0xff] }
0x11d5   : > { %11627 = vrcp.f32 %v6714_v26  ;;  %v6830_v52 = vmul.f32 %v11618_v3, %v19048_v1  ;;  %v6829_v38 = vmul.f32 %v11618_v3, %v19049_v21 }
0x11d6   : > { %11629 = vrcp.f32 %v6711_v5  ;;  %v19052_v5 = vld [vmem:[#allocation57_spill] sm:$0xff] }
0x11d7   : > { %11631 = vrcp.f32 %v7816_v53  ;;  %v10108_v41 = vpack.c.bf16 %v6830_v52, %v6828_v28  ;;  %v10110_v44 = vpack.c.bf16 %v6829_v38, %v6827_v11  ;;  %v6720_v23 = vpop.xlane.xlu0 %6719  ;;  %v19056_v52 = vld [vmem:[#allocation126_spill] sm:$0xff] }
0x11d8   : > { %11633 = vrcp.f32 %v7813_v62  ;;  %v19055_v62 = vld [vmem:[#allocation127_spill] sm:$0xff] }
0x11d9   : > { %10109 = vmatprep.subr.bf16.mxu1 %v10108_v41  ;;  %11635 = vrcp.f32 %v6720_v23 }
0x11db   : > { %v16712_v25 = vpop.eup %11619  ;;  %10111 = vmatpush1.bf16.xpose.msra.mxu1 %v10110_v44  ;;  %v19057_v44 = vld [vmem:[#allocation129_spill] sm:$0xff] }
0x11dc   : > { %19050 = vst [vmem:[#allocation31_spill] sm:$0xff] %v16712_v25  ;;  %v16714_v57 = vpop.eup %11621 }
0x11dd   : > { %v16716_v26 = vpop.eup %11623 }
0x11de   : > { %v7600_v7 = vpop.xlane.xlu0 %7599  ;;  %v16718_v56 = vpop.eup %11625  ;;  %v7880_v39 = vadd.f32 %v16716_v26, %v16714_v57 }
0x11df   : > { %v7663_v46 = vsub.f32 %v19051_v32, %v7600_v7  ;;  %v7664_v40 = vsub.f32 %v19052_v5, %v7600_v7  ;;  %v11628_v34 = vpop.eup %11627  ;;  %v7877_v13 = vadd.f32 %v16718_v56, %v16712_v25  ;;  %v19058_v32 = vld [vmem:[#allocation128_spill] sm:$0xff]  ;;  %v19062_v25 = vld [vmem:[#allocation23_spill] sm:$0xff] }
0x11e0   : > { %v11630_v17 = vpop.eup %11629  ;;  %7881 = vadd.xlane.f32.xlu0 %v7880_v39  ;;  %v6834_v28 = vmul.f32 %v11628_v34, %v19053_v27  ;;  %v6833_v11 = vmul.f32 %v11628_v34, %v19054_v45  ;;  %v19059_v39 = vld [vmem:[#allocation123_spill] sm:$0xff]  ;;  %v19060_v34 = vld [vmem:[#allocation122_spill] sm:$0xff] }
0x11e1   : > { %v7789_v3 = vmul.f32 1.442695, %v7663_v46  ;;  %v7791_v48 = vmul.f32 1.442695, %v7664_v40  ;;  %v11632_v53 = vpop.eup %11631  ;;  %7878 = vadd.xlane.f32.xlu1 %v7877_v13  ;;  %v6832_v1 = vmul.f32 %v11630_v17, %v19055_v62  ;;  %v6831_v21 = vmul.f32 %v11630_v17, %v19056_v52  ;;  %v19061_v52 = vld [vmem:[#allocation9_spill] sm:$0xff] }
0x11e2   : > { %v6717_v38 = vpop.xlane.xlu1 %6716  ;;  %v11634_v41 = vpop.eup %11633  ;;  %v7936_v7 = vmul.f32 %v11632_v53, %v19057_v44  ;;  %v7935_v46 = vmul.f32 %v11632_v53, %v19058_v32  ;;  %v19065_v32 = vld [vmem:[#allocation55_spill] sm:$0xff] }
0x11e3   : > { %11637 = vpow2.f32 %v7789_v3  ;;  %v10112_v5 = vpack.c.bf16 %v6834_v28, %v6832_v1  ;;  %v10114_v40 = vpack.c.bf16 %v6833_v11, %v6831_v21  ;;  %v7934_v27 = vmul.f32 %v11634_v41, %v19059_v39  ;;  %v11636_v53 = vpop.eup %11635  ;;  %v19067_v39 = vld [vmem:[#allocation24_spill] sm:$0xff] }
0x11e4   : > { %11639 = vpow2.f32 %v7791_v48  ;;  %v7933_v23 = vmul.f32 %v11634_v41, %v19060_v34  ;;  %v19068_v34 = vld [vmem:[#allocation80_spill] sm:$0xff] }
0x11e5   : > { %11641 = vrcp.f32 %v6717_v38  ;;  %10113 = vmatprep.subr.bf16.mxu1 %v10112_v5  ;;  %v10176_v13 = vpack.c.bf16 %v7936_v7, %v7934_v27  ;;  %v6726_v62 = vpop.xlane.xlu0 %6725  ;;  %v19066_v5 = vld [vmem:[#allocation56_spill] sm:$0xff] }
0x11e6   : > { %10115 = vmatpush1.bf16.xpose.msra.mxu1 %v10114_v40  ;;  %v10178_v17 = vpack.c.bf16 %v7935_v46, %v7933_v23  ;;  %11643 = vrcp.f32 %v6726_v62  ;;  %v6838_v46 = vmul.f32 %v11636_v53, %v19065_v32  ;;  %v6837_v23 = vmul.f32 %v11636_v53, %v19068_v34  ;;  %v19071_v32 = vld [vmem:[#allocation15_spill] sm:$0xff] }
0x11e7   : > { %v7597_v45 = vpop.xlane.xlu1 %7596  ;;  %10177 = vmatprep.subr.bf16.mxu0 %v10176_v13 }
0x11e8   : > { %v7661_v3 = vsub.f32 %v19061_v52, %v7597_v45  ;;  %v7662_v44 = vsub.f32 %v19062_v25, %v7597_v45  ;;  %10179 = vmatpush1.bf16.xpose.msra.mxu0 %v10178_v17 }
0x11ea   : > { %v7785_v48 = vmul.f32 1.442695, %v7661_v3  ;;  %v7787_v28 = vmul.f32 1.442695, %v7662_v44  ;;  %v7822_v11 = vpop.xlane.xlu0 %7821 }
0x11ec   : > { %11645 = vpow2.f32 %v7785_v48  ;;  %v6723_v21 = vpop.xlane.xlu1 %6722 }
0x11ed   : > { %11647 = vpow2.f32 %v7787_v28  ;;  %v16736_v1 = vpop.eup %11637 }
0x11ee   : > { %19063 = vst [vmem:[#allocation13_spill] sm:$0xff] %v16736_v1  ;;  %v16738_v38 = vpop.eup %11639  ;;  %11649 = vrcp.f32 %v6723_v21  ;;  %v6732_v25 = vpop.xlane.xlu0 %6731 }
0x11ef   : > { %19064 = vst [vmem:[#allocation67_spill] sm:$0xff] %v16738_v38  ;;  %v11642_v41 = vpop.eup %11641  ;;  %v7886_v7 = vadd.f32 %v16738_v38, %v16736_v1  ;;  %11651 = vrcp.f32 %v7822_v11 }
0x11f0   : > { %v6836_v40 = vmul.f32 %v11642_v41, %v19066_v5  ;;  %v6835_v27 = vmul.f32 %v11642_v41, %v19067_v39  ;;  %v7819_v13 = vpop.xlane.xlu1 %7818  ;;  %v11644_v52 = vpop.eup %11643  ;;  %v19070_v41 = vld [vmem:[#allocation79_spill] sm:$0xff] }
0x11f1   : > { %7887 = vadd.xlane.f32.xlu0 %v7886_v7  ;;  %11653 = vrcp.f32 %v7819_v13 }
0x11f2   : > { %v10116_v45 = vpack.c.bf16 %v6838_v46, %v6836_v40  ;;  %v10118_v17 = vpack.c.bf16 %v6837_v23, %v6835_v27  ;;  %v7828_v62 = vpop.xlane.xlu0 %7827  ;;  %11655 = vrcp.f32 %v6732_v25  ;;  %v6842_v25 = vmul.f32 %v11644_v52, %v19071_v32  ;;  %v19072_v46 = vld [vmem:[#allocation48_spill] sm:$0xff]  ;;  %v19073_v40 = vld [vmem:[#allocation107_spill] sm:$0xff] }
0x11f3   : > { %v6841_v39 = vmul.f32 %v11644_v52, %v19073_v40  ;;  %v19077_v32 = vld [vmem:[#allocation83_spill] sm:$0xff] }
0x11f4   : > { %10117 = vmatprep.subr.bf16.mxu1 %v10116_v45  ;;  %v6729_v44 = vpop.xlane.xlu1 %6728 }
0x11f5   : > { %10119 = vmatpush1.bf16.xpose.msra.mxu1 %v10118_v17  ;;  %11657 = vrcp.f32 %v6729_v44 }
0x11f6   : > { %v16746_v3 = vpop.eup %11645  ;;  %v6738_v28 = vpop.xlane.xlu0 %6737  ;;  %11659 = vrcp.f32 %v7828_v62  ;;  %v19074_v62 = vld [vmem:[#allocation60_spill] sm:$0xff] }
0x11f7   : > { %19069 = vst [vmem:[#allocation65_spill] sm:$0xff] %v16746_v3  ;;  %v16748_v48 = vpop.eup %11647 }
0x11f8   : > { %v7883_v11 = vadd.f32 %v16748_v48, %v16746_v3  ;;  %v11650_v53 = vpop.eup %11649  ;;  %v7825_v21 = vpop.xlane.xlu1 %7824 }
0x11f9   : > { %v6840_v7 = vmul.f32 %v11650_v53, %v19070_v41  ;;  %v6839_v5 = vmul.f32 %v11650_v53, %v19072_v46  ;;  %v11652_v27 = vpop.eup %11651  ;;  %11661 = vrcp.f32 %v7825_v21  ;;  %v19076_v41 = vld [vmem:[#allocation64_spill] sm:$0xff] }
0x11fa   : > { %7884 = vadd.xlane.f32.xlu1 %v7883_v11  ;;  %v7834_v34 = vpop.xlane.xlu0 %7833  ;;  %11663 = vrcp.f32 %v6738_v28  ;;  %v19075_v11 = vld [vmem:[#allocation112_spill] sm:$0xff]  ;;  %v7939_v38 = vmul.f32 %v11652_v27, %v19077_v32 }
0x11fb   : > { %v10120_v23 = vpack.c.bf16 %v6842_v25, %v6840_v7  ;;  %v10122_v13 = vpack.c.bf16 %v6841_v39, %v6839_v5  ;;  %v11654_v45 = vpop.eup %11653  ;;  %v7940_v1 = vmul.f32 %v11652_v27, %v19075_v11  ;;  %v19078_v5 = vld [vmem:[#allocation85_spill] sm:$0xff] }
0x11fc   : > { %v6735_v17 = vpop.xlane.xlu1 %6734  ;;  %v7938_v44 = vmul.f32 %v11654_v45, %v19074_v62  ;;  %v7937_v3 = vmul.f32 %v11654_v45, %v19076_v41  ;;  %v11656_v53 = vpop.eup %11655 }
0x11fd   : > { %10121 = vmatprep.subr.bf16.mxu1 %v10120_v23  ;;  %11665 = vrcp.f32 %v6735_v17  ;;  %v6846_v40 = vmul.f32 %v11656_v53, %v19078_v5  ;;  %v19079_v23 = vld [vmem:[#allocation33_spill] sm:$0xff] }
0x11fe   : > { %10123 = vmatpush1.bf16.xpose.msra.mxu1 %v10122_v13  ;;  %v6744_v52 = vpop.xlane.xlu0 %6743  ;;  %v10180_v21 = vpack.c.bf16 %v7940_v1, %v7938_v44  ;;  %v10182_v46 = vpack.c.bf16 %v7939_v38, %v7937_v3  ;;  %11667 = vrcp.f32 %v7834_v34  ;;  %v6845_v45 = vmul.f32 %v11656_v53, %v19079_v23  ;;  %v254_v53 = vld [vmem:[%s17617_s2 + $0x58] sm:$0xff] }
0x11ff   : > { %v11658_v7 = vpop.eup %11657 }
0x1200   : > { %10181 = vmatprep.subr.bf16.mxu0 %v10180_v21  ;;  %v7831_v28 = vpop.xlane.xlu1 %7830  ;;  %v6844_v25 = vmul.f32 %v11658_v7, %v16400_v50  ;;  %v6843_v39 = vmul.f32 %v11658_v7, %v16395_v37  ;;  %v11660_v62 = vpop.eup %11659 }
0x1201   : > { %11669 = vrcp.f32 %v7831_v28  ;;  %10183 = vmatpush1.bf16.xpose.msra.mxu0 %v10182_v46  ;;  %v7944_v50 = vmul.f32 %v11660_v62, %v16363_v24  ;;  %v7943_v37 = vmul.f32 %v11660_v62, %v16355_v49 }
0x1202   : > { %v7840_v27 = vpop.xlane.xlu0 %7839  ;;  %v10124_v13 = vpack.c.bf16 %v6846_v40, %v6844_v25  ;;  %v10126_v17 = vpack.c.bf16 %v6845_v45, %v6843_v39  ;;  %11671 = vrcp.f32 %v6744_v52 }
0x1203   : > { %v11662_v1 = vpop.eup %11661 }
0x1204   : > { %10125 = vmatprep.subr.bf16.mxu1 %v10124_v13  ;;  %v6741_v38 = vpop.xlane.xlu1 %6740  ;;  %v7942_v3 = vmul.f32 %v11662_v1, %v16347_v4  ;;  %v7941_v34 = vmul.f32 %v11662_v1, %v16330_v31  ;;  %v11664_v44 = vpop.eup %11663 }
0x1205   : > { %11673 = vrcp.f32 %v6741_v38  ;;  %v6850_v31 = vmul.f32 %v11664_v44, %v16420_v14  ;;  %v6849_v21 = vmul.f32 %v11664_v44, %v16416_v15  ;;  %v19082_v38 = vld [vmem:[#allocation74_spill] sm:$0xff] }
0x1206   : > { %10127 = vmatpush1.bf16.xpose.msra.mxu1 %v10126_v17  ;;  %v6750_v11 = vpop.xlane.xlu0 %6749  ;;  %v10184_v41 = vpack.c.bf16 %v7944_v50, %v7942_v3  ;;  %v10186_v32 = vpack.c.bf16 %v7943_v37, %v7941_v34  ;;  %11675 = vrcp.f32 %v7840_v27  ;;  %v19083_v50 = vld [vmem:[#allocation90_spill] sm:$0xff] }
0x1207   : > { %v11666_v52 = vpop.eup %11665  ;;  %v19084_v34 = vld [vmem:[#allocation62_spill] sm:$0xff] }
0x1208   : > { %10185 = vmatprep.subr.bf16.mxu0 %v10184_v41  ;;  %v7837_v4 = vpop.xlane.xlu1 %7836  ;;  %v6848_v24 = vmul.f32 %v11666_v52, %v16434_v43  ;;  %v6847_v49 = vmul.f32 %v11666_v52, %v16431_v22  ;;  %v11668_v46 = vpop.eup %11667  ;;  %v19080_v43 = vld [vmem:[#allocation111_spill] sm:$0xff]  ;;  %v19081_v22 = vld [vmem:[#allocation81_spill] sm:$0xff]  ;;  %v19085_v44 = vld [vmem:[#allocation86_spill] sm:$0xff] }
0x1209   : > { %11677 = vrcp.f32 %v7837_v4  ;;  %10187 = vmatpush1.bf16.xpose.msra.mxu0 %v10186_v32  ;;  %v7948_v23 = vmul.f32 %v11668_v46, %v19080_v43  ;;  %v7947_v45 = vmul.f32 %v11668_v46, %v19081_v22  ;;  %v19087_v46 = vld [vmem:[#allocation92_spill] sm:$0xff] }
0x120a   : > { %v7846_v7 = vpop.xlane.xlu0 %7845  ;;  %v10128_v28 = vpack.c.bf16 %v6850_v31, %v6848_v24  ;;  %v10130_v25 = vpack.c.bf16 %v6849_v21, %v6847_v49  ;;  %11679 = vrcp.f32 %v6750_v11  ;;  %v19086_v31 = vld [vmem:[#allocation89_spill] sm:$0xff] }
0x120b   : > { %312 = vperm.xlu1 %10394, %v254_v53   ;;  %v11670_v5 = vpop.eup %11669 }
0x120c   : > { %10129 = vmatprep.subr.bf16.mxu1 %v10128_v28  ;;  %v6747_v40 = vpop.xlane.xlu1 %6746  ;;  %v7946_v39 = vmul.f32 %v11670_v5, %v16403_v10  ;;  %v7945_v14 = vmul.f32 %v11670_v5, %v16368_v19  ;;  %v11672_v15 = vpop.eup %11671 }
0x120d   : > { %11681 = vrcp.f32 %v6747_v40  ;;  %v6854_v10 = vmul.f32 %v11672_v15, %v19083_v50  ;;  %v6853_v19 = vmul.f32 %v11672_v15, %v19085_v44  ;;  %v19091_v50 = vld [vmem:[#allocation87_spill] sm:$0xff] }
0x120e   : > { %10131 = vmatpush1.bf16.xpose.msra.mxu1 %v10130_v25  ;;  %v6756_v62 = vpop.xlane.xlu0 %6755  ;;  %v10188_v27 = vpack.c.bf16 %v7948_v23, %v7946_v39  ;;  %v10190_v13 = vpack.c.bf16 %v7947_v45, %v7945_v14  ;;  %11683 = vrcp.f32 %v7846_v7  ;;  %v19088_v14 = vld [vmem:[#allocation77_spill] sm:$0xff] }
0x120f   : > { %v11674_v17 = vpop.eup %11673  ;;  %v19089_v45 = vld [vmem:[#allocation69_spill] sm:$0xff] }
0x1210   : > { %10189 = vmatprep.subr.bf16.mxu0 %v10188_v27  ;;  %v7843_v1 = vpop.xlane.xlu1 %7842  ;;  %v6852_v3 = vmul.f32 %v11674_v17, %v19082_v38  ;;  %v6851_v37 = vmul.f32 %v11674_v17, %v19084_v34  ;;  %v11676_v11 = vpop.eup %11675  ;;  %v19092_v34 = vld [vmem:[#allocation21_spill] sm:$0xff] }
0x1211   : > { %11685 = vrcp.f32 %v7843_v1  ;;  %10191 = vmatpush1.bf16.xpose.msra.mxu0 %v10190_v13  ;;  %v7952_v49 = vmul.f32 %v11676_v11, %v19086_v31  ;;  %v7951_v7 = vmul.f32 %v11676_v11, %v19087_v46  ;;  %v19090_v1 = vld [vmem:[#allocation46_spill] sm:$0xff] }
0x1212   : > { %v7852_v41 = vpop.xlane.xlu0 %7851  ;;  %v10132_v32 = vpack.c.bf16 %v6854_v10, %v6852_v3  ;;  %v10134_v53 = vpack.c.bf16 %v6853_v19, %v6851_v37  ;;  %11687 = vrcp.f32 %v6756_v62  ;;  %v8178_v38 = vrot.slane %v19090_v1, 4 }
0x1213   : > { %v11678_v52 = vpop.eup %11677 }
0x1214   : > { %10133 = vmatprep.subr.bf16.mxu1 %v10132_v32  ;;  %v6753_v4 = vpop.xlane.xlu1 %6752  ;;  %v7950_v24 = vmul.f32 %v11678_v52, %v16484_v51  ;;  %v7949_v21 = vmul.f32 %v11678_v52, %v16454_v55  ;;  %v11680_v28 = vpop.eup %11679 }
0x1215   : > { %11689 = vrcp.f32 %v6753_v4  ;;  %v6858_v51 = vmul.f32 %v11680_v28, %v16480_v42  ;;  %v6857_v55 = vmul.f32 %v11680_v28, %v19089_v45  ;;  %v19095_v45 = vld [vmem:[#allocation7_spill] sm:$0xff] }
0x1216   : > { %10135 = vmatpush1.bf16.xpose.msra.mxu1 %v10134_v53  ;;  %v6762_v25 = vpop.xlane.xlu0 %6761  ;;  %v10192_v5 = vpack.c.bf16 %v7952_v49, %v7950_v24  ;;  %v10194_v40 = vpack.c.bf16 %v7951_v7, %v7949_v21  ;;  %11691 = vrcp.f32 %v7852_v41 }
0x1217   : > { %v11682_v39 = vpop.eup %11681 }
0x1218   : > { %10193 = vmatprep.subr.bf16.mxu0 %v10192_v5  ;;  %v7849_v43 = vpop.xlane.xlu1 %7848  ;;  %v6856_v23 = vmul.f32 %v11682_v39, %v16507_v29  ;;  %v6855_v22 = vmul.f32 %v11682_v39, %v19088_v14  ;;  %v11684_v15 = vpop.eup %11683 }
0x1219   : > { %11693 = vrcp.f32 %v7849_v43  ;;  %10195 = vmatpush1.bf16.xpose.msra.mxu0 %v10194_v40  ;;  %v7956_v42 = vmul.f32 %v11684_v15, %v19091_v50  ;;  %v7955_v37 = vmul.f32 %v11684_v15, %v19092_v34  ;;  %v19096_v15 = vld [vmem:[#allocation93_spill] sm:$0xff]  ;;  %v19100_v34 = vld [vmem:[#allocation102_spill] sm:$0xff] }
0x121a   : > { %v7858_v62 = vpop.xlane.xlu0 %7857  ;;  %v10136_v27 = vpack.c.bf16 %v6858_v51, %v6856_v23  ;;  %v10138_v13 = vpack.c.bf16 %v6857_v55, %v6855_v22  ;;  %11695 = vrcp.f32 %v6762_v25  ;;  %v19099_v50 = vld [vmem:[#allocation101_spill] sm:$0xff] }
0x121b   : > { %v11686_v17 = vpop.eup %11685 }
0x121c   : > { %10137 = vmatprep.subr.bf16.mxu1 %v10136_v27  ;;  %v6759_v3 = vpop.xlane.xlu1 %6758  ;;  %v7954_v29 = vmul.f32 %v11686_v17, %v16520_v33  ;;  %v7953_v10 = vmul.f32 %v11686_v17, %v16499_v18  ;;  %v11688_v44 = vpop.eup %11687  ;;  %v19093_v33 = vld [vmem:[#allocation115_spill] sm:$0xff]  ;;  %v19094_v18 = vld [vmem:[#allocation116_spill] sm:$0xff]  ;;  %v19098_v27 = vld [vmem:[#allocation94_spill] sm:$0xff] }
0x121d   : > { %11697 = vrcp.f32 %v6759_v3  ;;  %v6862_v4 = vmul.f32 %v11688_v44, %v19093_v33  ;;  %v6861_v31 = vmul.f32 %v11688_v44, %v19094_v18 }
0x121e   : > { %8182 = vxpose.xlu0.b32.start.end [1/1] (short) %v8178_v38, 128  ;;  %10139 = vmatpush1.bf16.xpose.msra.mxu1 %v10138_v13  ;;  %v6768_v19 = vpop.xlane.xlu0 %6767  ;;  %v10196_v11 = vpack.c.bf16 %v7956_v42, %v7954_v29  ;;  %v10198_v41 = vpack.c.bf16 %v7955_v37, %v7953_v10  ;;  %11699 = vrcp.f32 %v7858_v62  ;;  %v19097_v62 = vld [vmem:[#allocation19_spill] sm:$0xff] }
0x121f   : > { %v11690_v32 = vpop.eup %11689 }
0x1220   : > { %10197 = vmatprep.subr.bf16.mxu0 %v10196_v11  ;;  %v7855_v53 = vpop.xlane.xlu1 %7854  ;;  %v6860_v52 = vmul.f32 %v11690_v32, %v16542_v61  ;;  %v6859_v24 = vmul.f32 %v11690_v32, %v16534_v35  ;;  %v11692_v49 = vpop.eup %11691  ;;  %v19101_v32 = vld [vmem:[#allocation109_spill] sm:$0xff] }
0x1221   : > { %11701 = vrcp.f32 %v7855_v53  ;;  %10199 = vmatpush1.bf16.xpose.msra.mxu0 %v10198_v41  ;;  %v7960_v61 = vmul.f32 %v11692_v49, %v16531_v59  ;;  %v7959_v35 = vmul.f32 %v11692_v49, %v16526_v20  ;;  %v8179_v53 = vrot.slane %v19101_v32, 4  ;;  %v19112_v32 = vld [vmem:[#allocation95_spill] sm:$0xff] }
0x1222   : > { %v7864_v21 = vpop.xlane.xlu0 %7863  ;;  %v10140_v46 = vpack.c.bf16 %v6862_v4, %v6860_v52  ;;  %v10142_v7 = vpack.c.bf16 %v6861_v31, %v6859_v24  ;;  %11703 = vrcp.f32 %v6768_v19 }
0x1223   : > { %v11694_v28 = vpop.eup %11693 }
0x1224   : > { %10141 = vmatprep.subr.bf16.mxu1 %v10140_v46  ;;  %v6765_v25 = vpop.xlane.xlu1 %6764  ;;  %v7958_v5 = vmul.f32 %v11694_v28, %v16556_v47  ;;  %v7957_v40 = vmul.f32 %v11694_v28, %v16524_v16  ;;  %v11696_v39 = vpop.eup %11695 }
0x1225   : > { %11705 = vrcp.f32 %v6765_v25  ;;  %v6866_v47 = vmul.f32 %v11696_v39, %v19096_v15  ;;  %v6865_v16 = vmul.f32 %v11696_v39, %v19098_v27  ;;  %v19103_v39 = vld [vmem:[#allocation96_spill] sm:$0xff]  ;;  %v19107_v15 = vld [vmem:[#allocation22_spill] sm:$0xff] }
0x1226   : > { %10143 = vmatpush1.bf16.xpose.msra.mxu1 %v10142_v7  ;;  %v6774_v43 = vpop.xlane.xlu0 %6773  ;;  %v10200_v23 = vpack.c.bf16 %v7960_v61, %v7958_v5  ;;  %v10202_v51 = vpack.c.bf16 %v7959_v35, %v7957_v40  ;;  %11707 = vrcp.f32 %v7864_v21  ;;  %v19102_v40 = vld [vmem:[#allocation110_spill] sm:$0xff] }
0x1227   : > { %v11698_v14 = vpop.eup %11697 }
0x1228   : > { %10201 = vmatprep.subr.bf16.mxu0 %v10200_v23  ;;  %v7861_v22 = vpop.xlane.xlu1 %7860  ;;  %v6864_v55 = vmul.f32 %v11698_v14, %v19095_v45  ;;  %v6863_v59 = vmul.f32 %v11698_v14, %v19097_v62  ;;  %v11700_v13 = vpop.eup %11699  ;;  %v19105_v14 = vld [vmem:[#allocation50_spill] sm:$0xff]  ;;  %v19106_v45 = vld [vmem:[#allocation97_spill] sm:$0xff]  ;;  %v19108_v62 = vld [vmem:[#allocation20_spill] sm:$0xff] }
0x1229   : > { %11709 = vrcp.f32 %v7861_v22  ;;  %10203 = vmatpush1.bf16.xpose.msra.mxu0 %v10202_v51  ;;  %v7964_v42 = vmul.f32 %v11700_v13, %v19099_v50  ;;  %v7963_v37 = vmul.f32 %v11700_v13, %v19100_v34 }
0x122a   : > { %v7870_v20 = vpop.xlane.xlu0 %7869  ;;  %v10144_v17 = vpack.c.bf16 %v6866_v47, %v6864_v55  ;;  %v10146_v1 = vpack.c.bf16 %v6865_v16, %v6863_v59  ;;  %11711 = vrcp.f32 %v6774_v43 }
0x122b   : > { %v11702_v38 = vpop.eup %11701 }
0x122c   : > { %10145 = vmatprep.subr.bf16.mxu1 %v10144_v17  ;;  %v6771_v3 = vpop.xlane.xlu1 %6770  ;;  %v7962_v29 = vmul.f32 %v11702_v38, %v16590_v6  ;;  %v7961_v10 = vmul.f32 %v11702_v38, %v16560_v58  ;;  %v11704_v44 = vpop.eup %11703  ;;  %v19109_v17 = vld [vmem:[#allocation113_spill] sm:$0xff]  ;;  %v19110_v38 = vld [vmem:[#allocation108_spill] sm:$0xff] }
0x122d   : > { %11713 = vrcp.f32 %v6771_v3  ;;  %v6870_v4 = vmul.f32 %v11704_v44, %v16588_v0  ;;  %v6869_v24 = vmul.f32 %v11704_v44, %v16584_v2 }
0x122e   : > { %10147 = vmatpush1.bf16.xpose.msra.mxu1 %v10146_v1  ;;  %v10204_v19 = vpack.c.bf16 %v7964_v42, %v7962_v29  ;;  %v10206_v11 = vpack.c.bf16 %v7963_v37, %v7961_v10  ;;  %11715 = vrcp.f32 %v7870_v20  ;;  %v6780_v52 = vpop.xlane.xlu0 %6779  ;;  %v19111_v29 = vld [vmem:[#allocation91_spill] sm:$0xff] }
0x122f   : > { %v11706_v41 = vpop.eup %11705 }
0x1230   : > { %10205 = vmatprep.subr.bf16.mxu0 %v10204_v19  ;;  %v7867_v33 = vpop.xlane.xlu1 %7866  ;;  %v6868_v6 = vmul.f32 %v11706_v41, %v16616_v12  ;;  %v6867_v58 = vmul.f32 %v11706_v41, %v16612_v36  ;;  %v11708_v18 = vpop.eup %11707 }
0x1231   : > { %11717 = vrcp.f32 %v7867_v33  ;;  %10207 = vmatpush1.bf16.xpose.msra.mxu0 %v10206_v11  ;;  %v7968_v12 = vmul.f32 %v11708_v18, %v16606_v54  ;;  %v7967_v36 = vmul.f32 %v11708_v18, %v16599_v63 }
0x1232   : > { %v10148_v31 = vpack.c.bf16 %v6870_v4, %v6868_v6  ;;  %v10150_v49 = vpack.c.bf16 %v6869_v24, %v6867_v58  ;;  %11719 = vrcp.f32 %v6780_v52  ;;  %v6786_v34 = vpop.xlane.xlu0 %6785  ;;  %v19113_v52 = vld [vmem:[#allocation98_spill] sm:$0xff]  ;;  %v19114_v6 = vld [vmem:[#allocation73_spill] sm:$0xff] }
0x1233   : > { %v11710_v21 = vpop.eup %11709  ;;  %v19115_v58 = vld [vmem:[#allocation114_spill] sm:$0xff] }
0x1234   : > { %8214 = vxpose.xlu1.b32.start.end [1/1] (short) %v8179_v53, 128  ;;  %10149 = vmatprep.subr.bf16.mxu1 %v10148_v31  ;;  %v6777_v46 = vpop.xlane.xlu1 %6776  ;;  %v7966_v7 = vmul.f32 %v11710_v21, %v16624_v9  ;;  %v7965_v0 = vmul.f32 %v11710_v21, %v16594_v30  ;;  %v11712_v28 = vpop.eup %11711  ;;  %v19104_v9 = vld [vmem:[#allocation100_spill] sm:$0xff]  ;;  %v19116_v31 = vld [vmem:[#allocation6_spill] sm:$0xff]  ;;  %v19117_v21 = vld [vmem:[#allocation25_spill] sm:$0xff] }
0x1235   : > { %11721 = vrcp.f32 %v6777_v46  ;;  %v6874_v35 = vmul.f32 %v11712_v28, %v19102_v40  ;;  %v6873_v23 = vmul.f32 %v11712_v28, %v19104_v9  ;;  %v19119_v28 = vld [vmem:[#allocation8_spill] sm:$0xff] }
0x1236   : > { %10151 = vmatpush1.bf16.xpose.msra.mxu1 %v10150_v49  ;;  %v10208_v2 = vpack.c.bf16 %v7968_v12, %v7966_v7  ;;  %v10210_v25 = vpack.c.bf16 %v7967_v36, %v7965_v0  ;;  %11723 = vrcp.f32 %v6786_v34  ;;  %v19118_v12 = vld [vmem:[#allocation61_spill] sm:$0xff]  ;;  %v9669_v34 = vld [vmem:[%s17618_s3 + $0xb0] sm:$0xff] }
0x1237   : > { %v11714_v5 = vpop.eup %11713 }
0x1238   : > { %10209 = vmatprep.subr.bf16.mxu0 %v10208_v2  ;;  %v6872_v61 = vmul.f32 %v11714_v5, %v16638_v8  ;;  %v6871_v43 = vmul.f32 %v11714_v5, %v19103_v39  ;;  %v11716_v54 = vpop.eup %11715 }
0x1239   : > { %10211 = vmatpush1.bf16.xpose.msra.mxu0 %v10210_v25  ;;  %v7972_v55 = vmul.f32 %v11716_v54, %v19106_v45  ;;  %v7971_v8 = vmul.f32 %v11716_v54, %v19108_v62  ;;  %v19123_v62 = vld [vmem:[#allocation28_spill] sm:$0xff] }
0x123a   : > { %v10152_v30 = vpack.c.bf16 %v6874_v35, %v6872_v61  ;;  %v10154_v51 = vpack.c.bf16 %v6873_v23, %v6871_v43  ;;  %v19120_v35 = vld [vmem:[#allocation53_spill] sm:$0xff]  ;;  %v19121_v43 = vmov 0.0  }
0x123b   : > { %v11718_v63 = vpop.eup %11717  ;;  %v6885_v39 = vrot.slane %v19120_v35, 4 }
0x123c   : > { %10153 = vmatprep.subr.bf16.mxu1 %v10152_v30  ;;  %v7970_v22 = vmul.f32 %v11718_v63, %v19105_v14  ;;  %v7969_v47 = vmul.f32 %v11718_v63, %v19107_v15  ;;  %v11720_v59 = vpop.eup %11719  ;;  %v19122_v63 = vld [vmem:[#allocation31_spill] sm:$0xff] }
0x123d   : > { %v6878_v1 = vmul.f32 %v11720_v59, %v19109_v17  ;;  %v6877_v50 = vmul.f32 %v11720_v59, %v19111_v29  ;;  %v19124_v59 = vld [vmem:[#allocation67_spill] sm:$0xff] }
0x123e   : > { %10155 = vmatpush1.bf16.xpose.msra.mxu1 %v10154_v51  ;;  %v10212_v27 = vpack.c.bf16 %v7972_v55, %v7970_v22  ;;  %v10214_v16 = vpack.c.bf16 %v7971_v8, %v7969_v47 }
0x123f   : > { %v11722_v13 = vpop.eup %11721 }
0x1240   : > { %10213 = vmatprep.subr.bf16.mxu0 %v10212_v27  ;;  %v6876_v20 = vmul.f32 %v11722_v13, %v16662_v60  ;;  %v6875_v3 = vmul.f32 %v11722_v13, %v19110_v38  ;;  %v11724_v60 = vpop.eup %11723 }
0x1241   : > { %10215 = vmatpush1.bf16.xpose.msra.mxu0 %v10214_v16  ;;  %v6882_v33 = vmul.f32 %v11724_v60, %v19113_v52  ;;  %v6881_v24 = vmul.f32 %v11724_v60, %v19115_v58  ;;  %v19125_v16 = vld [vmem:[#allocation65_spill] sm:$0xff] }
0x1242   : > { %v10156_v42 = vpack.c.bf16 %v6878_v1, %v6876_v20  ;;  %v10158_v10 = vpack.c.bf16 %v6877_v50, %v6875_v3  ;;  %v19126_v20 = vld [vmem:[#allocation13_spill] sm:$0xff] }
0x1243   : > { %v19127_v3 = vld [vmem:[#allocation29_spill] sm:$0xff] }
0x1244   : > { %10157 = vmatprep.subr.bf16.mxu1 %v10156_v42 }
0x1246   : > { %10159 = vmatpush1.bf16.xpose.msra.mxu1 %v10158_v10  ;;  %v9668_v10 = vld [vmem:[%s17618_s3 + $0xa8] sm:$0xff] }
0x1256   : > { %v7873_v37 = vpop.xlane.xlu1 %7872 }
0x1257   : > { %11725 = vrcp.f32 %v7873_v37  ;;  %v9670_v37 = vld [vmem:[%s17618_s3 + $0xb8] sm:$0xff] }
0x125a   : > { %v6783_v44 = vpop.xlane.xlu1 %6782 }
0x125b   : > { %11727 = vrcp.f32 %v6783_v44 }
0x125c   : > { %v7876_v19 = vpop.xlane.xlu0 %7875 }
0x125d   : > { %11729 = vrcp.f32 %v7876_v19 }
0x1261   : > { %v11726_v11 = vpop.eup %11725 }
0x1262   : > { %v7974_v49 = vmul.f32 %v11726_v11, %v19116_v31  ;;  %v7973_v46 = vmul.f32 %v11726_v11, %v19117_v21  ;;  %v9714_v31 = vld [vmem:[%s17618_s3 + $0xd8] sm:$0xff] }
0x1265   : > { %v11728_v41 = vpop.eup %11727 }
0x1266   : > { %v6880_v53 = vmul.f32 %v11728_v41, %v19112_v32  ;;  %v6879_v4 = vmul.f32 %v11728_v41, %v19114_v6  ;;  %v9711_v32 = vld [vmem:[%s17618_s3 + $0xc0] sm:$0xff] }
0x1267   : > { %v11730_v18 = vpop.eup %11729 }
0x1268   : > { %v10160_v7 = vpack.c.bf16 %v6882_v33, %v6880_v53  ;;  %v7976_v0 = vmul.f32 %v11730_v18, %v19118_v12  ;;  %v10162_v36 = vpack.c.bf16 %v6881_v24, %v6879_v4  ;;  %v7975_v2 = vmul.f32 %v11730_v18, %v19119_v28  ;;  %v19129_v53 = vld [vmem:[#allocation45_spill] sm:$0xff]  ;;  %v19130_v33 = vld [vmem:[#allocation63_spill] sm:$0xff]  ;;  %v9712_v4 = vld [vmem:[%s17618_s3 + $0xc8] sm:$0xff] }
0x1269   : > { %v8247_v52 = vrot.slane %v19129_v53, 4  ;;  %v8246_v6 = vrot.slane %v19130_v33, 4  ;;  %v9713_v24 = vld [vmem:[%s17618_s3 + $0xd0] sm:$0xff] }
0x126a   : > { %10161 = vmatprep.subr.bf16.mxu1 %v10160_v7  ;;  %v10216_v25 = vpack.c.bf16 %v7976_v0, %v7974_v49  ;;  %v10218_v5 = vpack.c.bf16 %v7975_v2, %v7973_v46 }
0x126b   : > { %10163 = vmatpush1.bf16.xpose.msra.mxu1 %v10162_v36 }
0x126c   : > { %10217 = vmatprep.subr.bf16.mxu0 %v10216_v25 }
0x126d   : > { %v7882_v61 = vpop.xlane.xlu0 %7881  ;;  %10219 = vmatpush1.bf16.xpose.msra.mxu0 %v10218_v5 }
0x126e   : > { %11731 = vrcp.f32 %v7882_v61  ;;  %v7879_v40 = vpop.xlane.xlu1 %7878 }
0x126f   : > { %11733 = vrcp.f32 %v7879_v40 }
0x1272   : > { %6954 = vmatmul.mubr.f32.vlgmr.msra.gmra.mrb[204].mxu1 %v6885_v39 }
0x1273   : > { %7047 = vmatprep.mubr.f32.mxu1 %v19121_v43 }
0x1278   : > { %v11732_v9 = vpop.eup %11731 }
0x1279   : > { %v11734_v23 = vpop.eup %11733  ;;  %v7980_v54 = vmul.f32 %v11732_v9, %v16716_v26  ;;  %v7979_v30 = vmul.f32 %v11732_v9, %v16714_v57 }
0x127a   : > { %v7978_v51 = vmul.f32 %v11734_v23, %v16718_v56  ;;  %v7977_v14 = vmul.f32 %v11734_v23, %v19122_v63 }
0x127c   : > { %v10220_v22 = vpack.c.bf16 %v7980_v54, %v7978_v51  ;;  %v10222_v45 = vpack.c.bf16 %v7979_v30, %v7977_v14 }
0x127e   : > { %10221 = vmatprep.subr.bf16.mxu0 %v10220_v22  ;;  %v7888_v55 = vpop.xlane.xlu0 %7887 }
0x127f   : > { %10223 = vmatpush1.bf16.xpose.msra.mxu0 %v10222_v45  ;;  %11735 = vrcp.f32 %v7888_v55 }
0x1287   : > { %v7885_v15 = vpop.xlane.xlu1 %7884 }
0x1288   : > { %11737 = vrcp.f32 %v7885_v15 }
0x1289   : > { %v11736_v26 = vpop.eup %11735 }
0x128a   : > { %v7984_v27 = vmul.f32 %v11736_v26, %v19124_v59  ;;  %v7983_v17 = vmul.f32 %v11736_v26, %v19126_v20 }
0x128b   : > { %v313_v47 = vpop.permute.xlu1 %312 }
0x128c   : > { %v16848_v8 = vadd.f32 %v19123_v62, %v313_v47  ;;  %v16856_v29 = vadd.f32 %v19127_v3, %v313_v47 }
0x128e   : > { %8049 = vmatprep.mubr.f32.mxu0 %v16848_v8  ;;  %19128 = vst [vmem:[#allocation78_spill] sm:$0xff] %v16856_v29  ;;  %v9088_v62 = vrot.slane %v16848_v8, 4 }
0x1292   : > { %v11738_v57 = vpop.eup %11737 }
0x1293   : > { %v7982_v56 = vmul.f32 %v11738_v57, %v16748_v48  ;;  %v7981_v13 = vmul.f32 %v11738_v57, %v19125_v16  ;;  %v9667_v48 = vld [vmem:[%s17618_s3 + $0xa0] sm:$0xff] }
0x1295   : > { %v10224_v1 = vpack.c.bf16 %v7984_v27, %v7982_v56  ;;  %v10226_v38 = vpack.c.bf16 %v7983_v17, %v7981_v13 }
0x1297   : > { %10225 = vmatprep.subr.bf16.mxu0 %v10224_v1 }
0x1298   : > { %10227 = vmatpush1.bf16.xpose.msra.mxu0 %v10226_v38 }
0x129e   : > { %v8198_v44 = vpop.trf.xlu0 }
0x129f   : > { %8050 = vmatmul.mubr.f32.vlgmr.msra.gmra.mrb[38].mxu0 %v16856_v29 }
0x12a2   : > { %v8199_v19 = vpop.trf.xlu0 }
0x12a6   : > { %v8200_v60 = vpop.trf.xlu0 }
0x12aa   : > { %v8201_v58 = vpop.trf.xlu0 }
0x12ae   : > { %v8202_v18 = vpop.trf.xlu0 }
0x12b2   : > { %v8203_v49 = vpop.trf.xlu0 }
0x12b4   : > { %v8230_v36 = vpop.trf.xlu1 }
0x12b6   : > { %v8204_v21 = vpop.trf.xlu0 }
0x12b8   : > { %v8231_v2 = vpop.trf.xlu1 }
0x12ba   : > { %v8205_v46 = vpop.trf.xlu0 }
0x12bc   : > { %v8232_v5 = vpop.trf.xlu1 }
0x12be   : > { %v8206_v7 = vpop.trf.xlu0 }
0x12c0   : > { %v8233_v40 = vpop.trf.xlu1 }
0x12c2   : > { %v8207_v12 = vpop.trf.xlu0 }
0x12c4   : > { %v8234_v39 = vpop.trf.xlu1 }
0x12c6   : > { %v8208_v0 = vpop.trf.xlu0 }
0x12c8   : > { %v8235_v23 = vpop.trf.xlu1 }
0x12ca   : > { %v8209_v28 = vpop.trf.xlu0 }
0x12cc   : > { %v8236_v54 = vpop.trf.xlu1 }
0x12ce   : > { %v8210_v25 = vpop.trf.xlu0 }
0x12d0   : > { %v8237_v30 = vpop.trf.xlu1 }
0x12d2   : > { %v8211_v61 = vpop.trf.xlu0 }
0x12d4   : > { %v8238_v51 = vpop.trf.xlu1 }
0x12d6   : > { %v8212_v35 = vpop.trf.xlu0 }
0x12d8   : > { %v8239_v63 = vpop.trf.xlu1 }
0x12da   : > { %v8213_v9 = vpop.trf.xlu0 }
0x12dc   : > { %v8240_v14 = vpop.trf.xlu1 }
0x12e0   : > { %v8241_v22 = vpop.trf.xlu1 }
0x12e4   : > { %v8242_v45 = vpop.trf.xlu1 }
0x12e8   : > { %v8243_v55 = vpop.trf.xlu1 }
0x12ec   : > { %v8244_v15 = vpop.trf.xlu1 }
0x12f0   : > { %v8245_v47 = vpop.trf.xlu1 }
0x1345   : > { %v6955_v50 = vpop.f32.mrb[204].mxu1 }
0x1346   : > { %v6957_v42 = vpop.f32.mrb[205].mxu1 }
0x1347   : > { %9671 = vmatprep.subr.msk.mxu1 %vm652_vm1, %v6957_v42 }
0x1348   : > { %9672 = vmatpush1.msk.msra.mxu1 %vm652_vm1, %v6955_v50 }
0x1349   : > { %9673 = vmatmul.mubr.msk.f32.vlgmr.msra.gmra.mrb[138].mxu1 %vm555_vm2, %v9667_v48 }
0x134a   : > { %7053 = vmatprep.mubr.f32.mxu1 %v19121_v43 }
0x134d   : > { %9674 = vmatmul.mubr.msk.f32.gmra.mrb[132].mxu1 %vm555_vm2, %v9668_v10 }
0x134e   : > { %7059 = vmatprep.mubr.f32.mxu1 %v19121_v43 }
0x1351   : > { %9675 = vmatmul.mubr.msk.f32.gmra.mrb[134].mxu1 %vm555_vm2, %v9669_v34 }
0x1352   : > { %7065 = vmatprep.mubr.f32.mxu1 %v19121_v43 }
0x1355   : > { %9676 = vmatmul.mubr.msk.f32.gmra.mrb[136].mxu1 %vm555_vm2, %v9670_v37 }
0x1356   : > { %8143 = vmatprep.mubr.f32.mxu1 %v19121_v43 }
0x1372   : > { %v8051_v11 = vpop.f32.mrb[38].mxu0 }
0x1373   : > { %v8053_v41 = vpop.f32.mrb[39].mxu0 }
0x1374   : > { %9715 = vmatprep.subr.msk.mxu1 %vm652_vm1, %v8053_v41 }
0x1375   : > { %9716 = vmatpush1.msk.msra.mxu1 %vm652_vm1, %v8051_v11 }
0x1376   : > { %9717 = vmatmul.mubr.msk.f32.vlgmr.msra.gmra.mrb[138].mxu1 %vm555_vm2, %v9711_v32  ;;  %9721 = vmatprep.subr.msk.mxu1 %vm652_vm1, %v8247_v52 }
0x1377   : > { %9722 = vmatpush1.msk.msra.mxu1 %vm652_vm1, %v8246_v6  ;;  %8149 = vmatprep.mubr.f32.mxu1 %v19121_v43 }
0x137a   : > { %9718 = vmatmul.mubr.msk.f32.gmra.mrb[132].mxu1 %vm555_vm2, %v9712_v4 }
0x137b   : > { %8155 = vmatprep.mubr.f32.mxu1 %v19121_v43 }
0x137e   : > { %9719 = vmatmul.mubr.msk.f32.gmra.mrb[134].mxu1 %vm555_vm2, %v9713_v24 }
0x137f   : > { %8161 = vmatprep.mubr.f32.mxu1 %v19121_v43 }
0x1382   : > { %9720 = vmatmul.mubr.msk.f32.gmra.mrb[136].mxu1 %vm555_vm2, %v9714_v31 }
0x1383   : > { %8412 = vmatprep.mubr.f32.mxu1 %v19121_v43 }
0x1386   : > { %9723 = vmatmul.mubr.msk.f32.vlgmr.msra.gmra.mrb[206].mxu1 %vm555_vm2, %v8198_v44 }
0x1387   : > { %8418 = vmatprep.mubr.f32.mxu1 %v19121_v43 }
0x138a   : > { %9724 = vmatmul.mubr.msk.f32.gmra.mrb[208].mxu1 %vm555_vm2, %v8199_v19 }
0x138b   : > { %8424 = vmatprep.mubr.f32.mxu1 %v19121_v43 }
0x138e   : > { %9725 = vmatmul.mubr.msk.f32.gmra.mrb[210].mxu1 %vm555_vm2, %v8200_v60 }
0x138f   : > { %8430 = vmatprep.mubr.f32.mxu1 %v19121_v43 }
0x1392   : > { %9726 = vmatmul.mubr.msk.f32.gmra.mrb[212].mxu1 %vm555_vm2, %v8201_v58 }
0x1393   : > { %8436 = vmatprep.mubr.f32.mxu1 %v19121_v43 }
0x1396   : > { %9727 = vmatmul.mubr.msk.f32.gmra.mrb[214].mxu1 %vm555_vm2, %v8202_v18 }
0x1397   : > { %8442 = vmatprep.mubr.f32.mxu1 %v19121_v43 }
0x139a   : > { %9728 = vmatmul.mubr.msk.f32.gmra.mrb[216].mxu1 %vm555_vm2, %v8203_v49 }
0x139b   : > { %8448 = vmatprep.mubr.f32.mxu1 %v19121_v43 }
0x139e   : > { %9729 = vmatmul.mubr.msk.f32.gmra.mrb[218].mxu1 %vm555_vm2, %v8204_v21 }
0x139f   : > { %8454 = vmatprep.mubr.f32.mxu1 %v19121_v43 }
0x13a2   : > { %9730 = vmatmul.mubr.msk.f32.gmra.mrb[220].mxu1 %vm555_vm2, %v8205_v46 }
0x13a3   : > { %8460 = vmatprep.mubr.f32.mxu1 %v19121_v43 }
0x13a6   : > { %9731 = vmatmul.mubr.msk.f32.gmra.mrb[222].mxu1 %vm555_vm2, %v8206_v7 }
0x13a7   : > { %8466 = vmatprep.mubr.f32.mxu1 %v19121_v43 }
0x13aa   : > { %9732 = vmatmul.mubr.msk.f32.gmra.mrb[224].mxu1 %vm555_vm2, %v8207_v12 }
0x13ab   : > { %8472 = vmatprep.mubr.f32.mxu1 %v19121_v43 }
0x13ae   : > { %9733 = vmatmul.mubr.msk.f32.gmra.mrb[226].mxu1 %vm555_vm2, %v8208_v0 }
0x13af   : > { %8478 = vmatprep.mubr.f32.mxu1 %v19121_v43 }
0x13b2   : > { %9734 = vmatmul.mubr.msk.f32.gmra.mrb[228].mxu1 %vm555_vm2, %v8209_v28 }
0x13b3   : > { %8484 = vmatprep.mubr.f32.mxu1 %v19121_v43 }
0x13b6   : > { %9735 = vmatmul.mubr.msk.f32.gmra.mrb[230].mxu1 %vm555_vm2, %v8210_v25 }
0x13b7   : > { %8490 = vmatprep.mubr.f32.mxu1 %v19121_v43 }
0x13ba   : > { %9736 = vmatmul.mubr.msk.f32.gmra.mrb[232].mxu1 %vm555_vm2, %v8211_v61 }
0x13bb   : > { %8496 = vmatprep.mubr.f32.mxu1 %v19121_v43 }
0x13be   : > { %9737 = vmatmul.mubr.msk.f32.gmra.mrb[234].mxu1 %vm555_vm2, %v8212_v35 }
0x13bf   : > { %8502 = vmatprep.mubr.f32.mxu1 %v19121_v43 }
0x13c2   : > { %9738 = vmatmul.mubr.msk.f32.gmra.mrb[236].mxu1 %vm555_vm2, %v8213_v9 }
0x13c3   : > { %8508 = vmatprep.mubr.f32.mxu1 %v19121_v43 }
0x13c6   : > { %9739 = vmatmul.mubr.msk.f32.gmra.mrb[238].mxu1 %vm555_vm2, %v8230_v36 }
0x13c7   : > { %8514 = vmatprep.mubr.f32.mxu1 %v19121_v43 }
0x13ca   : > { %9740 = vmatmul.mubr.msk.f32.gmra.mrb[240].mxu1 %vm555_vm2, %v8231_v2 }
0x13cb   : > { %8520 = vmatprep.mubr.f32.mxu1 %v19121_v43 }
0x13ce   : > { %9741 = vmatmul.mubr.msk.f32.gmra.mrb[242].mxu1 %vm555_vm2, %v8232_v5 }
0x13cf   : > { %8526 = vmatprep.mubr.f32.mxu1 %v19121_v43 }
0x13d2   : > { %9742 = vmatmul.mubr.msk.f32.gmra.mrb[244].mxu1 %vm555_vm2, %v8233_v40 }
0x13d3   : > { %8532 = vmatprep.mubr.f32.mxu1 %v19121_v43 }
0x13d6   : > { %9743 = vmatmul.mubr.msk.f32.gmra.mrb[246].mxu1 %vm555_vm2, %v8234_v39 }
0x13d7   : > { %8538 = vmatprep.mubr.f32.mxu1 %v19121_v43 }
0x13da   : > { %9744 = vmatmul.mubr.msk.f32.gmra.mrb[248].mxu1 %vm555_vm2, %v8235_v23 }
0x13db   : > { %8544 = vmatprep.mubr.f32.mxu1 %v19121_v43 }
0x13de   : > { %9745 = vmatmul.mubr.msk.f32.gmra.mrb[250].mxu1 %vm555_vm2, %v8236_v54 }
0x13df   : > { %8550 = vmatprep.mubr.f32.mxu1 %v19121_v43 }
0x13e2   : > { %9746 = vmatmul.mubr.msk.f32.gmra.mrb[252].mxu1 %vm555_vm2, %v8237_v30 }
0x13e3   : > { %8556 = vmatprep.mubr.f32.mxu1 %v19121_v43 }
0x13e6   : > { %9747 = vmatmul.mubr.msk.f32.gmra.mrb[254].mxu1 %vm555_vm2, %v8238_v51 }
0x13e7   : > { %8562 = vmatprep.mubr.f32.mxu1 %v19121_v43 }
0x13ea   : > { %9748 = vmatmul.mubr.msk.f32.gmra.mrb[0].mxu1 %vm555_vm2, %v8239_v63 }
0x13eb   : > { %8568 = vmatprep.mubr.f32.mxu1 %v19121_v43 }
0x13ee   : > { %9749 = vmatmul.mubr.msk.f32.gmra.mrb[2].mxu1 %vm555_vm2, %v8240_v14 }
0x13ef   : > { %8574 = vmatprep.mubr.f32.mxu1 %v19121_v43 }
0x13f2   : > { %9750 = vmatmul.mubr.msk.f32.gmra.mrb[4].mxu1 %vm555_vm2, %v8241_v22 }
0x13f3   : > { %8580 = vmatprep.mubr.f32.mxu1 %v19121_v43 }
0x13f6   : > { %9751 = vmatmul.mubr.msk.f32.gmra.mrb[6].mxu1 %vm555_vm2, %v8242_v45 }
0x13f7   : > { %8586 = vmatprep.mubr.f32.mxu1 %v19121_v43 }
0x13fa   : > { %9752 = vmatmul.mubr.msk.f32.gmra.mrb[8].mxu1 %vm555_vm2, %v8243_v55 }
0x13fb   : > { %8592 = vmatprep.mubr.f32.mxu1 %v19121_v43 }
0x13fe   : > { %9753 = vmatmul.mubr.msk.f32.gmra.mrb[10].mxu1 %vm555_vm2, %v8244_v15 }
0x13ff   : > { %8598 = vmatprep.mubr.f32.mxu1 %v19121_v43 }
0x1402   : > { %9754 = vmatmul.mubr.msk.f32.gmra.mrb[12].mxu1 %vm555_vm2, %v8245_v47 }
0x1403   : > { %9155 = vmatprep.mubr.f32.mxu1 %v9088_v62 }
0x1459   : > { %v16971_v26 = vpop.f32.mrb[206].mxu1 }
0x145a   : > { %v16973_v57 = vpop.f32.mrb[207].mxu1 }
0x145b   : > { %v8605_v56 = vmax.f32 %v16971_v26, %v16973_v57 }
0x145d   : > { %8606 = vmax.xlane.f32.xlu0 %v8605_v56  ;;  %v16977_v59 = vpop.f32.mrb[208].mxu1 }
0x145e   : > { %v16979_v27 = vpop.f32.mrb[209].mxu1 }
0x145f   : > { %v8608_v16 = vmax.f32 %v16977_v59, %v16979_v27 }
0x1461   : > { %8609 = vmax.xlane.f32.xlu1 %v8608_v16  ;;  %v16983_v8 = vpop.f32.mrb[210].mxu1 }
0x1462   : > { %v16985_v13 = vpop.f32.mrb[211].mxu1 }
0x1463   : > { %v8611_v20 = vmax.f32 %v16983_v8, %v16985_v13 }
0x1465   : > { %8612 = vmax.xlane.f32.xlu0 %v8611_v20  ;;  %v16989_v17 = vpop.f32.mrb[212].mxu1 }
0x1466   : > { %v16991_v1 = vpop.f32.mrb[213].mxu1 }
0x1467   : > { %v8614_v38 = vmax.f32 %v16989_v17, %v16991_v1 }
0x1469   : > { %8615 = vmax.xlane.f32.xlu0 %v8614_v38  ;;  %v16995_v3 = vpop.f32.mrb[214].mxu1 }
0x146a   : > { %v16997_v50 = vpop.f32.mrb[215].mxu1 }
0x146b   : > { %v8617_v42 = vmax.f32 %v16995_v3, %v16997_v50 }
0x146d   : > { %8618 = vmax.xlane.f32.xlu1 %v8617_v42  ;;  %v17001_v48 = vpop.f32.mrb[216].mxu1 }
0x146e   : > { %v17003_v10 = vpop.f32.mrb[217].mxu1 }
0x146f   : > { %v8620_v34 = vmax.f32 %v17001_v48, %v17003_v10 }
0x1471   : > { %8621 = vmax.xlane.f32.xlu0 %v8620_v34  ;;  %v17007_v37 = vpop.f32.mrb[218].mxu1 }
0x1472   : > { %v17009_v44 = vpop.f32.mrb[219].mxu1 }
0x1473   : > { %v8623_v19 = vmax.f32 %v17007_v37, %v17009_v44 }
0x1475   : > { %8624 = vmax.xlane.f32.xlu1 %v8623_v19  ;;  %v17013_v60 = vpop.f32.mrb[220].mxu1 }
0x1476   : > { %v17015_v11 = vpop.f32.mrb[221].mxu1 }
0x1477   : > { %v8626_v41 = vmax.f32 %v17013_v60, %v17015_v11 }
0x1479   : > { %8627 = vmax.xlane.f32.xlu0 %v8626_v41  ;;  %v17019_v32 = vpop.f32.mrb[222].mxu1 }
0x147a   : > { %v17021_v53 = vpop.f32.mrb[223].mxu1 }
0x147b   : > { %v8629_v52 = vmax.f32 %v17019_v32, %v17021_v53 }
0x147d   : > { %8630 = vmax.xlane.f32.xlu1 %v8629_v52  ;;  %v17025_v33 = vpop.f32.mrb[224].mxu1 }
0x147e   : > { %v17027_v6 = vpop.f32.mrb[225].mxu1 }
0x147f   : > { %v8632_v4 = vmax.f32 %v17025_v33, %v17027_v6 }
0x1481   : > { %8633 = vmax.xlane.f32.xlu0 %v8632_v4  ;;  %v17031_v58 = vpop.f32.mrb[226].mxu1 }
0x1482   : > { %v17033_v24 = vpop.f32.mrb[227].mxu1 }
0x1483   : > { %v8635_v18 = vmax.f32 %v17031_v58, %v17033_v24 }
0x1485   : > { %8636 = vmax.xlane.f32.xlu1 %v8635_v18  ;;  %v17037_v31 = vpop.f32.mrb[228].mxu1 }
0x1486   : > { %v17039_v49 = vpop.f32.mrb[229].mxu1 }
0x1487   : > { %v8638_v21 = vmax.f32 %v17037_v31, %v17039_v49 }
0x1489   : > { %8639 = vmax.xlane.f32.xlu0 %v8638_v21  ;;  %v17043_v46 = vpop.f32.mrb[230].mxu1 }
0x148a   : > { %v17045_v7 = vpop.f32.mrb[231].mxu1 }
0x148b   : > { %v8641_v12 = vmax.f32 %v17043_v46, %v17045_v7 }
0x148d   : > { %8642 = vmax.xlane.f32.xlu1 %v8641_v12  ;;  %v17049_v0 = vpop.f32.mrb[232].mxu1 }
0x148e   : > { %v17051_v36 = vpop.f32.mrb[233].mxu1 }
0x148f   : > { %v8644_v28 = vmax.f32 %v17049_v0, %v17051_v36 }
0x1491   : > { %8645 = vmax.xlane.f32.xlu0 %v8644_v28  ;;  %v17055_v2 = vpop.f32.mrb[234].mxu1 }
0x1492   : > { %v17057_v25 = vpop.f32.mrb[235].mxu1 }
0x1493   : > { %v8647_v5 = vmax.f32 %v17055_v2, %v17057_v25 }
0x1495   : > { %8648 = vmax.xlane.f32.xlu1 %v8647_v5  ;;  %v17061_v61 = vpop.f32.mrb[236].mxu1 }
0x1496   : > { %v17063_v40 = vpop.f32.mrb[237].mxu1 }
0x1497   : > { %v8650_v35 = vmax.f32 %v17061_v61, %v17063_v40 }
0x1499   : > { %8651 = vmax.xlane.f32.xlu0 %v8650_v35  ;;  %v17067_v39 = vpop.f32.mrb[238].mxu1 }
0x149a   : > { %v17069_v9 = vpop.f32.mrb[239].mxu1 }
0x149b   : > { %v8653_v23 = vmax.f32 %v17067_v39, %v17069_v9 }
0x149d   : > { %8654 = vmax.xlane.f32.xlu1 %v8653_v23  ;;  %v17073_v54 = vpop.f32.mrb[240].mxu1 }
0x149e   : > { %v17075_v30 = vpop.f32.mrb[241].mxu1 }
0x149f   : > { %19131 = vst [vmem:[#allocation54_spill] sm:$0xff] %v17075_v30  ;;  %v8656_v51 = vmax.f32 %v17073_v54, %v17075_v30 }
0x14a1   : > { %8657 = vmax.xlane.f32.xlu0 %v8656_v51  ;;  %v17079_v63 = vpop.f32.mrb[242].mxu1 }
0x14a2   : > { %19132 = vst [vmem:[#allocation49_spill] sm:$0xff] %v17079_v63  ;;  %v17081_v14 = vpop.f32.mrb[243].mxu1 }
0x14a3   : > { %19133 = vst [vmem:[#allocation36_spill] sm:$0xff] %v17081_v14  ;;  %v8659_v22 = vmax.f32 %v17079_v63, %v17081_v14 }
0x14a5   : > { %8660 = vmax.xlane.f32.xlu1 %v8659_v22  ;;  %v17085_v45 = vpop.f32.mrb[244].mxu1 }
0x14a6   : > { %19134 = vst [vmem:[#allocation38_spill] sm:$0xff] %v17085_v45  ;;  %v17087_v55 = vpop.f32.mrb[245].mxu1 }
0x14a7   : > { %19135 = vst [vmem:[#allocation71_spill] sm:$0xff] %v17087_v55  ;;  %v8662_v15 = vmax.f32 %v17085_v45, %v17087_v55 }
0x14a9   : > { %8663 = vmax.xlane.f32.xlu0 %v8662_v15  ;;  %v17091_v47 = vpop.f32.mrb[246].mxu1 }
0x14aa   : > { %19136 = vst [vmem:[#allocation68_spill] sm:$0xff] %v17091_v47  ;;  %v17093_v62 = vpop.f32.mrb[247].mxu1 }
0x14ab   : > { %19137 = vst [vmem:[#allocation26_spill] sm:$0xff] %v17093_v62  ;;  %v8665_v56 = vmax.f32 %v17091_v47, %v17093_v62 }
0x14ad   : > { %8666 = vmax.xlane.f32.xlu1 %v8665_v56  ;;  %v17097_v16 = vpop.f32.mrb[248].mxu1 }
0x14ae   : > { %19138 = vst [vmem:[#allocation27_spill] sm:$0xff] %v17097_v16  ;;  %v17099_v20 = vpop.f32.mrb[249].mxu1 }
0x14af   : > { %19139 = vst [vmem:[#allocation58_spill] sm:$0xff] %v17099_v20  ;;  %v8668_v38 = vmax.f32 %v17097_v16, %v17099_v20 }
0x14b1   : > { %8669 = vmax.xlane.f32.xlu0 %v8668_v38  ;;  %v17103_v42 = vpop.f32.mrb[250].mxu1 }
0x14b2   : > { %19140 = vst [vmem:[#allocation70_spill] sm:$0xff] %v17103_v42  ;;  %v17105_v34 = vpop.f32.mrb[251].mxu1 }
0x14b3   : > { %19141 = vst [vmem:[#allocation105_spill] sm:$0xff] %v17105_v34  ;;  %v8671_v19 = vmax.f32 %v17103_v42, %v17105_v34 }
0x14b5   : > { %8672 = vmax.xlane.f32.xlu1 %v8671_v19  ;;  %v17109_v41 = vpop.f32.mrb[252].mxu1 }
0x14b6   : > { %19142 = vst [vmem:[#allocation106_spill] sm:$0xff] %v17109_v41  ;;  %v17111_v52 = vpop.f32.mrb[253].mxu1 }
0x14b7   : > { %19143 = vst [vmem:[#allocation66_spill] sm:$0xff] %v17111_v52  ;;  %v8674_v4 = vmax.f32 %v17109_v41, %v17111_v52 }
0x14b9   : > { %8675 = vmax.xlane.f32.xlu0 %v8674_v4  ;;  %v17115_v18 = vpop.f32.mrb[254].mxu1 }
0x14ba   : > { %v17117_v21 = vpop.f32.mrb[255].mxu1 }
0x14bd   : > { %v17121_v28 = vpop.f32.mrb[0].mxu1 }
0x14be   : > { %v17123_v5 = vpop.f32.mrb[1].mxu1 }
0x14c1   : > { %v17127_v23 = vpop.f32.mrb[2].mxu1 }
0x14c2   : > { %v17129_v51 = vpop.f32.mrb[3].mxu1 }
0x14c5   : > { %v17133_v15 = vpop.f32.mrb[4].mxu1 }
0x14c6   : > { %v17135_v56 = vpop.f32.mrb[5].mxu1 }
0x14c9   : > { %v17139_v19 = vpop.f32.mrb[6].mxu1 }
0x14ca   : > { %v17141_v4 = vpop.f32.mrb[7].mxu1 }
0x14cd   : > { %v17145_v12 = vpop.f32.mrb[8].mxu1 }
0x14ce   : > { %v17147_v43 = vpop.f32.mrb[9].mxu1 }
0x14d1   : > { %v17151_v29 = vpop.f32.mrb[10].mxu1 }
0x14d2   : > { %v17153_v52 = vpop.f32.mrb[11].mxu1 }
0x14d5   : > { %v17157_v41 = vpop.f32.mrb[12].mxu1 }
0x14d6   : > { %v17159_v34 = vpop.f32.mrb[13].mxu1 }
0x14ea   : > { %v8607_v42 = vpop.xlane.xlu0 %8606 }
0x14eb   : > { %v8701_v20 = vsub.f32 %v16971_v26, %v8607_v42  ;;  %v8702_v16 = vsub.f32 %v16973_v57, %v8607_v42 }
0x14ed   : > { %v8765_v22 = vmul.f32 1.442695, %v8701_v20  ;;  %v8767_v62 = vmul.f32 1.442695, %v8702_v16 }
0x14ee   : > { %v8610_v47 = vpop.xlane.xlu1 %8609 }
0x14ef   : > { %11739 = vpow2.f32 %v8765_v22  ;;  %v8703_v55 = vsub.f32 %v16977_v59, %v8610_v47  ;;  %v8704_v38 = vsub.f32 %v16979_v27, %v8610_v47 }
0x14f0   : > { %11741 = vpow2.f32 %v8767_v62 }
0x14f1   : > { %v8769_v45 = vmul.f32 1.442695, %v8703_v55  ;;  %v8771_v14 = vmul.f32 1.442695, %v8704_v38 }
0x14f2   : > { %v8613_v63 = vpop.xlane.xlu0 %8612 }
0x14f3   : > { %11743 = vpow2.f32 %v8769_v45  ;;  %v8705_v35 = vsub.f32 %v16983_v8, %v8613_v63  ;;  %v8706_v30 = vsub.f32 %v16985_v13, %v8613_v63 }
0x14f4   : > { %11745 = vpow2.f32 %v8771_v14 }
0x14f5   : > { %v8773_v26 = vmul.f32 1.442695, %v8705_v35  ;;  %v8775_v57 = vmul.f32 1.442695, %v8706_v30 }
0x14f6   : > { %v8616_v20 = vpop.xlane.xlu0 %8615 }
0x14f7   : > { %11747 = vpow2.f32 %v8773_v26  ;;  %v8707_v16 = vsub.f32 %v16989_v17, %v8616_v20  ;;  %v8708_v59 = vsub.f32 %v16991_v1, %v8616_v20 }
0x14f8   : > { %11749 = vpow2.f32 %v8775_v57  ;;  %v19144_v57 = vmax.f32 %v17115_v18, %v17117_v21 }
0x14f9   : > { %v17171_v27 = vpop.eup %11739  ;;  %v8777_v55 = vmul.f32 1.442695, %v8707_v16  ;;  %v8779_v47 = vmul.f32 1.442695, %v8708_v59 }
0x14fa   : > { %v17173_v62 = vpop.eup %11741  ;;  %v8619_v45 = vpop.xlane.xlu1 %8618 }
0x14fb   : > { %11751 = vpow2.f32 %v8777_v55  ;;  %v8709_v8 = vsub.f32 %v16995_v3, %v8619_v45  ;;  %v8710_v13 = vsub.f32 %v16997_v50, %v8619_v45  ;;  %v8893_v30 = vadd.f32 %v17173_v62, %v17171_v27 }
0x14fc   : > { %11753 = vpow2.f32 %v8779_v47 }
0x14fd   : > { %v17179_v17 = vpop.eup %11743  ;;  %v8781_v1 = vmul.f32 1.442695, %v8709_v8  ;;  %v8783_v63 = vmul.f32 1.442695, %v8710_v13  ;;  %8894 = vadd.xlane.f32.xlu1 %v8893_v30  ;;  %v19145_v8 = vmax.f32 %v17121_v28, %v17123_v5 }
0x14fe   : > { %v17181_v14 = vpop.eup %11745  ;;  %v8622_v42 = vpop.xlane.xlu0 %8621 }
0x14ff   : > { %11755 = vpow2.f32 %v8781_v1  ;;  %v8711_v35 = vsub.f32 %v17001_v48, %v8622_v42  ;;  %v8712_v22 = vsub.f32 %v17003_v10, %v8622_v42  ;;  %v8896_v3 = vadd.f32 %v17181_v14, %v17179_v17 }
0x1500   : > { %11757 = vpow2.f32 %v8783_v63 }
0x1501   : > { %v17187_v50 = vpop.eup %11747  ;;  %v8785_v38 = vmul.f32 1.442695, %v8711_v35  ;;  %v8787_v26 = vmul.f32 1.442695, %v8712_v22  ;;  %8678 = vmax.xlane.f32.xlu1 %v19144_v57  ;;  %8897 = vadd.xlane.f32.xlu0 %v8896_v3  ;;  %v19146_v22 = vmax.f32 %v17127_v23, %v17129_v51 }
0x1502   : > { %v17192_v20 = vpop.eup %11749  ;;  %v8625_v16 = vpop.xlane.xlu1 %8624 }
0x1503   : > { %11759 = vpow2.f32 %v8785_v38  ;;  %v8713_v48 = vsub.f32 %v17007_v37, %v8625_v16  ;;  %v8714_v10 = vsub.f32 %v17009_v44, %v8625_v16  ;;  %v8899_v59 = vadd.f32 %v17192_v20, %v17187_v50 }
0x1504   : > { %11761 = vpow2.f32 %v8787_v26 }
0x1505   : > { %v17198_v55 = vpop.eup %11751  ;;  %v8789_v47 = vmul.f32 1.442695, %v8713_v48  ;;  %v8791_v45 = vmul.f32 1.442695, %v8714_v10  ;;  %8900 = vadd.xlane.f32.xlu1 %v8899_v59  ;;  %8681 = vmax.xlane.f32.xlu0 %v19145_v8  ;;  %v19147_v10 = vmax.f32 %v17133_v15, %v17135_v56 }
0x1506   : > { %v17203_v13 = vpop.eup %11753  ;;  %v8628_v30 = vpop.xlane.xlu0 %8627 }
0x1507   : > { %11763 = vpow2.f32 %v8789_v47  ;;  %v8715_v37 = vsub.f32 %v17013_v60, %v8628_v30  ;;  %v8716_v44 = vsub.f32 %v17015_v11, %v8628_v30  ;;  %v8902_v1 = vadd.f32 %v17203_v13, %v17198_v55 }
0x1508   : > { %11765 = vpow2.f32 %v8791_v45 }
0x1509   : > { %v17209_v63 = vpop.eup %11755  ;;  %v8793_v42 = vmul.f32 1.442695, %v8715_v37  ;;  %v8795_v35 = vmul.f32 1.442695, %v8716_v44  ;;  %8684 = vmax.xlane.f32.xlu1 %v19146_v22  ;;  %8903 = vadd.xlane.f32.xlu0 %v8902_v1  ;;  %v19148_v44 = vmax.f32 %v17139_v19, %v17141_v4 }
0x150a   : > { %v17214_v3 = vpop.eup %11757  ;;  %v8631_v38 = vpop.xlane.xlu1 %8630 }
0x150b   : > { %11767 = vpow2.f32 %v8793_v42  ;;  %v8717_v60 = vsub.f32 %v17019_v32, %v8631_v38  ;;  %v8718_v11 = vsub.f32 %v17021_v53, %v8631_v38  ;;  %v8905_v26 = vadd.f32 %v17214_v3, %v17209_v63 }
0x150c   : > { %11769 = vpow2.f32 %v8795_v35 }
0x150d   : > { %v17220_v57 = vpop.eup %11759  ;;  %v8797_v16 = vmul.f32 1.442695, %v8717_v60  ;;  %v8799_v48 = vmul.f32 1.442695, %v8718_v11  ;;  %8687 = vmax.xlane.f32.xlu0 %v19147_v10  ;;  %8906 = vadd.xlane.f32.xlu1 %v8905_v26  ;;  %v19149_v11 = vmax.f32 %v17145_v12, %v17147_v43 }
0x150e   : > { %v17225_v59 = vpop.eup %11761  ;;  %v8634_v47 = vpop.xlane.xlu0 %8633 }
0x150f   : > { %11771 = vpow2.f32 %v8797_v16  ;;  %v8719_v32 = vsub.f32 %v17025_v33, %v8634_v47  ;;  %v8720_v53 = vsub.f32 %v17027_v6, %v8634_v47  ;;  %v8908_v45 = vadd.f32 %v17225_v59, %v17220_v57 }
0x1510   : > { %11773 = vpow2.f32 %v8799_v48 }
0x1511   : > { %v17231_v8 = vpop.eup %11763  ;;  %v8801_v30 = vmul.f32 1.442695, %v8719_v32  ;;  %v8803_v37 = vmul.f32 1.442695, %v8720_v53  ;;  %8909 = vadd.xlane.f32.xlu0 %v8908_v45  ;;  %8690 = vmax.xlane.f32.xlu1 %v19148_v44  ;;  %v19150_v53 = vmax.f32 %v17151_v29, %v17153_v52 }
0x1512   : > { %v17236_v1 = vpop.eup %11765  ;;  %v8637_v42 = vpop.xlane.xlu1 %8636 }
0x1513   : > { %11775 = vpow2.f32 %v8801_v30  ;;  %v8721_v33 = vsub.f32 %v17031_v58, %v8637_v42  ;;  %v8722_v6 = vsub.f32 %v17033_v24, %v8637_v42  ;;  %v8911_v35 = vadd.f32 %v17236_v1, %v17231_v8 }
0x1514   : > { %11777 = vpow2.f32 %v8803_v37 }
0x1515   : > { %v17242_v22 = vpop.eup %11767  ;;  %v8805_v38 = vmul.f32 1.442695, %v8721_v33  ;;  %v8807_v60 = vmul.f32 1.442695, %v8722_v6  ;;  %8693 = vmax.xlane.f32.xlu0 %v19149_v11  ;;  %8912 = vadd.xlane.f32.xlu1 %v8911_v35  ;;  %v19151_v6 = vmax.f32 %v17157_v41, %v17159_v34 }
0x1516   : > { %v17247_v26 = vpop.eup %11769  ;;  %v8640_v16 = vpop.xlane.xlu0 %8639 }
0x1517   : > { %11779 = vpow2.f32 %v8805_v38  ;;  %v8723_v58 = vsub.f32 %v17037_v31, %v8640_v16  ;;  %v8724_v24 = vsub.f32 %v17039_v49, %v8640_v16  ;;  %v8914_v48 = vadd.f32 %v17247_v26, %v17242_v22 }
0x1518   : > { %11781 = vpow2.f32 %v8807_v60 }
0x1519   : > { %v17253_v10 = vpop.eup %11771  ;;  %v8809_v47 = vmul.f32 1.442695, %v8723_v58  ;;  %v8811_v32 = vmul.f32 1.442695, %v8724_v24  ;;  %8915 = vadd.xlane.f32.xlu0 %v8914_v48  ;;  %8696 = vmax.xlane.f32.xlu1 %v19150_v53 }
0x151a   : > { %v17258_v45 = vpop.eup %11773  ;;  %v8643_v30 = vpop.xlane.xlu1 %8642 }
0x151b   : > { %11783 = vpow2.f32 %v8809_v47  ;;  %v8725_v31 = vsub.f32 %v17043_v46, %v8643_v30  ;;  %v8726_v49 = vsub.f32 %v17045_v7, %v8643_v30  ;;  %v8917_v37 = vadd.f32 %v17258_v45, %v17253_v10 }
0x151c   : > { %11785 = vpow2.f32 %v8811_v32 }
0x151d   : > { %v17264_v44 = vpop.eup %11775  ;;  %v8813_v42 = vmul.f32 1.442695, %v8725_v31  ;;  %v8815_v33 = vmul.f32 1.442695, %v8726_v49  ;;  %8699 = vmax.xlane.f32.xlu0 %v19151_v6  ;;  %8918 = vadd.xlane.f32.xlu1 %v8917_v37 }
0x151e   : > { %v17269_v35 = vpop.eup %11777  ;;  %v8646_v38 = vpop.xlane.xlu0 %8645 }
0x151f   : > { %11787 = vpow2.f32 %v8813_v42  ;;  %v8727_v46 = vsub.f32 %v17049_v0, %v8646_v38  ;;  %v8728_v7 = vsub.f32 %v17051_v36, %v8646_v38  ;;  %v8920_v60 = vadd.f32 %v17269_v35, %v17264_v44 }
0x1520   : > { %11789 = vpow2.f32 %v8815_v33 }
0x1521   : > { %v17275_v11 = vpop.eup %11779  ;;  %v8817_v16 = vmul.f32 1.442695, %v8727_v46  ;;  %v8819_v58 = vmul.f32 1.442695, %v8728_v7  ;;  %8921 = vadd.xlane.f32.xlu0 %v8920_v60 }
0x1522   : > { %v17277_v24 = vpop.eup %11781  ;;  %v8649_v48 = vpop.xlane.xlu1 %8648 }
0x1523   : > { %11791 = vpow2.f32 %v8817_v16  ;;  %v8729_v47 = vsub.f32 %v17055_v2, %v8649_v48  ;;  %v8730_v32 = vsub.f32 %v17057_v25, %v8649_v48  ;;  %v8923_v0 = vadd.f32 %v17277_v24, %v17275_v11 }
0x1524   : > { %11793 = vpow2.f32 %v8819_v58 }
0x1525   : > { %v17283_v36 = vpop.eup %11783  ;;  %v8821_v53 = vmul.f32 1.442695, %v8729_v47  ;;  %v8823_v30 = vmul.f32 1.442695, %v8730_v32  ;;  %8924 = vadd.xlane.f32.xlu1 %v8923_v0  ;;  %v19152_v0 = vld [vmem:[#allocation54_spill] sm:$0xff] }
0x1526   : > { %v17285_v31 = vpop.eup %11785  ;;  %v8652_v49 = vpop.xlane.xlu0 %8651 }
0x1527   : > { %11795 = vpow2.f32 %v8821_v53  ;;  %v8731_v37 = vsub.f32 %v17061_v61, %v8652_v49  ;;  %v8732_v42 = vsub.f32 %v17063_v40, %v8652_v49  ;;  %v8926_v2 = vadd.f32 %v17285_v31, %v17283_v36 }
0x1528   : > { %11797 = vpow2.f32 %v8823_v30 }
0x1529   : > { %v17291_v25 = vpop.eup %11787  ;;  %v8825_v33 = vmul.f32 1.442695, %v8731_v37  ;;  %v8827_v6 = vmul.f32 1.442695, %v8732_v42  ;;  %8927 = vadd.xlane.f32.xlu0 %v8926_v2  ;;  %v19154_v2 = vld [vmem:[#allocation49_spill] sm:$0xff] }
0x152a   : > { %v17293_v38 = vpop.eup %11789  ;;  %v8655_v46 = vpop.xlane.xlu1 %8654 }
0x152b   : > { %11799 = vpow2.f32 %v8825_v33  ;;  %v8733_v7 = vsub.f32 %v17067_v39, %v8655_v46  ;;  %v8734_v60 = vsub.f32 %v17069_v9, %v8655_v46  ;;  %v8929_v61 = vadd.f32 %v17293_v38, %v17291_v25 }
0x152c   : > { %11801 = vpow2.f32 %v8827_v6  ;;  %v19155_v6 = vld [vmem:[#allocation36_spill] sm:$0xff] }
0x152d   : > { %v17299_v40 = vpop.eup %11791  ;;  %v8829_v16 = vmul.f32 1.442695, %v8733_v7  ;;  %v8831_v58 = vmul.f32 1.442695, %v8734_v60  ;;  %8930 = vadd.xlane.f32.xlu1 %v8929_v61 }
0x152e   : > { %v17301_v48 = vpop.eup %11793  ;;  %v8658_v47 = vpop.xlane.xlu0 %8657 }
0x152f   : > { %11803 = vpow2.f32 %v8829_v16  ;;  %v8735_v32 = vsub.f32 %v17073_v54, %v8658_v47  ;;  %v8736_v53 = vsub.f32 %v19152_v0, %v8658_v47  ;;  %v8932_v39 = vadd.f32 %v17301_v48, %v17299_v40  ;;  %v19157_v47 = vld [vmem:[#allocation38_spill] sm:$0xff]  ;;  %v19158_v0 = vld [vmem:[#allocation71_spill] sm:$0xff] }
0x1530   : > { %11805 = vpow2.f32 %v8831_v58 }
0x1531   : > { %v17307_v9 = vpop.eup %11795  ;;  %v8833_v30 = vmul.f32 1.442695, %v8735_v32  ;;  %v8835_v49 = vmul.f32 1.442695, %v8736_v53  ;;  %8933 = vadd.xlane.f32.xlu0 %v8932_v39 }
0x1532   : > { %19153 = vst [vmem:[#allocation12_spill] sm:$0xff] %v17307_v9  ;;  %v17309_v37 = vpop.eup %11797  ;;  %v8661_v42 = vpop.xlane.xlu1 %8660 }
0x1533   : > { %11807 = vpow2.f32 %v8833_v30  ;;  %v8737_v33 = vsub.f32 %v19154_v2, %v8661_v42  ;;  %v8738_v46 = vsub.f32 %v19155_v6, %v8661_v42  ;;  %v8935_v54 = vadd.f32 %v17309_v37, %v17307_v9  ;;  %v19161_v6 = vld [vmem:[#allocation68_spill] sm:$0xff] }
0x1534   : > { %11809 = vpow2.f32 %v8835_v49 }
0x1535   : > { %v17315_v7 = vpop.eup %11799  ;;  %v8837_v60 = vmul.f32 1.442695, %v8737_v33  ;;  %v8839_v61 = vmul.f32 1.442695, %v8738_v46  ;;  %8936 = vadd.xlane.f32.xlu1 %v8935_v54  ;;  %v19162_v54 = vld [vmem:[#allocation26_spill] sm:$0xff] }
0x1536   : > { %19156 = vst [vmem:[#allocation35_spill] sm:$0xff] %v17315_v7  ;;  %v17317_v16 = vpop.eup %11801  ;;  %v8664_v58 = vpop.xlane.xlu0 %8663 }
0x1537   : > { %11811 = vpow2.f32 %v8837_v60  ;;  %v8739_v32 = vsub.f32 %v19157_v47, %v8664_v58  ;;  %v8740_v53 = vsub.f32 %v19158_v0, %v8664_v58  ;;  %v8938_v39 = vadd.f32 %v17317_v16, %v17315_v7 }
0x1538   : > { %11813 = vpow2.f32 %v8839_v61 }
0x1539   : > { %v17323_v30 = vpop.eup %11803  ;;  %v8841_v49 = vmul.f32 1.442695, %v8739_v32  ;;  %v8843_v42 = vmul.f32 1.442695, %v8740_v53  ;;  %8939 = vadd.xlane.f32.xlu0 %v8938_v39  ;;  %v19165_v39 = vld [vmem:[#allocation27_spill] sm:$0xff] }
0x153a   : > { %19159 = vst [vmem:[#allocation37_spill] sm:$0xff] %v17323_v30  ;;  %v17325_v2 = vpop.eup %11805  ;;  %v8667_v33 = vpop.xlane.xlu1 %8666 }
0x153b   : > { %19160 = vst [vmem:[#allocation34_spill] sm:$0xff] %v17325_v2  ;;  %11815 = vpow2.f32 %v8841_v49  ;;  %v8741_v46 = vsub.f32 %v19161_v6, %v8667_v33  ;;  %v8742_v60 = vsub.f32 %v19162_v54, %v8667_v33  ;;  %v8941_v58 = vadd.f32 %v17325_v2, %v17323_v30  ;;  %v19166_v49 = vld [vmem:[#allocation58_spill] sm:$0xff] }
0x153c   : > { %11817 = vpow2.f32 %v8843_v42 }
0x153d   : > { %v17331_v47 = vpop.eup %11807  ;;  %v8845_v61 = vmul.f32 1.442695, %v8741_v46  ;;  %v8847_v0 = vmul.f32 1.442695, %v8742_v60  ;;  %8942 = vadd.xlane.f32.xlu1 %v8941_v58  ;;  %v19167_v58 = vld [vmem:[#allocation70_spill] sm:$0xff] }
0x153e   : > { %19163 = vst [vmem:[#allocation39_spill] sm:$0xff] %v17331_v47  ;;  %v17333_v32 = vpop.eup %11809  ;;  %v8670_v53 = vpop.xlane.xlu0 %8669 }
0x153f   : > { %19164 = vst [vmem:[#allocation18_spill] sm:$0xff] %v17333_v32  ;;  %11819 = vpow2.f32 %v8845_v61  ;;  %v8743_v9 = vsub.f32 %v19165_v39, %v8670_v53  ;;  %v8744_v7 = vsub.f32 %v19166_v49, %v8670_v53  ;;  %v8944_v33 = vadd.f32 %v17333_v32, %v17331_v47  ;;  %v19168_v61 = vld [vmem:[#allocation105_spill] sm:$0xff] }
0x1540   : > { %11821 = vpow2.f32 %v8847_v0 }
0x1541   : > { %v17339_v6 = vpop.eup %11811  ;;  %v8849_v42 = vmul.f32 1.442695, %v8743_v9  ;;  %v8851_v54 = vmul.f32 1.442695, %v8744_v7  ;;  %8945 = vadd.xlane.f32.xlu0 %v8944_v33  ;;  %v19169_v33 = vld [vmem:[#allocation106_spill] sm:$0xff] }
0x1542   : > { %v17341_v46 = vpop.eup %11813  ;;  %v8673_v60 = vpop.xlane.xlu1 %8672 }
0x1543   : > { %11823 = vpow2.f32 %v8849_v42  ;;  %v8745_v30 = vsub.f32 %v19167_v58, %v8673_v60  ;;  %v8746_v2 = vsub.f32 %v19168_v61, %v8673_v60  ;;  %v8947_v53 = vadd.f32 %v17341_v46, %v17339_v6  ;;  %v19170_v42 = vld [vmem:[#allocation66_spill] sm:$0xff] }
0x1544   : > { %11825 = vpow2.f32 %v8851_v54 }
0x1545   : > { %v17347_v39 = vpop.eup %11815  ;;  %v8853_v0 = vmul.f32 1.442695, %v8745_v30  ;;  %v8855_v49 = vmul.f32 1.442695, %v8746_v2  ;;  %8948 = vadd.xlane.f32.xlu1 %v8947_v53 }
0x1546   : > { %v17349_v9 = vpop.eup %11817  ;;  %v8676_v7 = vpop.xlane.xlu0 %8675 }
0x1547   : > { %11827 = vpow2.f32 %v8853_v0  ;;  %v8747_v47 = vsub.f32 %v19169_v33, %v8676_v7  ;;  %v8748_v32 = vsub.f32 %v19170_v42, %v8676_v7  ;;  %v8950_v60 = vadd.f32 %v17349_v9, %v17347_v39 }
0x1548   : > { %11829 = vpow2.f32 %v8855_v49 }
0x1549   : > { %v17355_v58 = vpop.eup %11819  ;;  %v8857_v54 = vmul.f32 1.442695, %v8747_v47  ;;  %v8859_v61 = vmul.f32 1.442695, %v8748_v32  ;;  %8951 = vadd.xlane.f32.xlu0 %v8950_v60 }
0x154a   : > { %19171 = vst [vmem:[#allocation51_spill] sm:$0xff] %v17355_v58  ;;  %v17357_v30 = vpop.eup %11821 }
0x154b   : > { %19172 = vst [vmem:[#allocation40_spill] sm:$0xff] %v17357_v30  ;;  %11831 = vpow2.f32 %v8857_v54  ;;  %v8953_v2 = vadd.f32 %v17357_v30, %v17355_v58 }
0x154c   : > { %11833 = vpow2.f32 %v8859_v61 }
0x154d   : > { %v17361_v53 = vpop.eup %11823  ;;  %8954 = vadd.xlane.f32.xlu1 %v8953_v2 }
0x154e   : > { %19173 = vst [vmem:[#allocation44_spill] sm:$0xff] %v17361_v53  ;;  %v17363_v0 = vpop.eup %11825 }
0x154f   : > { %19174 = vst [vmem:[#allocation43_spill] sm:$0xff] %v17363_v0  ;;  %v8956_v49 = vadd.f32 %v17363_v0, %v17361_v53 }
0x1551   : > { %v17367_v7 = vpop.eup %11827  ;;  %8957 = vadd.xlane.f32.xlu0 %v8956_v49 }
0x1552   : > { %19175 = vst [vmem:[#allocation30_spill] sm:$0xff] %v17367_v7  ;;  %v17369_v47 = vpop.eup %11829 }
0x1553   : > { %19176 = vst [vmem:[#allocation42_spill] sm:$0xff] %v17369_v47  ;;  %v8959_v32 = vadd.f32 %v17369_v47, %v17367_v7 }
0x1555   : > { %v17373_v33 = vpop.eup %11831  ;;  %8960 = vadd.xlane.f32.xlu1 %v8959_v32 }
0x1556   : > { %19177 = vst [vmem:[#allocation59_spill] sm:$0xff] %v17373_v33  ;;  %v17375_v42 = vpop.eup %11833 }
0x1557   : > { %19178 = vst [vmem:[#allocation52_spill] sm:$0xff] %v17375_v42  ;;  %v8962_v60 = vadd.f32 %v17375_v42, %v17373_v33 }
0x1559   : > { %8963 = vadd.xlane.f32.xlu0 %v8962_v60 }
0x158a   : > { %v8895_v54 = vpop.xlane.xlu1 %8894 }
0x158b   : > { %11835 = vrcp.f32 %v8895_v54 }
0x158e   : > { %v8898_v61 = vpop.xlane.xlu0 %8897  ;;  %v8679_v2 = vpop.xlane.xlu1 %8678 }
0x158f   : > { %11837 = vrcp.f32 %v8898_v61  ;;  %v8749_v49 = vsub.f32 %v17115_v18, %v8679_v2  ;;  %v8750_v58 = vsub.f32 %v17117_v21, %v8679_v2 }
0x1591   : > { %v8861_v53 = vmul.f32 1.442695, %v8749_v49  ;;  %v8863_v7 = vmul.f32 1.442695, %v8750_v58 }
0x1592   : > { %v8682_v47 = vpop.xlane.xlu0 %8681  ;;  %v8901_v0 = vpop.xlane.xlu1 %8900 }
0x1593   : > { %11839 = vpow2.f32 %v8861_v53  ;;  %v8751_v32 = vsub.f32 %v17121_v28, %v8682_v47  ;;  %v8752_v30 = vsub.f32 %v17123_v5, %v8682_v47 }
0x1594   : > { %11841 = vpow2.f32 %v8863_v7 }
0x1595   : > { %v8865_v60 = vmul.f32 1.442695, %v8751_v32  ;;  %v8867_v33 = vmul.f32 1.442695, %v8752_v30  ;;  %11843 = vrcp.f32 %v8901_v0  ;;  %v11836_v61 = vpop.eup %11835 }
0x1596   : > { %v8904_v54 = vpop.xlane.xlu0 %8903  ;;  %v8685_v42 = vpop.xlane.xlu1 %8684  ;;  %v9022_v5 = vmul.f32 %v11836_v61, %v17173_v62  ;;  %v9021_v0 = vmul.f32 %v11836_v61, %v17171_v27 }
0x1597   : > { %11845 = vpow2.f32 %v8865_v60  ;;  %v8753_v18 = vsub.f32 %v17127_v23, %v8685_v42  ;;  %v8754_v21 = vsub.f32 %v17129_v51, %v8685_v42 }
0x1598   : > { %11847 = vpow2.f32 %v8867_v33 }
0x1599   : > { %v11838_v58 = vpop.eup %11837  ;;  %11849 = vrcp.f32 %v8904_v54  ;;  %v8869_v53 = vmul.f32 1.442695, %v8753_v18  ;;  %v8871_v2 = vmul.f32 1.442695, %v8754_v21 }
0x159a   : > { %v8688_v28 = vpop.xlane.xlu0 %8687  ;;  %v8907_v49 = vpop.xlane.xlu1 %8906  ;;  %v9024_v30 = vmul.f32 %v11838_v58, %v17181_v14  ;;  %v9023_v7 = vmul.f32 %v11838_v58, %v17179_v17 }
0x159b   : > { %11851 = vpow2.f32 %v8869_v53  ;;  %v8755_v23 = vsub.f32 %v17133_v15, %v8688_v28  ;;  %v8756_v51 = vsub.f32 %v17135_v56, %v8688_v28 }
0x159c   : > { %11853 = vpow2.f32 %v8871_v2  ;;  %v10228_v47 = vpack.c.bf16 %v9024_v30, %v9022_v5  ;;  %v10230_v33 = vpack.c.bf16 %v9023_v7, %v9021_v0 }
0x159d   : > { %v17391_v42 = vpop.eup %11839  ;;  %v8873_v32 = vmul.f32 1.442695, %v8755_v23  ;;  %v8875_v60 = vmul.f32 1.442695, %v8756_v51  ;;  %11855 = vrcp.f32 %v8907_v49 }
0x159e   : > { %v17393_v62 = vpop.eup %11841  ;;  %v8910_v14 = vpop.xlane.xlu0 %8909  ;;  %10229 = vmatprep.subr.bf16.mxu1 %v10228_v47 }
0x159f   : > { %v8691_v27 = vpop.xlane.xlu1 %8690  ;;  %v11844_v54 = vpop.eup %11843  ;;  %11857 = vpow2.f32 %v8873_v32  ;;  %10231 = vmatpush1.bf16.xpose.msra.mxu1 %v10230_v33  ;;  %v8965_v56 = vadd.f32 %v17393_v62, %v17391_v42 }
0x15a0   : > { %v8757_v17 = vsub.f32 %v17139_v19, %v8691_v27  ;;  %v8758_v15 = vsub.f32 %v17141_v4, %v8691_v27  ;;  %11859 = vpow2.f32 %v8875_v60  ;;  %v9026_v28 = vmul.f32 %v11844_v54, %v17192_v20 }
0x15a1   : > { %v17399_v61 = vpop.eup %11845  ;;  %11861 = vrcp.f32 %v8910_v14  ;;  %8966 = vadd.xlane.f32.xlu1 %v8965_v56  ;;  %v9025_v0 = vmul.f32 %v11844_v54, %v17187_v50 }
0x15a2   : > { %v8877_v18 = vmul.f32 1.442695, %v8757_v17  ;;  %v8879_v21 = vmul.f32 1.442695, %v8758_v15  ;;  %v17401_v58 = vpop.eup %11847  ;;  %v8694_v53 = vpop.xlane.xlu0 %8693 }
0x15a3   : > { %v8913_v2 = vpop.xlane.xlu1 %8912  ;;  %v11850_v19 = vpop.eup %11849  ;;  %v8759_v4 = vsub.f32 %v17145_v12, %v8694_v53  ;;  %v8760_v49 = vsub.f32 %v17147_v43, %v8694_v53  ;;  %v8968_v5 = vadd.f32 %v17401_v58, %v17399_v61 }
0x15a4   : > { %11863 = vpow2.f32 %v8877_v18  ;;  %v9028_v30 = vmul.f32 %v11850_v19, %v17203_v13  ;;  %v9027_v7 = vmul.f32 %v11850_v19, %v17198_v55 }
0x15a5   : > { %11865 = vpow2.f32 %v8879_v21  ;;  %v17411_v23 = vpop.eup %11851  ;;  %v8881_v51 = vmul.f32 1.442695, %v8759_v4  ;;  %v8883_v20 = vmul.f32 1.442695, %v8760_v49  ;;  %8969 = vadd.xlane.f32.xlu0 %v8968_v5 }
0x15a6   : > { %v17413_v47 = vpop.eup %11853  ;;  %11867 = vrcp.f32 %v8913_v2  ;;  %v8916_v12 = vpop.xlane.xlu0 %8915  ;;  %v10232_v43 = vpack.c.bf16 %v9028_v30, %v9026_v28  ;;  %v10234_v32 = vpack.c.bf16 %v9027_v7, %v9025_v0 }
0x15a7   : > { %v8697_v33 = vpop.xlane.xlu1 %8696  ;;  %v11856_v60 = vpop.eup %11855  ;;  %11869 = vpow2.f32 %v8881_v51  ;;  %v8971_v55 = vadd.f32 %v17413_v47, %v17411_v23 }
0x15a8   : > { %v8761_v13 = vsub.f32 %v17151_v29, %v8697_v33  ;;  %v8762_v50 = vsub.f32 %v17153_v52, %v8697_v33  ;;  %11871 = vpow2.f32 %v8883_v20  ;;  %10233 = vmatprep.subr.bf16.mxu1 %v10232_v43  ;;  %v9030_v56 = vmul.f32 %v11856_v60, %v17214_v3 }
0x15a9   : > { %v17419_v14 = vpop.eup %11857  ;;  %11873 = vrcp.f32 %v8916_v12  ;;  %10235 = vmatpush1.bf16.xpose.msra.mxu1 %v10234_v32  ;;  %8972 = vadd.xlane.f32.xlu1 %v8971_v55  ;;  %v9029_v28 = vmul.f32 %v11856_v60, %v17209_v63 }
0x15aa   : > { %v8885_v27 = vmul.f32 1.442695, %v8761_v13  ;;  %v8887_v54 = vmul.f32 1.442695, %v8762_v50  ;;  %v17421_v17 = vpop.eup %11859  ;;  %v8700_v15 = vpop.xlane.xlu0 %8699 }
0x15ab   : > { %v11862_v29 = vpop.eup %11861  ;;  %v8763_v52 = vsub.f32 %v17157_v41, %v8700_v15  ;;  %v8764_v18 = vsub.f32 %v17159_v34, %v8700_v15  ;;  %v8919_v21 = vpop.xlane.xlu1 %8918  ;;  %v8974_v53 = vadd.f32 %v17421_v17, %v17419_v14 }
0x15ac   : > { %11875 = vpow2.f32 %v8885_v27  ;;  %v9032_v2 = vmul.f32 %v11862_v29, %v17225_v59  ;;  %v9031_v19 = vmul.f32 %v11862_v29, %v17220_v57 }
0x15ad   : > { %11877 = vpow2.f32 %v8887_v54  ;;  %v8889_v3 = vmul.f32 1.442695, %v8763_v52  ;;  %v8891_v49 = vmul.f32 1.442695, %v8764_v18  ;;  %8975 = vadd.xlane.f32.xlu0 %v8974_v53 }
0x15ae   : > { %v17431_v4 = vpop.eup %11863  ;;  %11879 = vrcp.f32 %v8919_v21  ;;  %v8922_v34 = vpop.xlane.xlu0 %8921  ;;  %v10236_v41 = vpack.c.bf16 %v9032_v2, %v9030_v56  ;;  %v10238_v30 = vpack.c.bf16 %v9031_v19, %v9029_v28 }
0x15af   : > { %v17433_v5 = vpop.eup %11865  ;;  %11881 = vpow2.f32 %v8889_v3 }
0x15b0   : > { %v8977_v0 = vadd.f32 %v17433_v5, %v17431_v4  ;;  %v11868_v59 = vpop.eup %11867  ;;  %11883 = vpow2.f32 %v8891_v49  ;;  %10237 = vmatprep.subr.bf16.mxu1 %v10236_v41 }
0x15b1   : > { %v17437_v63 = vpop.eup %11869  ;;  %11885 = vrcp.f32 %v8922_v34  ;;  %10239 = vmatpush1.bf16.xpose.msra.mxu1 %v10238_v30  ;;  %v9034_v12 = vmul.f32 %v11868_v59, %v17236_v1  ;;  %v9033_v33 = vmul.f32 %v11868_v59, %v17231_v8  ;;  %v9282_v59 = vld [vmem:[%s17619_s4] sm:$0xff] }
0x15b2   : > { %8978 = vadd.xlane.f32.xlu1 %v8977_v0  ;;  %v17439_v57 = vpop.eup %11871  ;;  %v8925_v7 = vpop.xlane.xlu1 %8924 }
0x15b3   : > { %v11874_v51 = vpop.eup %11873  ;;  %v8980_v20 = vadd.f32 %v17439_v57, %v17437_v63  ;;  %11887 = vrcp.f32 %v8925_v7 }
0x15b4   : > { %v9036_v43 = vmul.f32 %v11874_v51, %v17247_v26  ;;  %v9035_v32 = vmul.f32 %v11874_v51, %v17242_v22  ;;  %v9284_v51 = vld [vmem:[%s17619_s4 + $0x10] sm:$0xff] }
0x15b5   : > { %8981 = vadd.xlane.f32.xlu0 %v8980_v20 }
0x15b6   : > { %v17447_v60 = vpop.eup %11875  ;;  %v8928_v50 = vpop.xlane.xlu0 %8927  ;;  %v10240_v55 = vpack.c.bf16 %v9036_v43, %v9034_v12  ;;  %v10242_v27 = vpack.c.bf16 %v9035_v32, %v9033_v33 }
0x15b7   : > { %v17449_v13 = vpop.eup %11877  ;;  %11889 = vrcp.f32 %v8928_v50 }
0x15b8   : > { %v8983_v54 = vadd.f32 %v17449_v13, %v17447_v60  ;;  %v11880_v1 = vpop.eup %11879  ;;  %10241 = vmatprep.subr.bf16.mxu1 %v10240_v55 }
0x15b9   : > { %v17453_v26 = vpop.eup %11881  ;;  %10243 = vmatpush1.bf16.xpose.msra.mxu1 %v10242_v27  ;;  %v9038_v29 = vmul.f32 %v11880_v1, %v17258_v45  ;;  %v9037_v18 = vmul.f32 %v11880_v1, %v17253_v10  ;;  %v19179_v27 = vld [vmem:[#allocation35_spill] sm:$0xff]  ;;  %v19180_v1 = vld [vmem:[#allocation12_spill] sm:$0xff] }
0x15ba   : > { %8984 = vadd.xlane.f32.xlu1 %v8983_v54  ;;  %v17455_v8 = vpop.eup %11883  ;;  %v8931_v22 = vpop.xlane.xlu1 %8930 }
0x15bb   : > { %v11886_v15 = vpop.eup %11885  ;;  %v8986_v56 = vadd.f32 %v17455_v8, %v17453_v26  ;;  %11891 = vrcp.f32 %v8931_v22 }
0x15bc   : > { %v9040_v52 = vmul.f32 %v11886_v15, %v17269_v35  ;;  %v9039_v21 = vmul.f32 %v11886_v15, %v17264_v44 }
0x15bd   : > { %8987 = vadd.xlane.f32.xlu0 %v8986_v56  ;;  %v11888_v19 = vpop.eup %11887 }
0x15be   : > { %v8934_v53 = vpop.xlane.xlu0 %8933  ;;  %v10244_v2 = vpack.c.bf16 %v9040_v52, %v9038_v29  ;;  %v10246_v28 = vpack.c.bf16 %v9039_v21, %v9037_v18  ;;  %v9042_v34 = vmul.f32 %v11888_v19, %v17277_v24  ;;  %v9041_v10 = vmul.f32 %v11888_v19, %v17275_v11 }
0x15bf   : > { %11893 = vrcp.f32 %v8934_v53  ;;  %v19181_v53 = vld [vmem:[#allocation34_spill] sm:$0xff] }
0x15c0   : > { %10245 = vmatprep.subr.bf16.mxu1 %v10244_v2 }
0x15c1   : > { %v11890_v3 = vpop.eup %11889  ;;  %10247 = vmatpush1.bf16.xpose.msra.mxu1 %v10246_v28 }
0x15c2   : > { %v8937_v49 = vpop.xlane.xlu1 %8936  ;;  %v9044_v45 = vmul.f32 %v11890_v3, %v17285_v31  ;;  %v9043_v35 = vmul.f32 %v11890_v3, %v17283_v36  ;;  %v19184_v3 = vld [vmem:[#allocation37_spill] sm:$0xff] }
0x15c3   : > { %11895 = vrcp.f32 %v8937_v49 }
0x15c4   : > { %v10248_v44 = vpack.c.bf16 %v9044_v45, %v9042_v34  ;;  %v10250_v41 = vpack.c.bf16 %v9043_v35, %v9041_v10 }
0x15c5   : > { %v11892_v0 = vpop.eup %11891 }
0x15c6   : > { %v8940_v30 = vpop.xlane.xlu0 %8939  ;;  %10249 = vmatprep.subr.bf16.mxu1 %v10248_v44  ;;  %v9046_v31 = vmul.f32 %v11892_v0, %v17293_v38  ;;  %v9045_v20 = vmul.f32 %v11892_v0, %v17291_v25  ;;  %v9285_v38 = vld [vmem:[%s17619_s4 + $0x18] sm:$0xff] }
0x15c7   : > { %11897 = vrcp.f32 %v8940_v30 }
0x15c9   : > { %v11894_v7 = vpop.eup %11893  ;;  %10251 = vmatpush1.bf16.xpose.msra.mxu1 %v10250_v41 }
0x15ca   : > { %v8943_v24 = vpop.xlane.xlu1 %8942  ;;  %v9048_v36 = vmul.f32 %v11894_v7, %v17301_v48  ;;  %v9047_v11 = vmul.f32 %v11894_v7, %v17299_v40  ;;  %v9283_v40 = vld [vmem:[%s17619_s4 + $0x8] sm:$0xff] }
0x15cb   : > { %9288 = vperm.xlu1 %10394, %v9282_v59   ;;  %11899 = vrcp.f32 %v8943_v24 }
0x15cc   : > { %v10252_v12 = vpack.c.bf16 %v9048_v36, %v9046_v31  ;;  %v10254_v43 = vpack.c.bf16 %v9047_v11, %v9045_v20  ;;  %v19185_v20 = vld [vmem:[#allocation40_spill] sm:$0xff] }
0x15cd   : > { %v11896_v32 = vpop.eup %11895 }
0x15ce   : > { %v8946_v33 = vpop.xlane.xlu0 %8945  ;;  %10253 = vmatprep.subr.bf16.mxu1 %v10252_v12  ;;  %v9050_v50 = vmul.f32 %v11896_v32, %v17309_v37  ;;  %v9049_v22 = vmul.f32 %v11896_v32, %v19180_v1  ;;  %v19182_v37 = vld [vmem:[#allocation18_spill] sm:$0xff] }
0x15cf   : > { %9298 = vperm.xlu1 %10394, %v9284_v51   ;;  %11901 = vrcp.f32 %v8946_v33 }
0x15d1   : > { %v11898_v48 = vpop.eup %11897  ;;  %10255 = vmatpush1.bf16.xpose.msra.mxu1 %v10254_v43  ;;  %v19186_v43 = vld [vmem:[#allocation43_spill] sm:$0xff] }
0x15d2   : > { %v8949_v25 = vpop.xlane.xlu1 %8948  ;;  %v9052_v55 = vmul.f32 %v11898_v48, %v17317_v16  ;;  %v9051_v54 = vmul.f32 %v11898_v48, %v19179_v27  ;;  %v19183_v16 = vld [vmem:[#allocation39_spill] sm:$0xff] }
0x15d3   : > { %9303 = vperm.xlu1 %10394, %v9285_v38   ;;  %9293 = vperm.xlu0 %10393, %v9283_v40   ;;  %11903 = vrcp.f32 %v8949_v25  ;;  %v19189_v25 = vld [vmem:[#allocation42_spill] sm:$0xff] }
0x15d4   : > { %v10256_v15 = vpack.c.bf16 %v9052_v55, %v9050_v50  ;;  %v10258_v56 = vpack.c.bf16 %v9051_v54, %v9049_v22  ;;  %v19190_v55 = vld [vmem:[#allocation52_spill] sm:$0xff]  ;;  %v19191_v54 = vld [vmem:[#allocation59_spill] sm:$0xff]  ;;  %v19192_v22 = vld [vmem:[#allocation30_spill] sm:$0xff] }
0x15d5   : > { %v11900_v52 = vpop.eup %11899 }
0x15d6   : > { %v8952_v29 = vpop.xlane.xlu0 %8951  ;;  %10257 = vmatprep.subr.bf16.mxu1 %v10256_v15  ;;  %v9054_v2 = vmul.f32 %v11900_v52, %v19181_v53  ;;  %v9053_v49 = vmul.f32 %v11900_v52, %v19184_v3 }
0x15d7   : > { %11905 = vrcp.f32 %v8952_v29 }
0x15d9   : > { %v11902_v18 = vpop.eup %11901  ;;  %10259 = vmatpush1.bf16.xpose.msra.mxu1 %v10258_v56 }
0x15da   : > { %v8955_v21 = vpop.xlane.xlu1 %8954  ;;  %v9056_v28 = vmul.f32 %v11902_v18, %v19182_v37  ;;  %v9055_v19 = vmul.f32 %v11902_v18, %v19183_v16 }
0x15db   : > { %11907 = vrcp.f32 %v8955_v21 }
0x15dc   : > { %v10260_v34 = vpack.c.bf16 %v9056_v28, %v9054_v2  ;;  %v10262_v45 = vpack.c.bf16 %v9055_v19, %v9053_v49 }
0x15dd   : > { %v11904_v10 = vpop.eup %11903 }
0x15de   : > { %v8958_v35 = vpop.xlane.xlu0 %8957  ;;  %10261 = vmatprep.subr.bf16.mxu1 %v10260_v34  ;;  %v9058_v30 = vmul.f32 %v11904_v10, %v17341_v46  ;;  %v9057_v7 = vmul.f32 %v11904_v10, %v17339_v6  ;;  %v19187_v46 = vld [vmem:[#allocation44_spill] sm:$0xff] }
0x15df   : > { %11909 = vrcp.f32 %v8958_v35 }
0x15e1   : > { %v11906_v44 = vpop.eup %11905  ;;  %10263 = vmatpush1.bf16.xpose.msra.mxu1 %v10262_v45 }
0x15e2   : > { %v8961_v41 = vpop.xlane.xlu1 %8960  ;;  %v9060_v0 = vmul.f32 %v11906_v44, %v17349_v9  ;;  %v9059_v59 = vmul.f32 %v11906_v44, %v17347_v39  ;;  %v19188_v9 = vld [vmem:[#allocation51_spill] sm:$0xff] }
0x15e3   : > { %11911 = vrcp.f32 %v8961_v41 }
0x15e4   : > { %v10264_v24 = vpack.c.bf16 %v9060_v0, %v9058_v30  ;;  %v10266_v31 = vpack.c.bf16 %v9059_v59, %v9057_v7 }
0x15e5   : > { %v11908_v11 = vpop.eup %11907 }
0x15e6   : > { %v8964_v36 = vpop.xlane.xlu0 %8963  ;;  %10265 = vmatprep.subr.bf16.mxu1 %v10264_v24  ;;  %v9062_v12 = vmul.f32 %v11908_v11, %v19185_v20  ;;  %v9061_v38 = vmul.f32 %v11908_v11, %v19188_v9 }
0x15e7   : > { %11913 = vrcp.f32 %v8964_v36 }
0x15e9   : > { %v11910_v51 = vpop.eup %11909  ;;  %10267 = vmatpush1.bf16.xpose.msra.mxu1 %v10266_v31 }
0x15ea   : > { %v9064_v33 = vmul.f32 %v11910_v51, %v19186_v43  ;;  %v9063_v32 = vmul.f32 %v11910_v51, %v19187_v46  ;;  %v19194_v46 = vmov 0.0  }
0x15ec   : > { %v10268_v39 = vpack.c.bf16 %v9064_v33, %v9062_v12  ;;  %v10270_v40 = vpack.c.bf16 %v9063_v32, %v9061_v38 }
0x15ed   : > { %v11912_v6 = vpop.eup %11911 }
0x15ee   : > { %10269 = vmatprep.subr.bf16.mxu1 %v10268_v39  ;;  %v9066_v50 = vmul.f32 %v11912_v6, %v19189_v25  ;;  %v9065_v15 = vmul.f32 %v11912_v6, %v19192_v22  ;;  %v19195_v39 = vld [vmem:[#allocation88_spill] sm:$0xff]  ;;  %v19196_v25 = vld [vmem:[#allocation17_spill] sm:$0xff] }
0x15f1   : > { %v11914_v48 = vpop.eup %11913  ;;  %10271 = vmatpush1.bf16.xpose.msra.mxu1 %v10270_v40 }
0x15f2   : > { %v9068_v27 = vmul.f32 %v11914_v48, %v19190_v55  ;;  %v9067_v1 = vmul.f32 %v11914_v48, %v19191_v54 }
0x15f4   : > { %v10272_v56 = vpack.c.bf16 %v9068_v27, %v9066_v50  ;;  %v10274_v29 = vpack.c.bf16 %v9067_v1, %v9065_v15  ;;  %v19197_v1 = vld [vmem:[#allocation82_spill] sm:$0xff] }
0x15f6   : > { %10273 = vmatprep.subr.bf16.mxu1 %v10272_v56 }
0x15f9   : > { %10275 = vmatpush1.bf16.xpose.msra.mxu1 %v10274_v29  ;;  %v19198_v29 = vld [vmem:[#allocation75_spill] sm:$0xff] }
0x162e   : > { %v8967_v52 = vpop.xlane.xlu1 %8966 }
0x162f   : > { %11915 = vrcp.f32 %v8967_v52 }
0x1632   : > { %v8970_v18 = vpop.xlane.xlu0 %8969 }
0x1633   : > { %11917 = vrcp.f32 %v8970_v18 }
0x1636   : > { %v8973_v21 = vpop.xlane.xlu1 %8972 }
0x1637   : > { %11919 = vrcp.f32 %v8973_v21 }
0x1639   : > { %v11916_v2 = vpop.eup %11915 }
0x163a   : > { %v8976_v53 = vpop.xlane.xlu0 %8975  ;;  %v9070_v16 = vmul.f32 %v11916_v2, %v17393_v62  ;;  %v9069_v3 = vmul.f32 %v11916_v2, %v17391_v42 }
0x163b   : > { %11921 = vrcp.f32 %v8976_v53 }
0x163d   : > { %v11918_v37 = vpop.eup %11917 }
0x163e   : > { %v9072_v19 = vmul.f32 %v11918_v37, %v17401_v58  ;;  %v9071_v49 = vmul.f32 %v11918_v37, %v17399_v61  ;;  %v19199_v37 = vld [vmem:[#allocation76_spill] sm:$0xff] }
0x163f   : > { %v8979_v28 = vpop.xlane.xlu1 %8978 }
0x1640   : > { %v10276_v34 = vpack.c.bf16 %v9072_v19, %v9070_v16  ;;  %v10278_v45 = vpack.c.bf16 %v9071_v49, %v9069_v3  ;;  %11923 = vrcp.f32 %v8979_v28  ;;  %v19200_v19 = vld [vmem:[#allocation84_spill] sm:$0xff] }
0x1641   : > { %v11920_v10 = vpop.eup %11919 }
0x1642   : > { %v8982_v35 = vpop.xlane.xlu0 %8981  ;;  %10277 = vmatprep.subr.bf16.mxu1 %v10276_v34  ;;  %v9074_v30 = vmul.f32 %v11920_v10, %v17413_v47  ;;  %v9073_v58 = vmul.f32 %v11920_v10, %v17411_v23 }
0x1643   : > { %11925 = vrcp.f32 %v8982_v35  ;;  %10279 = vmatpush1.bf16.xpose.msra.mxu1 %v10278_v45  ;;  %v19201_v35 = vld [vmem:[#allocation47_spill] sm:$0xff] }
0x1645   : > { %v11922_v44 = vpop.eup %11921 }
0x1646   : > { %v9076_v62 = vmul.f32 %v11922_v44, %v17421_v17  ;;  %v9075_v42 = vmul.f32 %v11922_v44, %v17419_v14 }
0x1647   : > { %v8985_v41 = vpop.xlane.xlu1 %8984 }
0x1648   : > { %v10280_v0 = vpack.c.bf16 %v9076_v62, %v9074_v30  ;;  %v10282_v61 = vpack.c.bf16 %v9075_v42, %v9073_v58  ;;  %11927 = vrcp.f32 %v8985_v41  ;;  %v19202_v30 = vld [vmem:[#allocation16_spill] sm:$0xff] }
0x164a   : > { %v8988_v59 = vpop.xlane.xlu0 %8987  ;;  %10281 = vmatprep.subr.bf16.mxu1 %v10280_v0  ;;  %v11924_v7 = vpop.eup %11923 }
0x164b   : > { %11929 = vrcp.f32 %v8988_v59  ;;  %10283 = vmatpush1.bf16.xpose.msra.mxu1 %v10282_v61  ;;  %v9078_v31 = vmul.f32 %v11924_v7, %v17433_v5  ;;  %v9077_v47 = vmul.f32 %v11924_v7, %v17431_v4  ;;  %v19193_v4 = vld [vmem:[#allocation78_spill] sm:$0xff]  ;;  %v9289_v48 = vpop.permute.xlu1 %9288 }
0x164d   : > { %v11926_v24 = vpop.eup %11925 }
0x164e   : > { %v9080_v36 = vmul.f32 %v11926_v24, %v17439_v57  ;;  %v9079_v17 = vmul.f32 %v11926_v24, %v17437_v63  ;;  %v9087_v63 = vrot.slane %v19193_v4, 4 }
0x164f   : > { %v9299_v21 = vpop.permute.xlu1 %9298 }
0x1650   : > { %v10284_v23 = vpack.c.bf16 %v9080_v36, %v9078_v31  ;;  %v10286_v11 = vpack.c.bf16 %v9079_v17, %v9077_v47 }
0x1652   : > { %10285 = vmatprep.subr.bf16.mxu1 %v10284_v23  ;;  %v11928_v14 = vpop.eup %11927  ;;  %v9294_v56 = vpop.permute.xlu0 %9293 }
0x1653   : > { %10287 = vmatpush1.bf16.xpose.msra.mxu1 %v10286_v11  ;;  %v9082_v20 = vmul.f32 %v11928_v14, %v17449_v13  ;;  %v9081_v43 = vmul.f32 %v11928_v14, %v17447_v60  ;;  %v9755_v13 = vld [vmem:[%s17618_s3 + $0xe0] sm:$0xff]  ;;  %v9756_v60 = vld [vmem:[%s17618_s3 + $0xe8] sm:$0xff]  ;;  %v9304_v41 = vpop.permute.xlu1 %9303 }
0x1655   : > { %v11930_v51 = vpop.eup %11929 }
0x1656   : > { %v9084_v12 = vmul.f32 %v11930_v51, %v17455_v8  ;;  %v9083_v5 = vmul.f32 %v11930_v51, %v17453_v26  ;;  %v9757_v26 = vld [vmem:[%s17618_s3 + $0xf0] sm:$0xff]  ;;  %v9758_v8 = vld [vmem:[%s17618_s3 + $0xf8] sm:$0xff] }
0x1658   : > { %v10288_v33 = vpack.c.bf16 %v9084_v12, %v9082_v20  ;;  %v10290_v57 = vpack.c.bf16 %v9083_v5, %v9081_v43 }
0x165a   : > { %10289 = vmatprep.subr.bf16.mxu1 %v10288_v33 }
0x165b   : > { %10291 = vmatpush1.bf16.xpose.msra.mxu1 %v10290_v57 }
0x1662   : > { %9156 = vmatmul.mubr.f32.vlgmr.msra.gmra.mrb[14].mxu1 %v9087_v63 }
0x1663   : > { %9249 = vmatprep.mubr.f32.mxu1 %v19194_v46 }
0x1735   : > { %v9157_v32 = vpop.f32.mrb[14].mxu1 }
0x1736   : > { %v9159_v9 = vpop.f32.mrb[15].mxu1 }
0x1737   : > { %9759 = vmatprep.subr.msk.mxu1 %vm652_vm1, %v9159_v9 }
0x1738   : > { %9760 = vmatpush1.msk.msra.mxu1 %vm652_vm1, %v9157_v32 }
0x1739   : > { %9761 = vmatmul.mubr.msk.f32.vlgmr.msra.gmra.mrb[138].mxu1 %vm555_vm2, %v9755_v13 }
0x173a   : > { %9255 = vmatprep.mubr.f32.mxu1 %v19194_v46 }
0x173d   : > { %9762 = vmatmul.mubr.msk.f32.gmra.mrb[132].mxu1 %vm555_vm2, %v9756_v60 }
0x173e   : > { %9261 = vmatprep.mubr.f32.mxu1 %v19194_v46 }
0x1741   : > { %9763 = vmatmul.mubr.msk.f32.gmra.mrb[134].mxu1 %vm555_vm2, %v9757_v26 }
0x1742   : > { %9267 = vmatprep.mubr.f32.mxu1 %v19194_v46 }
0x1745   : > { %9764 = vmatmul.mubr.msk.f32.gmra.mrb[136].mxu1 %vm555_vm2, %v9758_v8 }
0x180c   : > { %v9251_v38 = vpop.f32.mrb[138].mxu1 }
0x180d   : > { %v10294_v40 = vadd.f32 %v9251_v38, %v19195_v39  ;;  %v9253_v6 = vpop.f32.mrb[139].mxu1 }
0x180e   : > { %v10295_v50 = vadd.f32 %v9253_v6, %v19196_v25 }
0x180f   : > { %v9306_v55 = vadd.f32 %v10294_v40, %v9289_v48 }
0x1810   : > { %v9307_v27 = vadd.f32 %v10295_v50, %v9289_v48  ;;  %v9257_v54 = vpop.f32.mrb[132].mxu1 }
0x1811   : > { %9314 = vst [vmem:[%s17547_s26] sm:$0xff] %v9306_v55  ;;  %v10296_v22 = vadd.f32 %v9257_v54, %v19197_v1  ;;  %v9259_v15 = vpop.f32.mrb[133].mxu1 }
0x1812   : > { %9315 = vst [vmem:[%s17547_s26 + $0x8] sm:$0xff] %v9307_v27  ;;  %v10297_v52 = vadd.f32 %v9259_v15, %v19198_v29 }
0x1813   : > { %v9308_v18 = vadd.f32 %v10296_v22, %v9294_v56 }
0x1814   : > { %v9309_v53 = vadd.f32 %v10297_v52, %v9294_v56  ;;  %v9263_v2 = vpop.f32.mrb[134].mxu1 }
0x1815   : > { %9316 = vst [vmem:[%s17547_s26 + $0x10] sm:$0xff] %v9308_v18  ;;  %v10298_v28 = vadd.f32 %v9263_v2, %v19199_v37  ;;  %v9265_v16 = vpop.f32.mrb[135].mxu1 }
0x1816   : > { %9317 = vst [vmem:[%s17547_s26 + $0x18] sm:$0xff] %v9309_v53  ;;  %v10299_v3 = vadd.f32 %v9265_v16, %v19200_v19 }
0x1817   : > { %v9310_v49 = vadd.f32 %v10298_v28, %v9299_v21 }
0x1818   : > { %v9311_v34 = vadd.f32 %v10299_v3, %v9299_v21  ;;  %v9269_v45 = vpop.f32.mrb[136].mxu1 }
0x1819   : > { %9318 = vst [vmem:[%s17547_s26 + $0x20] sm:$0xff] %v9310_v49  ;;  %v10300_v10 = vadd.f32 %v9269_v45, %v19201_v35  ;;  %v9271_v44 = vpop.f32.mrb[137].mxu1 }
0x181a   : > { %9319 = vst [vmem:[%s17547_s26 + $0x28] sm:$0xff] %v9311_v34  ;;  %v10301_v62 = vadd.f32 %v9271_v44, %v19202_v30 }
0x181b   : > { %v9312_v58 = vadd.f32 %v10300_v10, %v9304_v41 }
0x181c   : > { %v9313_v42 = vadd.f32 %v10301_v62, %v9304_v41 }
0x181d   : > { %9320 = vst [vmem:[%s17547_s26 + $0x30] sm:$0xff] %v9312_v58 }
0x181e   : > { %9321 = vst [vmem:[%s17547_s26 + $0x38] sm:$0xff] %v9313_v42 }
0x181f   : > { %11944 = shalt.err (!%p11941_p3)
}
0x1820   : > { %s11945_s14 = scalar_lea.hbm %s17566_s9, 1024  ;;  %s11949_s17 = scalar_lea.hbm %s17620_s5, 2048 }
0x1821   : > { %p11946_p4 = scmp.ne.s32.totalorder %s17566_s9, %s11945_s14  ;;  %p11950_p9 = scmp.lt.u32.totalorder %s17566_s9, %s17620_s5 }
0x1822   : > { %p11951_p10 = scmp.lt.u32.totalorder %s11949_s17, %s11945_s14  ;;  %p11953_p12 = scmp.lt.u32.totalorder %s11945_s14, %s17566_s9 }
0x1823   : > { %p11947_p7 = pnand %p11946_p4, %p12068_p5 }
0x1824   : > { %p11952_p11 = por %p11951_p10, %p11950_p9 }
0x1825   : > { %p11948_p8 = pneg %p11947_p7 }
0x1826   : > { %p11954_p13 = por %p11953_p12, %p11952_p11 }
0x1828   : > { %p11955_p0 = pnand %p11954_p13, %p11948_p8 }
0x182a   : > { %11958 = shalt.err (!%p11955_p0)
}
0x182b   : > { %s11998_s26 = smov 256   ;;  %s11999_s30 = smov 16  }
0x182c   : > { %10350 = dma.vmem_to_hbm [thread:$0]  (%p12068_p5), %s17568_s6, 1024, %s17566_s9, %s17574_s22, %s11998_s26, %s11998_s26, %s11999_s30  }
0x182d PF: > { %p10356_p1 = scmp.ge.s32.totalorder %s11993_s21, 2  ;;  %s9351_s7 = sand.u32 1, %s11981_s18  }
0x182e   : > { %s9352_s8 = scalar_lea.sflag [#allocation3], %s9351_s7 }
0x182f   : > { %p10353_p2 = pnand %p10356_p1, %p12072_p6 }
0x1831   : > { %11976 = dma.done.wait (!%p10353_p2), %s9352_s8, 1024  }
0x1832   : > { %11978 = vsyncadd (!%p10353_p2), %s9352_s8, 4294966272  ;;  %p15_p3 = scmp.ge.s32.totalorder %s12055_s24, 4   ;;  %s19203_s18 = smov %s11985_s19 }
0x1833   : > { %s19204_s19 = smov %s11989_s20  ;;  %s19205_s20 = smov %s12066_s27 }
0x1834   : > { %s19206_s21 = smov %s12055_s24  ;;  %17 = sbr.rel (!%p15_p3) target bundleno = 3 (0x3), region = 82 }
0x183b   :  { %9357 = vsyncpa [#allocation3], 1 }
0x183c   :  { %9359 = vsyncpa [#allocation3 + $0x1], 1 }

</bundles_post_ra>
